<compile_context>
chip_gen: v5e
topology: v5e:2x2
jax: 0.10.0
libtpu: 0.0.40
codegen_flags: <defaults>
</compile_context>

<pallas_src>
import math

import jax
import jax.numpy as jnp
from jax.experimental import pallas as pl
from jax.experimental.pallas import tpu as pltpu


# ----------------------------- Pallas kernel ------------------------------ #

def _chain_kernel(x_ref,
                  we1_ref, be1_ref, we2_ref, be2_ref,
                  wb1_ref, bb1_ref, wb2_ref, bb2_ref,
                  wd1_ref, bd1_ref, wd2_ref, bd2_ref,
                  z_ref, xhat_ref):
    """One full chain (encoder -> B -> decoder), everything resident in VMEM.

    Weights are bf16 tiles; every jnp.dot accumulates in f32 on the MXU.
    """
    def mlp2(x_f32, w1_ref, b1_ref, w2_ref, b2_ref):
        h = jnp.dot(x_f32.astype(jnp.bfloat16), w1_ref[...],
                    preferred_element_type=jnp.float32) + b1_ref[...]
        h = jnp.maximum(h, 0.0)                               # ReLU on the VPU
        return jnp.dot(h.astype(jnp.bfloat16), w2_ref[...],
                       preferred_element_type=jnp.float32) + b2_ref[...]

    x = x_ref[...]                                            # (n, dim) f32
    z0 = mlp2(x, we1_ref, be1_ref, we2_ref, be2_ref)          # encoder -> (n, dimz)
    z = mlp2(z0, wb1_ref, bb1_ref, wb2_ref, bb2_ref)          # B       -> (n, dimz)
    z_ref[...] = z.astype(z_ref.dtype)
    xh = mlp2(z, wd1_ref, bd1_ref, wd2_ref, bd2_ref)          # decoder -> (n, dim)
    xhat_ref[...] = xh.astype(xhat_ref.dtype)


def fused_forward_chains(x_pair, p):
    """x_pair: (2, n, dim) f32; p: dict of chain-stacked params.

    Returns (z: (2, n, dimz) f32, xhat: (2, n, dim) f32).
    """
    _, n, dim = x_pair.shape
    dimz = p["we2"].shape[-1]

    def spec(*tail):
        # Leading chain axis is Squeezed (None): kernel sees 2-D tiles.
        return pl.BlockSpec((None,) + tail, lambda c: (c, 0, 0))

    in_specs = [
        spec(n, dim),                                              # x
        spec(dim, dim), spec(1, dim), spec(dim, dimz), spec(1, dimz),          # encoder
        spec(dimz, 2 * dimz), spec(1, 2 * dimz), spec(2 * dimz, dimz), spec(1, dimz),  # B
        spec(dimz, dim), spec(1, dim), spec(dim, dim), spec(1, dim),            # decoder
    ]
    out_specs = (
        spec(n, dimz),     # Z
        spec(n, dim),      # data_hat
    )

    return pl.pallas_call(
        _chain_kernel,
        grid=(2,),
        in_specs=in_specs,
        out_specs=out_specs,
        out_shape=(
            jax.ShapeDtypeStruct((2, n, dimz), jnp.float32),
            jax.ShapeDtypeStruct((2, n, dim), jnp.float32),
        ),
        compiler_params=pltpu.CompilerParams(
            dimension_semantics=("parallel",),
            vmem_limit_bytes=32 << 20,   # valid on v5e/v6e/v7x; ~11 MiB actually used
        ),
    )(x_pair,
      p["we1"], p["be1"], p["we2"], p["be2"],
      p["wb1"], p["bb1"], p["wb2"], p["bb2"],
      p["wd1"], p["bd1"], p["wd2"], p["bd2"])


# --------------------------- parameter creation ---------------------------- #

def _linear_params(key, d_in, d_out):
    """Deterministic synthetic init (uniform +-1/sqrt(d_in), like torch Linear)."""
    kw, kb = jax.random.split(key)
    bound = 1.0 / math.sqrt(d_in)
    w = jax.random.uniform(kw, (d_in, d_out), jnp.float32, -bound, bound)
    b = jax.random.uniform(kb, (1, d_out), jnp.float32, -bound, bound)
    return w, b


def make_params(key, reduction=4):
    """Weights stacked over the chain axis (0 = X path, 1 = Y path).

    Weights are stored bf16 (the kernel is HBM weight-fetch bound); biases f32.
    """
    dim = 2048 // 2           # 1024
    dimz = dim // reduction   # 256
    stages = {"e": (dim, dim, dimz),         # encoderX / encoderY
              "b": (dimz, 2 * dimz, dimz),   # BX / BY
              "d": (dimz, dim, dim)}         # decoderX / decoderY
    keys = iter(jax.random.split(key, 12))   # 2 chains * 3 stages * 2 linears
    params = {}
    for s, (d_in, d_hid, d_out) in stages.items():
        w1s, b1s, w2s, b2s = [], [], [], []
        for _chain in range(2):              # 0 = X, 1 = Y
            w1, b1 = _linear_params(next(keys), d_in, d_hid)
            w2, b2 = _linear_params(next(keys), d_hid, d_out)
            w1s.append(w1); b1s.append(b1); w2s.append(w2); b2s.append(b2)
        params[f"w{s}1"] = jnp.stack(w1s).astype(jnp.bfloat16)
        params[f"b{s}1"] = jnp.stack(b1s)
        params[f"w{s}2"] = jnp.stack(w2s).astype(jnp.bfloat16)
        params[f"b{s}2"] = jnp.stack(b2s)
    return params


# ------------------------------ forward pass ------------------------------- #

@jax.jit
def netfc000_forward(params, data):
    n, c, _, w = data.shape
    dataX = data[:, :, 0:16, :].reshape(n, -1)   # (n, 1024)
    dataY = data[:, :, 16:32, :].reshape(n, -1)  # (n, 1024)
    x_pair = jnp.stack([dataX, dataY], axis=0)   # (2, n, 1024)

    z, xhat = fused_forward_chains(x_pair, params)

    Zx, Zy = z[0], z[1]                          # (n, 256) each
    dataX_hat = xhat[0].reshape(n, c, 16, w)
    dataY_hat = xhat[1].reshape(n, c, 16, w)
    return Zx, Zy, dataX_hat, dataY_hat


# ------------------------------- reference --------------------------------- #

def _ref_mlp2(x, w1, b1, w2, b2):
    h = jnp.maximum(x @ w1.astype(jnp.float32) + b1, 0.0)
    return h @ w2.astype(jnp.float32) + b2


def netfc000_forward_ref(params, data):
    n, c, _, w = data.shape
    dataX = data[:, :, 0:16, :].reshape(n, -1)
    dataY = data[:, :, 16:32, :].reshape(n, -1)
    outs = []
    for chain, x in ((0, dataX), (1, dataY)):
        z0 = _ref_mlp2(x, params["we1"][chain], params["be1"][chain],
                       params["we2"][chain], params["be2"][chain])
        z = _ref_mlp2(z0, params["wb1"][chain], params["bb1"][chain],
                      params["wb2"][chain], params["bb2"][chain])
        xh = _ref_mlp2(z, params["wd1"][chain], params["bd1"][chain],
                       params["wd2"][chain], params["bd2"][chain])
        outs.append((z, xh))
    (Zx, dX), (Zy, dY) = outs
    return Zx, Zy, dX.reshape(n, c, 16, w), dY.reshape(n, c, 16, w)


if __name__ == "__main__":
    key = jax.random.PRNGKey(0)
    kp, kd = jax.random.split(key)

    params = make_params(kp, reduction=4)

    # Linear(1024, ...) forces c*16*w == 1024 per half -> smallest natural
    # input is (batch=2, c=2, h=32, w=32).
    data = jax.random.normal(kd, (2, 2, 32, 32), jnp.float32)

    outs = jax.block_until_ready(netfc000_forward(params, data))
    refs = netfc000_forward_ref(params, data)

    # bf16 weights/activations with f32 accumulation: loose-ish tolerance.
    for o, r in zip(outs, refs):
        assert o.shape == r.shape and o.dtype == r.dtype
        assert jnp.allclose(o, r, atol=5e-2, rtol=5e-2), "mismatch vs reference"

    print("KERNEL_OK")
</pallas_src>

<mosaic_0001>
module attributes {stable_mosaic.version = 11 : i64} {
  func.func @_chain_kernel(%arg0: i32, %arg1: memref<1x2x1024xf32, #tpu.memory_space<vmem>>, %arg2: memref<1x1024x1024xbf16, #tpu.memory_space<vmem>>, %arg3: memref<1x1x1024xf32, #tpu.memory_space<vmem>>, %arg4: memref<1x1024x256xbf16, #tpu.memory_space<vmem>>, %arg5: memref<1x1x256xf32, #tpu.memory_space<vmem>>, %arg6: memref<1x256x512xbf16, #tpu.memory_space<vmem>>, %arg7: memref<1x1x512xf32, #tpu.memory_space<vmem>>, %arg8: memref<1x512x256xbf16, #tpu.memory_space<vmem>>, %arg9: memref<1x1x256xf32, #tpu.memory_space<vmem>>, %arg10: memref<1x256x1024xbf16, #tpu.memory_space<vmem>>, %arg11: memref<1x1x1024xf32, #tpu.memory_space<vmem>>, %arg12: memref<1x1024x1024xbf16, #tpu.memory_space<vmem>>, %arg13: memref<1x1x1024xf32, #tpu.memory_space<vmem>>, %arg14: memref<1x2x256xf32, #tpu.memory_space<vmem>>, %arg15: memref<1x2x1024xf32, #tpu.memory_space<vmem>>) attributes {dimension_semantics = [#tpu.dimension_semantics<parallel>], iteration_bounds = array<i64: 2>, scalar_prefetch = 0 : i64, scratch_operands = 0 : i64, tpu.core_type = #tpu.core_type<tc>, window_params = [{transform_indices = @transform_0, window_bounds = array<i64: 1, 2, 1024>}, {transform_indices = @transform_1, window_bounds = array<i64: 1, 1024, 1024>}, {transform_indices = @transform_2, window_bounds = array<i64: 1, 1, 1024>}, {transform_indices = @transform_3, window_bounds = array<i64: 1, 1024, 256>}, {transform_indices = @transform_4, window_bounds = array<i64: 1, 1, 256>}, {transform_indices = @transform_5, window_bounds = array<i64: 1, 256, 512>}, {transform_indices = @transform_6, window_bounds = array<i64: 1, 1, 512>}, {transform_indices = @transform_7, window_bounds = array<i64: 1, 512, 256>}, {transform_indices = @transform_8, window_bounds = array<i64: 1, 1, 256>}, {transform_indices = @transform_9, window_bounds = array<i64: 1, 256, 1024>}, {transform_indices = @transform_10, window_bounds = array<i64: 1, 1, 1024>}, {transform_indices = @transform_11, window_bounds = array<i64: 1, 1024, 1024>}, {transform_indices = @transform_12, window_bounds = array<i64: 1, 1, 1024>}, {transform_indices = @transform_13, window_bounds = array<i64: 1, 2, 256>}, {transform_indices = @transform_14, window_bounds = array<i64: 1, 2, 1024>}]} {
    %c0 = arith.constant 0 : index
    %c0_0 = arith.constant 0 : index
    %c0_1 = arith.constant 0 : index
    %0 = vector.load %arg1[%c0, %c0_0, %c0_1] : memref<1x2x1024xf32, #tpu.memory_space<vmem>>, vector<1x2x1024xf32>
    %1 = vector.shape_cast %0 : vector<1x2x1024xf32> to vector<2x1024xf32>
    %2 = arith.truncf %1 : vector<2x1024xf32> to vector<2x1024xbf16>
    %c0_2 = arith.constant 0 : index
    %c0_3 = arith.constant 0 : index
    %c0_4 = arith.constant 0 : index
    %3 = vector.load %arg2[%c0_2, %c0_3, %c0_4] : memref<1x1024x1024xbf16, #tpu.memory_space<vmem>>, vector<1x1024x1024xbf16>
    %4 = vector.shape_cast %3 : vector<1x1024x1024xbf16> to vector<1024x1024xbf16>
    %cst = arith.constant dense<0.000000e+00> : vector<2x1024xf32>
    %5 = tpu.matmul %2, %4, %cst {dimension_numbers = #tpu.dot_dimension_numbers<[1], [0], [0], [1], [0, 0, 1, 1], [], []>} : vector<2x1024xbf16>, vector<1024x1024xbf16>, vector<2x1024xf32> -> vector<2x1024xf32>
    %c0_5 = arith.constant 0 : index
    %c0_6 = arith.constant 0 : index
    %c0_7 = arith.constant 0 : index
    %6 = vector.load %arg3[%c0_5, %c0_6, %c0_7] : memref<1x1x1024xf32, #tpu.memory_space<vmem>>, vector<1x1x1024xf32>
    %7 = vector.shape_cast %6 : vector<1x1x1024xf32> to vector<1x1024xf32>
    %8 = vector.broadcast %7 : vector<1x1024xf32> to vector<2x1024xf32>
    %9 = arith.addf %5, %8 : vector<2x1024xf32>
    %cst_8 = arith.constant 0.000000e+00 : f32
    %10 = vector.broadcast %cst_8 : f32 to vector<2x1024xf32>
    %11 = arith.maximumf %9, %10 : vector<2x1024xf32>
    %12 = arith.truncf %11 : vector<2x1024xf32> to vector<2x1024xbf16>
    %c0_9 = arith.constant 0 : index
    %c0_10 = arith.constant 0 : index
    %c0_11 = arith.constant 0 : index
    %13 = vector.load %arg4[%c0_9, %c0_10, %c0_11] : memref<1x1024x256xbf16, #tpu.memory_space<vmem>>, vector<1x1024x256xbf16>
    %14 = vector.shape_cast %13 : vector<1x1024x256xbf16> to vector<1024x256xbf16>
    %cst_12 = arith.constant dense<0.000000e+00> : vector<2x256xf32>
    %15 = tpu.matmul %12, %14, %cst_12 {dimension_numbers = #tpu.dot_dimension_numbers<[1], [0], [0], [1], [0, 0, 1, 1], [], []>} : vector<2x1024xbf16>, vector<1024x256xbf16>, vector<2x256xf32> -> vector<2x256xf32>
    %c0_13 = arith.constant 0 : index
    %c0_14 = arith.constant 0 : index
    %c0_15 = arith.constant 0 : index
    %16 = vector.load %arg5[%c0_13, %c0_14, %c0_15] : memref<1x1x256xf32, #tpu.memory_space<vmem>>, vector<1x1x256xf32>
    %17 = vector.shape_cast %16 : vector<1x1x256xf32> to vector<1x256xf32>
    %18 = vector.broadcast %17 : vector<1x256xf32> to vector<2x256xf32>
    %19 = arith.addf %15, %18 : vector<2x256xf32>
    %20 = arith.truncf %19 : vector<2x256xf32> to vector<2x256xbf16>
    %c0_16 = arith.constant 0 : index
    %c0_17 = arith.constant 0 : index
    %c0_18 = arith.constant 0 : index
    %21 = vector.load %arg6[%c0_16, %c0_17, %c0_18] : memref<1x256x512xbf16, #tpu.memory_space<vmem>>, vector<1x256x512xbf16>
    %22 = vector.shape_cast %21 : vector<1x256x512xbf16> to vector<256x512xbf16>
    %cst_19 = arith.constant dense<0.000000e+00> : vector<2x512xf32>
    %23 = tpu.matmul %20, %22, %cst_19 {dimension_numbers = #tpu.dot_dimension_numbers<[1], [0], [0], [1], [0, 0, 1, 1], [], []>} : vector<2x256xbf16>, vector<256x512xbf16>, vector<2x512xf32> -> vector<2x512xf32>
    %c0_20 = arith.constant 0 : index
    %c0_21 = arith.constant 0 : index
    %c0_22 = arith.constant 0 : index
    %24 = vector.load %arg7[%c0_20, %c0_21, %c0_22] : memref<1x1x512xf32, #tpu.memory_space<vmem>>, vector<1x1x512xf32>
    %25 = vector.shape_cast %24 : vector<1x1x512xf32> to vector<1x512xf32>
    %26 = vector.broadcast %25 : vector<1x512xf32> to vector<2x512xf32>
    %27 = arith.addf %23, %26 : vector<2x512xf32>
    %cst_23 = arith.constant 0.000000e+00 : f32
    %28 = vector.broadcast %cst_23 : f32 to vector<2x512xf32>
    %29 = arith.maximumf %27, %28 : vector<2x512xf32>
    %30 = arith.truncf %29 : vector<2x512xf32> to vector<2x512xbf16>
    %c0_24 = arith.constant 0 : index
    %c0_25 = arith.constant 0 : index
    %c0_26 = arith.constant 0 : index
    %31 = vector.load %arg8[%c0_24, %c0_25, %c0_26] : memref<1x512x256xbf16, #tpu.memory_space<vmem>>, vector<1x512x256xbf16>
    %32 = vector.shape_cast %31 : vector<1x512x256xbf16> to vector<512x256xbf16>
    %cst_27 = arith.constant dense<0.000000e+00> : vector<2x256xf32>
    %33 = tpu.matmul %30, %32, %cst_27 {dimension_numbers = #tpu.dot_dimension_numbers<[1], [0], [0], [1], [0, 0, 1, 1], [], []>} : vector<2x512xbf16>, vector<512x256xbf16>, vector<2x256xf32> -> vector<2x256xf32>
    %c0_28 = arith.constant 0 : index
    %c0_29 = arith.constant 0 : index
    %c0_30 = arith.constant 0 : index
    %34 = vector.load %arg9[%c0_28, %c0_29, %c0_30] : memref<1x1x256xf32, #tpu.memory_space<vmem>>, vector<1x1x256xf32>
    %35 = vector.shape_cast %34 : vector<1x1x256xf32> to vector<1x256xf32>
    %36 = vector.broadcast %35 : vector<1x256xf32> to vector<2x256xf32>
    %37 = arith.addf %33, %36 : vector<2x256xf32>
    %c0_31 = arith.constant 0 : index
    %c0_32 = arith.constant 0 : index
    %c0_33 = arith.constant 0 : index
    %38 = vector.load %arg14[%c0_31, %c0_32, %c0_33] : memref<1x2x256xf32, #tpu.memory_space<vmem>>, vector<1x2x256xf32>
    %39 = vector.shape_cast %38 : vector<1x2x256xf32> to vector<2x256xf32>
    %40 = vector.shape_cast %37 : vector<2x256xf32> to vector<1x2x256xf32>
    tpu.vector_store %arg14[%c0_31, %c0_32, %c0_33], %40 {strides = array<i32>} : memref<1x2x256xf32, #tpu.memory_space<vmem>>, vector<1x2x256xf32>,
    %41 = arith.truncf %37 : vector<2x256xf32> to vector<2x256xbf16>
    %c0_34 = arith.constant 0 : index
    %c0_35 = arith.constant 0 : index
    %c0_36 = arith.constant 0 : index
    %42 = vector.load %arg10[%c0_34, %c0_35, %c0_36] : memref<1x256x1024xbf16, #tpu.memory_space<vmem>>, vector<1x256x1024xbf16>
    %43 = vector.shape_cast %42 : vector<1x256x1024xbf16> to vector<256x1024xbf16>
    %cst_37 = arith.constant dense<0.000000e+00> : vector<2x1024xf32>
    %44 = tpu.matmul %41, %43, %cst_37 {dimension_numbers = #tpu.dot_dimension_numbers<[1], [0], [0], [1], [0, 0, 1, 1], [], []>} : vector<2x256xbf16>, vector<256x1024xbf16>, vector<2x1024xf32> -> vector<2x1024xf32>
    %c0_38 = arith.constant 0 : index
    %c0_39 = arith.constant 0 : index
    %c0_40 = arith.constant 0 : index
    %45 = vector.load %arg11[%c0_38, %c0_39, %c0_40] : memref<1x1x1024xf32, #tpu.memory_space<vmem>>, vector<1x1x1024xf32>
    %46 = vector.shape_cast %45 : vector<1x1x1024xf32> to vector<1x1024xf32>
    %47 = vector.broadcast %46 : vector<1x1024xf32> to vector<2x1024xf32>
    %48 = arith.addf %44, %47 : vector<2x1024xf32>
    %cst_41 = arith.constant 0.000000e+00 : f32
    %49 = vector.broadcast %cst_41 : f32 to vector<2x1024xf32>
    %50 = arith.maximumf %48, %49 : vector<2x1024xf32>
    %51 = arith.truncf %50 : vector<2x1024xf32> to vector<2x1024xbf16>
    %c0_42 = arith.constant 0 : index
    %c0_43 = arith.constant 0 : index
    %c0_44 = arith.constant 0 : index
    %52 = vector.load %arg12[%c0_42, %c0_43, %c0_44] : memref<1x1024x1024xbf16, #tpu.memory_space<vmem>>, vector<1x1024x1024xbf16>
    %53 = vector.shape_cast %52 : vector<1x1024x1024xbf16> to vector<1024x1024xbf16>
    %cst_45 = arith.constant dense<0.000000e+00> : vector<2x1024xf32>
    %54 = tpu.matmul %51, %53, %cst_45 {dimension_numbers = #tpu.dot_dimension_numbers<[1], [0], [0], [1], [0, 0, 1, 1], [], []>} : vector<2x1024xbf16>, vector<1024x1024xbf16>, vector<2x1024xf32> -> vector<2x1024xf32>
    %c0_46 = arith.constant 0 : index
    %c0_47 = arith.constant 0 : index
    %c0_48 = arith.constant 0 : index
    %55 = vector.load %arg13[%c0_46, %c0_47, %c0_48] : memref<1x1x1024xf32, #tpu.memory_space<vmem>>, vector<1x1x1024xf32>
    %56 = vector.shape_cast %55 : vector<1x1x1024xf32> to vector<1x1024xf32>
    %57 = vector.broadcast %56 : vector<1x1024xf32> to vector<2x1024xf32>
    %58 = arith.addf %54, %57 : vector<2x1024xf32>
    %c0_49 = arith.constant 0 : index
    %c0_50 = arith.constant 0 : index
    %c0_51 = arith.constant 0 : index
    %59 = vector.load %arg15[%c0_49, %c0_50, %c0_51] : memref<1x2x1024xf32, #tpu.memory_space<vmem>>, vector<1x2x1024xf32>
    %60 = vector.shape_cast %59 : vector<1x2x1024xf32> to vector<2x1024xf32>
    %61 = vector.shape_cast %58 : vector<2x1024xf32> to vector<1x2x1024xf32>
    tpu.vector_store %arg15[%c0_49, %c0_50, %c0_51], %61 {strides = array<i32>} : memref<1x2x1024xf32, #tpu.memory_space<vmem>>, vector<1x2x1024xf32>,
    return
  }
  func.func @transform_0(%arg0: i32) -> (i32, i32, i32) {
    %c0_i32 = arith.constant 0 : i32
    %c0_i32_0 = arith.constant 0 : i32
    %c0_i32_1 = arith.constant 0 : i32
    return %arg0, %c0_i32, %c0_i32_0 : i32, i32, i32
  }
  func.func @transform_1(%arg0: i32) -> (i32, i32, i32) {
    %c0_i32 = arith.constant 0 : i32
    %c0_i32_0 = arith.constant 0 : i32
    %c0_i32_1 = arith.constant 0 : i32
    return %arg0, %c0_i32, %c0_i32_0 : i32, i32, i32
  }
  func.func @transform_2(%arg0: i32) -> (i32, i32, i32) {
    %c0_i32 = arith.constant 0 : i32
    %c0_i32_0 = arith.constant 0 : i32
    %c0_i32_1 = arith.constant 0 : i32
    return %arg0, %c0_i32, %c0_i32_0 : i32, i32, i32
  }
  func.func @transform_3(%arg0: i32) -> (i32, i32, i32) {
    %c0_i32 = arith.constant 0 : i32
    %c0_i32_0 = arith.constant 0 : i32
    %c0_i32_1 = arith.constant 0 : i32
    return %arg0, %c0_i32, %c0_i32_0 : i32, i32, i32
  }
  func.func @transform_4(%arg0: i32) -> (i32, i32, i32) {
    %c0_i32 = arith.constant 0 : i32
    %c0_i32_0 = arith.constant 0 : i32
    %c0_i32_1 = arith.constant 0 : i32
    return %arg0, %c0_i32, %c0_i32_0 : i32, i32, i32
  }
  func.func @transform_5(%arg0: i32) -> (i32, i32, i32) {
    %c0_i32 = arith.constant 0 : i32
    %c0_i32_0 = arith.constant 0 : i32
    %c0_i32_1 = arith.constant 0 : i32
    return %arg0, %c0_i32, %c0_i32_0 : i32, i32, i32
  }
  func.func @transform_6(%arg0: i32) -> (i32, i32, i32) {
    %c0_i32 = arith.constant 0 : i32
    %c0_i32_0 = arith.constant 0 : i32
    %c0_i32_1 = arith.constant 0 : i32
    return %arg0, %c0_i32, %c0_i32_0 : i32, i32, i32
  }
  func.func @transform_7(%arg0: i32) -> (i32, i32, i32) {
    %c0_i32 = arith.constant 0 : i32
    %c0_i32_0 = arith.constant 0 : i32
    %c0_i32_1 = arith.constant 0 : i32
    return %arg0, %c0_i32, %c0_i32_0 : i32, i32, i32
  }
  func.func @transform_8(%arg0: i32) -> (i32, i32, i32) {
    %c0_i32 = arith.constant 0 : i32
    %c0_i32_0 = arith.constant 0 : i32
    %c0_i32_1 = arith.constant 0 : i32
    return %arg0, %c0_i32, %c0_i32_0 : i32, i32, i32
  }
  func.func @transform_9(%arg0: i32) -> (i32, i32, i32) {
    %c0_i32 = arith.constant 0 : i32
    %c0_i32_0 = arith.constant 0 : i32
    %c0_i32_1 = arith.constant 0 : i32
    return %arg0, %c0_i32, %c0_i32_0 : i32, i32, i32
  }
  func.func @transform_10(%arg0: i32) -> (i32, i32, i32) {
    %c0_i32 = arith.constant 0 : i32
    %c0_i32_0 = arith.constant 0 : i32
    %c0_i32_1 = arith.constant 0 : i32
    return %arg0, %c0_i32, %c0_i32_0 : i32, i32, i32
  }
  func.func @transform_11(%arg0: i32) -> (i32, i32, i32) {
    %c0_i32 = arith.constant 0 : i32
    %c0_i32_0 = arith.constant 0 : i32
    %c0_i32_1 = arith.constant 0 : i32
    return %arg0, %c0_i32, %c0_i32_0 : i32, i32, i32
  }
  func.func @transform_12(%arg0: i32) -> (i32, i32, i32) {
    %c0_i32 = arith.constant 0 : i32
    %c0_i32_0 = arith.constant 0 : i32
    %c0_i32_1 = arith.constant 0 : i32
    return %arg0, %c0_i32, %c0_i32_0 : i32, i32, i32
  }
  func.func @transform_13(%arg0: i32) -> (i32, i32, i32) {
    %c0_i32 = arith.constant 0 : i32
    %c0_i32_0 = arith.constant 0 : i32
    %c0_i32_1 = arith.constant 0 : i32
    return %arg0, %c0_i32, %c0_i32_0 : i32, i32, i32
  }
  func.func @transform_14(%arg0: i32) -> (i32, i32, i32) {
    %c0_i32 = arith.constant 0 : i32
    %c0_i32_0 = arith.constant 0 : i32
    %c0_i32_1 = arith.constant 0 : i32
    return %arg0, %c0_i32, %c0_i32_0 : i32, i32, i32
  }
}

</mosaic_0001>

<bundles_post_ra>
// kernel: squeeze.7
= control target key start
LH: loop header
LB: loop body
LE: loop exit
PB: predicated region body
PF: predicated region fallthrough
CT: control target
= control target key end

     0   :  { %s267_s0 = inlined_call_operand.vmem [shape: f32[1,2,1024], index: 0, kind: input, shape index: {}]   ;;  %s268_s1 = inlined_call_operand.hbm [shape: f32[2,2,16,32], index: 1, kind: output, shape index: {}]  }
   0x1   :  { %v161_v0 = vld [vmem:[%s267_s0 + $0xe] sm:$0x3]  ;;  %v162_v1 = vld [vmem:[%s267_s0 + $0xc] sm:$0x3]  ;;  %v163_v2 = vld [vmem:[%s267_s0 + $0xa] sm:$0x3] }
   0x2   :  { %8 = vst [vmem:[#allocation2 + $0x38] sm:$0x3] %v161_v0  ;;  %v164_v3 = vld [vmem:[%s267_s0 + $0x8] sm:$0x3]  ;;  %v165_v4 = vld [vmem:[%s267_s0 + $0x6] sm:$0x3] }
   0x3   :  { %12 = vst [vmem:[#allocation2 + $0x30] sm:$0x3] %v162_v1  ;;  %v166_v5 = vld [vmem:[%s267_s0 + $0x4] sm:$0x3]  ;;  %v167_v6 = vld [vmem:[%s267_s0 + $0x2] sm:$0x3] }
   0x4   :  { %16 = vst [vmem:[#allocation2 + $0x28] sm:$0x3] %v163_v2  ;;  %v33_v7 = vld [vmem:[%s267_s0] sm:$0x3] }
   0x5   :  { %20 = vst [vmem:[#allocation2 + $0x20] sm:$0x3] %v164_v3 }
   0x6   :  { %24 = vst [vmem:[#allocation2 + $0x18] sm:$0x3] %v165_v4 }
   0x7   :  { %2 = vsyncpa [#allocation1], 0  ;;  %28 = vst [vmem:[#allocation2 + $0x10] sm:$0x3] %v166_v5  ;;  %vm36_vm0 = vcmask 261120   ;;  %vm91_vm1 = vcmask 1047556  }
   0x8   :  { %32 = vst [vmem:[#allocation2 + $0x8] sm:$0x3] %v167_v6  ;;  %s198_s0 = smov 64   ;;  %s199_s22 = smov 96  }
   0x9   :  { %34 = vst [vmem:[#allocation2] sm:$0x3] %v33_v7  ;;  %v83_v8 = vld [vmem:[#allocation2 + $0x38] sm:$0x3]   ;;  %s200_s23 = smov 32   ;;  %s201_s24 = smov [#allocation0]  }
   0xa   :  { %v76_v9 = vld [vmem:[#allocation2 + $0x30] sm:$0x3]   ;;  %86 = vst.msk [vmem:[#allocation0 + $0x1c] sm:$0x1] %vm36_vm0, %v83_v8   ;;  %s152_s25 = sshll.u32 %s201_s24, 4  ;;  %s154_s1 = sshll.u32 %s268_s1, 4  ;;  %s153_s25 = int_to_ptr.vmem [resolvable:$true] %s152_s25  ;;  %s155_s1 = int_to_ptr.hbm [resolvable:$true] %s154_s1 }
   0xb   :  { %79 = vst.msk [vmem:[#allocation0 + $0x18] sm:$0x1] %vm36_vm0, %v76_v9   ;;  %v69_v25 = vld [vmem:[#allocation2 + $0x28] sm:$0x3]  }
   0xc   :  { %v110_v10 = vld [vmem:[#allocation2] ss:$8 sm:$0xf0]   ;;  %v121_v21 = vld [vmem:[#allocation2 + $0x1] ss:$8 sm:$0xf0]  }
   0xd   :  { %v55_v11 = vld [vmem:[#allocation2 + $0x18] sm:$0x3]   ;;  %v62_v22 = vld [vmem:[#allocation2 + $0x20] sm:$0x3]   ;;  %72 = vst.msk [vmem:[#allocation0 + $0x14] sm:$0x1] %vm36_vm0, %v69_v25  }
   0xe   :  { %v90_v12 = vld [vmem:[#allocation2] ss:$8 sm:$0xf0]   ;;  %58 = vst.msk [vmem:[#allocation0 + $0xc] sm:$0x1] %vm36_vm0, %v55_v11  }
   0xf   :  { %v48_v13 = vld [vmem:[#allocation2 + $0x10] sm:$0x3]   ;;  %v41_v14 = vld [vmem:[#allocation2 + $0x8] sm:$0x3]   ;;  %60 = vst.msk [vmem:[#allocation0 + $0x2b] sm:$0x2] %vm36_vm0, %v55_v11  }
  0x10   :  { %51 = vst.msk [vmem:[#allocation0 + $0x8] sm:$0x1] %vm36_vm0, %v48_v13   ;;  %v109_v15 = vld [vmem:[#allocation2] ss:$8 sm:$0xf]  }
  0x11   :  { %v35_v16 = vld [vmem:[#allocation2] sm:$0x3]   ;;  %v112_v17 = vsel %vm91_vm1, %v110_v10, %v109_v15  ;;  %44 = vst.msk [vmem:[#allocation0 + $0x4] sm:$0x1] %vm36_vm0, %v41_v14  }
  0x12   :  { %37 = vst.msk [vmem:[#allocation0] sm:$0x1] %vm36_vm0, %v35_v16   ;;  %v89_v18 = vld [vmem:[#allocation2] ss:$8 sm:$0xf]   ;;  %113 = vrot.lane.b32.xlu1 %v112_v17, %s198_s0 }
  0x13   :  { %39 = vst.msk [vmem:[#allocation0 + $0x1f] sm:$0x2] %vm36_vm0, %v35_v16   ;;  %v92_v19 = vsel %vm91_vm1, %v90_v12, %v89_v18  ;;  %v119_v20 = vld [vmem:[#allocation2 + $0x1] ss:$8 sm:$0xf]  }
  0x14   :  { %93 = vrot.lane.b32.xlu0 %v92_v19, %s199_s22  ;;  %v99_v23 = vld [vmem:[#allocation2 + $0x1] ss:$8 sm:$0xf]   ;;  %46 = vst.msk [vmem:[#allocation0 + $0x23] sm:$0x2] %vm36_vm0, %v41_v14   ;;  %v123_v28 = vsel %vm91_vm1, %v121_v21, %v119_v20 }
  0x15   :  { %v101_v24 = vld [vmem:[#allocation2 + $0x1] ss:$8 sm:$0xf0]   ;;  %53 = vst.msk [vmem:[#allocation0 + $0x27] sm:$0x2] %vm36_vm0, %v48_v13  }
  0x16   :  { %v129_v26 = vld [vmem:[#allocation2] ss:$8 sm:$0xf]   ;;  %65 = vst.msk [vmem:[#allocation0 + $0x10] sm:$0x1] %vm36_vm0, %v62_v22   ;;  %v103_v30 = vsel %vm91_vm1, %v101_v24, %v99_v23 }
  0x17   :  { %v130_v27 = vld [vmem:[#allocation2] ss:$8 sm:$0xf0]   ;;  %67 = vst.msk [vmem:[#allocation0 + $0x2f] sm:$0x2] %vm36_vm0, %v62_v22  }
  0x18   :  { %v132_v29 = vsel %vm91_vm1, %v130_v27, %v129_v26  ;;  %v139_v31 = vld [vmem:[#allocation2 + $0x1] ss:$8 sm:$0xf]   ;;  %74 = vst.msk [vmem:[#allocation0 + $0x33] sm:$0x2] %vm36_vm0, %v69_v25  }
  0x19   :  { %133 = vrot.lane.b32.xlu2 %v132_v29, %s200_s23  ;;  %v141_v32 = vld [vmem:[#allocation2 + $0x1] ss:$8 sm:$0xf0]   ;;  %81 = vst.msk [vmem:[#allocation0 + $0x37] sm:$0x2] %vm36_vm0, %v76_v9  }
  0x1a   :  { %124 = vrot.lane.b32.xlu1 %v123_v28, %s198_s0  ;;  %88 = vst.msk [vmem:[#allocation0 + $0x3b] sm:$0x2] %vm36_vm0, %v83_v8   ;;  %v143_v33 = vsel %vm91_vm1, %v141_v32, %v139_v31 }
  0x1c   :  { %104 = vrot.lane.b32.xlu0 %v103_v30, %s199_s22 }
  0x21   :  { %144 = vrot.lane.b32.xlu2 %v143_v33, %s200_s23 }
  0x73   :  { %v134_v34 = vpop.permute.xlu2 %133  }
  0x74   :  { %137 = vst.msk [vmem:[#allocation0 + $0x3] ss:$4 sm:$0xff] %vm36_vm0, %v134_v34  }
  0x7b   :  { %v145_v35 = vpop.permute.xlu2 %144  }
  0x7c   :  { %148 = vst.msk [vmem:[#allocation0 + $0x23] ss:$4 sm:$0xff] %vm36_vm0, %v145_v35  }
  0x84   :  { %v114_v36 = vpop.permute.xlu1 %113  }
  0x85   :  { %117 = vst.msk [vmem:[#allocation0 + $0x2] ss:$4 sm:$0xff] %vm36_vm0, %v114_v36  }
  0x86   :  { %v94_v37 = vpop.permute.xlu0 %93  }
  0x87   :  { %97 = vst.msk [vmem:[#allocation0 + $0x1] ss:$4 sm:$0xff] %vm36_vm0, %v94_v37  }
  0x8c   :  { %v125_v38 = vpop.permute.xlu1 %124  }
  0x8d   :  { %128 = vst.msk [vmem:[#allocation0 + $0x22] ss:$4 sm:$0xff] %vm36_vm0, %v125_v38  }
  0x8e   :  { %v105_v39 = vpop.permute.xlu0 %104  }
  0x8f   :  { %108 = vst.msk [vmem:[#allocation0 + $0x21] ss:$4 sm:$0xff] %vm36_vm0, %v105_v39  }
  0x90   :  { %157 = dma.vmem_to_hbm [thread:$0]  %s153_s25, 1024, %s155_s1, [#allocation1]  }
  0x91   :  { %196 = dma.done.wait [#allocation1], 1024  }
  0x92   :  { %197 = vsyncadd [#allocation1], 4294966272 }
  0x93   :  { %160 = vsyncpa [#allocation1], 1 }

// kernel: netfc000_forward.1
= control target key start
LH: loop header
LB: loop body
LE: loop exit
PB: predicated region body
PF: predicated region fallthrough
CT: control target
= control target key end

     0   :  { %s23569_s0 = inlined_call_operand.vmem [shape: f32[2,2,1024], index: 0, kind: input, shape index: {}]   ;;  %s23570_s1 = inlined_call_operand.hbm [shape: bf16[2,1024,1024], index: 1, kind: input, shape index: {}]   ;;  %s23571_s2 = inlined_call_operand.hbm [shape: f32[2,1,1024], index: 2, kind: input, shape index: {}]   ;;  %s23572_s3 = inlined_call_operand.hbm [shape: bf16[2,1024,256], index: 3, kind: input, shape index: {}]   ;;  %s23573_s4 = inlined_call_operand.hbm [shape: f32[2,1,256], index: 4, kind: input, shape index: {}]   ;;  %s23574_s5 = inlined_call_operand.hbm [shape: bf16[2,256,512], index: 5, kind: input, shape index: {}]   ;;  %s23575_s6 = inlined_call_operand.hbm [shape: f32[2,1,512], index: 6, kind: input, shape index: {}]   ;;  %s23576_s7 = inlined_call_operand.hbm [shape: bf16[2,512,256], index: 7, kind: input, shape index: {}]   ;;  %s23577_s8 = inlined_call_operand.hbm [shape: f32[2,1,256], index: 8, kind: input, shape index: {}]   ;;  %s23578_s9 = inlined_call_operand.hbm [shape: bf16[2,256,1024], index: 9, kind: input, shape index: {}]   ;;  %s23579_s10 = inlined_call_operand.hbm [shape: f32[2,1,1024], index: 10, kind: input, shape index: {}]   ;;  %s23580_s11 = inlined_call_operand.hbm [shape: bf16[2,1024,1024], index: 11, kind: input, shape index: {}]   ;;  %s23581_s12 = inlined_call_operand.hbm [shape: f32[2,1,1024], index: 12, kind: input, shape index: {}]   ;;  %s23582_s13 = inlined_call_operand.vmem [shape: f32[2,2,256], index: 13, kind: output, shape index: {0}]   ;;  %s23583_s14 = inlined_call_operand.vmem [shape: f32[2,2,1024], index: 14, kind: output, shape index: {1}]  }
   0x1   :  { %23607 = sst [smem:[#allocation34_spill]] %s23569_s0 }
   0x2   :  { %23608 = sst [smem:[#allocation35_spill]] %s23570_s1 }
   0x3   :  { %23609 = sst [smem:[#allocation36_spill]] %s23571_s2 }
   0x4   :  { %23610 = sst [smem:[#allocation37_spill]] %s23572_s3 }
   0x5   :  { %23611 = sst [smem:[#allocation38_spill]] %s23573_s4 }
   0x6   :  { %23612 = sst [smem:[#allocation39_spill]] %s23575_s6 }
   0x7   :  { %23613 = sst [smem:[#allocation40_spill]] %s23577_s8 }
   0x8   :  { %23614 = sst [smem:[#allocation41_spill]] %s23582_s13 }
   0x9   :  { %23615 = sst [smem:[#allocation42_spill]] %s23583_s14 }
   0xa   :  { %20 = vsyncpa [#allocation3], 0 }
   0xb   :  { %22 = vsyncpa [#allocation3 + $0x1], 0 }
   0xc   :  { %23 = vsyncpa [#allocation5], 0 }
   0xd   :  { %25 = vsyncpa [#allocation5 + $0x1], 0 }
   0xe   :  { %26 = vsyncpa [#allocation8], 0 }
   0xf   :  { %28 = vsyncpa [#allocation8 + $0x1], 0 }
  0x10   :  { %29 = vsyncpa [#allocation11], 0 }
  0x11   :  { %31 = vsyncpa [#allocation11 + $0x1], 0 }
  0x12   :  { %32 = vsyncpa [#allocation14], 0 }
  0x13   :  { %34 = vsyncpa [#allocation14 + $0x1], 0 }
  0x14   :  { %35 = vsyncpa [#allocation17], 0 }
  0x15   :  { %37 = vsyncpa [#allocation17 + $0x1], 0 }
  0x16   :  { %38 = vsyncpa [#allocation20], 0 }
  0x17   :  { %40 = vsyncpa [#allocation20 + $0x1], 0  ;;  %s19869_s29 = smov 0   ;;  %s19871_s30 = smov 0  }
  0x18   :  { %s19873_s15 = smov 0   ;;  %s19875_s16 = smov 0  }
  0x19 LB: > { %23616 = sst [smem:[#allocation28_spill]] %s19778_s30  ;;  %s19888_s17 = sadd.s32 4294967295, %s19786_s16   ;;  %s19786_s16 = sphi %s19875_s16, %s23651_s16   ;;  %s19782_s15 = sphi %s19873_s15, %s23654_s15   ;;  %s19778_s30 = sphi %s19871_s30, %s23653_s30   ;;  %s19774_s29 = sphi %s19869_s29, %s23652_s29  }
  0x1a   : > { %23617 = sst [smem:[#allocation29_spill]] %s19782_s15  ;;  %s19891_s18 = sadd.s32 1, %s19786_s16  }
  0x1b   : > { %23618 = sst [smem:[#allocation30_spill]] %s19888_s17  ;;  %s76_s19 = ssub.s32 %s19786_s16, %s19891_s18 }
  0x1c   : > { %23619 = sst [smem:[#allocation31_spill]] %s19891_s18  ;;  %s79_s20 = sadd.s32 1, %s19782_s15 }
  0x1d   : > { %p77_p0 = scmp.eq.s32.totalorder %s76_s19, 0  ;;  %p86_p1 = scmp.ne.s32.totalorder %s19782_s15, %s19778_s30 }
  0x1e   : > { %p87_p2 = scmp.eq.s32.totalorder %s19786_s16, 0  ;;  %p92_p3 = scmp.ne.s32.totalorder %s19778_s30, %s19774_s29 }
  0x1f   : > { %s19901_s21 = scalar_select %p77_p0, %s19782_s15, %s79_s20  }
  0x20   : > { %p19903_p4 = por %p87_p2, %p86_p1  ;;  %p93_p5 = scmp.eq.s32.totalorder %s19888_s17, 0 }
  0x21   : > { %23620 = sst [smem:[#allocation32_spill]] %s19901_s21  ;;  %p12224_p7 = scmp.ge.s32.totalorder %s19786_s16, 2 }
  0x22   : > { %p19908_p6 = por %p93_p5, %p92_p3  ;;  %s19914_s24 = sand.u32 (!%p12224_p7), 1, %s19782_s15  }
  0x23   : > { %450 = sbr.rel (%p12224_p7) target bundleno = 256 (0x100), region = 16  ;;  %s19917_s25 = sand.u32 (!%p12224_p7), 1, %s19786_s16  }
  0x24   : > { %s23622_s23 = scalar_select %p19908_p6, 1, 0 }
  0x25   : > { %s19920_s26 = sshll.u32 (!%p12224_p7), %s19914_s24, 3  ;;  %s19923_s27 = sshll.u32 (!%p12224_p7), %s19786_s16, 3 }
  0x26   : > { %23623 = sst [smem:[#allocation33_spill]] %s23622_s23  ;;  %s488_s20 = scalar_lea.vmem (!%p12224_p7), [#allocation4], %s19920_s26 }
  0x27   : > { %s23624_s2 = sld [smem:[#allocation36_spill]] (!%p12224_p7)  ;;  %s496_s21 = sshll.u32 (!%p12224_p7), %s488_s20, 4  ;;  %s497_s21 = int_to_ptr.vmem [resolvable:$true] %s496_s21 }
  0x28   : > { %s23592_s15 = scalar_lea.sflag [#allocation5], %s19917_s25 }
  0x2d   : > { %s492_s19 = scalar_lea.hbm %s23624_s2, %s19923_s27  ;;  %s19398_s23 = scalar_lea.hbm %s23624_s2, 16 }
  0x2e   : > { %s494_s18 = sshll.u32 %s492_s19, 4  ;;  %s495_s18 = int_to_ptr.hbm [resolvable:$true] %s494_s18 }
  0x2f   : > { %s19392_s14 = sshra.s32 %s495_s18, 4  ;;  %s19393_s14 = int_to_ptr.hbm [resolvable:$true] %s19392_s14 }
  0x30   : > { %s19394_s13 = scalar_lea.hbm %s19393_s14, 8  ;;  %p19399_p11 = scmp.lt.s32.totalorder %s19393_s14, %s23624_s2 }
  0x31   : > { %p19395_p8 = scmp.ne.s32.totalorder %s19393_s14, %s19394_s13  ;;  %p19400_p12 = scmp.lt.s32.totalorder %s19398_s23, %s19394_s13 }
  0x33   : > { %p19396_p9 = pnand %p19395_p8, %p19903_p4  ;;  %p19401_p13 = por %p19400_p12, %p19399_p11 }
  0x35   : > { %p19397_p10 = pneg %p19396_p9 }
  0x37   : > { %p19402_p0 = pnand %p19401_p13, %p19397_p10 }
  0x39   : > { %19405 = shalt.err (!%p19402_p0)
}
  0x3a   : > { %19326 = dma.hbm_to_vmem [thread:$0]  (%p19903_p4), %s495_s18, 128, %s497_s21, %s23592_s15  }
  0x3b   : > { %s23593_s0 = sshll.u32 %s19914_s24, 1  ;;  %s23594_s17 = sshll.u32 %s19786_s16, 1 }
  0x3c   : > { %s23625_s4 = sld [smem:[#allocation38_spill]]  ;;  %s529_s29 = scalar_lea.vmem [#allocation7], %s23593_s0 }
  0x3d   : > { %s537_s19 = sshll.u32 %s529_s29, 4  ;;  %s23595_s20 = scalar_lea.sflag [#allocation8], %s19917_s25  ;;  %s538_s19 = int_to_ptr.vmem [resolvable:$true] %s537_s19 }
  0x42   : > { %s533_s13 = scalar_lea.hbm %s23625_s4, %s23594_s17  ;;  %s19426_s15 = scalar_lea.hbm %s23625_s4, 4 }
  0x43   : > { %s535_s23 = sshll.u32 %s533_s13, 4  ;;  %s536_s23 = int_to_ptr.hbm [resolvable:$true] %s535_s23 }
  0x44   : > { %s19420_s28 = sshra.s32 %s536_s23, 4  ;;  %s19421_s28 = int_to_ptr.hbm [resolvable:$true] %s19420_s28 }
  0x45   : > { %s19422_s2 = scalar_lea.hbm %s19421_s28, 2  ;;  %p19427_p5 = scmp.lt.s32.totalorder %s19421_s28, %s23625_s4 }
  0x46   : > { %p19423_p1 = scmp.ne.s32.totalorder %s19421_s28, %s19422_s2  ;;  %p19428_p7 = scmp.lt.s32.totalorder %s19426_s15, %s19422_s2 }
  0x48   : > { %p19424_p2 = pnand %p19423_p1, %p19903_p4  ;;  %p19429_p8 = por %p19428_p7, %p19427_p5 }
  0x4a   : > { %p19425_p3 = pneg %p19424_p2 }
  0x4c   : > { %p19430_p9 = pnand %p19429_p8, %p19425_p3 }
  0x4e   : > { %19433 = shalt.err (!%p19430_p9)
}
  0x4f   : > { %19328 = dma.hbm_to_vmem [thread:$0]  (%p19903_p4), %s536_s23, 32, %s538_s19, %s23595_s20  }
  0x50   : > { %s12238_s13 = sshll.u32 %s19914_s24, 2  ;;  %s12239_s29 = sshll.u32 %s19786_s16, 2 }
  0x51   : > { %s23626_s6 = sld [smem:[#allocation39_spill]]  ;;  %s570_s28 = scalar_lea.vmem [#allocation10], %s12238_s13 }
  0x52   : > { %s578_s2 = sshll.u32 %s570_s28, 4  ;;  %s23598_s14 = scalar_lea.sflag [#allocation11], %s19917_s25  ;;  %s579_s2 = int_to_ptr.vmem [resolvable:$true] %s578_s2 }
  0x57   : > { %s574_s30 = scalar_lea.hbm %s23626_s6, %s12239_s29  ;;  %s19454_s20 = scalar_lea.hbm %s23626_s6, 8 }
  0x58   : > { %s576_s15 = sshll.u32 %s574_s30, 4  ;;  %s577_s15 = int_to_ptr.hbm [resolvable:$true] %s576_s15 }
  0x59   : > { %s19448_s0 = sshra.s32 %s577_s15, 4  ;;  %s19449_s0 = int_to_ptr.hbm [resolvable:$true] %s19448_s0 }
  0x5a   : > { %s19450_s17 = scalar_lea.hbm %s19449_s0, 4  ;;  %p19455_p13 = scmp.lt.s32.totalorder %s19449_s0, %s23626_s6 }
  0x5b   : > { %p19451_p10 = scmp.ne.s32.totalorder %s19449_s0, %s19450_s17  ;;  %p19456_p0 = scmp.lt.s32.totalorder %s19454_s20, %s19450_s17 }
  0x5d   : > { %p19452_p11 = pnand %p19451_p10, %p19903_p4  ;;  %p19457_p1 = por %p19456_p0, %p19455_p13 }
  0x5f   : > { %p19453_p12 = pneg %p19452_p11 }
  0x61   : > { %p19458_p2 = pnand %p19457_p1, %p19453_p12 }
  0x63   : > { %19461 = shalt.err (!%p19458_p2)
}
  0x64   : > { %19330 = dma.hbm_to_vmem [thread:$0]  (%p19903_p4), %s577_s15, 64, %s579_s2, %s23598_s14  }
  0x65   : > { %s23627_s13 = sshll.u32 %s19786_s16, 1  ;;  %s23628_s8 = sld [smem:[#allocation40_spill]] }
  0x66   : > { %s23629_s0 = sshll.u32 %s19914_s24, 1  ;;  %s23596_s28 = scalar_lea.sflag [#allocation14], %s19917_s25 }
  0x67   : > { %s611_s17 = scalar_lea.vmem [#allocation13], %s23629_s0 }
  0x68   : > { %s619_s20 = sshll.u32 %s611_s17, 4  ;;  %s620_s20 = int_to_ptr.vmem [resolvable:$true] %s619_s20 }
  0x6b   : > { %s615_s30 = scalar_lea.hbm %s23628_s8, %s23627_s13  ;;  %s19482_s18 = scalar_lea.hbm %s23628_s8, 4 }
  0x6c   : > { %s617_s4 = sshll.u32 %s615_s30, 4  ;;  %s618_s4 = int_to_ptr.hbm [resolvable:$true] %s617_s4 }
  0x6d   : > { %s19476_s23 = sshra.s32 %s618_s4, 4  ;;  %s19477_s23 = int_to_ptr.hbm [resolvable:$true] %s19476_s23 }
  0x6e   : > { %s19478_s19 = scalar_lea.hbm %s19477_s23, 2  ;;  %p19483_p8 = scmp.lt.s32.totalorder %s19477_s23, %s23628_s8 }
  0x6f   : > { %p19479_p3 = scmp.ne.s32.totalorder %s19477_s23, %s19478_s19  ;;  %p19484_p9 = scmp.lt.s32.totalorder %s19482_s18, %s19478_s19 }
  0x71   : > { %p19480_p5 = pnand %p19479_p3, %p19903_p4  ;;  %p19485_p10 = por %p19484_p9, %p19483_p8 }
  0x73   : > { %p19481_p7 = pneg %p19480_p5 }
  0x75   : > { %p19486_p11 = pnand %p19485_p10, %p19481_p7 }
  0x77   : > { %19489 = shalt.err (!%p19486_p11)
}
  0x78   : > { %19332 = dma.hbm_to_vmem [thread:$0]  (%p19903_p4), %s618_s4, 32, %s620_s20, %s23596_s28  }
  0x79   : > { %s656_s0 = scalar_lea.hbm %s23579_s10, %s19923_s27  ;;  %s652_s17 = scalar_lea.vmem [#allocation16], %s19920_s26 }
  0x7a   : > { %s660_s2 = sshll.u32 %s652_s17, 4  ;;  %s658_s23 = sshll.u32 %s656_s0, 4  ;;  %s661_s2 = int_to_ptr.vmem [resolvable:$true] %s660_s2  ;;  %s659_s23 = int_to_ptr.hbm [resolvable:$true] %s658_s23 }
  0x7b   : > { %s23597_s19 = scalar_lea.sflag [#allocation17], %s19917_s25  ;;  %s19504_s15 = sshra.s32 %s659_s23, 4  ;;  %s19505_s15 = int_to_ptr.hbm [resolvable:$true] %s19504_s15 }
  0x7c   : > { %s19506_s18 = scalar_lea.hbm %s19505_s15, 8  ;;  %s19510_s4 = scalar_lea.hbm %s23579_s10, 16 }
  0x7d   : > { %p19507_p12 = scmp.ne.s32.totalorder %s19505_s15, %s19506_s18  ;;  %p19511_p1 = scmp.lt.s32.totalorder %s19505_s15, %s23579_s10 }
  0x7e   : > { %p19512_p2 = scmp.lt.s32.totalorder %s19510_s4, %s19506_s18 }
  0x7f   : > { %p19508_p13 = pnand %p19507_p12, %p19903_p4 }
  0x80   : > { %p19513_p3 = por %p19512_p2, %p19511_p1 }
  0x81   : > { %p19509_p0 = pneg %p19508_p13 }
  0x83   : > { %p19514_p5 = pnand %p19513_p3, %p19509_p0 }
  0x85   : > { %19517 = shalt.err (!%p19514_p5)
}
  0x86   : > { %19334 = dma.hbm_to_vmem [thread:$0]  (%p19903_p4), %s659_s23, 128, %s661_s2, %s23597_s19  }
  0x87   : > { %s12225_s30 = sshll.u32 %s19914_s24, 12  ;;  %s17908_s0 = sshll.u32 %s19786_s16, 12 }
  0x88   : > { %s23630_s1 = sld [smem:[#allocation35_spill]]  ;;  %s466_s18 = scalar_lea.vmem [#allocation2], %s12225_s30 }
  0x89   : > { %s474_s4 = sshll.u32 %s466_s18, 4  ;;  %s463_s20 = scalar_lea.sflag [#allocation3], %s19914_s24  ;;  %s475_s4 = int_to_ptr.vmem [resolvable:$true] %s474_s4 }
  0x8e   : > { %s471_s13 = scalar_lea.hbm %s23630_s1, %s17908_s0  ;;  %s19538_s19 = scalar_lea.hbm %s23630_s1, 8192 }
  0x8f   : > { %s472_s15 = sshll.u32 %s471_s13, 4  ;;  %s473_s15 = int_to_ptr.hbm [resolvable:$true] %s472_s15 }
  0x90   : > { %s19532_s21 = sshra.s32 %s473_s15, 4  ;;  %s19533_s21 = int_to_ptr.hbm [resolvable:$true] %s19532_s21 }
  0x91   : > { %s19534_s28 = scalar_lea.hbm %s19533_s21, 4096  ;;  %p19539_p10 = scmp.lt.s32.totalorder %s19533_s21, %s23630_s1 }
  0x92   : > { %p19535_p7 = scmp.ne.s32.totalorder %s19533_s21, %s19534_s28  ;;  %p19540_p11 = scmp.lt.s32.totalorder %s19538_s19, %s19534_s28 }
  0x94   : > { %p19536_p8 = pnand %p19535_p7, %p19903_p4  ;;  %p19541_p12 = por %p19540_p11, %p19539_p10 }
  0x96   : > { %p19537_p9 = pneg %p19536_p8 }
  0x98   : > { %p19542_p13 = pnand %p19541_p12, %p19537_p9 }
  0x9a   : > { %19545 = shalt.err (!%p19542_p13)
}
  0x9b   : > { %s23599_s29 = smov 512   ;;  %s23601_s13 = smov 32  }
  0x9c   : > { %19325 = dma.hbm_to_vmem [thread:$0]  (%p19903_p4), %s473_s15, 65536, %s475_s4, %s463_s20, %s23599_s29, %s23599_s29, %s23601_s13  }
  0x9d   : > { %s20043_s14 = scalar_lea.hbm %s23580_s11, %s17908_s0  ;;  %s20046_s19 = scalar_lea.vmem [#allocation18], %s12225_s30 }
  0x9e   : > { %s23603_s23 = sshll.u32 %s19914_s24, 10  ;;  %s23604_s17 = sshll.u32 %s19786_s16, 10 }
  0x9f   : > { %s23631_s3 = sld [smem:[#allocation37_spill]]  ;;  %s507_s4 = scalar_lea.vmem [#allocation6], %s23603_s23 }
  0xa0   : > { %s515_s20 = sshll.u32 %s507_s4, 4  ;;  %s516_s20 = int_to_ptr.vmem [resolvable:$true] %s515_s20 }
  0xa5   : > { %s512_s8 = scalar_lea.hbm %s23631_s3, %s23604_s17  ;;  %s19566_s21 = scalar_lea.hbm %s23631_s3, 2048 }
  0xa6   : > { %s513_s15 = sshll.u32 %s512_s8, 4  ;;  %s514_s15 = int_to_ptr.hbm [resolvable:$true] %s513_s15 }
  0xa7   : > { %s19560_s0 = sshra.s32 %s514_s15, 4  ;;  %s19561_s0 = int_to_ptr.hbm [resolvable:$true] %s19560_s0 }
  0xa8   : > { %s19562_s18 = scalar_lea.hbm %s19561_s0, 1024  ;;  %p19567_p3 = scmp.lt.s32.totalorder %s19561_s0, %s23631_s3 }
  0xa9   : > { %p19563_p0 = scmp.ne.s32.totalorder %s19561_s0, %s19562_s18  ;;  %p19568_p5 = scmp.lt.s32.totalorder %s19566_s21, %s19562_s18 }
  0xab   : > { %p19564_p1 = pnand %p19563_p0, %p19903_p4  ;;  %p19569_p7 = por %p19568_p5, %p19567_p3 }
  0xad   : > { %p19565_p2 = pneg %p19564_p1 }
  0xaf   : > { %p19570_p8 = pnand %p19569_p7, %p19565_p2 }
  0xb1   : > { %19573 = shalt.err (!%p19570_p8)
}
  0xb2   : > { %s23605_s6 = smov 128   ;;  %s23606_s8 = smov 8  }
  0xb3   : > { %s23632_s4 = scalar_lea.sflag [#allocation5], %s19917_s25  ;;  %s12235_s30 = sshll.u32 %s19914_s24, 9 }
  0xb4   : > { %19327 = dma.hbm_to_vmem [thread:$0]  (%p19903_p4), %s514_s15, 16384, %s516_s20, %s23632_s4, %s23605_s6, %s23605_s6, %s23606_s8  }
  0xb5   : > { %s17910_s28 = sshll.u32 %s19786_s16, 9  ;;  %s548_s1 = scalar_lea.vmem [#allocation9], %s12235_s30 }
  0xb6   : > { %s553_s18 = scalar_lea.hbm %s23574_s5, %s17910_s28  ;;  %s556_s29 = sshll.u32 %s548_s1, 4  ;;  %s557_s29 = int_to_ptr.vmem [resolvable:$true] %s556_s29 }
  0xb7   : > { %s554_s2 = sshll.u32 %s553_s18, 4  ;;  %s19594_s20 = scalar_lea.hbm %s23574_s5, 1024  ;;  %s555_s2 = int_to_ptr.hbm [resolvable:$true] %s554_s2 }
  0xb8   : > { %s19588_s13 = sshra.s32 %s555_s2, 4  ;;  %s19589_s13 = int_to_ptr.hbm [resolvable:$true] %s19588_s13 }
  0xb9   : > { %s19590_s23 = scalar_lea.hbm %s19589_s13, 512  ;;  %p19595_p12 = scmp.lt.s32.totalorder %s19589_s13, %s23574_s5 }
  0xba   : > { %p19591_p9 = scmp.ne.s32.totalorder %s19589_s13, %s19590_s23  ;;  %p19596_p13 = scmp.lt.s32.totalorder %s19594_s20, %s19590_s23 }
  0xbc   : > { %p19592_p10 = pnand %p19591_p9, %p19903_p4  ;;  %p19597_p0 = por %p19596_p13, %p19595_p12 }
  0xbe   : > { %p19593_p11 = pneg %p19592_p10 }
  0xc0   : > { %p19598_p1 = pnand %p19597_p0, %p19593_p11 }
  0xc2   : > { %19601 = shalt.err (!%p19598_p1)
}
  0xc3   : > { %s19792_s0 = smov 256   ;;  %s19793_s21 = smov 16  }
  0xc4   : > { %s23633_s18 = scalar_lea.sflag [#allocation8], %s19917_s25  ;;  %s594_s17 = scalar_lea.hbm %s23576_s7, %s17910_s28 }
  0xc5   : > { %19329 = dma.hbm_to_vmem [thread:$0]  (%p19903_p4), %s555_s2, 8192, %s557_s29, %s23633_s18, %s19792_s0, %s19792_s0, %s19793_s21  }
  0xc6   : > { %s595_s15 = sshll.u32 %s594_s17, 4  ;;  %s589_s3 = scalar_lea.vmem [#allocation12], %s12235_s30  ;;  %s596_s15 = int_to_ptr.hbm [resolvable:$true] %s595_s15 }
  0xc7   : > { %s597_s6 = sshll.u32 %s589_s3, 4  ;;  %s19616_s13 = sshra.s32 %s596_s15, 4  ;;  %s598_s6 = int_to_ptr.vmem [resolvable:$true] %s597_s6  ;;  %s19617_s13 = int_to_ptr.hbm [resolvable:$true] %s19616_s13 }
  0xc8   : > { %s19618_s23 = scalar_lea.hbm %s19617_s13, 512  ;;  %s19622_s29 = scalar_lea.hbm %s23576_s7, 1024 }
  0xc9   : > { %p19619_p2 = scmp.ne.s32.totalorder %s19617_s13, %s19618_s23  ;;  %p19623_p7 = scmp.lt.s32.totalorder %s19617_s13, %s23576_s7 }
  0xca   : > { %p19624_p8 = scmp.lt.s32.totalorder %s19622_s29, %s19618_s23 }
  0xcb   : > { %p19620_p3 = pnand %p19619_p2, %p19903_p4 }
  0xcc   : > { %p19625_p9 = por %p19624_p8, %p19623_p7 }
  0xcd   : > { %p19621_p5 = pneg %p19620_p3 }
  0xcf   : > { %p19626_p10 = pnand %p19625_p9, %p19621_p5 }
  0xd1   : > { %19629 = shalt.err (!%p19626_p10)
}
  0xd2   : > { %s23634_s3 = smov 8   ;;  %s23635_s8 = smov 128  }
  0xd3   : > { %s23636_s30 = scalar_lea.sflag [#allocation11], %s19917_s25  ;;  %s23637_s28 = sshll.u32 %s19786_s16, 10 }
  0xd4   : > { %19331 = dma.hbm_to_vmem [thread:$0]  (%p19903_p4), %s596_s15, 8192, %s598_s6, %s23636_s30, %s23635_s8, %s23635_s8, %s23634_s3  }
  0xd5   : > { %s635_s1 = scalar_lea.hbm %s23578_s9, %s23637_s28  ;;  %s23638_s13 = sshll.u32 %s19914_s24, 10 }
  0xd6   : > { %s636_s17 = sshll.u32 %s635_s1, 4  ;;  %s630_s23 = scalar_lea.vmem [#allocation15], %s23638_s13  ;;  %s637_s17 = int_to_ptr.hbm [resolvable:$true] %s636_s17 }
  0xd7   : > { %s638_s20 = sshll.u32 %s630_s23, 4  ;;  %s19644_s4 = sshra.s32 %s637_s17, 4  ;;  %s639_s20 = int_to_ptr.vmem [resolvable:$true] %s638_s20  ;;  %s19645_s4 = int_to_ptr.hbm [resolvable:$true] %s19644_s4 }
  0xd8   : > { %s19646_s29 = scalar_lea.hbm %s19645_s4, 1024  ;;  %s19650_s6 = scalar_lea.hbm %s23578_s9, 2048 }
  0xd9   : > { %p19647_p11 = scmp.ne.s32.totalorder %s19645_s4, %s19646_s29  ;;  %p19651_p0 = scmp.lt.s32.totalorder %s19645_s4, %s23578_s9 }
  0xda   : > { %p19652_p1 = scmp.lt.s32.totalorder %s19650_s6, %s19646_s29 }
  0xdb   : > { %p19648_p12 = pnand %p19647_p11, %p19903_p4 }
  0xdc   : > { %p19653_p2 = por %p19652_p1, %p19651_p0 }
  0xdd   : > { %p19649_p13 = pneg %p19648_p12 }
  0xdf   : > { %p19654_p3 = pnand %p19653_p2, %p19649_p13 }
  0xe1   : > { %19657 = shalt.err (!%p19654_p3)
}
  0xe2   : > { %s23639_s8 = smov 32   ;;  %s23640_s30 = smov 512  }
  0xe3   : > { %s23641_s28 = scalar_lea.sflag [#allocation14], %s19917_s25  ;;  %s23642_s21 = sshll.u32 %s20043_s14, 4  ;;  %s678_s21 = int_to_ptr.hbm [resolvable:$true] %s23642_s21 }
  0xe4   : > { %19333 = dma.hbm_to_vmem [thread:$0]  (%p19903_p4), %s637_s17, 16384, %s639_s20, %s23641_s28, %s23640_s30, %s23640_s30, %s23639_s8  }
  0xe5   : > { %s23643_s18 = sshll.u32 %s20046_s19, 4  ;;  %s19672_s1 = sshra.s32 %s678_s21, 4  ;;  %s680_s18 = int_to_ptr.vmem [resolvable:$true] %s23643_s18  ;;  %s19673_s1 = int_to_ptr.hbm [resolvable:$true] %s19672_s1 }
  0xe6   : > { %s19674_s13 = scalar_lea.hbm %s19673_s1, 4096  ;;  %s19678_s29 = scalar_lea.hbm %s23580_s11, 8192 }
  0xe7   : > { %p19675_p5 = scmp.ne.s32.totalorder %s19673_s1, %s19674_s13  ;;  %p19679_p9 = scmp.lt.s32.totalorder %s19673_s1, %s23580_s11 }
  0xe8   : > { %p19680_p10 = scmp.lt.s32.totalorder %s19678_s29, %s19674_s13 }
  0xe9   : > { %p19676_p7 = pnand %p19675_p5, %p19903_p4 }
  0xea   : > { %p19681_p11 = por %p19680_p10, %p19679_p9 }
  0xeb   : > { %p19677_p8 = pneg %p19676_p7 }
  0xed   : > { %p19682_p12 = pnand %p19681_p11, %p19677_p8 }
  0xef   : > { %19685 = shalt.err (!%p19682_p12)
}
  0xf0   : > { %s23644_s14 = scalar_lea.sflag [#allocation17], %s19917_s25  ;;  %s697_s20 = scalar_lea.hbm %s23581_s12, %s19923_s27 }
  0xf1   : > { %19335 = dma.hbm_to_vmem [thread:$0]  (%p19903_p4), %s678_s21, 65536, %s680_s18, %s23644_s14, %s23640_s30, %s23640_s30, %s23639_s8  }
  0xf2   : > { %s693_s6 = scalar_lea.vmem [#allocation19], %s19920_s26  ;;  %s699_s3 = sshll.u32 %s697_s20, 4  ;;  %s700_s3 = int_to_ptr.hbm [resolvable:$true] %s699_s3 }
  0xf3   : > { %s701_s0 = sshll.u32 %s693_s6, 4  ;;  %s690_s28 = scalar_lea.sflag [#allocation20], %s19914_s24  ;;  %s702_s0 = int_to_ptr.vmem [resolvable:$true] %s701_s0 }
  0xf4   : > { %s19700_s1 = sshra.s32 %s700_s3, 4  ;;  %s19706_s8 = scalar_lea.hbm %s23581_s12, 16  ;;  %s19701_s1 = int_to_ptr.hbm [resolvable:$true] %s19700_s1 }
  0xf5   : > { %s19702_s13 = scalar_lea.hbm %s19701_s1, 8  ;;  %p19707_p2 = scmp.lt.s32.totalorder %s19701_s1, %s23581_s12 }
  0xf6   : > { %p19703_p13 = scmp.ne.s32.totalorder %s19701_s1, %s19702_s13  ;;  %p19708_p3 = scmp.lt.s32.totalorder %s19706_s8, %s19702_s13 }
  0xf8   : > { %p19704_p0 = pnand %p19703_p13, %p19903_p4  ;;  %p19709_p5 = por %p19708_p3, %p19707_p2 }
  0xfa   : > { %p19705_p1 = pneg %p19704_p0 }
  0xfc   : > { %p19710_p7 = pnand %p19709_p5, %p19705_p1 }
  0xfe   : > { %19713 = shalt.err (!%p19710_p7)
}
  0xff   : > { %19336 = dma.hbm_to_vmem [thread:$0]  (%p19903_p4), %s700_s3, 128, %s702_s0, %s690_s28  }
 0x100 PF: > { %p12255_p8 = scmp.ge.s32.totalorder %s19786_s16, 1  ;;  %p706_p9 = scmp.lt.s32.totalorder %s19786_s16, 3 }
 0x102   : > { %p707_p10 = pnand %p12255_p8, %p706_p9 }
 0x103   : > { %s23645_s24 = sld [smem:[#allocation28_spill]] (!%p707_p10) }
 0x104   : > { %710 = sbr.rel (%p707_p10) target bundleno = 2522 (0x9da), region = 72 }
 0x109   : > { %s20168_s27 = sand.u32 1, %s23645_s24  }
 0x10a   : > { %s12256_s18 = sshll.u32 %s20168_s27, 12  ;;  %s713_s4 = scalar_lea.sflag [#allocation3], %s20168_s27 }
 0x10b   : > { %s20174_s29 = scalar_lea.vmem [#allocation2], %s12256_s18 }
 0x10c   : > { %19745 = dma.done.wait (%p19908_p6), %s713_s4, 65536  }
 0x10d   : > { %19747 = vsyncadd (%p19908_p6), %s713_s4, 4294901760  ;;  %s23647_s16 = sld [smem:[#allocation30_spill]]  ;;  %s20184_s2 = sshll.u32 %s20168_s27, 3 }
 0x10e   : > { %s20188_s14 = scalar_lea.vmem [#allocation4], %s20184_s2 }
 0x113   : > { %s20181_s22 = sand.u32 1, %s23647_s16  }
 0x114   : > { %s723_s15 = scalar_lea.sflag [#allocation5], %s20181_s22 }
 0x115   : > { %19749 = dma.done.wait (%p19908_p6), %s723_s15, 16512  }
 0x116   : > { %19751 = vsyncadd (%p19908_p6), %s723_s15, 4294950784  ;;  %s12258_s19 = sshll.u32 %s20168_s27, 10  ;;  %s12259_s17 = sshll.u32 %s20168_s27, 1 }
 0x117   : > { %s20196_s20 = scalar_lea.vmem [#allocation6], %s12258_s19  ;;  %s743_s6 = scalar_lea.sflag [#allocation8], %s20181_s22 }
 0x118   : > { %s20199_s0 = scalar_lea.vmem [#allocation7], %s12259_s17 }
 0x119   : > { %19753 = dma.done.wait (%p19908_p6), %s743_s6, 8224  }
 0x11a   : > { %19755 = vsyncadd (%p19908_p6), %s743_s6, 4294959072  ;;  %s12260_s3 = sshll.u32 %s20168_s27, 9  ;;  %s12261_s28 = sshll.u32 %s20168_s27, 2 }
 0x11b   : > { %s20207_s1 = scalar_lea.vmem [#allocation9], %s12260_s3  ;;  %s763_s13 = scalar_lea.sflag [#allocation11], %s20181_s22 }
 0x11c   : > { %s20210_s25 = scalar_lea.vmem [#allocation10], %s12261_s28 }
 0x11d   : > { %19757 = dma.done.wait (%p19908_p6), %s763_s13, 8256  }
 0x11e   : > { %19759 = vsyncadd (%p19908_p6), %s763_s13, 4294959040  ;;  %s20216_s23 = scalar_lea.vmem [#allocation12], %s12260_s3  ;;  %s783_s8 = scalar_lea.sflag [#allocation14], %s20181_s22 }
 0x11f   : > { %s20219_s30 = scalar_lea.vmem [#allocation13], %s12259_s17 }
 0x120   : > { %19761 = dma.done.wait (%p19908_p6), %s783_s8, 16416  }
 0x121   : > { %19763 = vsyncadd (%p19908_p6), %s783_s8, 4294950880  ;;  %s20225_s21 = scalar_lea.vmem [#allocation15], %s12258_s19  ;;  %s803_s24 = scalar_lea.sflag [#allocation17], %s20181_s22 }
 0x122   : > { %s806_s4 = scalar_lea.vmem [#allocation16], %s20184_s2 }
 0x123   : > { %19765 = dma.done.wait (%p19908_p6), %s803_s24, 65664  }
 0x124   : > { %19767 = vsyncadd (%p19908_p6), %s803_s24, 4294901632  ;;  %s20235_s15 = scalar_lea.vmem [#allocation18], %s12256_s18  ;;  %s823_s17 = scalar_lea.sflag [#allocation20], %s20168_s27 }
 0x125   : > { %s20239_s6 = scalar_lea.vmem [#allocation19], %s20184_s2 }
 0x126   : > { %19769 = dma.done.wait (%p19908_p6), %s823_s17, 128  }
 0x127   : > { %19771 = vsyncadd (%p19908_p6), %s823_s17, 4294967168  ;;  %v12500_v0 = vld [vmem:[%s20174_s29 + $0x1c0] sm:$0xf]  ;;  %p937_p4 = scmp.lt.s32.totalorder %s23647_s16, 1  ;;  %s23648_s22 = sld [smem:[#allocation34_spill]]  ;;  %vm6908_vm0 = vcmask 1041408  }
 0x128   : > { %v17977_v1 = vld [vmem:[%s20174_s29 + $0x1dc] sm:$0xf0]  ;;  %vm11861_vm1 = vcmask 1045508   ;;  %vm11863_vm2 = vcmask 1043456  }
 0x129   : > { %v12756_v2 = vld [vmem:[%s20174_s29 + $0x3c0] sm:$0xf]  ;;  %v12501_v3 = vor.u32 %v17977_v1, %v12500_v0  ;;  %s23656_s16 = smov (!%p937_p4, %s23647_s16), 1 }
 0x12a   : > { %v18041_v4 = vld [vmem:[%s20174_s29 + $0x3dc] sm:$0xf0]  ;;  %s17914_s26 = sshll.u32 %s23656_s16, 4 }
 0x12b   : > { %v13012_v5 = vld [vmem:[%s20174_s29 + $0x5c0] sm:$0xf]  ;;  %v12757_v7 = vor.u32 %v18041_v4, %v12756_v2  ;;  %4073 = vmatpush.bf16.msra.mxu0 %v12501_v3 }
 0x12c   : > { %v18105_v6 = vld [vmem:[%s20174_s29 + $0x5dc] sm:$0xf0] }
 0x12d   : > { %v13013_v8 = vor.u32 %v18105_v6, %v13012_v5  ;;  %v13268_v9 = vld [vmem:[%s20174_s29 + $0x7c0] sm:$0xf]  ;;  %4086 = vmatpush.bf16.msra.mxu1 %v12757_v7  ;;  %s20340_s19 = scalar_lea.vmem %s23648_s22, %s17914_s26 }
 0x12e   : > { %v18169_v10 = vld [vmem:[%s20174_s29 + $0x7dc] sm:$0xf0] }
 0x12f   : > { %v12468_v11 = vld [vmem:[%s20174_s29 + $0x180] sm:$0xf]  ;;  %v13269_v12 = vor.u32 %v18169_v10, %v13268_v9  ;;  %4099 = vmatpush.bf16.msra.mxu2 %v13013_v8 }
 0x130   : > { %v17969_v13 = vld [vmem:[%s20174_s29 + $0x19c] sm:$0xf0] }
 0x131   : > { %v12724_v14 = vld [vmem:[%s20174_s29 + $0x380] sm:$0xf]  ;;  %v12469_v16 = vor.u32 %v17969_v13, %v12468_v11  ;;  %4112 = vmatpush.bf16.msra.mxu3 %v13269_v12 }
 0x132   : > { %v18033_v15 = vld [vmem:[%s20174_s29 + $0x39c] sm:$0xf0] }
 0x133   : > { %v12725_v17 = vor.u32 %v18033_v15, %v12724_v14  ;;  %v12980_v18 = vld [vmem:[%s20174_s29 + $0x580] sm:$0xf]  ;;  %4074 = vmatpush.bf16.msra.mxu0 %v12469_v16 }
 0x134   : > { %v18097_v19 = vld [vmem:[%s20174_s29 + $0x59c] sm:$0xf0] }
 0x135   : > { %v13236_v20 = vld [vmem:[%s20174_s29 + $0x780] sm:$0xf]  ;;  %v12981_v21 = vor.u32 %v18097_v19, %v12980_v18  ;;  %4087 = vmatpush.bf16.msra.mxu1 %v12725_v17 }
 0x136   : > { %v18161_v22 = vld [vmem:[%s20174_s29 + $0x79c] sm:$0xf0] }
 0x137   : > { %v12436_v23 = vld [vmem:[%s20174_s29 + $0x140] sm:$0xf]  ;;  %v13237_v25 = vor.u32 %v18161_v22, %v13236_v20  ;;  %4100 = vmatpush.bf16.msra.mxu2 %v12981_v21 }
 0x138   : > { %v17961_v24 = vld [vmem:[%s20174_s29 + $0x15c] sm:$0xf0] }
 0x139   : > { %v12692_v26 = vld [vmem:[%s20174_s29 + $0x340] sm:$0xf]  ;;  %v12437_v29 = vor.u32 %v17961_v24, %v12436_v23  ;;  %4113 = vmatpush.bf16.msra.mxu3 %v13237_v25 }
 0x13a   : > { %v18025_v27 = vld [vmem:[%s20174_s29 + $0x35c] sm:$0xf0] }
 0x13b   : > { %v12948_v28 = vld [vmem:[%s20174_s29 + $0x540] sm:$0xf]  ;;  %v12693_v33 = vor.u32 %v18025_v27, %v12692_v26  ;;  %4075 = vmatpush.bf16.msra.mxu0 %v12437_v29 }
 0x13c   : > { %v18089_v30 = vld [vmem:[%s20174_s29 + $0x55c] sm:$0xf0] }
 0x13d   : > { %v13204_v31 = vld [vmem:[%s20174_s29 + $0x740] sm:$0xf]  ;;  %v12949_v34 = vor.u32 %v18089_v30, %v12948_v28  ;;  %4088 = vmatpush.bf16.msra.mxu1 %v12693_v33 }
 0x13e   : > { %v18153_v32 = vld [vmem:[%s20174_s29 + $0x75c] sm:$0xf0] }
 0x13f   : > { %v12404_v35 = vld [vmem:[%s20174_s29 + $0x100] sm:$0xf]  ;;  %v13205_v38 = vor.u32 %v18153_v32, %v13204_v31  ;;  %4101 = vmatpush.bf16.msra.mxu2 %v12949_v34 }
 0x140   : > { %v17953_v36 = vld [vmem:[%s20174_s29 + $0x11c] sm:$0xf0] }
 0x141   : > { %v12660_v37 = vld [vmem:[%s20174_s29 + $0x300] sm:$0xf]  ;;  %v12405_v44 = vor.u32 %v17953_v36, %v12404_v35  ;;  %4114 = vmatpush.bf16.msra.mxu3 %v13205_v38 }
 0x142   : > { %v18017_v39 = vld [vmem:[%s20174_s29 + $0x31c] sm:$0xf0] }
 0x143   : > { %v12916_v40 = vld [vmem:[%s20174_s29 + $0x500] sm:$0xf]  ;;  %v12661_v45 = vor.u32 %v18017_v39, %v12660_v37  ;;  %4076 = vmatpush.bf16.msra.mxu0 %v12405_v44 }
 0x144   : > { %v18081_v41 = vld [vmem:[%s20174_s29 + $0x51c] sm:$0xf0] }
 0x145   : > { %v13172_v42 = vld [vmem:[%s20174_s29 + $0x700] sm:$0xf]  ;;  %v12917_v46 = vor.u32 %v18081_v41, %v12916_v40  ;;  %4089 = vmatpush.bf16.msra.mxu1 %v12661_v45 }
 0x146   : > { %v18145_v43 = vld [vmem:[%s20174_s29 + $0x71c] sm:$0xf0] }
 0x147   : > { %v12372_v47 = vld [vmem:[%s20174_s29 + $0xc0] sm:$0xf]  ;;  %v13173_v50 = vor.u32 %v18145_v43, %v13172_v42  ;;  %4102 = vmatpush.bf16.msra.mxu2 %v12917_v46 }
 0x148   : > { %v17945_v48 = vld [vmem:[%s20174_s29 + $0xdc] sm:$0xf0] }
 0x149   : > { %v12628_v49 = vld [vmem:[%s20174_s29 + $0x2c0] sm:$0xf]  ;;  %v12373_v56 = vor.u32 %v17945_v48, %v12372_v47  ;;  %4115 = vmatpush.bf16.msra.mxu3 %v13173_v50 }
 0x14a   : > { %v18009_v51 = vld [vmem:[%s20174_s29 + $0x2dc] sm:$0xf0] }
 0x14b   : > { %v12884_v52 = vld [vmem:[%s20174_s29 + $0x4c0] sm:$0xf]  ;;  %v12629_v57 = vor.u32 %v18009_v51, %v12628_v49  ;;  %4077 = vmatpush.bf16.msra.mxu0 %v12373_v56 }
 0x14c   : > { %v18073_v53 = vld [vmem:[%s20174_s29 + $0x4dc] sm:$0xf0] }
 0x14d   : > { %v13140_v54 = vld [vmem:[%s20174_s29 + $0x6c0] sm:$0xf]  ;;  %v12885_v58 = vor.u32 %v18073_v53, %v12884_v52  ;;  %4090 = vmatpush.bf16.msra.mxu1 %v12629_v57 }
 0x14e   : > { %v18137_v55 = vld [vmem:[%s20174_s29 + $0x6dc] sm:$0xf0] }
 0x14f   : > { %v12340_v59 = vld [vmem:[%s20174_s29 + $0x80] sm:$0xf]  ;;  %v13141_v62 = vor.u32 %v18137_v55, %v13140_v54  ;;  %4103 = vmatpush.bf16.msra.mxu2 %v12885_v58 }
 0x150   : > { %v17937_v60 = vld [vmem:[%s20174_s29 + $0x9c] sm:$0xf0] }
 0x151   : > { %v12596_v61 = vld [vmem:[%s20174_s29 + $0x280] sm:$0xf]  ;;  %v12341_v4 = vor.u32 %v17937_v60, %v12340_v59  ;;  %4116 = vmatpush.bf16.msra.mxu3 %v13141_v62 }
 0x152   : > { %v18001_v63 = vld [vmem:[%s20174_s29 + $0x29c] sm:$0xf0] }
 0x153   : > { %v12852_v0 = vld [vmem:[%s20174_s29 + $0x480] sm:$0xf]  ;;  %v12597_v5 = vor.u32 %v18001_v63, %v12596_v61  ;;  %4078 = vmatpush.bf16.msra.mxu0 %v12341_v4 }
 0x154   : > { %v18065_v1 = vld [vmem:[%s20174_s29 + $0x49c] sm:$0xf0] }
 0x155   : > { %v13108_v2 = vld [vmem:[%s20174_s29 + $0x680] sm:$0xf]  ;;  %v12853_v6 = vor.u32 %v18065_v1, %v12852_v0  ;;  %4091 = vmatpush.bf16.msra.mxu1 %v12597_v5 }
 0x156   : > { %v18129_v3 = vld [vmem:[%s20174_s29 + $0x69c] sm:$0xf0] }
 0x157   : > { %v12308_v7 = vld [vmem:[%s20174_s29 + $0x40] sm:$0xf]  ;;  %v13109_v10 = vor.u32 %v18129_v3, %v13108_v2  ;;  %4104 = vmatpush.bf16.msra.mxu2 %v12853_v6  ;;  %v952_v2 = vld [vmem:[%s20340_s19] sm:$0xff] }
 0x158   : > { %v17929_v8 = vld [vmem:[%s20174_s29 + $0x5c] sm:$0xf0]  ;;  %956 = vst [vmem:[#allocation1] ss:$4 sm:$0xff] %v952_v2 }
 0x159   : > { %v12564_v9 = vld [vmem:[%s20174_s29 + $0x240] sm:$0xf]  ;;  %v12309_v16 = vor.u32 %v17929_v8, %v12308_v7  ;;  %4117 = vmatpush.bf16.msra.mxu3 %v13109_v10 }
 0x15a   : > { %v17993_v11 = vld [vmem:[%s20174_s29 + $0x25c] sm:$0xf0] }
 0x15b   : > { %v12820_v12 = vld [vmem:[%s20174_s29 + $0x440] sm:$0xf]  ;;  %v12565_v19 = vor.u32 %v17993_v11, %v12564_v9  ;;  %4079 = vmatpush.bf16.msra.mxu0 %v12309_v16 }
 0x15c   : > { %v18057_v13 = vld [vmem:[%s20174_s29 + $0x45c] sm:$0xf0] }
 0x15d   : > { %v13076_v14 = vld [vmem:[%s20174_s29 + $0x640] sm:$0xf]  ;;  %v12821_v20 = vor.u32 %v18057_v13, %v12820_v12  ;;  %4092 = vmatpush.bf16.msra.mxu1 %v12565_v19 }
 0x15e   : > { %v18121_v15 = vld [vmem:[%s20174_s29 + $0x65c] sm:$0xf0] }
 0x15f   : > { %v12276_v17 = vld [vmem:[%s20174_s29] sm:$0xf]  ;;  %v13077_v24 = vor.u32 %v18121_v15, %v13076_v14  ;;  %4105 = vmatpush.bf16.msra.mxu2 %v12821_v20 }
 0x160   : > { %v17921_v18 = vld [vmem:[%s20174_s29 + $0x1c] sm:$0xf0] }
 0x161   : > { %v12532_v21 = vld [vmem:[%s20174_s29 + $0x200] sm:$0xf]  ;;  %v12277_v31 = vor.u32 %v17921_v18, %v12276_v17  ;;  %4118 = vmatpush.bf16.msra.mxu3 %v13077_v24 }
 0x162   : > { %v17985_v22 = vld [vmem:[%s20174_s29 + $0x21c] sm:$0xf0] }
 0x163   : > { %v12788_v23 = vld [vmem:[%s20174_s29 + $0x400] sm:$0xf]  ;;  %v12533_v35 = vor.u32 %v17985_v22, %v12532_v21  ;;  %4080 = vmatpush.bf16.msra.mxu0 %v12277_v31  ;;  %v959_v31 = vld.sshfl [vmem:[#allocation1] sm:$0xff pattern:$0x73625140] }
 0x164   : > { %v18049_v25 = vld [vmem:[%s20174_s29 + $0x41c] sm:$0xf0] }
 0x165   : > { %v13044_v26 = vld [vmem:[%s20174_s29 + $0x600] sm:$0xf]  ;;  %v12789_v36 = vor.u32 %v18049_v25, %v12788_v23  ;;  %4093 = vmatpush.bf16.msra.mxu1 %v12533_v35  ;;  %v962_v35 = vld.sshfl [vmem:[#allocation1 + $0x18] sm:$0xff pattern:$0x73625140] }
 0x166   : > { %v18113_v27 = vld [vmem:[%s20174_s29 + $0x61c] sm:$0xf0] }
 0x167   : > { %v13524_v28 = vld [vmem:[%s20174_s29 + $0x9c0] sm:$0xf]  ;;  %v13045_v39 = vor.u32 %v18113_v27, %v13044_v26  ;;  %4106 = vmatpush.bf16.msra.mxu2 %v12789_v36 }
 0x168   : > { %v18233_v29 = vld [vmem:[%s20174_s29 + $0x9dc] sm:$0xf0] }
 0x169   : > { %v13780_v30 = vld [vmem:[%s20174_s29 + $0xbc0] sm:$0xf]  ;;  %v13525_v40 = vor.u32 %v18233_v29, %v13524_v28  ;;  %4119 = vmatpush.bf16.msra.mxu3 %v13045_v39 }
 0x16a   : > { %v18297_v32 = vld [vmem:[%s20174_s29 + $0xbdc] sm:$0xf0] }
 0x16b   : > { %v14036_v33 = vld [vmem:[%s20174_s29 + $0xdc0] sm:$0xf]  ;;  %v13781_v41 = vor.u32 %v18297_v32, %v13780_v30  ;;  %4125 = vmatpush.bf16.msrb.mxu0 %v13525_v40  ;;  %v961_v30 = vld.sshfl [vmem:[#allocation1 + $0x10] sm:$0xff pattern:$0x73625140] }
 0x16c   : > { %v18361_v34 = vld [vmem:[%s20174_s29 + $0xddc] sm:$0xf0] }
 0x16d   : > { %v14292_v37 = vld [vmem:[%s20174_s29 + $0xfc0] sm:$0xf]  ;;  %v14037_v42 = vor.u32 %v18361_v34, %v14036_v33  ;;  %4138 = vmatpush.bf16.msrb.mxu1 %v13781_v41  ;;  %v20367_v33 = vpack.c.bf16 %v961_v30, %v961_v30  ;;  %v20369_v34 = vpack.c.bf16 %v959_v31, %v959_v31  ;;  %v20374_v41 = vpack.c.bf16 %v962_v35, %v962_v35  ;;  %v18093_v30 = vld [vmem:[%s20174_s29 + $0x584] sm:$0xf] }
 0x16e   : > { %v18425_v38 = vld [vmem:[%s20174_s29 + $0xfdc] sm:$0xf0]  ;;  %v12982_v31 = vld [vmem:[%s20174_s29 + $0x5a0] sm:$0xf0] }
 0x16f   : > { %v13492_v43 = vld [vmem:[%s20174_s29 + $0x980] sm:$0xf]  ;;  %v14293_v46 = vor.u32 %v18425_v38, %v14292_v37  ;;  %4151 = vmatpush.bf16.msrb.mxu2 %v14037_v42  ;;  %4081 = vmatmul.bf16.vlgmr.msra.gmra.mxu0 %v20369_v34  ;;  %v18157_v35 = vld [vmem:[%s20174_s29 + $0x784] sm:$0xf] }
 0x170   : > { %v18225_v44 = vld [vmem:[%s20174_s29 + $0x99c] sm:$0xf0]  ;;  %4107 = vmatmul.bf16.vlgmr.msra.gmra.mxu2 %v20367_v33  ;;  %4120 = vmatmul.bf16.vlgmr.msra.gmra.mxu3 %v20374_v41 }
 0x171   : > { %v13748_v45 = vld [vmem:[%s20174_s29 + $0xb80] sm:$0xf]  ;;  %v13493_v52 = vor.u32 %v18225_v44, %v13492_v43  ;;  %4164 = vmatpush.bf16.msrb.mxu3 %v14293_v46 }
 0x172   : > { %v18289_v47 = vld [vmem:[%s20174_s29 + $0xb9c] sm:$0xf0] }
 0x173   : > { %v14004_v48 = vld [vmem:[%s20174_s29 + $0xd80] sm:$0xf]  ;;  %v13749_v53 = vor.u32 %v18289_v47, %v13748_v45  ;;  %4126 = vmatpush.bf16.msrb.mxu0 %v13493_v52 }
 0x174   : > { %v18353_v49 = vld [vmem:[%s20174_s29 + $0xd9c] sm:$0xf0] }
 0x175   : > { %v14260_v50 = vld [vmem:[%s20174_s29 + $0xf80] sm:$0xf]  ;;  %v14005_v54 = vor.u32 %v18353_v49, %v14004_v48  ;;  %4139 = vmatpush.bf16.msrb.mxu1 %v13749_v53 }
 0x176   : > { %v18417_v51 = vld [vmem:[%s20174_s29 + $0xf9c] sm:$0xf0] }
 0x177   : > { %v13460_v55 = vld [vmem:[%s20174_s29 + $0x940] sm:$0xf]  ;;  %v14261_v58 = vor.u32 %v18417_v51, %v14260_v50  ;;  %4152 = vmatpush.bf16.msrb.mxu2 %v14005_v54 }
 0x178   : > { %v18217_v56 = vld [vmem:[%s20174_s29 + $0x95c] sm:$0xf0] }
 0x179   : > { %v13716_v57 = vld [vmem:[%s20174_s29 + $0xb40] sm:$0xf]  ;;  %v13461_v0 = vor.u32 %v18217_v56, %v13460_v55  ;;  %4165 = vmatpush.bf16.msrb.mxu3 %v14261_v58 }
 0x17a   : > { %v18281_v59 = vld [vmem:[%s20174_s29 + $0xb5c] sm:$0xf0] }
 0x17b   : > { %v13972_v60 = vld [vmem:[%s20174_s29 + $0xd40] sm:$0xf]  ;;  %v13717_v3 = vor.u32 %v18281_v59, %v13716_v57  ;;  %4127 = vmatpush.bf16.msrb.mxu0 %v13461_v0 }
 0x17c   : > { %v18345_v61 = vld [vmem:[%s20174_s29 + $0xd5c] sm:$0xf0] }
 0x17d   : > { %v14228_v62 = vld [vmem:[%s20174_s29 + $0xf40] sm:$0xf]  ;;  %v13973_v4 = vor.u32 %v18345_v61, %v13972_v60  ;;  %4140 = vmatpush.bf16.msrb.mxu1 %v13717_v3 }
 0x17e   : > { %v18409_v63 = vld [vmem:[%s20174_s29 + $0xf5c] sm:$0xf0] }
 0x17f   : > { %v13428_v1 = vld [vmem:[%s20174_s29 + $0x900] sm:$0xf]  ;;  %v14229_v7 = vor.u32 %v18409_v63, %v14228_v62  ;;  %4153 = vmatpush.bf16.msrb.mxu2 %v13973_v4 }
 0x180   : > { %v18209_v5 = vld [vmem:[%s20174_s29 + $0x91c] sm:$0xf0] }
 0x181   : > { %v13684_v6 = vld [vmem:[%s20174_s29 + $0xb00] sm:$0xf]  ;;  %v13429_v13 = vor.u32 %v18209_v5, %v13428_v1  ;;  %4166 = vmatpush.bf16.msrb.mxu3 %v14229_v7  ;;  %v12502_v7 = vld [vmem:[%s20174_s29 + $0x1e0] sm:$0xf0] }
 0x182   : > { %v18273_v8 = vld [vmem:[%s20174_s29 + $0xb1c] sm:$0xf0] }
 0x183   : > { %v13940_v9 = vld [vmem:[%s20174_s29 + $0xd00] sm:$0xf]  ;;  %v13685_v15 = vor.u32 %v18273_v8, %v13684_v6  ;;  %4128 = vmatpush.bf16.msrb.mxu0 %v13429_v13  ;;  %v17973_v6 = vld [vmem:[%s20174_s29 + $0x1c4] sm:$0xf] }
 0x184   : > { %v18337_v10 = vld [vmem:[%s20174_s29 + $0xd1c] sm:$0xf0]  ;;  %v18037_v8 = vld [vmem:[%s20174_s29 + $0x3c4] sm:$0xf] }
 0x185   : > { %v14196_v11 = vld [vmem:[%s20174_s29 + $0xf00] sm:$0xf]  ;;  %v13941_v16 = vor.u32 %v18337_v10, %v13940_v9  ;;  %4141 = vmatpush.bf16.msrb.mxu1 %v13685_v15  ;;  %v12758_v9 = vld [vmem:[%s20174_s29 + $0x3e0] sm:$0xf0] }
 0x186   : > { %v18401_v12 = vld [vmem:[%s20174_s29 + $0xf1c] sm:$0xf0]  ;;  %v18101_v10 = vld [vmem:[%s20174_s29 + $0x5c4] sm:$0xf] }
 0x187   : > { %v13396_v14 = vld [vmem:[%s20174_s29 + $0x8c0] sm:$0xf]  ;;  %v14197_v20 = vor.u32 %v18401_v12, %v14196_v11  ;;  %4154 = vmatpush.bf16.msrb.mxu2 %v13941_v16  ;;  %v13014_v12 = vld [vmem:[%s20174_s29 + $0x5e0] sm:$0xf0] }
 0x188   : > { %v18201_v17 = vld [vmem:[%s20174_s29 + $0x8dc] sm:$0xf0]  ;;  %v18165_v13 = vld [vmem:[%s20174_s29 + $0x7c4] sm:$0xf] }
 0x189   : > { %v13652_v18 = vld [vmem:[%s20174_s29 + $0xac0] sm:$0xf]  ;;  %v13397_v27 = vor.u32 %v18201_v17, %v13396_v14  ;;  %4167 = vmatpush.bf16.msrb.mxu3 %v14197_v20  ;;  %v13270_v14 = vld [vmem:[%s20174_s29 + $0x7e0] sm:$0xf0] }
 0x18a   : > { %v18265_v19 = vld [vmem:[%s20174_s29 + $0xadc] sm:$0xf0]  ;;  %v17965_v17 = vld [vmem:[%s20174_s29 + $0x184] sm:$0xf] }
 0x18b   : > { %v13908_v21 = vld [vmem:[%s20174_s29 + $0xcc0] sm:$0xf]  ;;  %v13653_v28 = vor.u32 %v18265_v19, %v13652_v18  ;;  %4129 = vmatpush.bf16.msrb.mxu0 %v13397_v27  ;;  %v12470_v18 = vld [vmem:[%s20174_s29 + $0x1a0] sm:$0xf0] }
 0x18c   : > { %v18329_v22 = vld [vmem:[%s20174_s29 + $0xcdc] sm:$0xf0] }
 0x18d   : > { %v14164_v23 = vld [vmem:[%s20174_s29 + $0xec0] sm:$0xf]  ;;  %v13909_v32 = vor.u32 %v18329_v22, %v13908_v21  ;;  %4142 = vmatpush.bf16.msrb.mxu1 %v13653_v28  ;;  %v12505_v21 = vor.u32 %v17973_v6, %v12502_v7  ;;  %v13273_v28 = vor.u32 %v18165_v13, %v13270_v14  ;;  %v12374_v6 = vld [vmem:[%s20174_s29 + $0xe0] sm:$0xf0] }
 0x18e   : > { %v18393_v24 = vld [vmem:[%s20174_s29 + $0xedc] sm:$0xf0]  ;;  %v18005_v7 = vld [vmem:[%s20174_s29 + $0x2c4] sm:$0xf] }
 0x18f   : > { %v13364_v25 = vld [vmem:[%s20174_s29 + $0x880] sm:$0xf]  ;;  %v14165_v37 = vor.u32 %v18393_v24, %v14164_v23  ;;  %4155 = vmatpush.bf16.msrb.mxu2 %v13909_v32  ;;  %v12761_v24 = vor.u32 %v18037_v8, %v12758_v9  ;;  %v12630_v9 = vld [vmem:[%s20174_s29 + $0x2e0] sm:$0xf0] }
 0x190   : > { %v18193_v26 = vld [vmem:[%s20174_s29 + $0x89c] sm:$0xf0]  ;;  %v13142_v13 = vld [vmem:[%s20174_s29 + $0x6e0] sm:$0xf0] }
 0x191   : > { %v13620_v29 = vld [vmem:[%s20174_s29 + $0xa80] sm:$0xf]  ;;  %v13365_v45 = vor.u32 %v18193_v26, %v13364_v25  ;;  %4168 = vmatpush.bf16.msrb.mxu3 %v14165_v37  ;;  %v13017_v25 = vor.u32 %v18101_v10, %v13014_v12  ;;  %v18029_v26 = vld [vmem:[%s20174_s29 + $0x384] sm:$0xf] }
 0x192   : > { %v960_v36 = vld.sshfl [vmem:[#allocation1 + $0x8] sm:$0xff pattern:$0x73625140] }
 0x193   : > { %v18257_v38 = vld [vmem:[%s20174_s29 + $0xa9c] sm:$0xf0]  ;;  %v20376_v42 = vpack.c.bf16 %v960_v36, %v960_v36  ;;  %4130 = vmatpush.bf16.msrb.mxu0 %v13365_v45  ;;  %v13238_v36 = vld [vmem:[%s20174_s29 + $0x7a0] sm:$0xf0] }
 0x194   : > { %v13876_v39 = vld [vmem:[%s20174_s29 + $0xc80] sm:$0xf]  ;;  %v13621_v48 = vor.u32 %v18257_v38, %v13620_v29  ;;  %v12726_v29 = vld [vmem:[%s20174_s29 + $0x3a0] sm:$0xf0] }
 0x195   : > { %v18321_v40 = vld [vmem:[%s20174_s29 + $0xc9c] sm:$0xf0]  ;;  %4094 = vmatmul.bf16.vlgmr.msra.gmra.mxu1 %v20376_v42  ;;  %v17957_v45 = vld [vmem:[%s20174_s29 + $0x144] sm:$0xf] }
 0x196   : > { %v14132_v43 = vld [vmem:[%s20174_s29 + $0xe80] sm:$0xf]  ;;  %v13877_v49 = vor.u32 %v18321_v40, %v13876_v39  ;;  %4143 = vmatpush.bf16.msrb.mxu1 %v13621_v48  ;;  %v12473_v39 = vor.u32 %v17965_v17, %v12470_v18  ;;  %v13241_v48 = vor.u32 %v18157_v35, %v13238_v36  ;;  %v18069_v10 = vld [vmem:[%s20174_s29 + $0x4c4] sm:$0xf] }
 0x197   : > { %v18385_v44 = vld [vmem:[%s20174_s29 + $0xe9c] sm:$0xf0]  ;;  %v18133_v12 = vld [vmem:[%s20174_s29 + $0x6c4] sm:$0xf] }
 0x198   : > { %v13332_v46 = vld [vmem:[%s20174_s29 + $0x840] sm:$0xf]  ;;  %v14133_v53 = vor.u32 %v18385_v44, %v14132_v43  ;;  %4156 = vmatpush.bf16.msrb.mxu2 %v13877_v49  ;;  %v12729_v43 = vor.u32 %v18029_v26, %v12726_v29  ;;  %v12985_v44 = vor.u32 %v18093_v30, %v12982_v31  ;;  %v12694_v49 = vld [vmem:[%s20174_s29 + $0x360] sm:$0xf0] }
 0x199   : > { %v18185_v47 = vld [vmem:[%s20174_s29 + $0x85c] sm:$0xf0]  ;;  %v17933_v17 = vld [vmem:[%s20174_s29 + $0x84] sm:$0xf] }
 0x19a   : > { %v13588_v50 = vld [vmem:[%s20174_s29 + $0xa40] sm:$0xf]  ;;  %v13333_v59 = vor.u32 %v18185_v47, %v13332_v46  ;;  %4169 = vmatpush.bf16.msrb.mxu3 %v14133_v53  ;;  %v12438_v46 = vld [vmem:[%s20174_s29 + $0x160] sm:$0xf0] }
 0x19b   : > { %v18249_v51 = vld [vmem:[%s20174_s29 + $0xa5c] sm:$0xf0]  ;;  %v18021_v47 = vld [vmem:[%s20174_s29 + $0x344] sm:$0xf] }
 0x19c   : > { %v953_v52 = vld [vmem:[%s20340_s19 + $0x8] sm:$0xff]  ;;  %v13589_v63 = vor.u32 %v18249_v51, %v13588_v50  ;;  %4131 = vmatpush.bf16.msrb.mxu0 %v13333_v59 }
 0x19d   : > { %v13844_v54 = vld [vmem:[%s20174_s29 + $0xc40] sm:$0xf]  ;;  %958 = vst [vmem:[#allocation1 + $0x20] ss:$4 sm:$0xff] %v953_v52  ;;  %v18085_v50 = vld [vmem:[%s20174_s29 + $0x544] sm:$0xf] }
 0x19e   : > { %v18313_v55 = vld [vmem:[%s20174_s29 + $0xc5c] sm:$0xf0]  ;;  %4144 = vmatpush.bf16.msrb.mxu1 %v13589_v63  ;;  %v12950_v51 = vld [vmem:[%s20174_s29 + $0x560] sm:$0xf0] }
 0x19f   : > { %v14100_v56 = vld [vmem:[%s20174_s29 + $0xe40] sm:$0xf]  ;;  %v13845_v0 = vor.u32 %v18313_v55, %v13844_v54  ;;  %v18149_v52 = vld [vmem:[%s20174_s29 + $0x744] sm:$0xf]  ;;  %v12441_v54 = vor.u32 %v17957_v45, %v12438_v46  ;;  %v12697_v55 = vor.u32 %v18021_v47, %v12694_v49 }
 0x1a0   : > { %v18377_v57 = vld [vmem:[%s20174_s29 + $0xe5c] sm:$0xf0]  ;;  %v13206_v53 = vld [vmem:[%s20174_s29 + $0x760] sm:$0xf0] }
 0x1a1   : > { %v13300_v58 = vld [vmem:[%s20174_s29 + $0x800] sm:$0xf]  ;;  %v14101_v4 = vor.u32 %v18377_v57, %v14100_v56  ;;  %4157 = vmatpush.bf16.msrb.mxu2 %v13845_v0  ;;  %v12953_v56 = vor.u32 %v18085_v50, %v12950_v51  ;;  %v17949_v57 = vld [vmem:[%s20174_s29 + $0x104] sm:$0xf] }
 0x1a2   : > { %v18177_v60 = vld [vmem:[%s20174_s29 + $0x81c] sm:$0xf0]  ;;  %v18013_v59 = vld [vmem:[%s20174_s29 + $0x304] sm:$0xf] }
 0x1a3   : > { %v13556_v61 = vld [vmem:[%s20174_s29 + $0xa00] sm:$0xf]  ;;  %v13301_v11 = vor.u32 %v18177_v60, %v13300_v58  ;;  %4170 = vmatpush.bf16.msrb.mxu3 %v14101_v4  ;;  %v12406_v58 = vld [vmem:[%s20174_s29 + $0x120] sm:$0xf0]  ;;  %v13209_v60 = vor.u32 %v18149_v52, %v13206_v53 }
 0x1a4   : > { %v18241_v62 = vld [vmem:[%s20174_s29 + $0xa1c] sm:$0xf0]  ;;  %v965_v19 = vld.sshfl [vmem:[#allocation1 + $0x30] sm:$0xff pattern:$0x73625140] }
 0x1a5   : > { %v13812_v1 = vld [vmem:[%s20174_s29 + $0xc00] sm:$0xf]  ;;  %v13557_v15 = vor.u32 %v18241_v62, %v13556_v61  ;;  %v963_v22 = vld.sshfl [vmem:[#allocation1 + $0x20] sm:$0xff pattern:$0x73625140]  ;;  %4132 = vmatpush.bf16.msrb.mxu0 %v13301_v11  ;;  %v20415_v32 = vpack.c.bf16 %v965_v19, %v965_v19 }
 0x1a6   : > { %v18305_v2 = vld [vmem:[%s20174_s29 + $0xc1c] sm:$0xf0]  ;;  %v966_v23 = vld.sshfl [vmem:[#allocation1 + $0x38] sm:$0xff pattern:$0x73625140]  ;;  %v20419_v37 = vpack.c.bf16 %v963_v22, %v963_v22 }
 0x1a7   : > { %v14068_v3 = vld [vmem:[%s20174_s29 + $0xe00] sm:$0xf]  ;;  %v13813_v16 = vor.u32 %v18305_v2, %v13812_v1  ;;  %4145 = vmatpush.bf16.msrb.mxu1 %v13557_v15  ;;  %v20421_v38 = vpack.c.bf16 %v966_v23, %v966_v23  ;;  %v12662_v61 = vld [vmem:[%s20174_s29 + $0x320] sm:$0xf0]  ;;  %v12409_v2 = vor.u32 %v17949_v57, %v12406_v58  ;;  %v12633_v15 = vor.u32 %v18005_v7, %v12630_v9 }
 0x1a8   : > { %v18369_v5 = vld [vmem:[%s20174_s29 + $0xe1c] sm:$0xf0]  ;;  %4133 = vmatmul.bf16.vlgmr.msrb.gmra.mxu0 %v20419_v37  ;;  %v18077_v62 = vld [vmem:[%s20174_s29 + $0x504] sm:$0xf] }
 0x1a9   : > { %v14069_v20 = vor.u32 %v18369_v5, %v14068_v3  ;;  %v964_v27 = vld.sshfl [vmem:[#allocation1 + $0x28] sm:$0xff pattern:$0x73625140]  ;;  %4158 = vmatpush.bf16.msrb.mxu2 %v13813_v16  ;;  %4177 = vmatpush.bf16.msra.mxu0 %v12505_v21  ;;  %v12665_v3 = vor.u32 %v18013_v59, %v12662_v61 }
 0x1aa   : > { %v20423_v40 = vpack.c.bf16 %v964_v27, %v964_v27  ;;  %v12918_v63 = vld [vmem:[%s20174_s29 + $0x520] sm:$0xf0] }
 0x1ab   : > { %4171 = vmatpush.bf16.msrb.mxu3 %v14069_v20  ;;  %4190 = vmatpush.bf16.msra.mxu1 %v12761_v24  ;;  %v18141_v0 = vld [vmem:[%s20174_s29 + $0x704] sm:$0xf]  ;;  %v12921_v4 = vor.u32 %v18077_v62, %v12918_v63  ;;  %v13145_v20 = vor.u32 %v18133_v12, %v13142_v13 }
 0x1ac   : > { %4159 = vmatmul.bf16.vlgmr.msrb.gmra.mxu2 %v20415_v32  ;;  %4146 = vmatmul.bf16.vlgmr.msrb.gmra.mxu1 %v20423_v40  ;;  %v13174_v1 = vld [vmem:[%s20174_s29 + $0x720] sm:$0xf0] }
 0x1ad   : > { %4203 = vmatpush.bf16.msra.mxu2 %v13017_v25  ;;  %4178 = vmatpush.bf16.msra.mxu0 %v12473_v39  ;;  %v17941_v5 = vld [vmem:[%s20174_s29 + $0xc4] sm:$0xf]  ;;  %v13177_v8 = vor.u32 %v18141_v0, %v13174_v1 }
 0x1ae   : > { %4172 = vmatmul.bf16.vlgmr.msrb.gmra.mxu3 %v20421_v38  ;;  %v12886_v11 = vld [vmem:[%s20174_s29 + $0x4e0] sm:$0xf0]  ;;  %v12377_v14 = vor.u32 %v17941_v5, %v12374_v6 }
 0x1af   : > { %4216 = vmatpush.bf16.msra.mxu3 %v13273_v28  ;;  %4191 = vmatpush.bf16.msra.mxu1 %v12729_v43  ;;  %v12889_v16 = vor.u32 %v18069_v10, %v12886_v11  ;;  %v12342_v18 = vld [vmem:[%s20174_s29 + $0xa0] sm:$0xf0] }
 0x1b0   : > { %v17997_v19 = vld [vmem:[%s20174_s29 + $0x284] sm:$0xf]  ;;  %v12345_v26 = vor.u32 %v17933_v17, %v12342_v18 }
 0x1b1   : > { %4204 = vmatpush.bf16.msra.mxu2 %v12985_v44  ;;  %4179 = vmatpush.bf16.msra.mxu0 %v12441_v54  ;;  %v12598_v21 = vld [vmem:[%s20174_s29 + $0x2a0] sm:$0xf0] }
 0x1b2   : > { %v18061_v22 = vld [vmem:[%s20174_s29 + $0x484] sm:$0xf]  ;;  %v12601_v27 = vor.u32 %v17997_v19, %v12598_v21 }
 0x1b3   : > { %4217 = vmatpush.bf16.msra.mxu3 %v13241_v48  ;;  %4192 = vmatpush.bf16.msra.mxu1 %v12697_v55  ;;  %v12854_v23 = vld [vmem:[%s20174_s29 + $0x4a0] sm:$0xf0] }
 0x1b4   : > { %v18125_v24 = vld [vmem:[%s20174_s29 + $0x684] sm:$0xf]  ;;  %v12857_v28 = vor.u32 %v18061_v22, %v12854_v23 }
 0x1b5   : > { %4205 = vmatpush.bf16.msra.mxu2 %v12953_v56  ;;  %4180 = vmatpush.bf16.msra.mxu0 %v12409_v2  ;;  %v13110_v25 = vld [vmem:[%s20174_s29 + $0x6a0] sm:$0xf0] }
 0x1b6   : > { %v17925_v29 = vld [vmem:[%s20174_s29 + $0x44] sm:$0xf]  ;;  %v13113_v35 = vor.u32 %v18125_v24, %v13110_v25 }
 0x1b7   : > { %4218 = vmatpush.bf16.msra.mxu3 %v13209_v60  ;;  %4193 = vmatpush.bf16.msra.mxu1 %v12665_v3  ;;  %v12310_v30 = vld [vmem:[%s20174_s29 + $0x60] sm:$0xf0] }
 0x1b8   : > { %v17989_v31 = vld [vmem:[%s20174_s29 + $0x244] sm:$0xf]  ;;  %v12313_v46 = vor.u32 %v17925_v29, %v12310_v30 }
 0x1b9   : > { %4206 = vmatpush.bf16.msra.mxu2 %v12921_v4  ;;  %4181 = vmatpush.bf16.msra.mxu0 %v12377_v14  ;;  %v12566_v36 = vld [vmem:[%s20174_s29 + $0x260] sm:$0xf0] }
 0x1ba   : > { %v18053_v39 = vld [vmem:[%s20174_s29 + $0x444] sm:$0xf]  ;;  %v12569_v49 = vor.u32 %v17989_v31, %v12566_v36 }
 0x1bb   : > { %4219 = vmatpush.bf16.msra.mxu3 %v13177_v8  ;;  %4194 = vmatpush.bf16.msra.mxu1 %v12633_v15  ;;  %v12822_v43 = vld [vmem:[%s20174_s29 + $0x460] sm:$0xf0] }
 0x1bc   : > { %v18117_v44 = vld [vmem:[%s20174_s29 + $0x644] sm:$0xf]  ;;  %v12825_v50 = vor.u32 %v18053_v39, %v12822_v43 }
 0x1bd   : > { %4207 = vmatpush.bf16.msra.mxu2 %v12889_v16  ;;  %v13078_v45 = vld [vmem:[%s20174_s29 + $0x660] sm:$0xf0]  ;;  %4182 = vmatpush.bf16.msra.mxu0 %v12345_v26 }
 0x1be   : > { %v17917_v47 = vld [vmem:[%s20174_s29 + $0x4] sm:$0xf]  ;;  %v13081_v54 = vor.u32 %v18117_v44, %v13078_v45 }
 0x1bf   : > { %4220 = vmatpush.bf16.msra.mxu3 %v13145_v20  ;;  %v12278_v48 = vld [vmem:[%s20174_s29 + $0x20] sm:$0xf0]  ;;  %4195 = vmatpush.bf16.msra.mxu1 %v12601_v27 }
 0x1c0   : > { %v17981_v51 = vld [vmem:[%s20174_s29 + $0x204] sm:$0xf]  ;;  %v12281_v61 = vor.u32 %v17917_v47, %v12278_v48 }
 0x1c1   : > { %4208 = vmatpush.bf16.msra.mxu2 %v12857_v28  ;;  %v12534_v52 = vld [vmem:[%s20174_s29 + $0x220] sm:$0xf0]  ;;  %4183 = vmatpush.bf16.msra.mxu0 %v12313_v46 }
 0x1c2   : > { %v18045_v53 = vld [vmem:[%s20174_s29 + $0x404] sm:$0xf]  ;;  %v12537_v1 = vor.u32 %v17981_v51, %v12534_v52 }
 0x1c3   : > { %4221 = vmatpush.bf16.msra.mxu3 %v13113_v35  ;;  %v12790_v55 = vld [vmem:[%s20174_s29 + $0x420] sm:$0xf0]  ;;  %4196 = vmatpush.bf16.msra.mxu1 %v12569_v49 }
 0x1c4   : > { %v18109_v56 = vld [vmem:[%s20174_s29 + $0x604] sm:$0xf]  ;;  %v12793_v2 = vor.u32 %v18045_v53, %v12790_v55 }
 0x1c5   : > { %v13046_v57 = vld [vmem:[%s20174_s29 + $0x620] sm:$0xf0]  ;;  %4209 = vmatpush.bf16.msra.mxu2 %v12825_v50  ;;  %4184 = vmatpush.bf16.msra.mxu0 %v12281_v61 }
 0x1c6   : > { %v18229_v58 = vld [vmem:[%s20174_s29 + $0x9c4] sm:$0xf]  ;;  %v13049_v5 = vor.u32 %v18109_v56, %v13046_v57 }
 0x1c7   : > { %v13526_v59 = vld [vmem:[%s20174_s29 + $0x9e0] sm:$0xf0]  ;;  %4222 = vmatpush.bf16.msra.mxu3 %v13081_v54  ;;  %4197 = vmatpush.bf16.msra.mxu1 %v12537_v1 }
 0x1c8   : > { %v18293_v60 = vld [vmem:[%s20174_s29 + $0xbc4] sm:$0xf]  ;;  %v13529_v6 = vor.u32 %v18229_v58, %v13526_v59  ;;  %4185 = vmatmul.bf16.vlgmr.msra.gmra.mxu0 %v20369_v34 }
 0x1c9   : > { %v13782_v62 = vld [vmem:[%s20174_s29 + $0xbe0] sm:$0xf0]  ;;  %4210 = vmatpush.bf16.msra.mxu2 %v12793_v2 }
 0x1ca   : > { %v18357_v63 = vld [vmem:[%s20174_s29 + $0xdc4] sm:$0xf]  ;;  %v13785_v7 = vor.u32 %v18293_v60, %v13782_v62  ;;  %4229 = vmatpush.bf16.msrb.mxu0 %v13529_v6  ;;  %4198 = vmatmul.bf16.vlgmr.msra.gmra.mxu1 %v20376_v42 }
 0x1cb   : > { %v14038_v0 = vld [vmem:[%s20174_s29 + $0xde0] sm:$0xf0]  ;;  %4223 = vmatpush.bf16.msra.mxu3 %v13049_v5 }
 0x1cc   : > { %v18421_v3 = vld [vmem:[%s20174_s29 + $0xfc4] sm:$0xf]  ;;  %v14041_v8 = vor.u32 %v18357_v63, %v14038_v0  ;;  %4242 = vmatpush.bf16.msrb.mxu1 %v13785_v7  ;;  %4211 = vmatmul.bf16.vlgmr.msra.gmra.mxu2 %v20367_v33 }
 0x1cd   : > { %v14294_v4 = vld [vmem:[%s20174_s29 + $0xfe0] sm:$0xf0] }
 0x1ce   : > { %v18221_v9 = vld [vmem:[%s20174_s29 + $0x984] sm:$0xf]  ;;  %v14297_v12 = vor.u32 %v18421_v3, %v14294_v4  ;;  %4255 = vmatpush.bf16.msrb.mxu2 %v14041_v8  ;;  %4224 = vmatmul.bf16.vlgmr.msra.gmra.mxu3 %v20374_v41 }
 0x1cf   : > { %v13494_v10 = vld [vmem:[%s20174_s29 + $0x9a0] sm:$0xf0] }
 0x1d0   : > { %v18285_v11 = vld [vmem:[%s20174_s29 + $0xb84] sm:$0xf]  ;;  %v13497_v18 = vor.u32 %v18221_v9, %v13494_v10  ;;  %4268 = vmatpush.bf16.msrb.mxu3 %v14297_v12 }
 0x1d1   : > { %v13750_v13 = vld [vmem:[%s20174_s29 + $0xba0] sm:$0xf0] }
 0x1d2   : > { %v18349_v14 = vld [vmem:[%s20174_s29 + $0xd84] sm:$0xf]  ;;  %v13753_v19 = vor.u32 %v18285_v11, %v13750_v13  ;;  %4230 = vmatpush.bf16.msrb.mxu0 %v13497_v18 }
 0x1d3   : > { %v14006_v15 = vld [vmem:[%s20174_s29 + $0xda0] sm:$0xf0] }
 0x1d4   : > { %v18413_v16 = vld [vmem:[%s20174_s29 + $0xf84] sm:$0xf]  ;;  %v14009_v20 = vor.u32 %v18349_v14, %v14006_v15  ;;  %4243 = vmatpush.bf16.msrb.mxu1 %v13753_v19 }
 0x1d5   : > { %v14262_v17 = vld [vmem:[%s20174_s29 + $0xfa0] sm:$0xf0] }
 0x1d6   : > { %v18213_v21 = vld [vmem:[%s20174_s29 + $0x944] sm:$0xf]  ;;  %v14265_v24 = vor.u32 %v18413_v16, %v14262_v17  ;;  %4256 = vmatpush.bf16.msrb.mxu2 %v14009_v20 }
 0x1d7   : > { %v13462_v22 = vld [vmem:[%s20174_s29 + $0x960] sm:$0xf0] }
 0x1d8   : > { %v18277_v23 = vld [vmem:[%s20174_s29 + $0xb44] sm:$0xf]  ;;  %v13465_v30 = vor.u32 %v18213_v21, %v13462_v22  ;;  %4269 = vmatpush.bf16.msrb.mxu3 %v14265_v24 }
 0x1d9   : > { %v13718_v25 = vld [vmem:[%s20174_s29 + $0xb60] sm:$0xf0] }
 0x1da   : > { %v18341_v26 = vld [vmem:[%s20174_s29 + $0xd44] sm:$0xf]  ;;  %v13721_v31 = vor.u32 %v18277_v23, %v13718_v25  ;;  %4231 = vmatpush.bf16.msrb.mxu0 %v13465_v30 }
 0x1db   : > { %v13974_v27 = vld [vmem:[%s20174_s29 + $0xd60] sm:$0xf0] }
 0x1dc   : > { %v18405_v28 = vld [vmem:[%s20174_s29 + $0xf44] sm:$0xf]  ;;  %v13977_v35 = vor.u32 %v18341_v26, %v13974_v27  ;;  %4244 = vmatpush.bf16.msrb.mxu1 %v13721_v31 }
 0x1dd   : > { %v14230_v29 = vld [vmem:[%s20174_s29 + $0xf60] sm:$0xf0] }
 0x1de   : > { %v18205_v36 = vld [vmem:[%s20174_s29 + $0x904] sm:$0xf]  ;;  %v14233_v44 = vor.u32 %v18405_v28, %v14230_v29  ;;  %4257 = vmatpush.bf16.msrb.mxu2 %v13977_v35 }
 0x1df   : > { %v13430_v39 = vld [vmem:[%s20174_s29 + $0x920] sm:$0xf0] }
 0x1e0   : > { %v18269_v43 = vld [vmem:[%s20174_s29 + $0xb04] sm:$0xf]  ;;  %v13433_v50 = vor.u32 %v18205_v36, %v13430_v39  ;;  %4270 = vmatpush.bf16.msrb.mxu3 %v14233_v44  ;;  %v12508_v39 = vld [vmem:[%s20174_s29 + $0x1c8] sm:$0xf] }
 0x1e1   : > { %v13686_v45 = vld [vmem:[%s20174_s29 + $0xb20] sm:$0xf0]  ;;  %v12764_v44 = vld [vmem:[%s20174_s29 + $0x3c8] sm:$0xf] }
 0x1e2   : > { %v18333_v46 = vld [vmem:[%s20174_s29 + $0xd04] sm:$0xf]  ;;  %v13689_v51 = vor.u32 %v18269_v43, %v13686_v45  ;;  %4232 = vmatpush.bf16.msrb.mxu0 %v13433_v50  ;;  %v17978_v43 = vld [vmem:[%s20174_s29 + $0x1e4] sm:$0xf0] }
 0x1e3   : > { %v13942_v47 = vld [vmem:[%s20174_s29 + $0xd20] sm:$0xf0] }
 0x1e4   : > { %v18397_v48 = vld [vmem:[%s20174_s29 + $0xf04] sm:$0xf]  ;;  %v13945_v52 = vor.u32 %v18333_v46, %v13942_v47  ;;  %4245 = vmatpush.bf16.msrb.mxu1 %v13689_v51  ;;  %v18042_v46 = vld [vmem:[%s20174_s29 + $0x3e4] sm:$0xf0] }
 0x1e5   : > { %v14198_v49 = vld [vmem:[%s20174_s29 + $0xf20] sm:$0xf0]  ;;  %v13020_v47 = vld [vmem:[%s20174_s29 + $0x5c8] sm:$0xf] }
 0x1e6   : > { %v18197_v53 = vld [vmem:[%s20174_s29 + $0x8c4] sm:$0xf]  ;;  %v14201_v56 = vor.u32 %v18397_v48, %v14198_v49  ;;  %4258 = vmatpush.bf16.msrb.mxu2 %v13945_v52  ;;  %v18106_v48 = vld [vmem:[%s20174_s29 + $0x5e4] sm:$0xf0] }
 0x1e7   : > { %v13398_v54 = vld [vmem:[%s20174_s29 + $0x8e0] sm:$0xf0]  ;;  %v13276_v51 = vld [vmem:[%s20174_s29 + $0x7c8] sm:$0xf] }
 0x1e8   : > { %v18261_v55 = vld [vmem:[%s20174_s29 + $0xac4] sm:$0xf]  ;;  %v13401_v62 = vor.u32 %v18197_v53, %v13398_v54  ;;  %4271 = vmatpush.bf16.msrb.mxu3 %v14201_v56  ;;  %v18170_v52 = vld [vmem:[%s20174_s29 + $0x7e4] sm:$0xf0]  ;;  %v12509_v54 = vor.u32 %v17978_v43, %v12508_v39  ;;  %v13021_v56 = vor.u32 %v18106_v48, %v13020_v47 }
 0x1e9   : > { %v13654_v57 = vld [vmem:[%s20174_s29 + $0xae0] sm:$0xf0]  ;;  %v12892_v39 = vld [vmem:[%s20174_s29 + $0x4c8] sm:$0xf] }
 0x1ea   : > { %v18325_v58 = vld [vmem:[%s20174_s29 + $0xcc4] sm:$0xf]  ;;  %v13657_v63 = vor.u32 %v18261_v55, %v13654_v57  ;;  %4233 = vmatpush.bf16.msrb.mxu0 %v13401_v62  ;;  %v12765_v55 = vor.u32 %v18042_v46, %v12764_v44  ;;  %v12476_v57 = vld [vmem:[%s20174_s29 + $0x188] sm:$0xf] }
 0x1eb   : > { %v13910_v59 = vld [vmem:[%s20174_s29 + $0xce0] sm:$0xf0]  ;;  %v12988_v62 = vld [vmem:[%s20174_s29 + $0x588] sm:$0xf] }
 0x1ec   : > { %v18389_v60 = vld [vmem:[%s20174_s29 + $0xec4] sm:$0xf]  ;;  %v13913_v0 = vor.u32 %v18325_v58, %v13910_v59  ;;  %4246 = vmatpush.bf16.msrb.mxu1 %v13657_v63  ;;  %v17970_v58 = vld [vmem:[%s20174_s29 + $0x1a4] sm:$0xf0] }
 0x1ed   : > { %v14166_v61 = vld [vmem:[%s20174_s29 + $0xee0] sm:$0xf0]  ;;  %v12732_v59 = vld [vmem:[%s20174_s29 + $0x388] sm:$0xf] }
 0x1ee   : > { %v18189_v1 = vld [vmem:[%s20174_s29 + $0x884] sm:$0xf]  ;;  %v14169_v4 = vor.u32 %v18389_v60, %v14166_v61  ;;  %4259 = vmatpush.bf16.msrb.mxu2 %v13913_v0  ;;  %v13277_v60 = vor.u32 %v18170_v52, %v13276_v51  ;;  %v18034_v61 = vld [vmem:[%s20174_s29 + $0x3a4] sm:$0xf0] }
 0x1ef   : > { %v13366_v2 = vld [vmem:[%s20174_s29 + $0x8a0] sm:$0xf0]  ;;  %v18098_v63 = vld [vmem:[%s20174_s29 + $0x5a4] sm:$0xf0] }
 0x1f0   : > { %v18253_v3 = vld [vmem:[%s20174_s29 + $0xa84] sm:$0xf]  ;;  %v13369_v10 = vor.u32 %v18189_v1, %v13366_v2  ;;  %4272 = vmatpush.bf16.msrb.mxu3 %v14169_v4  ;;  %v13244_v0 = vld [vmem:[%s20174_s29 + $0x788] sm:$0xf]  ;;  %v12477_v2 = vor.u32 %v17970_v58, %v12476_v57  ;;  %v12989_v4 = vor.u32 %v18098_v63, %v12988_v62 }
 0x1f1   : > { %v13622_v5 = vld [vmem:[%s20174_s29 + $0xaa0] sm:$0xf0]  ;;  %v18162_v1 = vld [vmem:[%s20174_s29 + $0x7a4] sm:$0xf0] }
 0x1f2   : > { %v18317_v6 = vld [vmem:[%s20174_s29 + $0xc84] sm:$0xf]  ;;  %v13625_v11 = vor.u32 %v18253_v3, %v13622_v5  ;;  %4234 = vmatpush.bf16.msrb.mxu0 %v13369_v10  ;;  %v12733_v3 = vor.u32 %v18034_v61, %v12732_v59  ;;  %v12444_v5 = vld [vmem:[%s20174_s29 + $0x148] sm:$0xf] }
 0x1f3   : > { %v13878_v7 = vld [vmem:[%s20174_s29 + $0xca0] sm:$0xf0]  ;;  %v12956_v10 = vld [vmem:[%s20174_s29 + $0x548] sm:$0xf] }
 0x1f4   : > { %v18381_v8 = vld [vmem:[%s20174_s29 + $0xe84] sm:$0xf]  ;;  %v13881_v12 = vor.u32 %v18317_v6, %v13878_v7  ;;  %4247 = vmatpush.bf16.msrb.mxu1 %v13625_v11  ;;  %v17962_v6 = vld [vmem:[%s20174_s29 + $0x164] sm:$0xf0] }
 0x1f5   : > { %v14134_v9 = vld [vmem:[%s20174_s29 + $0xea0] sm:$0xf0]  ;;  %v12700_v7 = vld [vmem:[%s20174_s29 + $0x348] sm:$0xf] }
 0x1f6   : > { %v18181_v13 = vld [vmem:[%s20174_s29 + $0x844] sm:$0xf]  ;;  %v14137_v16 = vor.u32 %v18381_v8, %v14134_v9  ;;  %4260 = vmatpush.bf16.msrb.mxu2 %v13881_v12  ;;  %v13245_v8 = vor.u32 %v18162_v1, %v13244_v0  ;;  %v18026_v9 = vld [vmem:[%s20174_s29 + $0x364] sm:$0xf0] }
 0x1f7   : > { %v13334_v14 = vld [vmem:[%s20174_s29 + $0x860] sm:$0xf0]  ;;  %v18090_v11 = vld [vmem:[%s20174_s29 + $0x564] sm:$0xf0] }
 0x1f8   : > { %v18245_v15 = vld [vmem:[%s20174_s29 + $0xa44] sm:$0xf]  ;;  %v13337_v22 = vor.u32 %v18181_v13, %v13334_v14  ;;  %4273 = vmatpush.bf16.msrb.mxu3 %v14137_v16  ;;  %v13212_v12 = vld [vmem:[%s20174_s29 + $0x748] sm:$0xf]  ;;  %v12445_v14 = vor.u32 %v17962_v6, %v12444_v5  ;;  %v12957_v16 = vor.u32 %v18090_v11, %v12956_v10 }
 0x1f9   : > { %v13590_v17 = vld [vmem:[%s20174_s29 + $0xa60] sm:$0xf0]  ;;  %v18154_v13 = vld [vmem:[%s20174_s29 + $0x764] sm:$0xf0] }
 0x1fa   : > { %v18309_v18 = vld [vmem:[%s20174_s29 + $0xc44] sm:$0xf]  ;;  %v13593_v25 = vor.u32 %v18245_v15, %v13590_v17  ;;  %4235 = vmatpush.bf16.msrb.mxu0 %v13337_v22  ;;  %v12701_v15 = vor.u32 %v18026_v9, %v12700_v7  ;;  %v12412_v17 = vld [vmem:[%s20174_s29 + $0x108] sm:$0xf] }
 0x1fb   : > { %v13846_v19 = vld [vmem:[%s20174_s29 + $0xc60] sm:$0xf0]  ;;  %v12924_v22 = vld [vmem:[%s20174_s29 + $0x508] sm:$0xf] }
 0x1fc   : > { %v18373_v20 = vld [vmem:[%s20174_s29 + $0xe44] sm:$0xf]  ;;  %v13849_v26 = vor.u32 %v18309_v18, %v13846_v19  ;;  %4248 = vmatpush.bf16.msrb.mxu1 %v13593_v25  ;;  %v17954_v18 = vld [vmem:[%s20174_s29 + $0x124] sm:$0xf0] }
 0x1fd   : > { %v14102_v21 = vld [vmem:[%s20174_s29 + $0xe60] sm:$0xf0]  ;;  %v12668_v19 = vld [vmem:[%s20174_s29 + $0x308] sm:$0xf] }
 0x1fe   : > { %v18173_v23 = vld [vmem:[%s20174_s29 + $0x804] sm:$0xf]  ;;  %v14105_v30 = vor.u32 %v18373_v20, %v14102_v21  ;;  %4261 = vmatpush.bf16.msrb.mxu2 %v13849_v26  ;;  %v13213_v20 = vor.u32 %v18154_v13, %v13212_v12  ;;  %v18018_v21 = vld [vmem:[%s20174_s29 + $0x324] sm:$0xf0]  ;;  %v12413_v26 = vor.u32 %v17954_v18, %v12412_v17 }
 0x1ff   : > { %v13302_v24 = vld [vmem:[%s20174_s29 + $0x820] sm:$0xf0]  ;;  %v18146_v25 = vld [vmem:[%s20174_s29 + $0x724] sm:$0xf0] }
 0x200   : > { %v18237_v27 = vld [vmem:[%s20174_s29 + $0xa04] sm:$0xf]  ;;  %v13305_v45 = vor.u32 %v18173_v23, %v13302_v24  ;;  %4274 = vmatpush.bf16.msrb.mxu3 %v14105_v30  ;;  %v18082_v23 = vld [vmem:[%s20174_s29 + $0x524] sm:$0xf0] }
 0x201   : > { %v13558_v28 = vld [vmem:[%s20174_s29 + $0xa20] sm:$0xf0]  ;;  %v13180_v24 = vld [vmem:[%s20174_s29 + $0x708] sm:$0xf] }
 0x202   : > { %v18301_v29 = vld [vmem:[%s20174_s29 + $0xc04] sm:$0xf]  ;;  %v13561_v49 = vor.u32 %v18237_v27, %v13558_v28  ;;  %4236 = vmatpush.bf16.msrb.mxu0 %v13305_v45  ;;  %v12669_v27 = vor.u32 %v18018_v21, %v12668_v19  ;;  %v12925_v28 = vor.u32 %v18082_v23, %v12924_v22  ;;  %v17946_v30 = vld [vmem:[%s20174_s29 + $0xe4] sm:$0xf0] }
 0x203   : > { %v13814_v31 = vld [vmem:[%s20174_s29 + $0xc20] sm:$0xf0]  ;;  %v18074_v43 = vld [vmem:[%s20174_s29 + $0x4e4] sm:$0xf0] }
 0x204   : > { %v18365_v35 = vld [vmem:[%s20174_s29 + $0xe04] sm:$0xf]  ;;  %v13817_v50 = vor.u32 %v18301_v29, %v13814_v31  ;;  %4249 = vmatpush.bf16.msrb.mxu1 %v13561_v49  ;;  %v12380_v29 = vld [vmem:[%s20174_s29 + $0xc8] sm:$0xf]  ;;  %v12893_v48 = vor.u32 %v18074_v43, %v12892_v39 }
 0x205   : > { %v14070_v36 = vld [vmem:[%s20174_s29 + $0xe20] sm:$0xf0]  ;;  %4237 = vmatmul.bf16.vlgmr.msrb.gmra.mxu0 %v20419_v37  ;;  %v12636_v31 = vld [vmem:[%s20174_s29 + $0x2c8] sm:$0xf]  ;;  %v12381_v46 = vor.u32 %v17946_v30, %v12380_v29 }
 0x206   : > { %v14073_v53 = vor.u32 %v18365_v35, %v14070_v36  ;;  %4262 = vmatpush.bf16.msrb.mxu2 %v13817_v50  ;;  %4281 = vmatpush.bf16.msra.mxu0 %v12509_v54  ;;  %v13181_v35 = vor.u32 %v18146_v25, %v13180_v24  ;;  %v18010_v36 = vld [vmem:[%s20174_s29 + $0x2e4] sm:$0xf0] }
 0x207   : > { %4250 = vmatmul.bf16.vlgmr.msrb.gmra.mxu1 %v20423_v40  ;;  %v13148_v44 = vld [vmem:[%s20174_s29 + $0x6c8] sm:$0xf]  ;;  %v12637_v47 = vor.u32 %v18010_v36, %v12636_v31 }
 0x208   : > { %4275 = vmatpush.bf16.msrb.mxu3 %v14073_v53  ;;  %4294 = vmatpush.bf16.msra.mxu1 %v12765_v55  ;;  %v18138_v45 = vld [vmem:[%s20174_s29 + $0x6e4] sm:$0xf0] }
 0x209   : > { %4263 = vmatmul.bf16.vlgmr.msrb.gmra.mxu2 %v20415_v32  ;;  %v12348_v49 = vld [vmem:[%s20174_s29 + $0x88] sm:$0xf]  ;;  %v13149_v52 = vor.u32 %v18138_v45, %v13148_v44 }
 0x20a   : > { %4307 = vmatpush.bf16.msra.mxu2 %v13021_v56  ;;  %4282 = vmatpush.bf16.msra.mxu0 %v12477_v2  ;;  %v17938_v50 = vld [vmem:[%s20174_s29 + $0xa4] sm:$0xf0] }
 0x20b   : > { %4276 = vmatmul.bf16.vlgmr.msrb.gmra.mxu3 %v20421_v38  ;;  %v12604_v51 = vld [vmem:[%s20174_s29 + $0x288] sm:$0xf]  ;;  %v12349_v58 = vor.u32 %v17938_v50, %v12348_v49 }
 0x20c   : > { %4320 = vmatpush.bf16.msra.mxu3 %v13277_v60  ;;  %4295 = vmatpush.bf16.msra.mxu1 %v12733_v3  ;;  %v18002_v53 = vld [vmem:[%s20174_s29 + $0x2a4] sm:$0xf0] }
 0x20d   : > { %v12860_v54 = vld [vmem:[%s20174_s29 + $0x488] sm:$0xf]  ;;  %v12605_v59 = vor.u32 %v18002_v53, %v12604_v51 }
 0x20e   : > { %4308 = vmatpush.bf16.msra.mxu2 %v12989_v4  ;;  %4283 = vmatpush.bf16.msra.mxu0 %v12445_v14  ;;  %v18066_v55 = vld [vmem:[%s20174_s29 + $0x4a4] sm:$0xf0] }
 0x20f   : > { %v13116_v56 = vld [vmem:[%s20174_s29 + $0x688] sm:$0xf]  ;;  %v12861_v60 = vor.u32 %v18066_v55, %v12860_v54 }
 0x210   : > { %4321 = vmatpush.bf16.msra.mxu3 %v13245_v8  ;;  %4296 = vmatpush.bf16.msra.mxu1 %v12701_v15  ;;  %v18130_v57 = vld [vmem:[%s20174_s29 + $0x6a4] sm:$0xf0] }
 0x211   : > { %v12316_v61 = vld [vmem:[%s20174_s29 + $0x48] sm:$0xf]  ;;  %v13117_v0 = vor.u32 %v18130_v57, %v13116_v56 }
 0x212   : > { %4309 = vmatpush.bf16.msra.mxu2 %v12957_v16  ;;  %4284 = vmatpush.bf16.msra.mxu0 %v12413_v26  ;;  %v17930_v62 = vld [vmem:[%s20174_s29 + $0x64] sm:$0xf0] }
 0x213   : > { %v12572_v63 = vld [vmem:[%s20174_s29 + $0x248] sm:$0xf]  ;;  %v12317_v6 = vor.u32 %v17930_v62, %v12316_v61 }
 0x214   : > { %4322 = vmatpush.bf16.msra.mxu3 %v13213_v20  ;;  %4297 = vmatpush.bf16.msra.mxu1 %v12669_v27  ;;  %v17994_v1 = vld [vmem:[%s20174_s29 + $0x264] sm:$0xf0] }
 0x215   : > { %v12828_v2 = vld [vmem:[%s20174_s29 + $0x448] sm:$0xf]  ;;  %v12573_v9 = vor.u32 %v17994_v1, %v12572_v63 }
 0x216   : > { %4310 = vmatpush.bf16.msra.mxu2 %v12925_v28  ;;  %4285 = vmatpush.bf16.msra.mxu0 %v12381_v46  ;;  %v18058_v3 = vld [vmem:[%s20174_s29 + $0x464] sm:$0xf0] }
 0x217   : > { %v13084_v4 = vld [vmem:[%s20174_s29 + $0x648] sm:$0xf]  ;;  %v12829_v10 = vor.u32 %v18058_v3, %v12828_v2 }
 0x218   : > { %4323 = vmatpush.bf16.msra.mxu3 %v13181_v35  ;;  %4298 = vmatpush.bf16.msra.mxu1 %v12637_v47  ;;  %v18122_v5 = vld [vmem:[%s20174_s29 + $0x664] sm:$0xf0] }
 0x219   : > { %v12284_v7 = vld [vmem:[%s20174_s29 + $0x8] sm:$0xf]  ;;  %v13085_v14 = vor.u32 %v18122_v5, %v13084_v4 }
 0x21a   : > { %4311 = vmatpush.bf16.msra.mxu2 %v12893_v48  ;;  %4286 = vmatpush.bf16.msra.mxu0 %v12349_v58  ;;  %v17922_v8 = vld [vmem:[%s20174_s29 + $0x24] sm:$0xf0] }
 0x21b   : > { %v12540_v11 = vld [vmem:[%s20174_s29 + $0x208] sm:$0xf]  ;;  %v12285_v21 = vor.u32 %v17922_v8, %v12284_v7 }
 0x21c   : > { %4324 = vmatpush.bf16.msra.mxu3 %v13149_v52  ;;  %4299 = vmatpush.bf16.msra.mxu1 %v12605_v59  ;;  %v17986_v12 = vld [vmem:[%s20174_s29 + $0x224] sm:$0xf0] }
 0x21d   : > { %v12796_v13 = vld [vmem:[%s20174_s29 + $0x408] sm:$0xf]  ;;  %v12541_v25 = vor.u32 %v17986_v12, %v12540_v11 }
 0x21e   : > { %4312 = vmatpush.bf16.msra.mxu2 %v12861_v60  ;;  %v18050_v15 = vld [vmem:[%s20174_s29 + $0x424] sm:$0xf0]  ;;  %4287 = vmatpush.bf16.msra.mxu0 %v12317_v6 }
 0x21f   : > { %v13052_v16 = vld [vmem:[%s20174_s29 + $0x608] sm:$0xf]  ;;  %v12797_v26 = vor.u32 %v18050_v15, %v12796_v13 }
 0x220   : > { %4325 = vmatpush.bf16.msra.mxu3 %v13117_v0  ;;  %v18114_v17 = vld [vmem:[%s20174_s29 + $0x624] sm:$0xf0]  ;;  %4300 = vmatpush.bf16.msra.mxu1 %v12573_v9 }
 0x221   : > { %v13532_v18 = vld [vmem:[%s20174_s29 + $0x9c8] sm:$0xf]  ;;  %v13053_v29 = vor.u32 %v18114_v17, %v13052_v16 }
 0x222   : > { %v18234_v19 = vld [vmem:[%s20174_s29 + $0x9e4] sm:$0xf0]  ;;  %4313 = vmatpush.bf16.msra.mxu2 %v12829_v10  ;;  %4288 = vmatpush.bf16.msra.mxu0 %v12285_v21 }
 0x223   : > { %v13788_v20 = vld [vmem:[%s20174_s29 + $0xbc8] sm:$0xf]  ;;  %v13533_v30 = vor.u32 %v18234_v19, %v13532_v18 }
 0x224   : > { %v18298_v22 = vld [vmem:[%s20174_s29 + $0xbe4] sm:$0xf0]  ;;  %4326 = vmatpush.bf16.msra.mxu3 %v13085_v14  ;;  %4301 = vmatpush.bf16.msra.mxu1 %v12541_v25 }
 0x225   : > { %v14044_v23 = vld [vmem:[%s20174_s29 + $0xdc8] sm:$0xf]  ;;  %v13789_v31 = vor.u32 %v18298_v22, %v13788_v20  ;;  %4289 = vmatmul.bf16.vlgmr.msra.gmra.mxu0 %v20369_v34 }
 0x226   : > { %v18362_v24 = vld [vmem:[%s20174_s29 + $0xde4] sm:$0xf0]  ;;  %4314 = vmatpush.bf16.msra.mxu2 %v12797_v26  ;;  %4333 = vmatpush.bf16.msrb.mxu0 %v13533_v30 }
 0x227   : > { %v14300_v27 = vld [vmem:[%s20174_s29 + $0xfc8] sm:$0xf]  ;;  %v14045_v35 = vor.u32 %v18362_v24, %v14044_v23  ;;  %4302 = vmatmul.bf16.vlgmr.msra.gmra.mxu1 %v20376_v42 }
 0x228   : > { %v18426_v28 = vld [vmem:[%s20174_s29 + $0xfe4] sm:$0xf0]  ;;  %4327 = vmatpush.bf16.msra.mxu3 %v13053_v29  ;;  %4346 = vmatpush.bf16.msrb.mxu1 %v13789_v31 }
 0x229   : > { %v13500_v36 = vld [vmem:[%s20174_s29 + $0x988] sm:$0xf]  ;;  %v14301_v44 = vor.u32 %v18426_v28, %v14300_v27  ;;  %4315 = vmatmul.bf16.vlgmr.msra.gmra.mxu2 %v20367_v33 }
 0x22a   : > { %v18226_v39 = vld [vmem:[%s20174_s29 + $0x9a4] sm:$0xf0]  ;;  %4359 = vmatpush.bf16.msrb.mxu2 %v14045_v35 }
 0x22b   : > { %v13756_v43 = vld [vmem:[%s20174_s29 + $0xb88] sm:$0xf]  ;;  %v13501_v50 = vor.u32 %v18226_v39, %v13500_v36  ;;  %4328 = vmatmul.bf16.vlgmr.msra.gmra.mxu3 %v20374_v41 }
 0x22c   : > { %v18290_v45 = vld [vmem:[%s20174_s29 + $0xba4] sm:$0xf0]  ;;  %4372 = vmatpush.bf16.msrb.mxu3 %v14301_v44 }
 0x22d   : > { %v14012_v46 = vld [vmem:[%s20174_s29 + $0xd88] sm:$0xf]  ;;  %v13757_v51 = vor.u32 %v18290_v45, %v13756_v43  ;;  %4334 = vmatpush.bf16.msrb.mxu0 %v13501_v50 }
 0x22e   : > { %v18354_v47 = vld [vmem:[%s20174_s29 + $0xda4] sm:$0xf0] }
 0x22f   : > { %v14268_v48 = vld [vmem:[%s20174_s29 + $0xf88] sm:$0xf]  ;;  %v14013_v52 = vor.u32 %v18354_v47, %v14012_v46  ;;  %4347 = vmatpush.bf16.msrb.mxu1 %v13757_v51 }
 0x230   : > { %v18418_v49 = vld [vmem:[%s20174_s29 + $0xfa4] sm:$0xf0] }
 0x231   : > { %v13468_v53 = vld [vmem:[%s20174_s29 + $0x948] sm:$0xf]  ;;  %v14269_v56 = vor.u32 %v18418_v49, %v14268_v48  ;;  %4360 = vmatpush.bf16.msrb.mxu2 %v14013_v52 }
 0x232   : > { %v18218_v54 = vld [vmem:[%s20174_s29 + $0x964] sm:$0xf0] }
 0x233   : > { %v13724_v55 = vld [vmem:[%s20174_s29 + $0xb48] sm:$0xf]  ;;  %v13469_v62 = vor.u32 %v18218_v54, %v13468_v53  ;;  %4373 = vmatpush.bf16.msrb.mxu3 %v14269_v56 }
 0x234   : > { %v18282_v57 = vld [vmem:[%s20174_s29 + $0xb64] sm:$0xf0] }
 0x235   : > { %v13980_v58 = vld [vmem:[%s20174_s29 + $0xd48] sm:$0xf]  ;;  %v13725_v63 = vor.u32 %v18282_v57, %v13724_v55  ;;  %4335 = vmatpush.bf16.msrb.mxu0 %v13469_v62 }
 0x236   : > { %v18346_v59 = vld [vmem:[%s20174_s29 + $0xd64] sm:$0xf0] }
 0x237   : > { %v14236_v60 = vld [vmem:[%s20174_s29 + $0xf48] sm:$0xf]  ;;  %v13981_v0 = vor.u32 %v18346_v59, %v13980_v58  ;;  %4348 = vmatpush.bf16.msrb.mxu1 %v13725_v63  ;;  %v4082_v59 = vpop.f32.mrf.mxu0 }
 0x238   : > { %v18410_v61 = vld [vmem:[%s20174_s29 + $0xf64] sm:$0xf0] }
 0x239   : > { %v13436_v1 = vld [vmem:[%s20174_s29 + $0x908] sm:$0xf]  ;;  %v14237_v4 = vor.u32 %v18410_v61, %v14236_v60  ;;  %4361 = vmatpush.bf16.msrb.mxu2 %v13981_v0 }
 0x23a   : > { %v18210_v2 = vld [vmem:[%s20174_s29 + $0x924] sm:$0xf0] }
 0x23b   : > { %v13692_v3 = vld [vmem:[%s20174_s29 + $0xb08] sm:$0xf]  ;;  %v13437_v10 = vor.u32 %v18210_v2, %v13436_v1  ;;  %4374 = vmatpush.bf16.msrb.mxu3 %v14237_v4 }
 0x23c   : > { %v18274_v5 = vld [vmem:[%s20174_s29 + $0xb24] sm:$0xf0] }
 0x23d   : > { %v13948_v6 = vld [vmem:[%s20174_s29 + $0xd08] sm:$0xf]  ;;  %v13693_v11 = vor.u32 %v18274_v5, %v13692_v3  ;;  %4336 = vmatpush.bf16.msrb.mxu0 %v13437_v10 }
 0x23e   : > { %v18338_v7 = vld [vmem:[%s20174_s29 + $0xd24] sm:$0xf0] }
 0x23f   : > { %v14204_v8 = vld [vmem:[%s20174_s29 + $0xf08] sm:$0xf]  ;;  %v13949_v12 = vor.u32 %v18338_v7, %v13948_v6  ;;  %4349 = vmatpush.bf16.msrb.mxu1 %v13693_v11  ;;  %v17974_v6 = vld [vmem:[%s20174_s29 + $0x1cc] sm:$0xf] }
 0x240   : > { %v18402_v9 = vld [vmem:[%s20174_s29 + $0xf24] sm:$0xf0]  ;;  %v12510_v7 = vld [vmem:[%s20174_s29 + $0x1e8] sm:$0xf0] }
 0x241   : > { %v13404_v13 = vld [vmem:[%s20174_s29 + $0x8c8] sm:$0xf]  ;;  %v14205_v16 = vor.u32 %v18402_v9, %v14204_v8  ;;  %4362 = vmatpush.bf16.msrb.mxu2 %v13949_v12  ;;  %v18038_v8 = vld [vmem:[%s20174_s29 + $0x3cc] sm:$0xf]  ;;  %v4095_v9 = vpop.f32.mrf.mxu1 }
 0x242   : > { %v18202_v14 = vld [vmem:[%s20174_s29 + $0x8e4] sm:$0xf0]  ;;  %v12766_v11 = vld [vmem:[%s20174_s29 + $0x3e8] sm:$0xf0] }
 0x243   : > { %v13660_v15 = vld [vmem:[%s20174_s29 + $0xac8] sm:$0xf]  ;;  %v13405_v22 = vor.u32 %v18202_v14, %v13404_v13  ;;  %4375 = vmatpush.bf16.msrb.mxu3 %v14205_v16  ;;  %v18102_v12 = vld [vmem:[%s20174_s29 + $0x5cc] sm:$0xf] }
 0x244   : > { %v18266_v17 = vld [vmem:[%s20174_s29 + $0xae4] sm:$0xf0]  ;;  %v13022_v13 = vld [vmem:[%s20174_s29 + $0x5e8] sm:$0xf0] }
 0x245   : > { %v13916_v18 = vld [vmem:[%s20174_s29 + $0xcc8] sm:$0xf]  ;;  %v13661_v24 = vor.u32 %v18266_v17, %v13660_v15  ;;  %4337 = vmatpush.bf16.msrb.mxu0 %v13405_v22  ;;  %v18166_v17 = vld [vmem:[%s20174_s29 + $0x7cc] sm:$0xf]  ;;  %v12769_v22 = vor.u32 %v18038_v8, %v12766_v11 }
 0x246   : > { %v18330_v19 = vld [vmem:[%s20174_s29 + $0xce4] sm:$0xf0]  ;;  %v13182_v8 = vld [vmem:[%s20174_s29 + $0x728] sm:$0xf0] }
 0x247   : > { %v14172_v20 = vld [vmem:[%s20174_s29 + $0xec8] sm:$0xf]  ;;  %v13917_v25 = vor.u32 %v18330_v19, %v13916_v18  ;;  %4350 = vmatpush.bf16.msrb.mxu1 %v13661_v24  ;;  %v13278_v18 = vld [vmem:[%s20174_s29 + $0x7e8] sm:$0xf0] }
 0x248   : > { %v18394_v21 = vld [vmem:[%s20174_s29 + $0xee4] sm:$0xf0]  ;;  %v17966_v24 = vld [vmem:[%s20174_s29 + $0x18c] sm:$0xf] }
 0x249   : > { %v13372_v23 = vld [vmem:[%s20174_s29 + $0x888] sm:$0xf]  ;;  %v14173_v29 = vor.u32 %v18394_v21, %v14172_v20  ;;  %4363 = vmatpush.bf16.msrb.mxu2 %v13917_v25  ;;  %v12513_v20 = vor.u32 %v17974_v6, %v12510_v7  ;;  %v4108_v21 = vpop.f32.mrf.mxu2  ;;  %v12478_v25 = vld [vmem:[%s20174_s29 + $0x1a8] sm:$0xf0] }
 0x24a   : > { %v18194_v26 = vld [vmem:[%s20174_s29 + $0x8a4] sm:$0xf0]  ;;  %v12926_v6 = vld [vmem:[%s20174_s29 + $0x528] sm:$0xf0] }
 0x24b   : > { %v13628_v27 = vld [vmem:[%s20174_s29 + $0xa88] sm:$0xf]  ;;  %v13373_v43 = vor.u32 %v18194_v26, %v13372_v23  ;;  %4376 = vmatpush.bf16.msrb.mxu3 %v14173_v29  ;;  %v13025_v23 = vor.u32 %v18102_v12, %v13022_v13  ;;  %v18030_v26 = vld [vmem:[%s20174_s29 + $0x38c] sm:$0xf]  ;;  %v13281_v29 = vor.u32 %v18166_v17, %v13278_v18 }
 0x24c   : > { %v18258_v28 = vld [vmem:[%s20174_s29 + $0xaa4] sm:$0xf0]  ;;  %v18142_v7 = vld [vmem:[%s20174_s29 + $0x70c] sm:$0xf] }
 0x24d   : > { %v13884_v30 = vld [vmem:[%s20174_s29 + $0xc88] sm:$0xf]  ;;  %v13629_v45 = vor.u32 %v18258_v28, %v13628_v27  ;;  %4338 = vmatpush.bf16.msrb.mxu0 %v13373_v43  ;;  %v4121_v28 = vpop.f32.mrf.mxu3  ;;  %v18158_v43 = vld [vmem:[%s20174_s29 + $0x78c] sm:$0xf]  ;;  %v13185_v18 = vor.u32 %v18142_v7, %v13182_v8 }
 0x24e   : > { %v18322_v31 = vld [vmem:[%s20174_s29 + $0xca4] sm:$0xf0]  ;;  %v17942_v13 = vld [vmem:[%s20174_s29 + $0xcc] sm:$0xf] }
 0x24f   : > { %v20664_v35 = vld [vmem:[%s20188_s14] sm:$0xff]  ;;  %v13885_v46 = vor.u32 %v18322_v31, %v13884_v30  ;;  %4351 = vmatpush.bf16.msrb.mxu1 %v13629_v45 }
 0x250   : > { %v14140_v36 = vld [vmem:[%s20174_s29 + $0xe88] sm:$0xf]  ;;  %v1497_v49 = vperm.slane %v20664_v35, 0  ;;  %v12734_v30 = vld [vmem:[%s20174_s29 + $0x3a8] sm:$0xf0] }
 0x251   : > { %v18386_v39 = vld [vmem:[%s20174_s29 + $0xea4] sm:$0xf0]  ;;  %4364 = vmatpush.bf16.msrb.mxu2 %v13885_v46  ;;  %v18094_v31 = vld [vmem:[%s20174_s29 + $0x58c] sm:$0xf]  ;;  %v12481_v46 = vor.u32 %v17966_v24, %v12478_v25 }
 0x252   : > { %v13340_v44 = vld [vmem:[%s20174_s29 + $0x848] sm:$0xf]  ;;  %v14141_v50 = vor.u32 %v18386_v39, %v14140_v36  ;;  %v4083_v1 = vadd.f32 %v4082_v59, %v1497_v49  ;;  %v12990_v36 = vld [vmem:[%s20174_s29 + $0x5a8] sm:$0xf0]  ;;  %v4084_v39 = vpop.f32.mrf.mxu0 }
 0x253   : > { %v18186_v47 = vld [vmem:[%s20174_s29 + $0x864] sm:$0xf0]  ;;  %v17958_v49 = vld [vmem:[%s20174_s29 + $0x14c] sm:$0xf] }
 0x254   : > { %v13596_v48 = vld [vmem:[%s20174_s29 + $0xa48] sm:$0xf]  ;;  %v13341_v56 = vor.u32 %v18186_v47, %v13340_v44  ;;  %4377 = vmatpush.bf16.msrb.mxu3 %v14141_v50  ;;  %v4096_v14 = vadd.f32 %v4095_v9, %v4083_v1  ;;  %v13246_v44 = vld [vmem:[%s20174_s29 + $0x7a8] sm:$0xf0]  ;;  %v12737_v47 = vor.u32 %v18030_v26, %v12734_v30 }
 0x255   : > { %v18250_v51 = vld [vmem:[%s20174_s29 + $0xa64] sm:$0xf0]  ;;  %v12446_v50 = vld [vmem:[%s20174_s29 + $0x168] sm:$0xf0] }
 0x256   : > { %v13852_v52 = vld [vmem:[%s20174_s29 + $0xc48] sm:$0xf]  ;;  %v13597_v60 = vor.u32 %v18250_v51, %v13596_v48  ;;  %4339 = vmatpush.bf16.msrb.mxu0 %v13341_v56  ;;  %v4109_v27 = vadd.f32 %v4108_v21, %v4096_v14  ;;  %v12993_v48 = vor.u32 %v18094_v31, %v12990_v36  ;;  %v18022_v51 = vld [vmem:[%s20174_s29 + $0x34c] sm:$0xf]  ;;  %v12449_v59 = vor.u32 %v17958_v49, %v12446_v50 }
 0x257   : > { %v18314_v53 = vld [vmem:[%s20174_s29 + $0xc64] sm:$0xf0]  ;;  %v12958_v56 = vld [vmem:[%s20174_s29 + $0x568] sm:$0xf0] }
 0x258   : > { %v14108_v54 = vld [vmem:[%s20174_s29 + $0xe48] sm:$0xf]  ;;  %v13853_v61 = vor.u32 %v18314_v53, %v13852_v52  ;;  %4352 = vmatpush.bf16.msrb.mxu1 %v13597_v60  ;;  %v4122_v45 = vadd.f32 %v4121_v28, %v4109_v27  ;;  %v4097_v52 = vpop.f32.mrf.mxu1  ;;  %v13249_v53 = vor.u32 %v18158_v43, %v13246_v44  ;;  %v4110_v60 = vpop.f32.mrf.mxu2  ;;  %v18014_v1 = vld [vmem:[%s20174_s29 + $0x30c] sm:$0xf] }
 0x259   : > { %v18378_v55 = vld [vmem:[%s20174_s29 + $0xe64] sm:$0xf0]  ;;  %v12382_v14 = vld [vmem:[%s20174_s29 + $0xe8] sm:$0xf0] }
 0x25a   : > { %v13308_v57 = vld [vmem:[%s20174_s29 + $0x808] sm:$0xf]  ;;  %v14109_v2 = vor.u32 %v18378_v55, %v14108_v54  ;;  %4365 = vmatpush.bf16.msrb.mxu2 %v13853_v61  ;;  %v12702_v54 = vld [vmem:[%s20174_s29 + $0x368] sm:$0xf0]  ;;  %v12385_v25 = vor.u32 %v17942_v13, %v12382_v14 }
 0x25b   : > { %v18178_v58 = vld [vmem:[%s20174_s29 + $0x824] sm:$0xf0]  ;;  %v18086_v55 = vld [vmem:[%s20174_s29 + $0x54c] sm:$0xf]  ;;  %v12705_v61 = vor.u32 %v18022_v51, %v12702_v54 }
 0x25c   : > { %v13564_v62 = vld [vmem:[%s20174_s29 + $0xa08] sm:$0xf]  ;;  %v13309_v10 = vor.u32 %v18178_v58, %v13308_v57  ;;  %4378 = vmatpush.bf16.msrb.mxu3 %v14109_v2  ;;  %v18150_v57 = vld [vmem:[%s20174_s29 + $0x74c] sm:$0xf]  ;;  %v4123_v2 = vpop.f32.mrf.mxu3 }
 0x25d   : > { %v18242_v63 = vld [vmem:[%s20174_s29 + $0xa24] sm:$0xf0]  ;;  %v13214_v58 = vld [vmem:[%s20174_s29 + $0x768] sm:$0xf0] }
 0x25e   : > { %v13820_v0 = vld [vmem:[%s20174_s29 + $0xc08] sm:$0xf]  ;;  %v13565_v15 = vor.u32 %v18242_v63, %v13564_v62  ;;  %4340 = vmatpush.bf16.msrb.mxu0 %v13309_v10  ;;  %v12961_v62 = vor.u32 %v18086_v55, %v12958_v56  ;;  %v17950_v63 = vld [vmem:[%s20174_s29 + $0x10c] sm:$0xf]  ;;  %v4134_v10 = vpop.f32.mrf.mxu0 }
 0x25f   : > { %v18306_v3 = vld [vmem:[%s20174_s29 + $0xc24] sm:$0xf0]  ;;  %v12894_v21 = vld [vmem:[%s20174_s29 + $0x4e8] sm:$0xf0] }
 0x260   : > { %v14076_v4 = vld [vmem:[%s20174_s29 + $0xe08] sm:$0xf]  ;;  %v13821_v16 = vor.u32 %v18306_v3, %v13820_v0  ;;  %4353 = vmatpush.bf16.msrb.mxu1 %v13565_v15  ;;  %v12414_v0 = vld [vmem:[%s20174_s29 + $0x128] sm:$0xf0]  ;;  %v13217_v3 = vor.u32 %v18150_v57, %v13214_v58  ;;  %v4147_v17 = vpop.f32.mrf.mxu1  ;;  %v4160_v31 = vpop.f32.mrf.mxu2 }
 0x261   : > { %v18370_v5 = vld [vmem:[%s20174_s29 + $0xe24] sm:$0xf0]  ;;  %4341 = vmatmul.bf16.vlgmr.msrb.gmra.mxu0 %v20419_v37  ;;  %v12417_v9 = vor.u32 %v17950_v63, %v12414_v0  ;;  %v18006_v15 = vld [vmem:[%s20174_s29 + $0x2cc] sm:$0xf] }
 0x262   : > { %v14077_v19 = vor.u32 %v18370_v5, %v14076_v4  ;;  %4366 = vmatpush.bf16.msrb.mxu2 %v13821_v16  ;;  %4385 = vmatpush.bf16.msra.mxu0 %v12513_v20  ;;  %v12670_v4 = vld [vmem:[%s20174_s29 + $0x328] sm:$0xf0]  ;;  %v4135_v16 = vadd.f32 %v4134_v10, %v4122_v45 }
 0x263   : > { %4354 = vmatmul.bf16.vlgmr.msrb.gmra.mxu1 %v20423_v40  ;;  %v18078_v5 = vld [vmem:[%s20174_s29 + $0x50c] sm:$0xf]  ;;  %v12673_v11 = vor.u32 %v18014_v1, %v12670_v4 }
 0x264   : > { %4379 = vmatpush.bf16.msrb.mxu3 %v14077_v19  ;;  %4398 = vmatpush.bf16.msra.mxu1 %v12769_v22  ;;  %v12929_v12 = vor.u32 %v18078_v5, %v12926_v6  ;;  %v12638_v19 = vld [vmem:[%s20174_s29 + $0x2e8] sm:$0xf0]  ;;  %v4148_v24 = vadd.f32 %v4147_v17, %v4135_v16 }
 0x265   : > { %4367 = vmatmul.bf16.vlgmr.msrb.gmra.mxu2 %v20415_v32  ;;  %v18070_v20 = vld [vmem:[%s20174_s29 + $0x4cc] sm:$0xf]  ;;  %v12641_v26 = vor.u32 %v18006_v15, %v12638_v19 }
 0x266   : > { %4411 = vmatpush.bf16.msra.mxu2 %v13025_v23  ;;  %4386 = vmatpush.bf16.msra.mxu0 %v12481_v46  ;;  %v18134_v22 = vld [vmem:[%s20174_s29 + $0x6cc] sm:$0xf]  ;;  %v12897_v27 = vor.u32 %v18070_v20, %v12894_v21  ;;  %v4161_v45 = vadd.f32 %v4160_v31, %v4148_v24  ;;  %v4173_v46 = vpop.f32.mrf.mxu3  ;;  %v4136_v51 = vpop.f32.mrf.mxu0 }
 0x267   : > { %4380 = vmatmul.bf16.vlgmr.msrb.gmra.mxu3 %v20421_v38  ;;  %v13150_v23 = vld [vmem:[%s20174_s29 + $0x6e8] sm:$0xf0] }
 0x268   : > { %4424 = vmatpush.bf16.msra.mxu3 %v13281_v29  ;;  %4399 = vmatpush.bf16.msra.mxu1 %v12737_v47  ;;  %v17934_v28 = vld [vmem:[%s20174_s29 + $0x8c] sm:$0xf]  ;;  %v13153_v36 = vor.u32 %v18134_v22, %v13150_v23  ;;  %v20737_v50 = vadd.f32 %v4173_v46, %v4161_v45  ;;  %v4149_v57 = vpop.f32.mrf.mxu1  ;;  %v4162_v8 = vpop.f32.mrf.mxu2 }
 0x269   : > { %v12350_v29 = vld [vmem:[%s20174_s29 + $0xa8] sm:$0xf0] }
 0x26a   : > { %4412 = vmatpush.bf16.msra.mxu2 %v12993_v48  ;;  %4387 = vmatpush.bf16.msra.mxu0 %v12449_v59  ;;  %v17998_v30 = vld [vmem:[%s20174_s29 + $0x28c] sm:$0xf]  ;;  %v12353_v49 = vor.u32 %v17934_v28, %v12350_v29 }
 0x26b   : > { %v12606_v39 = vld [vmem:[%s20174_s29 + $0x2a8] sm:$0xf0] }
 0x26c   : > { %4425 = vmatpush.bf16.msra.mxu3 %v13249_v53  ;;  %4400 = vmatpush.bf16.msra.mxu1 %v12705_v61  ;;  %v18062_v43 = vld [vmem:[%s20174_s29 + $0x48c] sm:$0xf]  ;;  %v12609_v52 = vor.u32 %v17998_v30, %v12606_v39 }
 0x26d   : > { %v12862_v44 = vld [vmem:[%s20174_s29 + $0x4a8] sm:$0xf0] }
 0x26e   : > { %4413 = vmatpush.bf16.msra.mxu2 %v12961_v62  ;;  %4388 = vmatpush.bf16.msra.mxu0 %v12417_v9  ;;  %v18126_v47 = vld [vmem:[%s20174_s29 + $0x68c] sm:$0xf]  ;;  %v12865_v53 = vor.u32 %v18062_v43, %v12862_v44  ;;  %v4175_v13 = vpop.f32.mrf.mxu3 }
 0x26f   : > { %v13118_v48 = vld [vmem:[%s20174_s29 + $0x6a8] sm:$0xf0] }
 0x270   : > { %4426 = vmatpush.bf16.msra.mxu3 %v13217_v3  ;;  %4401 = vmatpush.bf16.msra.mxu1 %v12673_v11  ;;  %v17926_v54 = vld [vmem:[%s20174_s29 + $0x4c] sm:$0xf]  ;;  %v13121_v58 = vor.u32 %v18126_v47, %v13118_v48 }
 0x271   : > { %v12318_v55 = vld [vmem:[%s20174_s29 + $0x68] sm:$0xf0] }
 0x272   : > { %4414 = vmatpush.bf16.msra.mxu2 %v12929_v12  ;;  %4389 = vmatpush.bf16.msra.mxu0 %v12385_v25  ;;  %v17990_v56 = vld [vmem:[%s20174_s29 + $0x24c] sm:$0xf]  ;;  %v12321_v0 = vor.u32 %v17926_v54, %v12318_v55 }
 0x273   : > { %v12574_v59 = vld [vmem:[%s20174_s29 + $0x268] sm:$0xf0] }
 0x274   : > { %4427 = vmatpush.bf16.msra.mxu3 %v13185_v18  ;;  %4402 = vmatpush.bf16.msra.mxu1 %v12641_v26  ;;  %v18054_v60 = vld [vmem:[%s20174_s29 + $0x44c] sm:$0xf]  ;;  %v12577_v3 = vor.u32 %v17990_v56, %v12574_v59 }
 0x275   : > { %v12830_v61 = vld [vmem:[%s20174_s29 + $0x468] sm:$0xf0] }
 0x276   : > { %4415 = vmatpush.bf16.msra.mxu2 %v12897_v27  ;;  %v18118_v62 = vld [vmem:[%s20174_s29 + $0x64c] sm:$0xf]  ;;  %4390 = vmatpush.bf16.msra.mxu0 %v12353_v49  ;;  %v12833_v4 = vor.u32 %v18054_v60, %v12830_v61 }
 0x277   : > { %v13086_v63 = vld [vmem:[%s20174_s29 + $0x668] sm:$0xf0] }
 0x278   : > { %4428 = vmatpush.bf16.msra.mxu3 %v13153_v36  ;;  %v17918_v1 = vld [vmem:[%s20174_s29 + $0xc] sm:$0xf]  ;;  %4403 = vmatpush.bf16.msra.mxu1 %v12609_v52  ;;  %v13089_v9 = vor.u32 %v18118_v62, %v13086_v63 }
 0x279   : > { %v12286_v2 = vld [vmem:[%s20174_s29 + $0x28] sm:$0xf0] }
 0x27a   : > { %4416 = vmatpush.bf16.msra.mxu2 %v12865_v53  ;;  %v17982_v5 = vld [vmem:[%s20174_s29 + $0x20c] sm:$0xf]  ;;  %4391 = vmatpush.bf16.msra.mxu0 %v12321_v0  ;;  %v12289_v17 = vor.u32 %v17918_v1, %v12286_v2  ;;  %v1498_v2 = vperm.slane %v20664_v35, 1 }
 0x27b   : > { %v12542_v6 = vld [vmem:[%s20174_s29 + $0x228] sm:$0xf0] }
 0x27c   : > { %v18046_v7 = vld [vmem:[%s20174_s29 + $0x40c] sm:$0xf]  ;;  %4429 = vmatpush.bf16.msra.mxu3 %v13121_v58  ;;  %4404 = vmatpush.bf16.msra.mxu1 %v12577_v3  ;;  %v12545_v21 = vor.u32 %v17982_v5, %v12542_v6 }
 0x27d   : > { %v12798_v10 = vld [vmem:[%s20174_s29 + $0x428] sm:$0xf0] }
 0x27e   : > { %v18110_v11 = vld [vmem:[%s20174_s29 + $0x60c] sm:$0xf]  ;;  %4417 = vmatpush.bf16.msra.mxu2 %v12833_v4  ;;  %v12801_v22 = vor.u32 %v18046_v7, %v12798_v10  ;;  %4392 = vmatpush.bf16.msra.mxu0 %v12289_v17  ;;  %v4186_v10 = vpop.f32.mrf.mxu0 }
 0x27f   : > { %v13054_v12 = vld [vmem:[%s20174_s29 + $0x628] sm:$0xf0] }
 0x280   : > { %v18230_v14 = vld [vmem:[%s20174_s29 + $0x9cc] sm:$0xf]  ;;  %4430 = vmatpush.bf16.msra.mxu3 %v13089_v9  ;;  %v13057_v25 = vor.u32 %v18110_v11, %v13054_v12  ;;  %4405 = vmatpush.bf16.msra.mxu1 %v12545_v21 }
 0x281   : > { %v13534_v15 = vld [vmem:[%s20174_s29 + $0x9e8] sm:$0xf0]  ;;  %4393 = vmatmul.bf16.vlgmr.msra.gmra.mxu0 %v20369_v34 }
 0x282   : > { %v18294_v16 = vld [vmem:[%s20174_s29 + $0xbcc] sm:$0xf]  ;;  %v13537_v26 = vor.u32 %v18230_v14, %v13534_v15  ;;  %4418 = vmatpush.bf16.msra.mxu2 %v12801_v22  ;;  %v4187_v15 = vadd.f32 %v4186_v10, %v1498_v2 }
 0x283   : > { %v13790_v18 = vld [vmem:[%s20174_s29 + $0xbe8] sm:$0xf0]  ;;  %4406 = vmatmul.bf16.vlgmr.msra.gmra.mxu1 %v20376_v42 }
 0x284   : > { %v18358_v19 = vld [vmem:[%s20174_s29 + $0xdcc] sm:$0xf]  ;;  %v13793_v27 = vor.u32 %v18294_v16, %v13790_v18  ;;  %4431 = vmatpush.bf16.msra.mxu3 %v13057_v25  ;;  %4437 = vmatpush.bf16.msrb.mxu0 %v13537_v26  ;;  %v4199_v16 = vpop.f32.mrf.mxu1 }
 0x285   : > { %v14046_v20 = vld [vmem:[%s20174_s29 + $0xde8] sm:$0xf0]  ;;  %4419 = vmatmul.bf16.vlgmr.msra.gmra.mxu2 %v20367_v33 }
 0x286   : > { %v18422_v23 = vld [vmem:[%s20174_s29 + $0xfcc] sm:$0xf]  ;;  %v14049_v28 = vor.u32 %v18358_v19, %v14046_v20  ;;  %4450 = vmatpush.bf16.msrb.mxu1 %v13793_v27 }
 0x287   : > { %v14302_v24 = vld [vmem:[%s20174_s29 + $0xfe8] sm:$0xf0]  ;;  %4432 = vmatmul.bf16.vlgmr.msra.gmra.mxu3 %v20374_v41 }
 0x288   : > { %v18222_v29 = vld [vmem:[%s20174_s29 + $0x98c] sm:$0xf]  ;;  %v14305_v36 = vor.u32 %v18422_v23, %v14302_v24  ;;  %4463 = vmatpush.bf16.msrb.mxu2 %v14049_v28  ;;  %v4200_v23 = vadd.f32 %v4199_v16, %v4187_v15  ;;  %v12772_v15 = vld [vmem:[%s20174_s29 + $0x3d0] sm:$0xf] }
 0x289   : > { %v13502_v30 = vld [vmem:[%s20174_s29 + $0x9a8] sm:$0xf0] }
 0x28a   : > { %v18286_v31 = vld [vmem:[%s20174_s29 + $0xb8c] sm:$0xf]  ;;  %v13505_v47 = vor.u32 %v18222_v29, %v13502_v30  ;;  %4476 = vmatpush.bf16.msrb.mxu3 %v14305_v36  ;;  %v4212_v30 = vpop.f32.mrf.mxu2 }
 0x28b   : > { %v13758_v39 = vld [vmem:[%s20174_s29 + $0xba8] sm:$0xf0] }
 0x28c   : > { %v18350_v43 = vld [vmem:[%s20174_s29 + $0xd8c] sm:$0xf]  ;;  %v13761_v48 = vor.u32 %v18286_v31, %v13758_v39  ;;  %4438 = vmatpush.bf16.msrb.mxu0 %v13505_v47 }
 0x28d   : > { %v14014_v44 = vld [vmem:[%s20174_s29 + $0xda8] sm:$0xf0] }
 0x28e   : > { %v18414_v45 = vld [vmem:[%s20174_s29 + $0xf8c] sm:$0xf]  ;;  %v14017_v49 = vor.u32 %v18350_v43, %v14014_v44  ;;  %4451 = vmatpush.bf16.msrb.mxu1 %v13761_v48  ;;  %v4213_v44 = vadd.f32 %v4212_v30, %v4200_v23  ;;  %v18171_v23 = vld [vmem:[%s20174_s29 + $0x7ec] sm:$0xf0] }
 0x28f   : > { %v14270_v46 = vld [vmem:[%s20174_s29 + $0xfa8] sm:$0xf0]  ;;  %v12740_v30 = vld [vmem:[%s20174_s29 + $0x390] sm:$0xf] }
 0x290   : > { %v18214_v51 = vld [vmem:[%s20174_s29 + $0x94c] sm:$0xf]  ;;  %v14273_v54 = vor.u32 %v18414_v45, %v14270_v46  ;;  %4464 = vmatpush.bf16.msrb.mxu2 %v14017_v49  ;;  %v4225_v45 = vpop.f32.mrf.mxu3 }
 0x291   : > { %v13470_v52 = vld [vmem:[%s20174_s29 + $0x968] sm:$0xf0]  ;;  %v20808_v49 = vadd.f32 %v4225_v45, %v4213_v44  ;;  %v13252_v44 = vld [vmem:[%s20174_s29 + $0x790] sm:$0xf] }
 0x292   : > { %v18278_v53 = vld [vmem:[%s20174_s29 + $0xb4c] sm:$0xf]  ;;  %v13473_v60 = vor.u32 %v18214_v51, %v13470_v52  ;;  %4477 = vmatpush.bf16.msrb.mxu3 %v14273_v54  ;;  %v4188_v51 = vpop.f32.mrf.mxu0  ;;  %v18163_v45 = vld [vmem:[%s20174_s29 + $0x7ac] sm:$0xf0] }
 0x293   : > { %v13726_v55 = vld [vmem:[%s20174_s29 + $0xb68] sm:$0xf0]  ;;  %v12452_v51 = vld [vmem:[%s20174_s29 + $0x150] sm:$0xf] }
 0x294   : > { %v18342_v56 = vld [vmem:[%s20174_s29 + $0xd4c] sm:$0xf]  ;;  %v13729_v62 = vor.u32 %v18278_v53, %v13726_v55  ;;  %4439 = vmatpush.bf16.msrb.mxu0 %v13473_v60 }
 0x295   : > { %v13982_v57 = vld [vmem:[%s20174_s29 + $0xd68] sm:$0xf0] }
 0x296   : > { %v18406_v58 = vld [vmem:[%s20174_s29 + $0xf4c] sm:$0xf]  ;;  %v13985_v63 = vor.u32 %v18342_v56, %v13982_v57  ;;  %4452 = vmatpush.bf16.msrb.mxu1 %v13729_v62  ;;  %v4201_v57 = vpop.f32.mrf.mxu1 }
 0x297   : > { %v14238_v59 = vld [vmem:[%s20174_s29 + $0xf68] sm:$0xf0]  ;;  %v18091_v57 = vld [vmem:[%s20174_s29 + $0x56c] sm:$0xf0] }
 0x298   : > { %v18206_v61 = vld [vmem:[%s20174_s29 + $0x90c] sm:$0xf]  ;;  %v14241_v3 = vor.u32 %v18406_v58, %v14238_v59  ;;  %4465 = vmatpush.bf16.msrb.mxu2 %v13985_v63 }
 0x299   : > { %v13438_v0 = vld [vmem:[%s20174_s29 + $0x928] sm:$0xf0] }
 0x29a   : > { %v18270_v1 = vld [vmem:[%s20174_s29 + $0xb0c] sm:$0xf]  ;;  %v13441_v9 = vor.u32 %v18206_v61, %v13438_v0  ;;  %4478 = vmatpush.bf16.msrb.mxu3 %v14241_v3 }
 0x29b   : > { %v13694_v4 = vld [vmem:[%s20174_s29 + $0xb28] sm:$0xf0] }
 0x29c   : > { %v18334_v5 = vld [vmem:[%s20174_s29 + $0xd0c] sm:$0xf]  ;;  %v13697_v35 = vor.u32 %v18270_v1, %v13694_v4  ;;  %4440 = vmatpush.bf16.msrb.mxu0 %v13441_v9 }
 0x29d   : > { %v13950_v6 = vld [vmem:[%s20174_s29 + $0xd28] sm:$0xf0] }
 0x29e   : > { %v18398_v7 = vld [vmem:[%s20174_s29 + $0xf0c] sm:$0xf]  ;;  %v13953_v11 = vor.u32 %v18334_v5, %v13950_v6  ;;  %4453 = vmatpush.bf16.msrb.mxu1 %v13697_v35 }
 0x29f   : > { %v14206_v8 = vld [vmem:[%s20174_s29 + $0xf28] sm:$0xf0] }
 0x2a0   : > { %v18198_v12 = vld [vmem:[%s20174_s29 + $0x8cc] sm:$0xf]  ;;  %v14209_v17 = vor.u32 %v18398_v7, %v14206_v8  ;;  %4466 = vmatpush.bf16.msrb.mxu2 %v13953_v11  ;;  %v4214_v8 = vpop.f32.mrf.mxu2 }
 0x2a1   : > { %v13406_v13 = vld [vmem:[%s20174_s29 + $0x8e8] sm:$0xf0] }
 0x2a2   : > { %v18262_v14 = vld [vmem:[%s20174_s29 + $0xacc] sm:$0xf]  ;;  %v13409_v24 = vor.u32 %v18198_v12, %v13406_v13  ;;  %4479 = vmatpush.bf16.msrb.mxu3 %v14209_v17  ;;  %v4227_v12 = vpop.f32.mrf.mxu3  ;;  %v12516_v13 = vld [vmem:[%s20174_s29 + $0x1d0] sm:$0xf] }
 0x2a3   : > { %v13662_v18 = vld [vmem:[%s20174_s29 + $0xae8] sm:$0xf0]  ;;  %v18043_v17 = vld [vmem:[%s20174_s29 + $0x3ec] sm:$0xf0] }
 0x2a4   : > { %v18326_v19 = vld [vmem:[%s20174_s29 + $0xccc] sm:$0xf]  ;;  %v13665_v25 = vor.u32 %v18262_v14, %v13662_v18  ;;  %4441 = vmatpush.bf16.msrb.mxu0 %v13409_v24  ;;  %v17979_v14 = vld [vmem:[%s20174_s29 + $0x1ec] sm:$0xf0] }
 0x2a5   : > { %v13918_v20 = vld [vmem:[%s20174_s29 + $0xce8] sm:$0xf0]  ;;  %v13028_v18 = vld [vmem:[%s20174_s29 + $0x5d0] sm:$0xf] }
 0x2a6   : > { %v18390_v21 = vld [vmem:[%s20174_s29 + $0xecc] sm:$0xf]  ;;  %v13921_v26 = vor.u32 %v18326_v19, %v13918_v20  ;;  %4454 = vmatpush.bf16.msrb.mxu1 %v13665_v25  ;;  %v18107_v19 = vld [vmem:[%s20174_s29 + $0x5ec] sm:$0xf0]  ;;  %v12517_v25 = vor.u32 %v17979_v14, %v12516_v13 }
 0x2a7   : > { %v14174_v22 = vld [vmem:[%s20174_s29 + $0xee8] sm:$0xf0]  ;;  %v17947_v12 = vld [vmem:[%s20174_s29 + $0xec] sm:$0xf0] }
 0x2a8   : > { %v18190_v27 = vld [vmem:[%s20174_s29 + $0x88c] sm:$0xf]  ;;  %v14177_v31 = vor.u32 %v18390_v21, %v14174_v22  ;;  %4467 = vmatpush.bf16.msrb.mxu2 %v13921_v26  ;;  %v13284_v22 = vld [vmem:[%s20174_s29 + $0x7d0] sm:$0xf]  ;;  %v12773_v26 = vor.u32 %v18043_v17, %v12772_v15  ;;  %v4251_v15 = vpop.f32.mrf.mxu1 }
 0x2a9   : > { %v13374_v28 = vld [vmem:[%s20174_s29 + $0x8a8] sm:$0xf0]  ;;  %v12644_v13 = vld [vmem:[%s20174_s29 + $0x2d0] sm:$0xf] }
 0x2aa   : > { %v18254_v29 = vld [vmem:[%s20174_s29 + $0xa8c] sm:$0xf]  ;;  %v13377_v48 = vor.u32 %v18190_v27, %v13374_v28  ;;  %4480 = vmatpush.bf16.msrb.mxu3 %v14177_v31  ;;  %v13029_v27 = vor.u32 %v18107_v19, %v13028_v18  ;;  %v12484_v28 = vld [vmem:[%s20174_s29 + $0x190] sm:$0xf]  ;;  %v13285_v31 = vor.u32 %v18171_v23, %v13284_v22 }
 0x2ab   : > { %v13630_v36 = vld [vmem:[%s20174_s29 + $0xaa8] sm:$0xf0]  ;;  %v18011_v17 = vld [vmem:[%s20174_s29 + $0x2ec] sm:$0xf0] }
 0x2ac   : > { %v18318_v39 = vld [vmem:[%s20174_s29 + $0xc8c] sm:$0xf]  ;;  %v13633_v52 = vor.u32 %v18254_v29, %v13630_v36  ;;  %4442 = vmatpush.bf16.msrb.mxu0 %v13377_v48  ;;  %v17971_v29 = vld [vmem:[%s20174_s29 + $0x1ac] sm:$0xf0] }
 0x2ad   : > { %v13886_v43 = vld [vmem:[%s20174_s29 + $0xca8] sm:$0xf0]  ;;  %v18035_v36 = vld [vmem:[%s20174_s29 + $0x3ac] sm:$0xf0] }
 0x2ae   : > { %v18382_v46 = vld [vmem:[%s20174_s29 + $0xe8c] sm:$0xf]  ;;  %v13889_v53 = vor.u32 %v18318_v39, %v13886_v43  ;;  %4455 = vmatpush.bf16.msrb.mxu1 %v13633_v52  ;;  %v12996_v39 = vld [vmem:[%s20174_s29 + $0x590] sm:$0xf] }
 0x2af   : > { %v14142_v47 = vld [vmem:[%s20174_s29 + $0xea8] sm:$0xf0]  ;;  %v18099_v43 = vld [vmem:[%s20174_s29 + $0x5ac] sm:$0xf0] }
 0x2b0   : > { %v18182_v54 = vld [vmem:[%s20174_s29 + $0x84c] sm:$0xf]  ;;  %v14145_v58 = vor.u32 %v18382_v46, %v14142_v47  ;;  %4468 = vmatpush.bf16.msrb.mxu2 %v13889_v53  ;;  %v12485_v46 = vor.u32 %v17971_v29, %v12484_v28  ;;  %v12741_v47 = vor.u32 %v18035_v36, %v12740_v30  ;;  %v12997_v48 = vor.u32 %v18099_v43, %v12996_v39  ;;  %v17963_v52 = vld [vmem:[%s20174_s29 + $0x16c] sm:$0xf0]  ;;  %v4264_v28 = vpop.f32.mrf.mxu2  ;;  %v4277_v43 = vpop.f32.mrf.mxu3 }
 0x2b1   : > { %v13342_v55 = vld [vmem:[%s20174_s29 + $0x868] sm:$0xf0]  ;;  %v12708_v53 = vld [vmem:[%s20174_s29 + $0x350] sm:$0xf] }
 0x2b2   : > { %v18246_v56 = vld [vmem:[%s20174_s29 + $0xa4c] sm:$0xf]  ;;  %v13345_v0 = vor.u32 %v18182_v54, %v13342_v55  ;;  %4481 = vmatpush.bf16.msrb.mxu3 %v14145_v58  ;;  %v13253_v54 = vor.u32 %v18163_v45, %v13252_v44  ;;  %v18027_v55 = vld [vmem:[%s20174_s29 + $0x36c] sm:$0xf0] }
 0x2b3   : > { %v13598_v59 = vld [vmem:[%s20174_s29 + $0xa68] sm:$0xf0]  ;;  %v13220_v58 = vld [vmem:[%s20174_s29 + $0x750] sm:$0xf] }
 0x2b4   : > { %v18310_v60 = vld [vmem:[%s20174_s29 + $0xc4c] sm:$0xf]  ;;  %v13601_v3 = vor.u32 %v18246_v56, %v13598_v59  ;;  %4443 = vmatpush.bf16.msrb.mxu0 %v13345_v0  ;;  %v12964_v56 = vld [vmem:[%s20174_s29 + $0x550] sm:$0xf] }
 0x2b5   : > { %v13854_v61 = vld [vmem:[%s20174_s29 + $0xc68] sm:$0xf0]  ;;  %v18155_v59 = vld [vmem:[%s20174_s29 + $0x76c] sm:$0xf0] }
 0x2b6   : > { %v18374_v62 = vld [vmem:[%s20174_s29 + $0xe4c] sm:$0xf]  ;;  %v13857_v4 = vor.u32 %v18310_v60, %v13854_v61  ;;  %4456 = vmatpush.bf16.msrb.mxu1 %v13601_v3  ;;  %v12453_v60 = vor.u32 %v17963_v52, %v12452_v51  ;;  %v12709_v61 = vor.u32 %v18027_v55, %v12708_v53  ;;  %v17955_v0 = vld [vmem:[%s20174_s29 + $0x12c] sm:$0xf0] }
 0x2b7   : > { %v14110_v63 = vld [vmem:[%s20174_s29 + $0xe68] sm:$0xf0]  ;;  %v18019_v3 = vld [vmem:[%s20174_s29 + $0x32c] sm:$0xf0] }
 0x2b8   : > { %v18174_v1 = vld [vmem:[%s20174_s29 + $0x80c] sm:$0xf]  ;;  %v14113_v9 = vor.u32 %v18374_v62, %v14110_v63  ;;  %4469 = vmatpush.bf16.msrb.mxu2 %v13857_v4  ;;  %v12965_v62 = vor.u32 %v18091_v57, %v12964_v56  ;;  %v12420_v63 = vld [vmem:[%s20174_s29 + $0x110] sm:$0xf]  ;;  %v4253_v56 = vpop.f32.mrf.mxu1 }
 0x2b9   : > { %v13310_v2 = vld [vmem:[%s20174_s29 + $0x828] sm:$0xf0]  ;;  %v12932_v4 = vld [vmem:[%s20174_s29 + $0x510] sm:$0xf]  ;;  %v12421_v8 = vor.u32 %v17955_v0, %v12420_v63 }
 0x2ba   : > { %v18238_v5 = vld [vmem:[%s20174_s29 + $0xa0c] sm:$0xf]  ;;  %v13313_v16 = vor.u32 %v18174_v1, %v13310_v2  ;;  %4482 = vmatpush.bf16.msrb.mxu3 %v14113_v9  ;;  %v12676_v1 = vld [vmem:[%s20174_s29 + $0x310] sm:$0xf]  ;;  %v13221_v2 = vor.u32 %v18155_v59, %v13220_v58  ;;  %v4238_v9 = vpop.f32.mrf.mxu0 }
 0x2bb   : > { %v13566_v6 = vld [vmem:[%s20174_s29 + $0xa28] sm:$0xf0]  ;;  %v4239_v14 = vadd.f32 %v4238_v9, %v20808_v49  ;;  %v12900_v18 = vld [vmem:[%s20174_s29 + $0x4d0] sm:$0xf]  ;;  %v12645_v49 = vor.u32 %v18011_v17, %v12644_v13 }
 0x2bc   : > { %v18302_v7 = vld [vmem:[%s20174_s29 + $0xc0c] sm:$0xf]  ;;  %v13569_v20 = vor.u32 %v18238_v5, %v13566_v6  ;;  %4444 = vmatpush.bf16.msrb.mxu0 %v13313_v16  ;;  %v18083_v5 = vld [vmem:[%s20174_s29 + $0x52c] sm:$0xf0] }
 0x2bd   : > { %v13822_v10 = vld [vmem:[%s20174_s29 + $0xc28] sm:$0xf0]  ;;  %v13188_v6 = vld [vmem:[%s20174_s29 + $0x710] sm:$0xf]  ;;  %v4252_v22 = vadd.f32 %v4251_v15, %v4239_v14 }
 0x2be   : > { %v18366_v35 = vld [vmem:[%s20174_s29 + $0xe0c] sm:$0xf]  ;;  %v13825_v21 = vor.u32 %v18302_v7, %v13822_v10  ;;  %4457 = vmatpush.bf16.msrb.mxu1 %v13569_v20  ;;  %v18147_v7 = vld [vmem:[%s20174_s29 + $0x72c] sm:$0xf0]  ;;  %v12677_v10 = vor.u32 %v18019_v3, %v12676_v1 }
 0x2bf   : > { %v14078_v11 = vld [vmem:[%s20174_s29 + $0xe28] sm:$0xf0]  ;;  %4445 = vmatmul.bf16.vlgmr.msrb.gmra.mxu0 %v20419_v37  ;;  %v13189_v16 = vor.u32 %v18147_v7, %v13188_v6  ;;  %v18075_v19 = vld [vmem:[%s20174_s29 + $0x4ec] sm:$0xf0]  ;;  %v4265_v39 = vadd.f32 %v4264_v28, %v4252_v22  ;;  %v4266_v7 = vpop.f32.mrf.mxu2 }
 0x2c0   : > { %v14081_v24 = vor.u32 %v18366_v35, %v14078_v11  ;;  %4470 = vmatpush.bf16.msrb.mxu2 %v13825_v21  ;;  %4489 = vmatpush.bf16.msra.mxu0 %v12517_v25  ;;  %v12933_v35 = vor.u32 %v18083_v5, %v12932_v4  ;;  %v12388_v11 = vld [vmem:[%s20174_s29 + $0xd0] sm:$0xf] }
 0x2c1   : > { %4458 = vmatmul.bf16.vlgmr.msrb.gmra.mxu1 %v20423_v40  ;;  %v13156_v20 = vld [vmem:[%s20174_s29 + $0x6d0] sm:$0xf]  ;;  %v12389_v23 = vor.u32 %v17947_v12, %v12388_v11  ;;  %v4279_v11 = vpop.f32.mrf.mxu3 }
 0x2c2   : > { %4483 = vmatpush.bf16.msrb.mxu3 %v14081_v24  ;;  %4502 = vmatpush.bf16.msra.mxu1 %v12773_v26  ;;  %v18139_v21 = vld [vmem:[%s20174_s29 + $0x6ec] sm:$0xf0]  ;;  %v12901_v24 = vor.u32 %v18075_v19, %v12900_v18 }
 0x2c3   : > { %4471 = vmatmul.bf16.vlgmr.msrb.gmra.mxu2 %v20415_v32  ;;  %v12356_v25 = vld [vmem:[%s20174_s29 + $0x90] sm:$0xf]  ;;  %v13157_v29 = vor.u32 %v18139_v21, %v13156_v20 }
 0x2c4   : > { %4515 = vmatpush.bf16.msra.mxu2 %v13029_v27  ;;  %4490 = vmatpush.bf16.msra.mxu0 %v12485_v46  ;;  %v17939_v26 = vld [vmem:[%s20174_s29 + $0xac] sm:$0xf0] }
 0x2c5   : > { %4484 = vmatmul.bf16.vlgmr.msrb.gmra.mxu3 %v20421_v38  ;;  %v12612_v27 = vld [vmem:[%s20174_s29 + $0x290] sm:$0xf]  ;;  %v12357_v46 = vor.u32 %v17939_v26, %v12356_v25 }
 0x2c6   : > { %4528 = vmatpush.bf16.msra.mxu3 %v13285_v31  ;;  %4503 = vmatpush.bf16.msra.mxu1 %v12741_v47  ;;  %v18003_v30 = vld [vmem:[%s20174_s29 + $0x2ac] sm:$0xf0]  ;;  %v20879_v47 = vadd.f32 %v4277_v43, %v4265_v39 }
 0x2c7   : > { %v12868_v31 = vld [vmem:[%s20174_s29 + $0x490] sm:$0xf]  ;;  %v12613_v51 = vor.u32 %v18003_v30, %v12612_v27 }
 0x2c8   : > { %4516 = vmatpush.bf16.msra.mxu2 %v12997_v48  ;;  %4491 = vmatpush.bf16.msra.mxu0 %v12453_v60  ;;  %v18067_v36 = vld [vmem:[%s20174_s29 + $0x4ac] sm:$0xf0]  ;;  %v4240_v48 = vpop.f32.mrf.mxu0 }
 0x2c9   : > { %v13124_v44 = vld [vmem:[%s20174_s29 + $0x690] sm:$0xf]  ;;  %v12869_v52 = vor.u32 %v18067_v36, %v12868_v31 }
 0x2ca   : > { %4529 = vmatpush.bf16.msra.mxu3 %v13253_v54  ;;  %4504 = vmatpush.bf16.msra.mxu1 %v12709_v61  ;;  %v18131_v45 = vld [vmem:[%s20174_s29 + $0x6ac] sm:$0xf0] }
 0x2cb   : > { %v12324_v53 = vld [vmem:[%s20174_s29 + $0x50] sm:$0xf]  ;;  %v13125_v57 = vor.u32 %v18131_v45, %v13124_v44 }
 0x2cc   : > { %4517 = vmatpush.bf16.msra.mxu2 %v12965_v62  ;;  %4492 = vmatpush.bf16.msra.mxu0 %v12421_v8  ;;  %v17931_v54 = vld [vmem:[%s20174_s29 + $0x6c] sm:$0xf0] }
 0x2cd   : > { %v12580_v55 = vld [vmem:[%s20174_s29 + $0x250] sm:$0xf]  ;;  %v12325_v63 = vor.u32 %v17931_v54, %v12324_v53 }
 0x2ce   : > { %4530 = vmatpush.bf16.msra.mxu3 %v13221_v2  ;;  %4505 = vmatpush.bf16.msra.mxu1 %v12677_v10  ;;  %v17995_v58 = vld [vmem:[%s20174_s29 + $0x26c] sm:$0xf0] }
 0x2cf   : > { %v12836_v59 = vld [vmem:[%s20174_s29 + $0x450] sm:$0xf]  ;;  %v12581_v2 = vor.u32 %v17995_v58, %v12580_v55 }
 0x2d0   : > { %4518 = vmatpush.bf16.msra.mxu2 %v12933_v35  ;;  %4493 = vmatpush.bf16.msra.mxu0 %v12389_v23  ;;  %v18059_v60 = vld [vmem:[%s20174_s29 + $0x46c] sm:$0xf0] }
 0x2d1   : > { %v13092_v61 = vld [vmem:[%s20174_s29 + $0x650] sm:$0xf]  ;;  %v12837_v3 = vor.u32 %v18059_v60, %v12836_v59 }
 0x2d2   : > { %4531 = vmatpush.bf16.msra.mxu3 %v13189_v16  ;;  %4506 = vmatpush.bf16.msra.mxu1 %v12645_v49  ;;  %v18123_v62 = vld [vmem:[%s20174_s29 + $0x66c] sm:$0xf0] }
 0x2d3   : > { %v12292_v0 = vld [vmem:[%s20174_s29 + $0x10] sm:$0xf]  ;;  %v13093_v8 = vor.u32 %v18123_v62, %v13092_v61 }
 0x2d4   : > { %4519 = vmatpush.bf16.msra.mxu2 %v12901_v24  ;;  %4494 = vmatpush.bf16.msra.mxu0 %v12357_v46  ;;  %v17923_v1 = vld [vmem:[%s20174_s29 + $0x2c] sm:$0xf0] }
 0x2d5   : > { %v12548_v4 = vld [vmem:[%s20174_s29 + $0x210] sm:$0xf]  ;;  %v12293_v15 = vor.u32 %v17923_v1, %v12292_v0  ;;  %v20929_v1 = vld [vmem:[%s20188_s14] sm:$0xff] }
 0x2d6   : > { %4532 = vmatpush.bf16.msra.mxu3 %v13157_v29  ;;  %4507 = vmatpush.bf16.msra.mxu1 %v12613_v51  ;;  %v17987_v5 = vld [vmem:[%s20174_s29 + $0x22c] sm:$0xf0] }
 0x2d7   : > { %v12804_v6 = vld [vmem:[%s20174_s29 + $0x410] sm:$0xf]  ;;  %v12549_v19 = vor.u32 %v17987_v5, %v12548_v4 }
 0x2d8   : > { %4520 = vmatpush.bf16.msra.mxu2 %v12869_v52  ;;  %v18051_v9 = vld [vmem:[%s20174_s29 + $0x42c] sm:$0xf0]  ;;  %4495 = vmatpush.bf16.msra.mxu0 %v12325_v63 }
 0x2d9   : > { %v13060_v10 = vld [vmem:[%s20174_s29 + $0x610] sm:$0xf]  ;;  %v12805_v20 = vor.u32 %v18051_v9, %v12804_v6 }
 0x2da   : > { %4533 = vmatpush.bf16.msra.mxu3 %v13125_v57  ;;  %v18115_v35 = vld [vmem:[%s20174_s29 + $0x62c] sm:$0xf0]  ;;  %4508 = vmatpush.bf16.msra.mxu1 %v12581_v2  ;;  %v1499_v2 = vperm.slane %v20929_v1, 2 }
 0x2db   : > { %v13540_v12 = vld [vmem:[%s20174_s29 + $0x9d0] sm:$0xf]  ;;  %v13061_v23 = vor.u32 %v18115_v35, %v13060_v10  ;;  %v4290_v10 = vpop.f32.mrf.mxu0 }
 0x2dc   : > { %v18235_v13 = vld [vmem:[%s20174_s29 + $0x9ec] sm:$0xf0]  ;;  %4521 = vmatpush.bf16.msra.mxu2 %v12837_v3  ;;  %4496 = vmatpush.bf16.msra.mxu0 %v12293_v15  ;;  %v4291_v15 = vadd.f32 %v4290_v10, %v1499_v2 }
 0x2dd   : > { %v13796_v14 = vld [vmem:[%s20174_s29 + $0xbd0] sm:$0xf]  ;;  %v13541_v49 = vor.u32 %v18235_v13, %v13540_v12 }
 0x2de   : > { %v18299_v16 = vld [vmem:[%s20174_s29 + $0xbec] sm:$0xf0]  ;;  %4534 = vmatpush.bf16.msra.mxu3 %v13093_v8  ;;  %4509 = vmatpush.bf16.msra.mxu1 %v12549_v19 }
 0x2df   : > { %v14052_v17 = vld [vmem:[%s20174_s29 + $0xdd0] sm:$0xf]  ;;  %v13797_v24 = vor.u32 %v18299_v16, %v13796_v14  ;;  %4497 = vmatmul.bf16.vlgmr.msra.gmra.mxu0 %v20369_v34  ;;  %v4303_v16 = vpop.f32.mrf.mxu1 }
 0x2e0   : > { %v18363_v18 = vld [vmem:[%s20174_s29 + $0xdec] sm:$0xf0]  ;;  %4522 = vmatpush.bf16.msra.mxu2 %v12805_v20  ;;  %4541 = vmatpush.bf16.msrb.mxu0 %v13541_v49 }
 0x2e1   : > { %v14308_v21 = vld [vmem:[%s20174_s29 + $0xfd0] sm:$0xf]  ;;  %v14053_v25 = vor.u32 %v18363_v18, %v14052_v17  ;;  %4510 = vmatmul.bf16.vlgmr.msra.gmra.mxu1 %v20376_v42 }
 0x2e2   : > { %v18427_v22 = vld [vmem:[%s20174_s29 + $0xfec] sm:$0xf0]  ;;  %4535 = vmatpush.bf16.msra.mxu3 %v13061_v23  ;;  %4554 = vmatpush.bf16.msrb.mxu1 %v13797_v24  ;;  %v4304_v23 = vadd.f32 %v4303_v16, %v4291_v15  ;;  %v17975_v15 = vld [vmem:[%s20174_s29 + $0x1d4] sm:$0xf] }
 0x2e3   : > { %v13508_v26 = vld [vmem:[%s20174_s29 + $0x990] sm:$0xf]  ;;  %v14309_v29 = vor.u32 %v18427_v22, %v14308_v21  ;;  %4523 = vmatmul.bf16.vlgmr.msra.gmra.mxu2 %v20367_v33  ;;  %v12518_v16 = vld [vmem:[%s20174_s29 + $0x1f0] sm:$0xf0] }
 0x2e4   : > { %v18227_v27 = vld [vmem:[%s20174_s29 + $0x9ac] sm:$0xf0]  ;;  %4567 = vmatpush.bf16.msrb.mxu2 %v14053_v25 }
 0x2e5   : > { %v13764_v28 = vld [vmem:[%s20174_s29 + $0xb90] sm:$0xf]  ;;  %v13509_v44 = vor.u32 %v18227_v27, %v13508_v26  ;;  %4536 = vmatmul.bf16.vlgmr.msra.gmra.mxu3 %v20374_v41 }
 0x2e6   : > { %v18291_v30 = vld [vmem:[%s20174_s29 + $0xbac] sm:$0xf0]  ;;  %4580 = vmatpush.bf16.msrb.mxu3 %v14309_v29  ;;  %v4316_v29 = vpop.f32.mrf.mxu2 }
 0x2e7   : > { %v14020_v31 = vld [vmem:[%s20174_s29 + $0xd90] sm:$0xf]  ;;  %v13765_v45 = vor.u32 %v18291_v30, %v13764_v28  ;;  %4542 = vmatpush.bf16.msrb.mxu0 %v13509_v44  ;;  %v4329_v44 = vpop.f32.mrf.mxu3 }
 0x2e8   : > { %v18355_v36 = vld [vmem:[%s20174_s29 + $0xdac] sm:$0xf0] }
 0x2e9   : > { %v14276_v39 = vld [vmem:[%s20174_s29 + $0xf90] sm:$0xf]  ;;  %v14021_v46 = vor.u32 %v18355_v36, %v14020_v31  ;;  %4555 = vmatpush.bf16.msrb.mxu1 %v13765_v45 }
 0x2ea   : > { %v18419_v43 = vld [vmem:[%s20174_s29 + $0xfac] sm:$0xf0] }
 0x2eb   : > { %v13476_v48 = vld [vmem:[%s20174_s29 + $0x950] sm:$0xf]  ;;  %v14277_v53 = vor.u32 %v18419_v43, %v14276_v39  ;;  %4568 = vmatpush.bf16.msrb.mxu2 %v14021_v46  ;;  %v4317_v43 = vadd.f32 %v4316_v29, %v4304_v23  ;;  %v17967_v29 = vld [vmem:[%s20174_s29 + $0x194] sm:$0xf] }
 0x2ec   : > { %v18219_v51 = vld [vmem:[%s20174_s29 + $0x96c] sm:$0xf0] }
 0x2ed   : > { %v13732_v52 = vld [vmem:[%s20174_s29 + $0xb50] sm:$0xf]  ;;  %v13477_v59 = vor.u32 %v18219_v51, %v13476_v48  ;;  %4581 = vmatpush.bf16.msrb.mxu3 %v14277_v53  ;;  %v20953_v51 = vadd.f32 %v4329_v44, %v4317_v43  ;;  %v18095_v43 = vld [vmem:[%s20174_s29 + $0x594] sm:$0xf] }
 0x2ee   : > { %v18283_v54 = vld [vmem:[%s20174_s29 + $0xb6c] sm:$0xf0]  ;;  %v4318_v10 = vpop.f32.mrf.mxu2  ;;  %v12998_v44 = vld [vmem:[%s20174_s29 + $0x5b0] sm:$0xf0] }
 0x2ef   : > { %v13988_v55 = vld [vmem:[%s20174_s29 + $0xd50] sm:$0xf]  ;;  %v13733_v61 = vor.u32 %v18283_v54, %v13732_v52  ;;  %4543 = vmatpush.bf16.msrb.mxu0 %v13477_v59  ;;  %v4292_v52 = vpop.f32.mrf.mxu0  ;;  %v18143_v10 = vld [vmem:[%s20174_s29 + $0x714] sm:$0xf] }
 0x2f0   : > { %v18347_v56 = vld [vmem:[%s20174_s29 + $0xd6c] sm:$0xf0] }
 0x2f1   : > { %v14244_v57 = vld [vmem:[%s20174_s29 + $0xf50] sm:$0xf]  ;;  %v13989_v62 = vor.u32 %v18347_v56, %v13988_v55  ;;  %4556 = vmatpush.bf16.msrb.mxu1 %v13733_v61 }
 0x2f2   : > { %v18411_v58 = vld [vmem:[%s20174_s29 + $0xf6c] sm:$0xf0] }
 0x2f3   : > { %v13444_v60 = vld [vmem:[%s20174_s29 + $0x910] sm:$0xf]  ;;  %v14245_v3 = vor.u32 %v18411_v58, %v14244_v57  ;;  %4569 = vmatpush.bf16.msrb.mxu2 %v13989_v62  ;;  %v4305_v58 = vpop.f32.mrf.mxu1 }
 0x2f4   : > { %v18211_v63 = vld [vmem:[%s20174_s29 + $0x92c] sm:$0xf0]  ;;  %v12710_v58 = vld [vmem:[%s20174_s29 + $0x370] sm:$0xf0] }
 0x2f5   : > { %v13700_v0 = vld [vmem:[%s20174_s29 + $0xb10] sm:$0xf]  ;;  %v13445_v9 = vor.u32 %v18211_v63, %v13444_v60  ;;  %4582 = vmatpush.bf16.msrb.mxu3 %v14245_v3 }
 0x2f6   : > { %v18275_v4 = vld [vmem:[%s20174_s29 + $0xb2c] sm:$0xf0] }
 0x2f7   : > { %v13956_v5 = vld [vmem:[%s20174_s29 + $0xd10] sm:$0xf]  ;;  %v13701_v35 = vor.u32 %v18275_v4, %v13700_v0  ;;  %4544 = vmatpush.bf16.msrb.mxu0 %v13445_v9 }
 0x2f8   : > { %v18339_v6 = vld [vmem:[%s20174_s29 + $0xd2c] sm:$0xf0] }
 0x2f9   : > { %v14212_v7 = vld [vmem:[%s20174_s29 + $0xf10] sm:$0xf]  ;;  %v13957_v11 = vor.u32 %v18339_v6, %v13956_v5  ;;  %4557 = vmatpush.bf16.msrb.mxu1 %v13701_v35 }
 0x2fa   : > { %v18403_v8 = vld [vmem:[%s20174_s29 + $0xf2c] sm:$0xf0] }
 0x2fb   : > { %v13412_v12 = vld [vmem:[%s20174_s29 + $0x8d0] sm:$0xf]  ;;  %v14213_v17 = vor.u32 %v18403_v8, %v14212_v7  ;;  %4570 = vmatpush.bf16.msrb.mxu2 %v13957_v11 }
 0x2fc   : > { %v18203_v13 = vld [vmem:[%s20174_s29 + $0x8ec] sm:$0xf0] }
 0x2fd   : > { %v13668_v14 = vld [vmem:[%s20174_s29 + $0xad0] sm:$0xf]  ;;  %v13413_v49 = vor.u32 %v18203_v13, %v13412_v12  ;;  %4583 = vmatpush.bf16.msrb.mxu3 %v14213_v17  ;;  %v18039_v17 = vld [vmem:[%s20174_s29 + $0x3d4] sm:$0xf] }
 0x2fe   : > { %v18267_v18 = vld [vmem:[%s20174_s29 + $0xaec] sm:$0xf0] }
 0x2ff   : > { %v13924_v19 = vld [vmem:[%s20174_s29 + $0xcd0] sm:$0xf]  ;;  %v13669_v24 = vor.u32 %v18267_v18, %v13668_v14  ;;  %4545 = vmatpush.bf16.msrb.mxu0 %v13413_v49  ;;  %v4331_v14 = vpop.f32.mrf.mxu3  ;;  %v18167_v49 = vld [vmem:[%s20174_s29 + $0x7d4] sm:$0xf] }
 0x300   : > { %v18331_v20 = vld [vmem:[%s20174_s29 + $0xcec] sm:$0xf0] }
 0x301   : > { %v14180_v21 = vld [vmem:[%s20174_s29 + $0xed0] sm:$0xf]  ;;  %v13925_v25 = vor.u32 %v18331_v20, %v13924_v19  ;;  %4558 = vmatpush.bf16.msrb.mxu1 %v13669_v24  ;;  %v12774_v19 = vld [vmem:[%s20174_s29 + $0x3f0] sm:$0xf0] }
 0x302   : > { %v18395_v22 = vld [vmem:[%s20174_s29 + $0xeec] sm:$0xf0]  ;;  %v18103_v20 = vld [vmem:[%s20174_s29 + $0x5d4] sm:$0xf] }
 0x303   : > { %v13380_v26 = vld [vmem:[%s20174_s29 + $0x890] sm:$0xf]  ;;  %v14181_v30 = vor.u32 %v18395_v22, %v14180_v21  ;;  %4571 = vmatpush.bf16.msrb.mxu2 %v13925_v25  ;;  %v13030_v21 = vld [vmem:[%s20174_s29 + $0x5f0] sm:$0xf0] }
 0x304   : > { %v18195_v27 = vld [vmem:[%s20174_s29 + $0x8ac] sm:$0xf0]  ;;  %v13286_v24 = vld [vmem:[%s20174_s29 + $0x7f0] sm:$0xf0] }
 0x305   : > { %v13636_v28 = vld [vmem:[%s20174_s29 + $0xa90] sm:$0xf]  ;;  %v13381_v48 = vor.u32 %v18195_v27, %v13380_v26  ;;  %4584 = vmatpush.bf16.msrb.mxu3 %v14181_v30  ;;  %v12521_v26 = vor.u32 %v17975_v15, %v12518_v16  ;;  %v12777_v27 = vor.u32 %v18039_v17, %v12774_v19  ;;  %v12486_v30 = vld [vmem:[%s20174_s29 + $0x1b0] sm:$0xf0]  ;;  %v4355_v19 = vpop.f32.mrf.mxu1 }
 0x306   : > { %v18259_v31 = vld [vmem:[%s20174_s29 + $0xaac] sm:$0xf0]  ;;  %v17943_v15 = vld [vmem:[%s20174_s29 + $0xd4] sm:$0xf] }
 0x307   : > { %v13892_v36 = vld [vmem:[%s20174_s29 + $0xc90] sm:$0xf]  ;;  %v13637_v53 = vor.u32 %v18259_v31, %v13636_v28  ;;  %4546 = vmatpush.bf16.msrb.mxu0 %v13381_v48  ;;  %v13033_v28 = vor.u32 %v18103_v20, %v13030_v21  ;;  %v18031_v31 = vld [vmem:[%s20174_s29 + $0x394] sm:$0xf]  ;;  %v12489_v48 = vor.u32 %v17967_v29, %v12486_v30 }
 0x308   : > { %v18323_v39 = vld [vmem:[%s20174_s29 + $0xcac] sm:$0xf0]  ;;  %v12390_v16 = vld [vmem:[%s20174_s29 + $0xf0] sm:$0xf0] }
 0x309   : > { %v14148_v45 = vld [vmem:[%s20174_s29 + $0xe90] sm:$0xf]  ;;  %v13893_v54 = vor.u32 %v18323_v39, %v13892_v36  ;;  %4559 = vmatpush.bf16.msrb.mxu1 %v13637_v53  ;;  %v13289_v36 = vor.u32 %v18167_v49, %v13286_v24  ;;  %v12742_v39 = vld [vmem:[%s20174_s29 + $0x3b0] sm:$0xf0]  ;;  %v13001_v53 = vor.u32 %v18095_v43, %v12998_v44 }
 0x30a   : > { %v18387_v46 = vld [vmem:[%s20174_s29 + $0xeac] sm:$0xf0]  ;;  %v12745_v52 = vor.u32 %v18031_v31, %v12742_v39  ;;  %v18007_v17 = vld [vmem:[%s20174_s29 + $0x2d4] sm:$0xf]  ;;  %v4368_v31 = vpop.f32.mrf.mxu2 }
 0x30b   : > { %v13348_v55 = vld [vmem:[%s20174_s29 + $0x850] sm:$0xf]  ;;  %v14149_v59 = vor.u32 %v18387_v46, %v14148_v45  ;;  %4572 = vmatpush.bf16.msrb.mxu2 %v13893_v54  ;;  %v18159_v45 = vld [vmem:[%s20174_s29 + $0x794] sm:$0xf] }
 0x30c   : > { %v18187_v56 = vld [vmem:[%s20174_s29 + $0x86c] sm:$0xf0]  ;;  %v13254_v46 = vld [vmem:[%s20174_s29 + $0x7b0] sm:$0xf0] }
 0x30d   : > { %v13604_v57 = vld [vmem:[%s20174_s29 + $0xa50] sm:$0xf]  ;;  %v13349_v2 = vor.u32 %v18187_v56, %v13348_v55  ;;  %4585 = vmatpush.bf16.msrb.mxu3 %v14149_v59  ;;  %v17959_v54 = vld [vmem:[%s20174_s29 + $0x154] sm:$0xf] }
 0x30e   : > { %v18251_v60 = vld [vmem:[%s20174_s29 + $0xa6c] sm:$0xf0]  ;;  %v12454_v55 = vld [vmem:[%s20174_s29 + $0x170] sm:$0xf0] }
 0x30f   : > { %v13860_v61 = vld [vmem:[%s20174_s29 + $0xc50] sm:$0xf]  ;;  %v13605_v5 = vor.u32 %v18251_v60, %v13604_v57  ;;  %4547 = vmatpush.bf16.msrb.mxu0 %v13349_v2  ;;  %v18023_v56 = vld [vmem:[%s20174_s29 + $0x354] sm:$0xf]  ;;  %v13257_v57 = vor.u32 %v18159_v45, %v13254_v46  ;;  %v4381_v46 = vpop.f32.mrf.mxu3 }
 0x310   : > { %v18315_v62 = vld [vmem:[%s20174_s29 + $0xc6c] sm:$0xf0]  ;;  %v18087_v59 = vld [vmem:[%s20174_s29 + $0x554] sm:$0xf] }
 0x311   : > { %v14116_v63 = vld [vmem:[%s20174_s29 + $0xe50] sm:$0xf]  ;;  %v13861_v6 = vor.u32 %v18315_v62, %v13860_v61  ;;  %4560 = vmatpush.bf16.msrb.mxu1 %v13605_v5  ;;  %v12966_v60 = vld [vmem:[%s20174_s29 + $0x570] sm:$0xf0] }
 0x312   : > { %v18379_v0 = vld [vmem:[%s20174_s29 + $0xe6c] sm:$0xf0]  ;;  %v18151_v61 = vld [vmem:[%s20174_s29 + $0x754] sm:$0xf]  ;;  %v12969_v2 = vor.u32 %v18087_v59, %v12966_v60 }
 0x313   : > { %v13316_v3 = vld [vmem:[%s20174_s29 + $0x810] sm:$0xf]  ;;  %v14117_v35 = vor.u32 %v18379_v0, %v14116_v63  ;;  %4573 = vmatpush.bf16.msrb.mxu2 %v13861_v6  ;;  %v13222_v62 = vld [vmem:[%s20174_s29 + $0x770] sm:$0xf0]  ;;  %v12457_v63 = vor.u32 %v17959_v54, %v12454_v55  ;;  %v12713_v0 = vor.u32 %v18023_v56, %v12710_v58 }
 0x314   : > { %v18179_v4 = vld [vmem:[%s20174_s29 + $0x82c] sm:$0xf0]  ;;  %v18015_v5 = vld [vmem:[%s20174_s29 + $0x314] sm:$0xf]  ;;  %v13225_v6 = vor.u32 %v18151_v61, %v13222_v62  ;;  %v4357_v61 = vpop.f32.mrf.mxu1 }
 0x315   : > { %v13572_v7 = vld [vmem:[%s20174_s29 + $0xa10] sm:$0xf]  ;;  %v13317_v18 = vor.u32 %v18179_v4, %v13316_v3  ;;  %4586 = vmatpush.bf16.msrb.mxu3 %v14117_v35  ;;  %v17951_v3 = vld [vmem:[%s20174_s29 + $0x114] sm:$0xf] }
 0x316   : > { %v18243_v8 = vld [vmem:[%s20174_s29 + $0xa2c] sm:$0xf0]  ;;  %v12422_v4 = vld [vmem:[%s20174_s29 + $0x130] sm:$0xf0] }
 0x317   : > { %v13828_v9 = vld [vmem:[%s20174_s29 + $0xc10] sm:$0xf]  ;;  %v13573_v22 = vor.u32 %v18243_v8, %v13572_v7  ;;  %4548 = vmatpush.bf16.msrb.mxu0 %v13317_v18  ;;  %v12678_v7 = vld [vmem:[%s20174_s29 + $0x330] sm:$0xf0] }
 0x318   : > { %v18307_v11 = vld [vmem:[%s20174_s29 + $0xc2c] sm:$0xf0]  ;;  %v18079_v8 = vld [vmem:[%s20174_s29 + $0x514] sm:$0xf] }
 0x319   : > { %v14084_v12 = vld [vmem:[%s20174_s29 + $0xe10] sm:$0xf]  ;;  %v13829_v23 = vor.u32 %v18307_v11, %v13828_v9  ;;  %4561 = vmatpush.bf16.msrb.mxu1 %v13573_v22  ;;  %v12934_v9 = vld [vmem:[%s20174_s29 + $0x530] sm:$0xf0]  ;;  %v12425_v11 = vor.u32 %v17951_v3, %v12422_v4 }
 0x31a   : > { %v18371_v13 = vld [vmem:[%s20174_s29 + $0xe2c] sm:$0xf0]  ;;  %4549 = vmatmul.bf16.vlgmr.msrb.gmra.mxu0 %v20419_v37  ;;  %v13190_v35 = vld [vmem:[%s20174_s29 + $0x730] sm:$0xf0]  ;;  %v12937_v14 = vor.u32 %v18079_v8, %v12934_v9 }
 0x31b   : > { %v14085_v25 = vor.u32 %v18371_v13, %v14084_v12  ;;  %4574 = vmatpush.bf16.msrb.mxu2 %v13829_v23  ;;  %4593 = vmatpush.bf16.msra.mxu0 %v12521_v26  ;;  %v4342_v12 = vpop.f32.mrf.mxu0  ;;  %v12681_v13 = vor.u32 %v18015_v5, %v12678_v7  ;;  %v13193_v20 = vor.u32 %v18143_v10, %v13190_v35  ;;  %v12646_v21 = vld [vmem:[%s20174_s29 + $0x2f0] sm:$0xf0] }
 0x31c   : > { %4562 = vmatmul.bf16.vlgmr.msrb.gmra.mxu1 %v20423_v40  ;;  %v4343_v18 = vadd.f32 %v4342_v12, %v20953_v51  ;;  %v18071_v22 = vld [vmem:[%s20174_s29 + $0x4d4] sm:$0xf]  ;;  %v12393_v26 = vor.u32 %v17943_v15, %v12390_v16  ;;  %v12649_v51 = vor.u32 %v18007_v17, %v12646_v21  ;;  %v4370_v12 = vpop.f32.mrf.mxu2  ;;  %v4383_v17 = vpop.f32.mrf.mxu3 }
 0x31d   : > { %4587 = vmatpush.bf16.msrb.mxu3 %v14085_v25  ;;  %4606 = vmatpush.bf16.msra.mxu1 %v12777_v27  ;;  %v12902_v23 = vld [vmem:[%s20174_s29 + $0x4f0] sm:$0xf0] }
 0x31e   : > { %4575 = vmatmul.bf16.vlgmr.msrb.gmra.mxu2 %v20415_v32  ;;  %v18135_v49 = vld [vmem:[%s20174_s29 + $0x6d4] sm:$0xf]  ;;  %v4356_v25 = vadd.f32 %v4355_v19, %v4343_v18  ;;  %v12905_v27 = vor.u32 %v18071_v22, %v12902_v23 }
 0x31f   : > { %4619 = vmatpush.bf16.msra.mxu2 %v13033_v28  ;;  %4594 = vmatpush.bf16.msra.mxu0 %v12489_v48  ;;  %v13158_v24 = vld [vmem:[%s20174_s29 + $0x6f0] sm:$0xf0] }
 0x320   : > { %4588 = vmatmul.bf16.vlgmr.msrb.gmra.mxu3 %v20421_v38  ;;  %v17935_v28 = vld [vmem:[%s20174_s29 + $0x94] sm:$0xf]  ;;  %v4369_v45 = vadd.f32 %v4368_v31, %v4356_v25 }
 0x321   : > { %4632 = vmatpush.bf16.msra.mxu3 %v13289_v36  ;;  %4607 = vmatpush.bf16.msra.mxu1 %v12745_v52  ;;  %v12358_v29 = vld [vmem:[%s20174_s29 + $0xb0] sm:$0xf0]  ;;  %v13161_v36 = vor.u32 %v18135_v49, %v13158_v24 }
 0x322   : > { %v17999_v30 = vld [vmem:[%s20174_s29 + $0x294] sm:$0xf]  ;;  %v21024_v54 = vadd.f32 %v4381_v46, %v4369_v45 }
 0x323   : > { %4620 = vmatpush.bf16.msra.mxu2 %v13001_v53  ;;  %4595 = vmatpush.bf16.msra.mxu0 %v12457_v63  ;;  %v12614_v39 = vld [vmem:[%s20174_s29 + $0x2b0] sm:$0xf0]  ;;  %v12361_v53 = vor.u32 %v17935_v28, %v12358_v29  ;;  %v4344_v55 = vpop.f32.mrf.mxu0 }
 0x324   : > { %v18063_v43 = vld [vmem:[%s20174_s29 + $0x494] sm:$0xf]  ;;  %v12617_v56 = vor.u32 %v17999_v30, %v12614_v39 }
 0x325   : > { %4633 = vmatpush.bf16.msra.mxu3 %v13257_v57  ;;  %4608 = vmatpush.bf16.msra.mxu1 %v12713_v0  ;;  %v12870_v44 = vld [vmem:[%s20174_s29 + $0x4b0] sm:$0xf0] }
 0x326   : > { %v18127_v48 = vld [vmem:[%s20174_s29 + $0x694] sm:$0xf]  ;;  %v12873_v57 = vor.u32 %v18063_v43, %v12870_v44 }
 0x327   : > { %4621 = vmatpush.bf16.msra.mxu2 %v12969_v2  ;;  %4596 = vmatpush.bf16.msra.mxu0 %v12425_v11  ;;  %v13126_v52 = vld [vmem:[%s20174_s29 + $0x6b0] sm:$0xf0] }
 0x328   : > { %v17927_v58 = vld [vmem:[%s20174_s29 + $0x54] sm:$0xf]  ;;  %v13129_v62 = vor.u32 %v18127_v48, %v13126_v52 }
 0x329   : > { %4634 = vmatpush.bf16.msra.mxu3 %v13225_v6  ;;  %4609 = vmatpush.bf16.msra.mxu1 %v12681_v13  ;;  %v12326_v59 = vld [vmem:[%s20174_s29 + $0x70] sm:$0xf0] }
 0x32a   : > { %v17991_v60 = vld [vmem:[%s20174_s29 + $0x254] sm:$0xf]  ;;  %v12329_v5 = vor.u32 %v17927_v58, %v12326_v59 }
 0x32b   : > { %4622 = vmatpush.bf16.msra.mxu2 %v12937_v14  ;;  %4597 = vmatpush.bf16.msra.mxu0 %v12393_v26  ;;  %v12582_v63 = vld [vmem:[%s20174_s29 + $0x270] sm:$0xf0] }
 0x32c   : > { %v18055_v0 = vld [vmem:[%s20174_s29 + $0x454] sm:$0xf]  ;;  %v12585_v8 = vor.u32 %v17991_v60, %v12582_v63 }
 0x32d   : > { %4635 = vmatpush.bf16.msra.mxu3 %v13193_v20  ;;  %4610 = vmatpush.bf16.msra.mxu1 %v12649_v51  ;;  %v12838_v2 = vld [vmem:[%s20174_s29 + $0x470] sm:$0xf0] }
 0x32e   : > { %v18119_v3 = vld [vmem:[%s20174_s29 + $0x654] sm:$0xf]  ;;  %v12841_v9 = vor.u32 %v18055_v0, %v12838_v2 }
 0x32f   : > { %4623 = vmatpush.bf16.msra.mxu2 %v12905_v27  ;;  %v13094_v4 = vld [vmem:[%s20174_s29 + $0x670] sm:$0xf0]  ;;  %4598 = vmatpush.bf16.msra.mxu0 %v12361_v53 }
 0x330   : > { %v17919_v6 = vld [vmem:[%s20174_s29 + $0x14] sm:$0xf]  ;;  %v13097_v13 = vor.u32 %v18119_v3, %v13094_v4 }
 0x331   : > { %4636 = vmatpush.bf16.msra.mxu3 %v13161_v36  ;;  %v12294_v7 = vld [vmem:[%s20174_s29 + $0x30] sm:$0xf0]  ;;  %4611 = vmatpush.bf16.msra.mxu1 %v12617_v56 }
 0x332   : > { %v17983_v10 = vld [vmem:[%s20174_s29 + $0x214] sm:$0xf]  ;;  %v12297_v21 = vor.u32 %v17919_v6, %v12294_v7 }
 0x333   : > { %4624 = vmatpush.bf16.msra.mxu2 %v12873_v57  ;;  %v12550_v35 = vld [vmem:[%s20174_s29 + $0x230] sm:$0xf0]  ;;  %4599 = vmatpush.bf16.msra.mxu0 %v12329_v5 }
 0x334   : > { %v18047_v11 = vld [vmem:[%s20174_s29 + $0x414] sm:$0xf]  ;;  %v12553_v24 = vor.u32 %v17983_v10, %v12550_v35 }
 0x335   : > { %4637 = vmatpush.bf16.msra.mxu3 %v13129_v62  ;;  %v12806_v14 = vld [vmem:[%s20174_s29 + $0x430] sm:$0xf0]  ;;  %4612 = vmatpush.bf16.msra.mxu1 %v12585_v8 }
 0x336   : > { %v18111_v15 = vld [vmem:[%s20174_s29 + $0x614] sm:$0xf]  ;;  %v12809_v25 = vor.u32 %v18047_v11, %v12806_v14 }
 0x337   : > { %v13062_v16 = vld [vmem:[%s20174_s29 + $0x630] sm:$0xf0]  ;;  %4625 = vmatpush.bf16.msra.mxu2 %v12841_v9  ;;  %4600 = vmatpush.bf16.msra.mxu0 %v12297_v21  ;;  %v1500_v9 = vperm.slane %v20929_v1, 3 }
 0x338   : > { %v18231_v18 = vld [vmem:[%s20174_s29 + $0x9d4] sm:$0xf]  ;;  %v13065_v27 = vor.u32 %v18111_v15, %v13062_v16  ;;  %v4394_v16 = vpop.f32.mrf.mxu0 }
 0x339   : > { %v13542_v19 = vld [vmem:[%s20174_s29 + $0x9f0] sm:$0xf0]  ;;  %4638 = vmatpush.bf16.msra.mxu3 %v13097_v13  ;;  %4613 = vmatpush.bf16.msra.mxu1 %v12553_v24  ;;  %v4395_v21 = vadd.f32 %v4394_v16, %v1500_v9 }
 0x33a   : > { %v18295_v20 = vld [vmem:[%s20174_s29 + $0xbd4] sm:$0xf]  ;;  %v13545_v28 = vor.u32 %v18231_v18, %v13542_v19  ;;  %4601 = vmatmul.bf16.vlgmr.msra.gmra.mxu0 %v20369_v34 }
 0x33b   : > { %v13798_v22 = vld [vmem:[%s20174_s29 + $0xbf0] sm:$0xf0]  ;;  %4626 = vmatpush.bf16.msra.mxu2 %v12809_v25 }
 0x33c   : > { %v18359_v23 = vld [vmem:[%s20174_s29 + $0xdd4] sm:$0xf]  ;;  %v13801_v29 = vor.u32 %v18295_v20, %v13798_v22  ;;  %4645 = vmatpush.bf16.msrb.mxu0 %v13545_v28  ;;  %4614 = vmatmul.bf16.vlgmr.msra.gmra.mxu1 %v20376_v42  ;;  %v4407_v22 = vpop.f32.mrf.mxu1 }
 0x33d   : > { %v14054_v49 = vld [vmem:[%s20174_s29 + $0xdf0] sm:$0xf0]  ;;  %4639 = vmatpush.bf16.msra.mxu3 %v13065_v27  ;;  %v4408_v27 = vadd.f32 %v4407_v22, %v4395_v21  ;;  %v12524_v21 = vld [vmem:[%s20174_s29 + $0x1d8] sm:$0xf] }
 0x33e   : > { %v18423_v26 = vld [vmem:[%s20174_s29 + $0xfd4] sm:$0xf]  ;;  %v14057_v30 = vor.u32 %v18359_v23, %v14054_v49  ;;  %4658 = vmatpush.bf16.msrb.mxu1 %v13801_v29  ;;  %4627 = vmatmul.bf16.vlgmr.msra.gmra.mxu2 %v20367_v33  ;;  %v17980_v22 = vld [vmem:[%s20174_s29 + $0x1f4] sm:$0xf0] }
 0x33f   : > { %v14310_v51 = vld [vmem:[%s20174_s29 + $0xff0] sm:$0xf0] }
 0x340   : > { %v18223_v31 = vld [vmem:[%s20174_s29 + $0x994] sm:$0xf]  ;;  %v14313_v43 = vor.u32 %v18423_v26, %v14310_v51  ;;  %4671 = vmatpush.bf16.msrb.mxu2 %v14057_v30  ;;  %4640 = vmatmul.bf16.vlgmr.msra.gmra.mxu3 %v20374_v41 }
 0x341   : > { %v13510_v36 = vld [vmem:[%s20174_s29 + $0x9b0] sm:$0xf0] }
 0x342   : > { %v18287_v39 = vld [vmem:[%s20174_s29 + $0xb94] sm:$0xf]  ;;  %v13513_v53 = vor.u32 %v18223_v31, %v13510_v36  ;;  %4684 = vmatpush.bf16.msrb.mxu3 %v14313_v43  ;;  %v4420_v43 = vpop.f32.mrf.mxu2 }
 0x343   : > { %v13766_v44 = vld [vmem:[%s20174_s29 + $0xbb0] sm:$0xf0] }
 0x344   : > { %v18351_v45 = vld [vmem:[%s20174_s29 + $0xd94] sm:$0xf]  ;;  %v13769_v55 = vor.u32 %v18287_v39, %v13766_v44  ;;  %4646 = vmatpush.bf16.msrb.mxu0 %v13513_v53  ;;  %v4433_v53 = vpop.f32.mrf.mxu3 }
 0x345   : > { %v14022_v46 = vld [vmem:[%s20174_s29 + $0xdb0] sm:$0xf0] }
 0x346   : > { %v18415_v48 = vld [vmem:[%s20174_s29 + $0xf94] sm:$0xf]  ;;  %v14025_v56 = vor.u32 %v18351_v45, %v14022_v46  ;;  %4659 = vmatpush.bf16.msrb.mxu1 %v13769_v55 }
 0x347   : > { %v14278_v52 = vld [vmem:[%s20174_s29 + $0xfb0] sm:$0xf0] }
 0x348   : > { %v18215_v57 = vld [vmem:[%s20174_s29 + $0x954] sm:$0xf]  ;;  %v14281_v60 = vor.u32 %v18415_v48, %v14278_v52  ;;  %4672 = vmatpush.bf16.msrb.mxu2 %v14025_v56  ;;  %v4421_v52 = vadd.f32 %v4420_v43, %v4408_v27  ;;  %v12492_v43 = vld [vmem:[%s20174_s29 + $0x198] sm:$0xf] }
 0x349   : > { %v13478_v58 = vld [vmem:[%s20174_s29 + $0x970] sm:$0xf0] }
 0x34a   : > { %v18279_v59 = vld [vmem:[%s20174_s29 + $0xb54] sm:$0xf]  ;;  %v13481_v3 = vor.u32 %v18215_v57, %v13478_v58  ;;  %4685 = vmatpush.bf16.msrb.mxu3 %v14281_v60  ;;  %v21095_v58 = vadd.f32 %v4433_v53, %v4421_v52  ;;  %v4422_v16 = vpop.f32.mrf.mxu2  ;;  %v13004_v52 = vld [vmem:[%s20174_s29 + $0x598] sm:$0xf] }
 0x34b   : > { %v13734_v61 = vld [vmem:[%s20174_s29 + $0xb70] sm:$0xf0]  ;;  %v18100_v53 = vld [vmem:[%s20174_s29 + $0x5b4] sm:$0xf0] }
 0x34c   : > { %v18343_v62 = vld [vmem:[%s20174_s29 + $0xd54] sm:$0xf]  ;;  %v13737_v5 = vor.u32 %v18279_v59, %v13734_v61  ;;  %4647 = vmatpush.bf16.msrb.mxu0 %v13481_v3  ;;  %v4396_v59 = vpop.f32.mrf.mxu0  ;;  %v13196_v16 = vld [vmem:[%s20174_s29 + $0x718] sm:$0xf] }
 0x34d   : > { %v13990_v63 = vld [vmem:[%s20174_s29 + $0xd70] sm:$0xf0] }
 0x34e   : > { %v18407_v0 = vld [vmem:[%s20174_s29 + $0xf54] sm:$0xf]  ;;  %v13993_v6 = vor.u32 %v18343_v62, %v13990_v63  ;;  %4660 = vmatpush.bf16.msrb.mxu1 %v13737_v5 }
 0x34f   : > { %v14246_v2 = vld [vmem:[%s20174_s29 + $0xf70] sm:$0xf0] }
 0x350   : > { %v18207_v4 = vld [vmem:[%s20174_s29 + $0x914] sm:$0xf]  ;;  %v14249_v10 = vor.u32 %v18407_v0, %v14246_v2  ;;  %4673 = vmatpush.bf16.msrb.mxu2 %v13993_v6  ;;  %v4409_v2 = vpop.f32.mrf.mxu1 }
 0x351   : > { %v13446_v7 = vld [vmem:[%s20174_s29 + $0x930] sm:$0xf0]  ;;  %v18028_v2 = vld [vmem:[%s20174_s29 + $0x374] sm:$0xf0] }
 0x352   : > { %v18271_v8 = vld [vmem:[%s20174_s29 + $0xb14] sm:$0xf]  ;;  %v13449_v15 = vor.u32 %v18207_v4, %v13446_v7  ;;  %4686 = vmatpush.bf16.msrb.mxu3 %v14249_v10 }
 0x353   : > { %v13702_v35 = vld [vmem:[%s20174_s29 + $0xb30] sm:$0xf0] }
 0x354   : > { %v18335_v11 = vld [vmem:[%s20174_s29 + $0xd14] sm:$0xf]  ;;  %v13705_v1 = vor.u32 %v18271_v8, %v13702_v35  ;;  %4648 = vmatpush.bf16.msrb.mxu0 %v13449_v15 }
 0x355   : > { %v13958_v12 = vld [vmem:[%s20174_s29 + $0xd30] sm:$0xf0] }
 0x356   : > { %v18399_v13 = vld [vmem:[%s20174_s29 + $0xf14] sm:$0xf]  ;;  %v13961_v17 = vor.u32 %v18335_v11, %v13958_v12  ;;  %4661 = vmatpush.bf16.msrb.mxu1 %v13705_v1 }
 0x357   : > { %v14214_v14 = vld [vmem:[%s20174_s29 + $0xf30] sm:$0xf0] }
 0x358   : > { %v18199_v18 = vld [vmem:[%s20174_s29 + $0x8d4] sm:$0xf]  ;;  %v14217_v23 = vor.u32 %v18399_v13, %v14214_v14  ;;  %4674 = vmatpush.bf16.msrb.mxu2 %v13961_v17 }
 0x359   : > { %v13414_v19 = vld [vmem:[%s20174_s29 + $0x8f0] sm:$0xf0] }
 0x35a   : > { %v18263_v20 = vld [vmem:[%s20174_s29 + $0xad4] sm:$0xf]  ;;  %v13417_v28 = vor.u32 %v18199_v18, %v13414_v19  ;;  %4687 = vmatpush.bf16.msrb.mxu3 %v14217_v23  ;;  %v12780_v23 = vld [vmem:[%s20174_s29 + $0x3d8] sm:$0xf] }
 0x35b   : > { %v13670_v49 = vld [vmem:[%s20174_s29 + $0xaf0] sm:$0xf0] }
 0x35c   : > { %v18327_v24 = vld [vmem:[%s20174_s29 + $0xcd4] sm:$0xf]  ;;  %v13673_v29 = vor.u32 %v18263_v20, %v13670_v49  ;;  %4649 = vmatpush.bf16.msrb.mxu0 %v13417_v28  ;;  %v4435_v20 = vpop.f32.mrf.mxu3  ;;  %v13292_v28 = vld [vmem:[%s20174_s29 + $0x7d8] sm:$0xf] }
 0x35d   : > { %v13926_v25 = vld [vmem:[%s20174_s29 + $0xcf0] sm:$0xf0] }
 0x35e   : > { %v18391_v26 = vld [vmem:[%s20174_s29 + $0xed4] sm:$0xf]  ;;  %v13929_v30 = vor.u32 %v18327_v24, %v13926_v25  ;;  %4662 = vmatpush.bf16.msrb.mxu1 %v13673_v29  ;;  %v18044_v24 = vld [vmem:[%s20174_s29 + $0x3f4] sm:$0xf0] }
 0x35f   : > { %v14182_v51 = vld [vmem:[%s20174_s29 + $0xef0] sm:$0xf0]  ;;  %v13036_v25 = vld [vmem:[%s20174_s29 + $0x5d8] sm:$0xf] }
 0x360   : > { %v18191_v31 = vld [vmem:[%s20174_s29 + $0x894] sm:$0xf]  ;;  %v14185_v44 = vor.u32 %v18391_v26, %v14182_v51  ;;  %4675 = vmatpush.bf16.msrb.mxu2 %v13929_v30  ;;  %v18108_v26 = vld [vmem:[%s20174_s29 + $0x5f4] sm:$0xf0] }
 0x361   : > { %v13382_v36 = vld [vmem:[%s20174_s29 + $0x8b0] sm:$0xf0]  ;;  %v18172_v29 = vld [vmem:[%s20174_s29 + $0x7f4] sm:$0xf0] }
 0x362   : > { %v18255_v39 = vld [vmem:[%s20174_s29 + $0xa94] sm:$0xf]  ;;  %v13385_v57 = vor.u32 %v18191_v31, %v13382_v36  ;;  %4688 = vmatpush.bf16.msrb.mxu3 %v14185_v44  ;;  %v12525_v31 = vor.u32 %v17980_v22, %v12524_v21  ;;  %v12781_v36 = vor.u32 %v18044_v24, %v12780_v23  ;;  %v17972_v44 = vld [vmem:[%s20174_s29 + $0x1b4] sm:$0xf0]  ;;  %v4459_v24 = vpop.f32.mrf.mxu1 }
 0x363   : > { %v13638_v45 = vld [vmem:[%s20174_s29 + $0xab0] sm:$0xf0]  ;;  %v12396_v21 = vld [vmem:[%s20174_s29 + $0xd8] sm:$0xf] }
 0x364   : > { %v18319_v46 = vld [vmem:[%s20174_s29 + $0xc94] sm:$0xf]  ;;  %v13641_v60 = vor.u32 %v18255_v39, %v13638_v45  ;;  %4650 = vmatpush.bf16.msrb.mxu0 %v13385_v57  ;;  %v13037_v39 = vor.u32 %v18108_v26, %v13036_v25  ;;  %v12748_v45 = vld [vmem:[%s20174_s29 + $0x398] sm:$0xf]  ;;  %v12493_v57 = vor.u32 %v17972_v44, %v12492_v43 }
 0x365   : > { %v13894_v48 = vld [vmem:[%s20174_s29 + $0xcb0] sm:$0xf0]  ;;  %v17948_v22 = vld [vmem:[%s20174_s29 + $0xf4] sm:$0xf0] }
 0x366   : > { %v18383_v55 = vld [vmem:[%s20174_s29 + $0xe94] sm:$0xf]  ;;  %v13897_v61 = vor.u32 %v18319_v46, %v13894_v48  ;;  %4663 = vmatpush.bf16.msrb.mxu1 %v13641_v60  ;;  %v13293_v46 = vor.u32 %v18172_v29, %v13292_v28  ;;  %v18036_v48 = vld [vmem:[%s20174_s29 + $0x3b4] sm:$0xf0]  ;;  %v13005_v60 = vor.u32 %v18100_v53, %v13004_v52 }
 0x367   : > { %v14150_v56 = vld [vmem:[%s20174_s29 + $0xeb0] sm:$0xf0]  ;;  %v12749_v59 = vor.u32 %v18036_v48, %v12748_v45  ;;  %v12652_v23 = vld [vmem:[%s20174_s29 + $0x2d8] sm:$0xf]  ;;  %v4472_v45 = vpop.f32.mrf.mxu2 }
 0x368   : > { %v18183_v62 = vld [vmem:[%s20174_s29 + $0x854] sm:$0xf]  ;;  %v14153_v3 = vor.u32 %v18383_v55, %v14150_v56  ;;  %4676 = vmatpush.bf16.msrb.mxu2 %v13897_v61  ;;  %v13260_v55 = vld [vmem:[%s20174_s29 + $0x798] sm:$0xf] }
 0x369   : > { %v13350_v63 = vld [vmem:[%s20174_s29 + $0x870] sm:$0xf0]  ;;  %v18164_v56 = vld [vmem:[%s20174_s29 + $0x7b4] sm:$0xf0] }
 0x36a   : > { %v18247_v0 = vld [vmem:[%s20174_s29 + $0xa54] sm:$0xf]  ;;  %v13353_v9 = vor.u32 %v18183_v62, %v13350_v63  ;;  %4689 = vmatpush.bf16.msrb.mxu3 %v14153_v3  ;;  %v12460_v61 = vld [vmem:[%s20174_s29 + $0x158] sm:$0xf] }
 0x36b   : > { %v13606_v4 = vld [vmem:[%s20174_s29 + $0xa70] sm:$0xf0]  ;;  %v17964_v62 = vld [vmem:[%s20174_s29 + $0x174] sm:$0xf0] }
 0x36c   : > { %v18311_v5 = vld [vmem:[%s20174_s29 + $0xc54] sm:$0xf]  ;;  %v13609_v11 = vor.u32 %v18247_v0, %v13606_v4  ;;  %4651 = vmatpush.bf16.msrb.mxu0 %v13353_v9  ;;  %v12716_v63 = vld [vmem:[%s20174_s29 + $0x358] sm:$0xf]  ;;  %v13261_v0 = vor.u32 %v18164_v56, %v13260_v55  ;;  %v4485_v56 = vpop.f32.mrf.mxu3 }
 0x36d   : > { %v13862_v6 = vld [vmem:[%s20174_s29 + $0xc70] sm:$0xf0]  ;;  %v12972_v3 = vld [vmem:[%s20174_s29 + $0x558] sm:$0xf] }
 0x36e   : > { %v18375_v7 = vld [vmem:[%s20174_s29 + $0xe54] sm:$0xf]  ;;  %v13865_v12 = vor.u32 %v18311_v5, %v13862_v6  ;;  %4664 = vmatpush.bf16.msrb.mxu1 %v13609_v11  ;;  %v18092_v4 = vld [vmem:[%s20174_s29 + $0x574] sm:$0xf0] }
 0x36f   : > { %v14118_v8 = vld [vmem:[%s20174_s29 + $0xe70] sm:$0xf0]  ;;  %v13228_v5 = vld [vmem:[%s20174_s29 + $0x758] sm:$0xf]  ;;  %v12973_v9 = vor.u32 %v18092_v4, %v12972_v3 }
 0x370   : > { %v18175_v10 = vld [vmem:[%s20174_s29 + $0x814] sm:$0xf]  ;;  %v14121_v1 = vor.u32 %v18375_v7, %v14118_v8  ;;  %4677 = vmatpush.bf16.msrb.mxu2 %v13865_v12  ;;  %v18156_v6 = vld [vmem:[%s20174_s29 + $0x774] sm:$0xf0]  ;;  %v12461_v7 = vor.u32 %v17964_v62, %v12460_v61  ;;  %v12717_v8 = vor.u32 %v18028_v2, %v12716_v63 }
 0x371   : > { %v13318_v35 = vld [vmem:[%s20174_s29 + $0x830] sm:$0xf0]  ;;  %v12684_v11 = vld [vmem:[%s20174_s29 + $0x318] sm:$0xf]  ;;  %v13229_v12 = vor.u32 %v18156_v6, %v13228_v5  ;;  %v4461_v5 = vpop.f32.mrf.mxu1 }
 0x372   : > { %v18239_v13 = vld [vmem:[%s20174_s29 + $0xa14] sm:$0xf]  ;;  %v13321_v49 = vor.u32 %v18175_v10, %v13318_v35  ;;  %4690 = vmatpush.bf16.msrb.mxu3 %v14121_v1  ;;  %v12428_v10 = vld [vmem:[%s20174_s29 + $0x118] sm:$0xf] }
 0x373   : > { %v13574_v14 = vld [vmem:[%s20174_s29 + $0xa30] sm:$0xf0]  ;;  %v17956_v35 = vld [vmem:[%s20174_s29 + $0x134] sm:$0xf0] }
 0x374   : > { %v18303_v15 = vld [vmem:[%s20174_s29 + $0xc14] sm:$0xf]  ;;  %v13577_v51 = vor.u32 %v18239_v13, %v13574_v14  ;;  %4652 = vmatpush.bf16.msrb.mxu0 %v13321_v49  ;;  %v18020_v13 = vld [vmem:[%s20174_s29 + $0x334] sm:$0xf0] }
 0x375   : > { %v13830_v17 = vld [vmem:[%s20174_s29 + $0xc30] sm:$0xf0]  ;;  %v12940_v14 = vld [vmem:[%s20174_s29 + $0x518] sm:$0xf] }
 0x376   : > { %v18367_v18 = vld [vmem:[%s20174_s29 + $0xe14] sm:$0xf]  ;;  %v13833_v27 = vor.u32 %v18303_v15, %v13830_v17  ;;  %4665 = vmatpush.bf16.msrb.mxu1 %v13577_v51  ;;  %v18084_v15 = vld [vmem:[%s20174_s29 + $0x534] sm:$0xf0]  ;;  %v12429_v17 = vor.u32 %v17956_v35, %v12428_v10 }
 0x377   : > { %v14086_v19 = vld [vmem:[%s20174_s29 + $0xe30] sm:$0xf0]  ;;  %4653 = vmatmul.bf16.vlgmr.msrb.gmra.mxu0 %v20419_v37  ;;  %v18148_v1 = vld [vmem:[%s20174_s29 + $0x734] sm:$0xf0]  ;;  %v12941_v20 = vor.u32 %v18084_v15, %v12940_v14 }
 0x378   : > { %v14089_v30 = vor.u32 %v18367_v18, %v14086_v19  ;;  %4678 = vmatpush.bf16.msrb.mxu2 %v13833_v27  ;;  %4697 = vmatpush.bf16.msra.mxu0 %v12525_v31  ;;  %v4446_v18 = vpop.f32.mrf.mxu0  ;;  %v12685_v19 = vor.u32 %v18020_v13, %v12684_v11  ;;  %v13197_v25 = vor.u32 %v18148_v1, %v13196_v16  ;;  %v18012_v26 = vld [vmem:[%s20174_s29 + $0x2f4] sm:$0xf0] }
 0x379   : > { %4666 = vmatmul.bf16.vlgmr.msrb.gmra.mxu1 %v20423_v40  ;;  %v4447_v49 = vadd.f32 %v4446_v18, %v21095_v58  ;;  %v12908_v51 = vld [vmem:[%s20174_s29 + $0x4d8] sm:$0xf]  ;;  %v12397_v31 = vor.u32 %v17948_v22, %v12396_v21  ;;  %v12653_v58 = vor.u32 %v18012_v26, %v12652_v23  ;;  %v4474_v18 = vpop.f32.mrf.mxu2  ;;  %v4487_v23 = vpop.f32.mrf.mxu3 }
 0x37a   : > { %4691 = vmatpush.bf16.msrb.mxu3 %v14089_v30  ;;  %4710 = vmatpush.bf16.msra.mxu1 %v12781_v36  ;;  %v18076_v27 = vld [vmem:[%s20174_s29 + $0x4f4] sm:$0xf0] }
 0x37b   : > { %4679 = vmatmul.bf16.vlgmr.msrb.gmra.mxu2 %v20415_v32  ;;  %v13164_v28 = vld [vmem:[%s20174_s29 + $0x6d8] sm:$0xf]  ;;  %v4460_v30 = vadd.f32 %v4459_v24, %v4447_v49  ;;  %v12909_v36 = vor.u32 %v18076_v27, %v12908_v51 }
 0x37c   : > { %4723 = vmatpush.bf16.msra.mxu2 %v13037_v39  ;;  %4698 = vmatpush.bf16.msra.mxu0 %v12493_v57  ;;  %v18140_v29 = vld [vmem:[%s20174_s29 + $0x6f4] sm:$0xf0] }
 0x37d   : > { %4692 = vmatmul.bf16.vlgmr.msrb.gmra.mxu3 %v20421_v38  ;;  %v12364_v39 = vld [vmem:[%s20174_s29 + $0x98] sm:$0xf]  ;;  %v4473_v55 = vadd.f32 %v4472_v45, %v4460_v30 }
 0x37e   : > { %4736 = vmatpush.bf16.msra.mxu3 %v13293_v46  ;;  %4711 = vmatpush.bf16.msra.mxu1 %v12749_v59  ;;  %v17940_v43 = vld [vmem:[%s20174_s29 + $0xb4] sm:$0xf0]  ;;  %v13165_v46 = vor.u32 %v18140_v29, %v13164_v28 }
 0x37f   : > { %v12620_v44 = vld [vmem:[%s20174_s29 + $0x298] sm:$0xf]  ;;  %v21166_v61 = vadd.f32 %v4485_v56, %v4473_v55 }
 0x380   : > { %4724 = vmatpush.bf16.msra.mxu2 %v13005_v60  ;;  %4699 = vmatpush.bf16.msra.mxu0 %v12461_v7  ;;  %v18004_v48 = vld [vmem:[%s20174_s29 + $0x2b4] sm:$0xf0]  ;;  %v12365_v60 = vor.u32 %v17940_v43, %v12364_v39  ;;  %v4448_v62 = vpop.f32.mrf.mxu0 }
 0x381   : > { %v12876_v52 = vld [vmem:[%s20174_s29 + $0x498] sm:$0xf]  ;;  %v12621_v63 = vor.u32 %v18004_v48, %v12620_v44 }
 0x382   : > { %4737 = vmatpush.bf16.msra.mxu3 %v13261_v0  ;;  %4712 = vmatpush.bf16.msra.mxu1 %v12717_v8  ;;  %v18068_v53 = vld [vmem:[%s20174_s29 + $0x4b4] sm:$0xf0] }
 0x383   : > { %v13132_v57 = vld [vmem:[%s20174_s29 + $0x698] sm:$0xf]  ;;  %v12877_v0 = vor.u32 %v18068_v53, %v12876_v52 }
 0x384   : > { %4725 = vmatpush.bf16.msra.mxu2 %v12973_v9  ;;  %4700 = vmatpush.bf16.msra.mxu0 %v12429_v17  ;;  %v18132_v59 = vld [vmem:[%s20174_s29 + $0x6b4] sm:$0xf0] }
 0x385   : > { %v12332_v2 = vld [vmem:[%s20174_s29 + $0x58] sm:$0xf]  ;;  %v13133_v6 = vor.u32 %v18132_v59, %v13132_v57 }
 0x386   : > { %4738 = vmatpush.bf16.msra.mxu3 %v13229_v12  ;;  %4713 = vmatpush.bf16.msra.mxu1 %v12685_v19  ;;  %v17932_v3 = vld [vmem:[%s20174_s29 + $0x74] sm:$0xf0] }
 0x387   : > { %v12588_v4 = vld [vmem:[%s20174_s29 + $0x258] sm:$0xf]  ;;  %v12333_v11 = vor.u32 %v17932_v3, %v12332_v2 }
 0x388   : > { %4726 = vmatpush.bf16.msra.mxu2 %v12941_v20  ;;  %4701 = vmatpush.bf16.msra.mxu0 %v12397_v31  ;;  %v17996_v7 = vld [vmem:[%s20174_s29 + $0x274] sm:$0xf0]  ;;  %v4498_v23 = vpop.f32.mrf.mxu0 }
 0x389   : > { %v12844_v8 = vld [vmem:[%s20174_s29 + $0x458] sm:$0xf]  ;;  %v12589_v14 = vor.u32 %v17996_v7, %v12588_v4 }
 0x38a   : > { %4739 = vmatpush.bf16.msra.mxu3 %v13197_v25  ;;  %4714 = vmatpush.bf16.msra.mxu1 %v12653_v58  ;;  %v18060_v9 = vld [vmem:[%s20174_s29 + $0x474] sm:$0xf0] }
 0x38b   : > { %v13100_v10 = vld [vmem:[%s20174_s29 + $0x658] sm:$0xf]  ;;  %v12845_v15 = vor.u32 %v18060_v9, %v12844_v8 }
 0x38c   : > { %4727 = vmatpush.bf16.msra.mxu2 %v12909_v36  ;;  %v18124_v35 = vld [vmem:[%s20174_s29 + $0x674] sm:$0xf0]  ;;  %4702 = vmatpush.bf16.msra.mxu0 %v12365_v60 }
 0x38d   : > { %v12300_v12 = vld [vmem:[%s20174_s29 + $0x18] sm:$0xf]  ;;  %v13101_v19 = vor.u32 %v18124_v35, %v13100_v10 }
 0x38e   : > { %4740 = vmatpush.bf16.msra.mxu3 %v13165_v46  ;;  %v17924_v13 = vld [vmem:[%s20174_s29 + $0x34] sm:$0xf0]  ;;  %4715 = vmatpush.bf16.msra.mxu1 %v12621_v63 }
 0x38f   : > { %v12556_v16 = vld [vmem:[%s20174_s29 + $0x218] sm:$0xf]  ;;  %v12301_v26 = vor.u32 %v17924_v13, %v12300_v12 }
 0x390   : > { %4728 = vmatpush.bf16.msra.mxu2 %v12877_v0  ;;  %v17988_v1 = vld [vmem:[%s20174_s29 + $0x234] sm:$0xf0]  ;;  %4703 = vmatpush.bf16.msra.mxu0 %v12333_v11 }
 0x391   : > { %v12812_v17 = vld [vmem:[%s20174_s29 + $0x418] sm:$0xf]  ;;  %v12557_v29 = vor.u32 %v17988_v1, %v12556_v16 }
 0x392   : > { %4741 = vmatpush.bf16.msra.mxu3 %v13133_v6  ;;  %v18052_v20 = vld [vmem:[%s20174_s29 + $0x434] sm:$0xf0]  ;;  %4716 = vmatpush.bf16.msra.mxu1 %v12589_v14 }
 0x393   : > { %v13068_v21 = vld [vmem:[%s20174_s29 + $0x618] sm:$0xf]  ;;  %v12813_v30 = vor.u32 %v18052_v20, %v12812_v17 }
 0x394   : > { %v18116_v22 = vld [vmem:[%s20174_s29 + $0x634] sm:$0xf0]  ;;  %4729 = vmatpush.bf16.msra.mxu2 %v12845_v15  ;;  %4704 = vmatpush.bf16.msra.mxu0 %v12301_v26  ;;  %v21216_v15 = vld [vmem:[%s20188_s14] sm:$0xff] }
 0x395   : > { %v13548_v49 = vld [vmem:[%s20174_s29 + $0x9d8] sm:$0xf]  ;;  %v13069_v36 = vor.u32 %v18116_v22, %v13068_v21  ;;  %v1501_v16 = vperm.slane %v21216_v15, 4 }
 0x396   : > { %v18236_v24 = vld [vmem:[%s20174_s29 + $0x9f4] sm:$0xf0]  ;;  %4742 = vmatpush.bf16.msra.mxu3 %v13101_v19  ;;  %4717 = vmatpush.bf16.msra.mxu1 %v12557_v29 }
 0x397   : > { %v13804_v25 = vld [vmem:[%s20174_s29 + $0xbd8] sm:$0xf]  ;;  %v13549_v39 = vor.u32 %v18236_v24, %v13548_v49  ;;  %4705 = vmatmul.bf16.vlgmr.msra.gmra.mxu0 %v20369_v34 }
 0x398   : > { %v18300_v51 = vld [vmem:[%s20174_s29 + $0xbf4] sm:$0xf0]  ;;  %4730 = vmatpush.bf16.msra.mxu2 %v12813_v30 }
 0x399   : > { %v14060_v27 = vld [vmem:[%s20174_s29 + $0xdd8] sm:$0xf]  ;;  %v13805_v43 = vor.u32 %v18300_v51, %v13804_v25  ;;  %4749 = vmatpush.bf16.msrb.mxu0 %v13549_v39  ;;  %4718 = vmatmul.bf16.vlgmr.msra.gmra.mxu1 %v20376_v42 }
 0x39a   : > { %v18364_v28 = vld [vmem:[%s20174_s29 + $0xdf4] sm:$0xf0]  ;;  %4743 = vmatpush.bf16.msra.mxu3 %v13069_v36 }
 0x39b   : > { %v14316_v31 = vld [vmem:[%s20174_s29 + $0xfd8] sm:$0xf]  ;;  %v14061_v44 = vor.u32 %v18364_v28, %v14060_v27  ;;  %4762 = vmatpush.bf16.msrb.mxu1 %v13805_v43  ;;  %4731 = vmatmul.bf16.vlgmr.msra.gmra.mxu2 %v20367_v33  ;;  %v4499_v27 = vadd.f32 %v4498_v23, %v1501_v16  ;;  %v4511_v28 = vpop.f32.mrf.mxu1 }
 0x39c   : > { %v18428_v58 = vld [vmem:[%s20174_s29 + $0xff4] sm:$0xf0] }
 0x39d   : > { %v13516_v45 = vld [vmem:[%s20174_s29 + $0x998] sm:$0xf]  ;;  %v14317_v52 = vor.u32 %v18428_v58, %v14316_v31  ;;  %4775 = vmatpush.bf16.msrb.mxu2 %v14061_v44  ;;  %4744 = vmatmul.bf16.vlgmr.msra.gmra.mxu3 %v20374_v41  ;;  %v4512_v43 = vadd.f32 %v4511_v28, %v4499_v27 }
 0x39e   : > { %v18228_v46 = vld [vmem:[%s20174_s29 + $0x9b4] sm:$0xf0] }
 0x39f   : > { %v13772_v48 = vld [vmem:[%s20174_s29 + $0xb98] sm:$0xf]  ;;  %v13517_v60 = vor.u32 %v18228_v46, %v13516_v45  ;;  %4788 = vmatpush.bf16.msrb.mxu3 %v14317_v52 }
 0x3a0   : > { %v18292_v53 = vld [vmem:[%s20174_s29 + $0xbb4] sm:$0xf0] }
 0x3a1   : > { %v14028_v55 = vld [vmem:[%s20174_s29 + $0xd98] sm:$0xf]  ;;  %v13773_v62 = vor.u32 %v18292_v53, %v13772_v48  ;;  %4750 = vmatpush.bf16.msrb.mxu0 %v13517_v60 }
 0x3a2   : > { %v18356_v56 = vld [vmem:[%s20174_s29 + $0xdb4] sm:$0xf0] }
 0x3a3   : > { %v14284_v57 = vld [vmem:[%s20174_s29 + $0xf98] sm:$0xf]  ;;  %v14029_v63 = vor.u32 %v18356_v56, %v14028_v55  ;;  %4763 = vmatpush.bf16.msrb.mxu1 %v13773_v62  ;;  %v4524_v55 = vpop.f32.mrf.mxu2 }
 0x3a4   : > { %v18420_v59 = vld [vmem:[%s20174_s29 + $0xfb4] sm:$0xf0]  ;;  %v4525_v62 = vadd.f32 %v4524_v55, %v4512_v43  ;;  %v13038_v43 = vld [vmem:[%s20174_s29 + $0x5f8] sm:$0xf0] }
 0x3a5   : > { %v13484_v0 = vld [vmem:[%s20174_s29 + $0x958] sm:$0xf]  ;;  %v14285_v4 = vor.u32 %v18420_v59, %v14284_v57  ;;  %4776 = vmatpush.bf16.msrb.mxu2 %v14029_v63  ;;  %v4537_v63 = vpop.f32.mrf.mxu3 }
 0x3a6   : > { %v18220_v2 = vld [vmem:[%s20174_s29 + $0x974] sm:$0xf0] }
 0x3a7   : > { %v13740_v3 = vld [vmem:[%s20174_s29 + $0xb58] sm:$0xf]  ;;  %v13485_v10 = vor.u32 %v18220_v2, %v13484_v0  ;;  %4789 = vmatpush.bf16.msrb.mxu3 %v14285_v4  ;;  %v21240_v4 = vadd.f32 %v4537_v63, %v4525_v62  ;;  %v12750_v63 = vld [vmem:[%s20174_s29 + $0x3b8] sm:$0xf0] }
 0x3a8   : > { %v18284_v5 = vld [vmem:[%s20174_s29 + $0xb74] sm:$0xf0] }
 0x3a9   : > { %v13996_v6 = vld [vmem:[%s20174_s29 + $0xd58] sm:$0xf]  ;;  %v13741_v11 = vor.u32 %v18284_v5, %v13740_v3  ;;  %4751 = vmatpush.bf16.msrb.mxu0 %v13485_v10  ;;  %v4500_v5 = vpop.f32.mrf.mxu0 }
 0x3aa   : > { %v18348_v7 = vld [vmem:[%s20174_s29 + $0xd74] sm:$0xf0]  ;;  %v13262_v5 = vld [vmem:[%s20174_s29 + $0x7b8] sm:$0xf0] }
 0x3ab   : > { %v14252_v8 = vld [vmem:[%s20174_s29 + $0xf58] sm:$0xf]  ;;  %v13997_v12 = vor.u32 %v18348_v7, %v13996_v6  ;;  %4764 = vmatpush.bf16.msrb.mxu1 %v13741_v11 }
 0x3ac   : > { %v18412_v9 = vld [vmem:[%s20174_s29 + $0xf74] sm:$0xf0] }
 0x3ad   : > { %v13452_v35 = vld [vmem:[%s20174_s29 + $0x918] sm:$0xf]  ;;  %v14253_v1 = vor.u32 %v18412_v9, %v14252_v8  ;;  %4777 = vmatpush.bf16.msrb.mxu2 %v13997_v12  ;;  %v4539_v28 = vpop.f32.mrf.mxu3 }
 0x3ae   : > { %v18212_v13 = vld [vmem:[%s20174_s29 + $0x934] sm:$0xf0] }
 0x3af   : > { %v13708_v14 = vld [vmem:[%s20174_s29 + $0xb18] sm:$0xf]  ;;  %v13453_v22 = vor.u32 %v18212_v13, %v13452_v35  ;;  %4790 = vmatpush.bf16.msrb.mxu3 %v14253_v1  ;;  %v4513_v35 = vpop.f32.mrf.mxu1 }
 0x3b0   : > { %v18276_v17 = vld [vmem:[%s20174_s29 + $0xb34] sm:$0xf0]  ;;  %v18024_v35 = vld [vmem:[%s20174_s29 + $0x35c] sm:$0xf] }
 0x3b1   : > { %v13964_v18 = vld [vmem:[%s20174_s29 + $0xd18] sm:$0xf]  ;;  %v13709_v49 = vor.u32 %v18276_v17, %v13708_v14  ;;  %4752 = vmatpush.bf16.msrb.mxu0 %v13453_v22  ;;  %v4550_v28 = vpop.f32.mrf.mxu0 }
 0x3b2   : > { %v18340_v19 = vld [vmem:[%s20174_s29 + $0xd34] sm:$0xf0] }
 0x3b3   : > { %v14220_v20 = vld [vmem:[%s20174_s29 + $0xf18] sm:$0xf]  ;;  %v13965_v24 = vor.u32 %v18340_v19, %v13964_v18  ;;  %4765 = vmatpush.bf16.msrb.mxu1 %v13709_v49 }
 0x3b4   : > { %v18404_v21 = vld [vmem:[%s20174_s29 + $0xf34] sm:$0xf0] }
 0x3b5   : > { %v13420_v25 = vld [vmem:[%s20174_s29 + $0x8d8] sm:$0xf]  ;;  %v14221_v29 = vor.u32 %v18404_v21, %v14220_v20  ;;  %4778 = vmatpush.bf16.msrb.mxu2 %v13965_v24  ;;  %v4526_v24 = vpop.f32.mrf.mxu2 }
 0x3b6   : > { %v18204_v26 = vld [vmem:[%s20174_s29 + $0x8f4] sm:$0xf0]  ;;  %v18080_v24 = vld [vmem:[%s20174_s29 + $0x51c] sm:$0xf] }
 0x3b7   : > { %v13676_v51 = vld [vmem:[%s20174_s29 + $0xad8] sm:$0xf]  ;;  %v13421_v44 = vor.u32 %v18204_v26, %v13420_v25  ;;  %4791 = vmatpush.bf16.msrb.mxu3 %v14221_v29  ;;  %v17976_v29 = vld [vmem:[%s20174_s29 + $0x1dc] sm:$0xf] }
 0x3b8   : > { %v18268_v30 = vld [vmem:[%s20174_s29 + $0xaf4] sm:$0xf0] }
 0x3b9   : > { %v13932_v31 = vld [vmem:[%s20174_s29 + $0xcd8] sm:$0xf]  ;;  %v13677_v45 = vor.u32 %v18268_v30, %v13676_v51  ;;  %4753 = vmatpush.bf16.msrb.mxu0 %v13421_v44  ;;  %v12526_v30 = vld [vmem:[%s20174_s29 + $0x1f8] sm:$0xf0] }
 0x3ba   : > { %v18332_v58 = vld [vmem:[%s20174_s29 + $0xcf4] sm:$0xf0] }
 0x3bb   : > { %v14188_v36 = vld [vmem:[%s20174_s29 + $0xed8] sm:$0xf]  ;;  %v13933_v46 = vor.u32 %v18332_v58, %v13932_v31  ;;  %4766 = vmatpush.bf16.msrb.mxu1 %v13677_v45  ;;  %v18040_v31 = vld [vmem:[%s20174_s29 + $0x3dc] sm:$0xf] }
 0x3bc   : > { %v18396_v39 = vld [vmem:[%s20174_s29 + $0xef4] sm:$0xf0] }
 0x3bd   : > { %v13388_v48 = vld [vmem:[%s20174_s29 + $0x898] sm:$0xf]  ;;  %v14189_v56 = vor.u32 %v18396_v39, %v14188_v36  ;;  %4779 = vmatpush.bf16.msrb.mxu2 %v13933_v46  ;;  %v12782_v36 = vld [vmem:[%s20174_s29 + $0x3f8] sm:$0xf0] }
 0x3be   : > { %v18196_v52 = vld [vmem:[%s20174_s29 + $0x8b4] sm:$0xf0]  ;;  %v18104_v39 = vld [vmem:[%s20174_s29 + $0x5dc] sm:$0xf]  ;;  %v12785_v55 = vor.u32 %v18040_v31, %v12782_v36 }
 0x3bf   : > { %v13644_v53 = vld [vmem:[%s20174_s29 + $0xa98] sm:$0xf]  ;;  %v13389_v3 = vor.u32 %v18196_v52, %v13388_v48  ;;  %4792 = vmatpush.bf16.msrb.mxu3 %v14189_v56  ;;  %v18168_v46 = vld [vmem:[%s20174_s29 + $0x7dc] sm:$0xf]  ;;  %v13041_v56 = vor.u32 %v18104_v39, %v13038_v43  ;;  %v4551_v39 = vadd.f32 %v4550_v28, %v21240_v4  ;;  %v4563_v43 = vpop.f32.mrf.mxu1 }
 0x3c0   : > { %v18260_v57 = vld [vmem:[%s20174_s29 + $0xab4] sm:$0xf0]  ;;  %v13294_v48 = vld [vmem:[%s20174_s29 + $0x7f8] sm:$0xf0] }
 0x3c1   : > { %v13900_v59 = vld [vmem:[%s20174_s29 + $0xc98] sm:$0xf]  ;;  %v13645_v6 = vor.u32 %v18260_v57, %v13644_v53  ;;  %4754 = vmatpush.bf16.msrb.mxu0 %v13389_v3  ;;  %v12529_v53 = vor.u32 %v17976_v29, %v12526_v30  ;;  %v17968_v57 = vld [vmem:[%s20174_s29 + $0x19c] sm:$0xf]  ;;  %v13297_v62 = vor.u32 %v18168_v46, %v13294_v48 }
 0x3c2   : > { %v18324_v60 = vld [vmem:[%s20174_s29 + $0xcb4] sm:$0xf0]  ;;  %v18160_v3 = vld [vmem:[%s20174_s29 + $0x79c] sm:$0xf] }
 0x3c3   : > { %v14156_v0 = vld [vmem:[%s20174_s29 + $0xe98] sm:$0xf]  ;;  %v13901_v7 = vor.u32 %v18324_v60, %v13900_v59  ;;  %4767 = vmatpush.bf16.msrb.mxu1 %v13645_v6  ;;  %v12494_v59 = vld [vmem:[%s20174_s29 + $0x1b8] sm:$0xf0] }
 0x3c4   : > { %v18388_v2 = vld [vmem:[%s20174_s29 + $0xeb4] sm:$0xf0]  ;;  %v18032_v60 = vld [vmem:[%s20174_s29 + $0x39c] sm:$0xf]  ;;  %v12497_v6 = vor.u32 %v17968_v57, %v12494_v59 }
 0x3c5   : > { %v13356_v8 = vld [vmem:[%s20174_s29 + $0x858] sm:$0xf]  ;;  %v14157_v11 = vor.u32 %v18388_v2, %v14156_v0  ;;  %4780 = vmatpush.bf16.msrb.mxu2 %v13901_v7  ;;  %v18096_v0 = vld [vmem:[%s20174_s29 + $0x59c] sm:$0xf]  ;;  %v12753_v7 = vor.u32 %v18032_v60, %v12750_v63  ;;  %v4576_v63 = vpop.f32.mrf.mxu2 }
 0x3c6   : > { %v18188_v9 = vld [vmem:[%s20174_s29 + $0x874] sm:$0xf0]  ;;  %v13006_v2 = vld [vmem:[%s20174_s29 + $0x5b8] sm:$0xf0] }
 0x3c7   : > { %v13612_v10 = vld [vmem:[%s20174_s29 + $0xa58] sm:$0xf]  ;;  %v13357_v17 = vor.u32 %v18188_v9, %v13356_v8  ;;  %4793 = vmatpush.bf16.msrb.mxu3 %v14157_v11  ;;  %v13009_v8 = vor.u32 %v18096_v0, %v13006_v2  ;;  %v17960_v9 = vld [vmem:[%s20174_s29 + $0x15c] sm:$0xf]  ;;  %v13265_v11 = vor.u32 %v18160_v3, %v13262_v5 }
 0x3c8   : > { %v18252_v12 = vld [vmem:[%s20174_s29 + $0xa74] sm:$0xf0]  ;;  %v17944_v31 = vld [vmem:[%s20174_s29 + $0xdc] sm:$0xf] }
 0x3c9   : > { %v13868_v13 = vld [vmem:[%s20174_s29 + $0xc58] sm:$0xf]  ;;  %v13613_v20 = vor.u32 %v18252_v12, %v13612_v10  ;;  %4755 = vmatpush.bf16.msrb.mxu0 %v13357_v17  ;;  %v12462_v10 = vld [vmem:[%s20174_s29 + $0x178] sm:$0xf0] }
 0x3ca   : > { %v18316_v14 = vld [vmem:[%s20174_s29 + $0xc74] sm:$0xf0]  ;;  %v12718_v12 = vld [vmem:[%s20174_s29 + $0x378] sm:$0xf0]  ;;  %v12465_v17 = vor.u32 %v17960_v9, %v12462_v10 }
 0x3cb   : > { %v14124_v16 = vld [vmem:[%s20174_s29 + $0xe58] sm:$0xf]  ;;  %v13869_v21 = vor.u32 %v18316_v14, %v13868_v13  ;;  %4768 = vmatpush.bf16.msrb.mxu1 %v13613_v20  ;;  %v18088_v13 = vld [vmem:[%s20174_s29 + $0x55c] sm:$0xf] }
 0x3cc   : > { %v18380_v1 = vld [vmem:[%s20174_s29 + $0xe74] sm:$0xf0]  ;;  %v12974_v14 = vld [vmem:[%s20174_s29 + $0x578] sm:$0xf0] }
 0x3cd   : > { %v13324_v18 = vld [vmem:[%s20174_s29 + $0x818] sm:$0xf]  ;;  %v14125_v25 = vor.u32 %v18380_v1, %v14124_v16  ;;  %4781 = vmatpush.bf16.msrb.mxu2 %v13869_v21  ;;  %v18152_v16 = vld [vmem:[%s20174_s29 + $0x75c] sm:$0xf] }
 0x3ce   : > { %v18180_v19 = vld [vmem:[%s20174_s29 + $0x834] sm:$0xf0]  ;;  %v13230_v1 = vld [vmem:[%s20174_s29 + $0x778] sm:$0xf0] }
 0x3cf   : > { %v13580_v22 = vld [vmem:[%s20174_s29 + $0xa18] sm:$0xf]  ;;  %v13325_v58 = vor.u32 %v18180_v19, %v13324_v18  ;;  %4794 = vmatpush.bf16.msrb.mxu3 %v14125_v25  ;;  %v12721_v18 = vor.u32 %v18024_v35, %v12718_v12  ;;  %v12977_v19 = vor.u32 %v18088_v13, %v12974_v14  ;;  %v17952_v20 = vld [vmem:[%s20174_s29 + $0x11c] sm:$0xf] }
 0x3d0   : > { %v18244_v23 = vld [vmem:[%s20174_s29 + $0xa34] sm:$0xf0]  ;;  %v12430_v21 = vld [vmem:[%s20174_s29 + $0x138] sm:$0xf0] }
 0x3d1   : > { %v13836_v49 = vld [vmem:[%s20174_s29 + $0xc18] sm:$0xf]  ;;  %v13581_v44 = vor.u32 %v18244_v23, %v13580_v22  ;;  %4756 = vmatpush.bf16.msrb.mxu0 %v13325_v58  ;;  %v18016_v22 = vld [vmem:[%s20174_s29 + $0x31c] sm:$0xf]  ;;  %v13233_v23 = vor.u32 %v18152_v16, %v13230_v1 }
 0x3d2   : > { %v18308_v26 = vld [vmem:[%s20174_s29 + $0xc34] sm:$0xf0]  ;;  %v12942_v25 = vld [vmem:[%s20174_s29 + $0x538] sm:$0xf0] }
 0x3d3   : > { %v14092_v51 = vld [vmem:[%s20174_s29 + $0xe18] sm:$0xf]  ;;  %v13837_v45 = vor.u32 %v18308_v26, %v13836_v49  ;;  %4769 = vmatpush.bf16.msrb.mxu1 %v13581_v44  ;;  %v12686_v49 = vld [vmem:[%s20174_s29 + $0x338] sm:$0xf0]  ;;  %v12945_v30 = vor.u32 %v18080_v24, %v12942_v25 }
 0x3d4   : > { %v18372_v27 = vld [vmem:[%s20174_s29 + $0xe34] sm:$0xf0]  ;;  %4757 = vmatmul.bf16.vlgmr.msrb.gmra.mxu0 %v20419_v37  ;;  %v18144_v26 = vld [vmem:[%s20174_s29 + $0x71c] sm:$0xf]  ;;  %v12689_v29 = vor.u32 %v18016_v22, %v12686_v49 }
 0x3d5   : > { %v14093_v52 = vor.u32 %v18372_v27, %v14092_v51  ;;  %4782 = vmatpush.bf16.msrb.mxu2 %v13837_v45  ;;  %4801 = vmatpush.bf16.msra.mxu0 %v12529_v53  ;;  %v13198_v51 = vld [vmem:[%s20174_s29 + $0x738] sm:$0xf0]  ;;  %v12433_v27 = vor.u32 %v17952_v20, %v12430_v21 }
 0x3d6   : > { %4770 = vmatmul.bf16.vlgmr.msrb.gmra.mxu1 %v20423_v40  ;;  %v12398_v58 = vld [vmem:[%s20174_s29 + $0xf8] sm:$0xf0]  ;;  %v13201_v44 = vor.u32 %v18144_v26, %v13198_v51 }
 0x3d7   : > { %4795 = vmatpush.bf16.msrb.mxu3 %v14093_v52  ;;  %4814 = vmatpush.bf16.msra.mxu1 %v12785_v55  ;;  %v18008_v36 = vld [vmem:[%s20174_s29 + $0x2dc] sm:$0xf]  ;;  %v4564_v55 = vadd.f32 %v4563_v43, %v4551_v39 }
 0x3d8   : > { %4783 = vmatmul.bf16.vlgmr.msrb.gmra.mxu2 %v20415_v32  ;;  %v12654_v45 = vld [vmem:[%s20174_s29 + $0x2f8] sm:$0xf0] }
 0x3d9   : > { %4827 = vmatpush.bf16.msra.mxu2 %v13041_v56  ;;  %4802 = vmatpush.bf16.msra.mxu0 %v12497_v6  ;;  %v18072_v46 = vld [vmem:[%s20174_s29 + $0x4dc] sm:$0xf]  ;;  %v12401_v56 = vor.u32 %v17944_v31, %v12398_v58  ;;  %v12657_v4 = vor.u32 %v18008_v36, %v12654_v45  ;;  %v4577_v6 = vadd.f32 %v4576_v63, %v4564_v55 }
 0x3da   : > { %4796 = vmatmul.bf16.vlgmr.msrb.gmra.mxu3 %v20421_v38  ;;  %v12910_v48 = vld [vmem:[%s20174_s29 + $0x4f8] sm:$0xf0] }
 0x3db   : > { %4840 = vmatpush.bf16.msra.mxu3 %v13297_v62  ;;  %4815 = vmatpush.bf16.msra.mxu1 %v12753_v7  ;;  %v18136_v52 = vld [vmem:[%s20174_s29 + $0x6dc] sm:$0xf]  ;;  %v12913_v57 = vor.u32 %v18072_v46, %v12910_v48  ;;  %v4589_v7 = vpop.f32.mrf.mxu3 }
 0x3dc   : > { %v13166_v53 = vld [vmem:[%s20174_s29 + $0x6f8] sm:$0xf0]  ;;  %v21311_v35 = vadd.f32 %v4589_v7, %v4577_v6 }
 0x3dd   : > { %4828 = vmatpush.bf16.msra.mxu2 %v13009_v8  ;;  %4803 = vmatpush.bf16.msra.mxu0 %v12465_v17  ;;  %v17936_v59 = vld [vmem:[%s20174_s29 + $0x9c] sm:$0xf]  ;;  %v13169_v0 = vor.u32 %v18136_v52, %v13166_v53  ;;  %v4565_v17 = vpop.f32.mrf.mxu1 }
 0x3de   : > { %v12366_v60 = vld [vmem:[%s20174_s29 + $0xb8] sm:$0xf0] }
 0x3df   : > { %4841 = vmatpush.bf16.msra.mxu3 %v13265_v11  ;;  %4816 = vmatpush.bf16.msra.mxu1 %v12721_v18  ;;  %v18000_v62 = vld [vmem:[%s20174_s29 + $0x29c] sm:$0xf]  ;;  %v12369_v10 = vor.u32 %v17936_v59, %v12366_v60  ;;  %v4552_v11 = vpop.f32.mrf.mxu0 }
 0x3e0   : > { %v12622_v2 = vld [vmem:[%s20174_s29 + $0x2b8] sm:$0xf0] }
 0x3e1   : > { %4829 = vmatpush.bf16.msra.mxu2 %v12977_v19  ;;  %4804 = vmatpush.bf16.msra.mxu0 %v12433_v27  ;;  %v18064_v3 = vld [vmem:[%s20174_s29 + $0x49c] sm:$0xf]  ;;  %v12625_v12 = vor.u32 %v18000_v62, %v12622_v2 }
 0x3e2   : > { %v12878_v5 = vld [vmem:[%s20174_s29 + $0x4b8] sm:$0xf0] }
 0x3e3   : > { %4842 = vmatpush.bf16.msra.mxu3 %v13233_v23  ;;  %4817 = vmatpush.bf16.msra.mxu1 %v12689_v29  ;;  %v18128_v8 = vld [vmem:[%s20174_s29 + $0x69c] sm:$0xf]  ;;  %v12881_v13 = vor.u32 %v18064_v3, %v12878_v5  ;;  %v4591_v43 = vpop.f32.mrf.mxu3 }
 0x3e4   : > { %v13134_v9 = vld [vmem:[%s20174_s29 + $0x6b8] sm:$0xf0] }
 0x3e5   : > { %4830 = vmatpush.bf16.msra.mxu2 %v12945_v30  ;;  %4805 = vmatpush.bf16.msra.mxu0 %v12401_v56  ;;  %v17928_v14 = vld [vmem:[%s20174_s29 + $0x5c] sm:$0xf]  ;;  %v13137_v18 = vor.u32 %v18128_v8, %v13134_v9  ;;  %v4578_v30 = vpop.f32.mrf.mxu2 }
 0x3e6   : > { %v12334_v16 = vld [vmem:[%s20174_s29 + $0x78] sm:$0xf0] }
 0x3e7   : > { %4843 = vmatpush.bf16.msra.mxu3 %v13201_v44  ;;  %4818 = vmatpush.bf16.msra.mxu1 %v12657_v4  ;;  %v17992_v1 = vld [vmem:[%s20174_s29 + $0x25c] sm:$0xf]  ;;  %v12337_v49 = vor.u32 %v17928_v14, %v12334_v16 }
 0x3e8   : > { %v12590_v19 = vld [vmem:[%s20174_s29 + $0x278] sm:$0xf0] }
 0x3e9   : > { %4831 = vmatpush.bf16.msra.mxu2 %v12913_v57  ;;  %v18056_v20 = vld [vmem:[%s20174_s29 + $0x45c] sm:$0xf]  ;;  %4806 = vmatpush.bf16.msra.mxu0 %v12369_v10  ;;  %v12593_v26 = vor.u32 %v17992_v1, %v12590_v19 }
 0x3ea   : > { %v12846_v21 = vld [vmem:[%s20174_s29 + $0x478] sm:$0xf0] }
 0x3eb   : > { %4844 = vmatpush.bf16.msra.mxu3 %v13169_v0  ;;  %v18120_v22 = vld [vmem:[%s20174_s29 + $0x65c] sm:$0xf]  ;;  %4819 = vmatpush.bf16.msra.mxu1 %v12625_v12  ;;  %v12849_v51 = vor.u32 %v18056_v20, %v12846_v21 }
 0x3ec   : > { %v13102_v23 = vld [vmem:[%s20174_s29 + $0x678] sm:$0xf0] }
 0x3ed   : > { %v17920_v24 = vld [vmem:[%s20174_s29 + $0x1c] sm:$0xf]  ;;  %4832 = vmatpush.bf16.msra.mxu2 %v12881_v13  ;;  %v13105_v31 = vor.u32 %v18120_v22, %v13102_v23  ;;  %4807 = vmatpush.bf16.msra.mxu0 %v12337_v49 }
 0x3ee   : > { %v12302_v25 = vld [vmem:[%s20174_s29 + $0x38] sm:$0xf0] }
 0x3ef   : > { %v17984_v27 = vld [vmem:[%s20174_s29 + $0x21c] sm:$0xf]  ;;  %4845 = vmatpush.bf16.msra.mxu3 %v13137_v18  ;;  %v12305_v48 = vor.u32 %v17920_v24, %v12302_v25  ;;  %4820 = vmatpush.bf16.msra.mxu1 %v12593_v26 }
 0x3f0   : > { %v12558_v28 = vld [vmem:[%s20174_s29 + $0x238] sm:$0xf0] }
 0x3f1   : > { %v18048_v29 = vld [vmem:[%s20174_s29 + $0x41c] sm:$0xf]  ;;  %4833 = vmatpush.bf16.msra.mxu2 %v12849_v51  ;;  %v12561_v56 = vor.u32 %v17984_v27, %v12558_v28  ;;  %4808 = vmatpush.bf16.msra.mxu0 %v12305_v48 }
 0x3f2   : > { %v12814_v58 = vld [vmem:[%s20174_s29 + $0x438] sm:$0xf0] }
 0x3f3   : > { %v18112_v36 = vld [vmem:[%s20174_s29 + $0x61c] sm:$0xf]  ;;  %v12817_v4 = vor.u32 %v18048_v29, %v12814_v58  ;;  %4846 = vmatpush.bf16.msra.mxu3 %v13105_v31  ;;  %4821 = vmatpush.bf16.msra.mxu1 %v12561_v56  ;;  %v21365_v31 = vpop.f32.mrf.mxu0 }
 0x3f4   : > { %v13070_v39 = vld [vmem:[%s20174_s29 + $0x638] sm:$0xf0]  ;;  %4809 = vmatmul.bf16.vlgmr.msra.gmra.mxu0 %v20369_v34 }
 0x3f5   : > { %v18232_v44 = vld [vmem:[%s20174_s29 + $0x9dc] sm:$0xf]  ;;  %v13073_v60 = vor.u32 %v18112_v36, %v13070_v39  ;;  %4834 = vmatpush.bf16.msra.mxu2 %v12817_v4 }
 0x3f6   : > { %v13550_v45 = vld [vmem:[%s20174_s29 + $0x9f8] sm:$0xf0]  ;;  %4822 = vmatmul.bf16.vlgmr.msra.gmra.mxu1 %v20376_v42 }
 0x3f7   : > { %v18296_v46 = vld [vmem:[%s20174_s29 + $0xbdc] sm:$0xf]  ;;  %v13553_v62 = vor.u32 %v18232_v44, %v13550_v45  ;;  %4847 = vmatpush.bf16.msra.mxu3 %v13073_v60  ;;  %v21370_v45 = vpop.f32.mrf.mxu1 }
 0x3f8   : > { %v13806_v52 = vld [vmem:[%s20174_s29 + $0xbf8] sm:$0xf0]  ;;  %4835 = vmatmul.bf16.vlgmr.msra.gmra.mxu2 %v20367_v33 }
 0x3f9   : > { %v18360_v53 = vld [vmem:[%s20174_s29 + $0xddc] sm:$0xf]  ;;  %v13809_v63 = vor.u32 %v18296_v46, %v13806_v52  ;;  %4853 = vmatpush.bf16.msrb.mxu0 %v13553_v62 }
 0x3fa   : > { %v14062_v55 = vld [vmem:[%s20174_s29 + $0xdf8] sm:$0xf0]  ;;  %4848 = vmatmul.bf16.vlgmr.msra.gmra.mxu3 %v20374_v41 }
 0x3fb   : > { %v18424_v57 = vld [vmem:[%s20174_s29 + $0xfdc] sm:$0xf]  ;;  %v14065_v0 = vor.u32 %v18360_v53, %v14062_v55  ;;  %4866 = vmatpush.bf16.msrb.mxu1 %v13809_v63 }
 0x3fc   : > { %v14318_v59 = vld [vmem:[%s20174_s29 + $0xff8] sm:$0xf0] }
 0x3fd   : > { %v18224_v2 = vld [vmem:[%s20174_s29 + $0x99c] sm:$0xf]  ;;  %v14321_v6 = vor.u32 %v18424_v57, %v14318_v59  ;;  %4879 = vmatpush.bf16.msrb.mxu2 %v14065_v0  ;;  %v21380_v0 = vpop.f32.mrf.mxu2 }
 0x3fe   : > { %v13518_v3 = vld [vmem:[%s20174_s29 + $0x9b8] sm:$0xf0] }
 0x3ff   : > { %v18288_v5 = vld [vmem:[%s20174_s29 + $0xb9c] sm:$0xf]  ;;  %v13521_v12 = vor.u32 %v18224_v2, %v13518_v3  ;;  %4892 = vmatpush.bf16.msrb.mxu3 %v14321_v6 }
 0x400   : > { %v13774_v7 = vld [vmem:[%s20174_s29 + $0xbb8] sm:$0xf0] }
 0x401   : > { %v18352_v8 = vld [vmem:[%s20174_s29 + $0xd9c] sm:$0xf]  ;;  %v13777_v13 = vor.u32 %v18288_v5, %v13774_v7  ;;  %4854 = vmatpush.bf16.msrb.mxu0 %v13521_v12  ;;  %v21385_v7 = vpop.f32.mrf.mxu3 }
 0x402   : > { %v14030_v9 = vld [vmem:[%s20174_s29 + $0xdb8] sm:$0xf0] }
 0x403   : > { %v18416_v10 = vld [vmem:[%s20174_s29 + $0xf9c] sm:$0xf]  ;;  %v14033_v14 = vor.u32 %v18352_v8, %v14030_v9  ;;  %4867 = vmatpush.bf16.msrb.mxu1 %v13777_v13 }
 0x404   : > { %v14286_v11 = vld [vmem:[%s20174_s29 + $0xfb8] sm:$0xf0] }
 0x405   : > { %v18216_v16 = vld [vmem:[%s20174_s29 + $0x95c] sm:$0xf]  ;;  %v14289_v18 = vor.u32 %v18416_v10, %v14286_v11  ;;  %4880 = vmatpush.bf16.msrb.mxu2 %v14033_v14  ;;  %v4604_v11 = vpop.f32.mrf.mxu0 }
 0x406   : > { %v13486_v1 = vld [vmem:[%s20174_s29 + $0x978] sm:$0xf0]  ;;  %v18490_v11 = vld [vmem:[%s20196_s20 + $0x1e4] sm:$0xf0] }
 0x407   : > { %v18280_v17 = vld [vmem:[%s20174_s29 + $0xb5c] sm:$0xf]  ;;  %v13489_v49 = vor.u32 %v18216_v16, %v13486_v1  ;;  %4893 = vmatpush.bf16.msrb.mxu3 %v14289_v18 }
 0x408   : > { %v13742_v19 = vld [vmem:[%s20174_s29 + $0xb78] sm:$0xf0] }
 0x409   : > { %v18344_v20 = vld [vmem:[%s20174_s29 + $0xd5c] sm:$0xf]  ;;  %v13745_v33 = vor.u32 %v18280_v17, %v13742_v19  ;;  %4855 = vmatpush.bf16.msrb.mxu0 %v13489_v49  ;;  %v4617_v17 = vpop.f32.mrf.mxu1 }
 0x40a   : > { %v13998_v21 = vld [vmem:[%s20174_s29 + $0xd78] sm:$0xf0]  ;;  %v14428_v17 = vld [vmem:[%s20196_s20 + $0xd0] sm:$0xf] }
 0x40b   : > { %v18408_v22 = vld [vmem:[%s20174_s29 + $0xf5c] sm:$0xf]  ;;  %v14001_v24 = vor.u32 %v18344_v20, %v13998_v21  ;;  %4868 = vmatpush.bf16.msrb.mxu1 %v13745_v33 }
 0x40c   : > { %v14254_v23 = vld [vmem:[%s20174_s29 + $0xf78] sm:$0xf0] }
 0x40d   : > { %v18208_v25 = vld [vmem:[%s20174_s29 + $0x91c] sm:$0xf]  ;;  %v14257_v34 = vor.u32 %v18408_v22, %v14254_v23  ;;  %4881 = vmatpush.bf16.msrb.mxu2 %v14001_v24 }
 0x40e   : > { %v13454_v26 = vld [vmem:[%s20174_s29 + $0x938] sm:$0xf0] }
 0x40f   : > { %v18272_v51 = vld [vmem:[%s20174_s29 + $0xb1c] sm:$0xf]  ;;  %v13457_v42 = vor.u32 %v18208_v25, %v13454_v26  ;;  %4894 = vmatpush.bf16.msrb.mxu3 %v14257_v34 }
 0x410   : > { %v13710_v27 = vld [vmem:[%s20174_s29 + $0xb38] sm:$0xf0] }
 0x411   : > { %v18336_v41 = vld [vmem:[%s20174_s29 + $0xd1c] sm:$0xf]  ;;  %v13713_v58 = vor.u32 %v18272_v51, %v13710_v27  ;;  %4856 = vmatpush.bf16.msrb.mxu0 %v13457_v42 }
 0x412   : > { %v13966_v28 = vld [vmem:[%s20174_s29 + $0xd38] sm:$0xf0] }
 0x413   : > { %v18400_v29 = vld [vmem:[%s20174_s29 + $0xf1c] sm:$0xf]  ;;  %v13969_v36 = vor.u32 %v18336_v41, %v13966_v28  ;;  %4869 = vmatpush.bf16.msrb.mxu1 %v13713_v58  ;;  %v4630_v41 = vpop.f32.mrf.mxu2  ;;  %v4643_v58 = vpop.f32.mrf.mxu3 }
 0x414   : > { %v14222_v30 = vld [vmem:[%s20174_s29 + $0xf38] sm:$0xf0]  ;;  %v18436_v58 = vld [vmem:[%s20196_s20 + $0x34] sm:$0xf0] }
 0x415   : > { %v18200_v39 = vld [vmem:[%s20174_s29 + $0x8dc] sm:$0xf]  ;;  %v14225_v46 = vor.u32 %v18400_v29, %v14222_v30  ;;  %4882 = vmatpush.bf16.msrb.mxu2 %v13969_v36  ;;  %v14380_v36 = vld [vmem:[%s20196_s20 + $0x70] sm:$0xf] }
 0x416   : > { %v13422_v43 = vld [vmem:[%s20174_s29 + $0x8f8] sm:$0xf0] }
 0x417   : > { %v18264_v44 = vld [vmem:[%s20174_s29 + $0xadc] sm:$0xf]  ;;  %v13425_v4 = vor.u32 %v18200_v39, %v13422_v43  ;;  %4895 = vmatpush.bf16.msrb.mxu3 %v14225_v46  ;;  %v18444_v39 = vld [vmem:[%s20196_s20 + $0x74] sm:$0xf0]  ;;  %v14444_v43 = vld [vmem:[%s20196_s20 + $0xf0] sm:$0xf] }
 0x418   : > { %v13678_v48 = vld [vmem:[%s20174_s29 + $0xaf8] sm:$0xf0]  ;;  %v18460_v46 = vld [vmem:[%s20196_s20 + $0xf4] sm:$0xf0] }
 0x419   : > { %v18328_v52 = vld [vmem:[%s20174_s29 + $0xcdc] sm:$0xf]  ;;  %v13681_v57 = vor.u32 %v18264_v44, %v13678_v48  ;;  %4857 = vmatpush.bf16.msrb.mxu0 %v13425_v4  ;;  %v14508_v48 = vld [vmem:[%s20196_s20 + $0x170] sm:$0xf]  ;;  %v18492_v4 = vld [vmem:[%s20196_s20 + $0x1f4] sm:$0xf0] }
 0x41a   : > { %v13934_v53 = vld [vmem:[%s20174_s29 + $0xcf8] sm:$0xf0] }
 0x41b   : > { %v18392_v55 = vld [vmem:[%s20174_s29 + $0xedc] sm:$0xf]  ;;  %v13937_v59 = vor.u32 %v18328_v52, %v13934_v53  ;;  %4870 = vmatpush.bf16.msrb.mxu1 %v13681_v57  ;;  %v18476_v52 = vld [vmem:[%s20196_s20 + $0x174] sm:$0xf0] }
 0x41c   : > { %v14190_v56 = vld [vmem:[%s20174_s29 + $0xef8] sm:$0xf0] }
 0x41d   : > { %v18192_v60 = vld [vmem:[%s20174_s29 + $0x89c] sm:$0xf]  ;;  %v14193_v2 = vor.u32 %v18392_v55, %v14190_v56  ;;  %4883 = vmatpush.bf16.msrb.mxu2 %v13937_v59  ;;  %v14572_v56 = vld [vmem:[%s20196_s20 + $0x1f0] sm:$0xf]  ;;  %v14381_v59 = vor.u32 %v18444_v39, %v14380_v36  ;;  %v21446_v39 = vpop.f32.mrf.mxu1 }
 0x41e   : > { %v13390_v62 = vld [vmem:[%s20174_s29 + $0x8b8] sm:$0xf0]  ;;  %v14412_v36 = vld [vmem:[%s20196_s20 + $0xb0] sm:$0xf] }
 0x41f   : > { %v18256_v63 = vld [vmem:[%s20174_s29 + $0xa9c] sm:$0xf]  ;;  %v13393_v10 = vor.u32 %v18192_v60, %v13390_v62  ;;  %4896 = vmatpush.bf16.msrb.mxu3 %v14193_v2  ;;  %v14445_v60 = vor.u32 %v18460_v46, %v14444_v43  ;;  %v14509_v62 = vor.u32 %v18476_v52, %v14508_v48  ;;  %v18442_v2 = vld [vmem:[%s20196_s20 + $0x64] sm:$0xf0]  ;;  %v14476_v46 = vld [vmem:[%s20196_s20 + $0x130] sm:$0xf] }
 0x420   : > { %v13646_v3 = vld [vmem:[%s20174_s29 + $0xab8] sm:$0xf0]  ;;  %v18468_v48 = vld [vmem:[%s20196_s20 + $0x134] sm:$0xf0]  ;;  %v14540_v52 = vld [vmem:[%s20196_s20 + $0x1b0] sm:$0xf] }
 0x421   : > { %v18320_v5 = vld [vmem:[%s20174_s29 + $0xc9c] sm:$0xf]  ;;  %v13649_v12 = vor.u32 %v18256_v63, %v13646_v3  ;;  %4858 = vmatpush.bf16.msrb.mxu0 %v13393_v10  ;;  %v14372_v63 = vld [vmem:[%s20196_s20 + $0x60] sm:$0xf] }
 0x422   : > { %v13902_v6 = vld [vmem:[%s20174_s29 + $0xcb8] sm:$0xf0]  ;;  %v14436_v3 = vld [vmem:[%s20196_s20 + $0xe0] sm:$0xf] }
 0x423   : > { %v18384_v8 = vld [vmem:[%s20174_s29 + $0xe9c] sm:$0xf]  ;;  %v13905_v13 = vor.u32 %v18320_v5, %v13902_v6  ;;  %4871 = vmatpush.bf16.msrb.mxu1 %v13649_v12  ;;  %v14573_v5 = vor.u32 %v18492_v4, %v14572_v56  ;;  %v18458_v6 = vld [vmem:[%s20196_s20 + $0xe4] sm:$0xf0]  ;;  %v14564_v10 = vld [vmem:[%s20196_s20 + $0x1e0] sm:$0xf]  ;;  %v14373_v12 = vor.u32 %v18442_v2, %v14372_v63  ;;  %v14477_v4 = vor.u32 %v18468_v48, %v14476_v46 }
 0x424   : > { %v14158_v9 = vld [vmem:[%s20174_s29 + $0xeb8] sm:$0xf0]  ;;  %v18450_v2 = vld [vmem:[%s20196_s20 + $0xa4] sm:$0xf0]  ;;  %v14764_v46 = vld [vmem:[%s20196_s20 + $0x370] sm:$0xf] }
 0x425   : > { %v18184_v14 = vld [vmem:[%s20174_s29 + $0x85c] sm:$0xf]  ;;  %v14161_v18 = vor.u32 %v18384_v8, %v14158_v9  ;;  %4884 = vmatpush.bf16.msrb.mxu2 %v13905_v13  ;;  %v14500_v8 = vld [vmem:[%s20196_s20 + $0x160] sm:$0xf]  ;;  %v18474_v9 = vld [vmem:[%s20196_s20 + $0x164] sm:$0xf0]  ;;  %v14437_v13 = vor.u32 %v18458_v6, %v14436_v3  ;;  %v21461_v6 = vpop.f32.mrf.mxu3 }
 0x426   : > { %v13358_v16 = vld [vmem:[%s20174_s29 + $0x878] sm:$0xf0]  ;;  %v14468_v3 = vld [vmem:[%s20196_s20 + $0x120] sm:$0xf]  ;;  %v18540_v48 = vld [vmem:[%s20196_s20 + $0x374] sm:$0xf0] }
 0x427   : > { %v18248_v1 = vld [vmem:[%s20174_s29 + $0xa5c] sm:$0xf]  ;;  %v13361_v49 = vor.u32 %v18184_v14, %v13358_v16  ;;  %4897 = vmatpush.bf16.msrb.mxu3 %v14161_v18  ;;  %v14501_v14 = vor.u32 %v18474_v9, %v14500_v8  ;;  %v14364_v16 = vld [vmem:[%s20196_s20 + $0x50] sm:$0xf]  ;;  %v14565_v18 = vor.u32 %v18490_v11, %v14564_v10  ;;  %v14532_v8 = vld [vmem:[%s20196_s20 + $0x1a0] sm:$0xf] }
 0x428   : > { %v13614_v19 = vld [vmem:[%s20174_s29 + $0xa78] sm:$0xf0]  ;;  %v18482_v9 = vld [vmem:[%s20196_s20 + $0x1a4] sm:$0xf0] }
 0x429   : > { %v18312_v20 = vld [vmem:[%s20174_s29 + $0xc5c] sm:$0xf]  ;;  %v13617_v25 = vor.u32 %v18248_v1, %v13614_v19  ;;  %4859 = vmatpush.bf16.msrb.mxu0 %v13361_v49  ;;  %v18440_v1 = vld [vmem:[%s20196_s20 + $0x54] sm:$0xf0] }
 0x42a   : > { %v13870_v21 = vld [vmem:[%s20174_s29 + $0xc78] sm:$0xf0]  ;;  %v18456_v19 = vld [vmem:[%s20196_s20 + $0xd4] sm:$0xf0] }
 0x42b   : > { %v18376_v22 = vld [vmem:[%s20174_s29 + $0xe5c] sm:$0xf]  ;;  %v13873_v26 = vor.u32 %v18312_v20, %v13870_v21  ;;  %4872 = vmatpush.bf16.msrb.mxu1 %v13617_v25  ;;  %v14492_v20 = vld [vmem:[%s20196_s20 + $0x150] sm:$0xf]  ;;  %v18472_v21 = vld [vmem:[%s20196_s20 + $0x154] sm:$0xf0]  ;;  %v14429_v49 = vor.u32 %v18456_v19, %v14428_v17  ;;  %v4669_v17 = vpop.f32.mrf.mxu1 }
 0x42c   : > { %v14126_v23 = vld [vmem:[%s20174_s29 + $0xe78] sm:$0xf0]  ;;  %v18438_v25 = vld [vmem:[%s20196_s20 + $0x44] sm:$0xf0]  ;;  %v18448_v19 = vld [vmem:[%s20196_s20 + $0x94] sm:$0xf0] }
 0x42d   : > { %v18176_v33 = vld [vmem:[%s20174_s29 + $0x81c] sm:$0xf]  ;;  %v14129_v28 = vor.u32 %v18376_v22, %v14126_v23  ;;  %4885 = vmatpush.bf16.msrb.mxu2 %v13873_v26  ;;  %v14556_v22 = vld [vmem:[%s20196_s20 + $0x1d0] sm:$0xf]  ;;  %v18488_v23 = vld [vmem:[%s20196_s20 + $0x1d4] sm:$0xf0] }
 0x42e   : > { %v13326_v24 = vld [vmem:[%s20174_s29 + $0x838] sm:$0xf0]  ;;  %v18454_v26 = vld [vmem:[%s20196_s20 + $0xc4] sm:$0xf0] }
 0x42f   : > { %v18240_v51 = vld [vmem:[%s20174_s29 + $0xa1c] sm:$0xf]  ;;  %v13329_v44 = vor.u32 %v18176_v33, %v13326_v24  ;;  %4898 = vmatpush.bf16.msrb.mxu3 %v14129_v28  ;;  %v14493_v33 = vor.u32 %v18472_v21, %v14492_v20  ;;  %v14356_v24 = vld [vmem:[%s20196_s20 + $0x40] sm:$0xf]  ;;  %v21441_v28 = vpop.f32.mrf.mxu0  ;;  %v14460_v20 = vld [vmem:[%s20196_s20 + $0x110] sm:$0xf] }
 0x430   : > { %v13582_v34 = vld [vmem:[%s20174_s29 + $0xa38] sm:$0xf0]  ;;  %v14357_v41 = vor.u32 %v18438_v25, %v14356_v24  ;;  %v18464_v21 = vld [vmem:[%s20196_s20 + $0x114] sm:$0xf0]  ;;  %v18430_v24 = vld [vmem:[%s20196_s20 + $0x4] sm:$0xf0] }
 0x431   : > { %v18304_v27 = vld [vmem:[%s20174_s29 + $0xc1c] sm:$0xf]  ;;  %v13585_v53 = vor.u32 %v18240_v51, %v13582_v34  ;;  %4860 = vmatpush.bf16.msrb.mxu0 %v13329_v44  ;;  %v14484_v51 = vld [vmem:[%s20196_s20 + $0x140] sm:$0xf]  ;;  %v18470_v34 = vld [vmem:[%s20196_s20 + $0x144] sm:$0xf0] }
 0x432   : > { %v13838_v29 = vld [vmem:[%s20174_s29 + $0xc38] sm:$0xf0]  ;;  %v18452_v44 = vld [vmem:[%s20196_s20 + $0xb4] sm:$0xf0] }
 0x433   : > { %v18368_v30 = vld [vmem:[%s20174_s29 + $0xe1c] sm:$0xf]  ;;  %v13841_v55 = vor.u32 %v18304_v27, %v13838_v29  ;;  %4873 = vmatpush.bf16.msrb.mxu1 %v13585_v53  ;;  %v18486_v27 = vld [vmem:[%s20196_s20 + $0x1c4] sm:$0xf0]  ;;  %v18484_v53 = vld [vmem:[%s20196_s20 + $0x1b4] sm:$0xf0]  ;;  %v14413_v56 = vor.u32 %v18452_v44, %v14412_v36 }
 0x434   : > { %v14094_v42 = vld [vmem:[%s20174_s29 + $0xe38] sm:$0xf0]  ;;  %4861 = vmatmul.bf16.vlgmr.msrb.gmra.mxu0 %v20419_v37  ;;  %v14365_v37 = vor.u32 %v18440_v1, %v14364_v16  ;;  %v14541_v63 = vor.u32 %v18484_v53, %v14540_v52  ;;  %v18432_v16 = vld [vmem:[%s20196_s20 + $0x14] sm:$0xf0]  ;;  %v14396_v1 = vld [vmem:[%s20196_s20 + $0x90] sm:$0xf] }
 0x435   : > { %v14097_v57 = vor.u32 %v18368_v30, %v14094_v42  ;;  %4886 = vmatpush.bf16.msrb.mxu2 %v13841_v55  ;;  %5695 = vmatpush.bf16.msra.mxu0 %v14381_v59  ;;  %v14485_v30 = vor.u32 %v18470_v34, %v14484_v51  ;;  %v14348_v42 = vld [vmem:[%s20196_s20 + $0x30] sm:$0xf]  ;;  %v18434_v59 = vld [vmem:[%s20196_s20 + $0x24] sm:$0xf0]  ;;  %v14397_v25 = vor.u32 %v18448_v19, %v14396_v1  ;;  %v14452_v51 = vld [vmem:[%s20196_s20 + $0x100] sm:$0xf] }
 0x436   : > { %4874 = vmatmul.bf16.vlgmr.msrb.gmra.mxu1 %v20423_v40  ;;  %v14420_v40 = vld [vmem:[%s20196_s20 + $0xc0] sm:$0xf]  ;;  %v14349_v55 = vor.u32 %v18436_v58, %v14348_v42  ;;  %v18508_v42 = vld [vmem:[%s20196_s20 + $0x274] sm:$0xf0]  ;;  %v14700_v58 = vld [vmem:[%s20196_s20 + $0x2f0] sm:$0xf] }
 0x437   : > { %4899 = vmatpush.bf16.msrb.mxu3 %v14097_v57  ;;  %5708 = vmatpush.bf16.msra.mxu1 %v14445_v60  ;;  %v14421_v29 = vor.u32 %v18454_v26, %v14420_v40  ;;  %v14340_v57 = vld [vmem:[%s20196_s20 + $0x20] sm:$0xf]  ;;  %v4656_v11 = vpop.f32.mrf.mxu0  ;;  %v14461_v40 = vor.u32 %v18464_v21, %v14460_v20  ;;  %v18446_v26 = vld [vmem:[%s20196_s20 + $0x84] sm:$0xf0]  ;;  %v18524_v44 = vld [vmem:[%s20196_s20 + $0x2f4] sm:$0xf0] }
 0x438   : > { %4887 = vmatmul.bf16.vlgmr.msrb.gmra.mxu2 %v20415_v32  ;;  %v14557_v32 = vor.u32 %v18488_v23, %v14556_v22  ;;  %v14404_v60 = vld [vmem:[%s20196_s20 + $0xa0] sm:$0xf]  ;;  %v14341_v10 = vor.u32 %v18434_v59, %v14340_v57  ;;  %v14524_v22 = vld [vmem:[%s20196_s20 + $0x190] sm:$0xf]  ;;  %v18480_v23 = vld [vmem:[%s20196_s20 + $0x194] sm:$0xf0] }
 0x439   : > { %5721 = vmatpush.bf16.msra.mxu2 %v14509_v62  ;;  %5696 = vmatpush.bf16.msra.mxu0 %v14373_v12  ;;  %v21456_v62 = vpop.f32.mrf.mxu2  ;;  %v14405_v12 = vor.u32 %v18450_v2, %v14404_v60  ;;  %v14525_v34 = vor.u32 %v18480_v23, %v14524_v22  ;;  %v4905_v52 = vmax.f32 %v20737_v50, 0.0  ;;  %v4906_v53 = vmax.f32 %v20879_v47, 0.0  ;;  %v14628_v2 = vld [vmem:[%s20196_s20 + $0x260] sm:$0xf]  ;;  %v18506_v50 = vld [vmem:[%s20196_s20 + $0x264] sm:$0xf0] }
 0x43a   : > { %4900 = vmatmul.bf16.vlgmr.msrb.gmra.mxu3 %v20421_v38  ;;  %v14548_v38 = vld [vmem:[%s20196_s20 + $0x1c0] sm:$0xf]  ;;  %v14701_v60 = vor.u32 %v18524_v44, %v14700_v58  ;;  %v14684_v1 = vld [vmem:[%s20196_s20 + $0x2d0] sm:$0xf]  ;;  %v18536_v20 = vld [vmem:[%s20196_s20 + $0x354] sm:$0xf0] }
 0x43b   : > { %5734 = vmatpush.bf16.msra.mxu3 %v14573_v5  ;;  %5709 = vmatpush.bf16.msra.mxu1 %v14437_v13  ;;  %v14549_v43 = vor.u32 %v18486_v27, %v14548_v38  ;;  %v18466_v5 = vld [vmem:[%s20196_s20 + $0x124] sm:$0xf0]  ;;  %v14516_v27 = vld [vmem:[%s20196_s20 + $0x180] sm:$0xf]  ;;  %v14748_v19 = vld [vmem:[%s20196_s20 + $0x350] sm:$0xf] }
 0x43c   : > { %v14469_v13 = vor.u32 %v18466_v5, %v14468_v3  ;;  %v18462_v38 = vld [vmem:[%s20196_s20 + $0x104] sm:$0xf0]  ;;  %v14692_v3 = vld [vmem:[%s20196_s20 + $0x2e0] sm:$0xf]  ;;  %v14749_v22 = vor.u32 %v18536_v20, %v14748_v19  ;;  %s17915_s29 = sshll.u32 %s23656_s16, 2 }
 0x43d   : > { %5722 = vmatpush.bf16.msra.mxu2 %v14501_v14  ;;  %5697 = vmatpush.bf16.msra.mxu0 %v14365_v37  ;;  %v14332_v14 = vld [vmem:[%s20196_s20 + $0x10] sm:$0xf]  ;;  %v1502_v37 = vperm.slane %v21216_v15, 5  ;;  %v18522_v5 = vld [vmem:[%s20196_s20 + $0x2e4] sm:$0xf0] }
 0x43e   : > { %v14612_v23 = vld [vmem:[%s20196_s20 + $0x240] sm:$0xf]  ;;  %v18526_v19 = vld [vmem:[%s20196_s20 + $0x304] sm:$0xf0] }
 0x43f   : > { %5735 = vmatpush.bf16.msra.mxu3 %v14565_v18  ;;  %5710 = vmatpush.bf16.msra.mxu1 %v14429_v49  ;;  %v14533_v18 = vor.u32 %v18482_v9, %v14532_v8  ;;  %v14333_v49 = vor.u32 %v18432_v16, %v14332_v14  ;;  %v4603_v36 = vadd.f32 %v21365_v31, %v1502_v37  ;;  %v4907_v31 = vmax.f32 %v21024_v54, 0.0  ;;  %v14756_v8 = vld [vmem:[%s20196_s20 + $0x360] sm:$0xf]  ;;  %v18538_v9 = vld [vmem:[%s20196_s20 + $0x364] sm:$0xf0] }
 0x440   : > { %v21500_v54 = vpack.c.bf16 %v4905_v52, %v4905_v52  ;;  %v14620_v14 = vld [vmem:[%s20196_s20 + $0x250] sm:$0xf]  ;;  %v18504_v16 = vld [vmem:[%s20196_s20 + $0x254] sm:$0xf0]  ;;  %v18502_v37 = vld [vmem:[%s20196_s20 + $0x244] sm:$0xf0] }
 0x441   : > { %5723 = vmatpush.bf16.msra.mxu2 %v14493_v33  ;;  %5698 = vmatpush.bf16.msra.mxu0 %v14357_v41  ;;  %v14324_v33 = vld [vmem:[%s20196_s20] sm:$0xf]  ;;  %v4682_v15 = vpop.f32.mrf.mxu2  ;;  %v18478_v41 = vld [vmem:[%s20196_s20 + $0x184] sm:$0xf0]  ;;  %v4616_v47 = vadd.f32 %v21370_v45, %v4603_v36  ;;  %v14629_v45 = vor.u32 %v18506_v50, %v14628_v2  ;;  %v14621_v21 = vor.u32 %v18504_v16, %v14620_v14  ;;  %v14652_v2 = vld [vmem:[%s20196_s20 + $0x290] sm:$0xf] }
 0x442   : > { %v14517_v57 = vor.u32 %v18478_v41, %v14516_v27  ;;  %v21531_v27 = vpop.f32.mrf.mxu1  ;;  %v14596_v44 = vld [vmem:[%s20196_s20 + $0x220] sm:$0xf]  ;;  %v18494_v14 = vld [vmem:[%s20196_s20 + $0x204] sm:$0xf0] }
 0x443   : > { %5736 = vmatpush.bf16.msra.mxu3 %v14557_v32  ;;  %5711 = vmatpush.bf16.msra.mxu1 %v14421_v29  ;;  %v14388_v32 = vld [vmem:[%s20196_s20 + $0x80] sm:$0xf]  ;;  %v4695_v29 = vpop.f32.mrf.mxu3  ;;  %v4629_v17 = vadd.f32 %v21380_v0, %v4616_v47  ;;  %v18512_v47 = vld [vmem:[%s20196_s20 + $0x294] sm:$0xf0] }
 0x444   : > { %v18516_v29 = vld [vmem:[%s20196_s20 + $0x2b4] sm:$0xf0]  ;;  %v14644_v16 = vld [vmem:[%s20196_s20 + $0x280] sm:$0xf] }
 0x445   : > { %5724 = vmatpush.bf16.msra.mxu2 %v14485_v30  ;;  %5699 = vmatpush.bf16.msra.mxu0 %v14349_v55  ;;  %v14636_v30 = vld [vmem:[%s20196_s20 + $0x270] sm:$0xf]  ;;  %v14389_v55 = vor.u32 %v18446_v26, %v14388_v32  ;;  %v14613_v32 = vor.u32 %v18502_v37, %v14612_v23  ;;  %v21526_v26 = vpop.f32.mrf.mxu0  ;;  %v18459_v23 = vld [vmem:[%s20196_s20 + $0xf4] sm:$0xf] }
 0x446   : > { %v14637_v59 = vor.u32 %v18508_v42, %v14636_v30  ;;  %v14732_v30 = vld [vmem:[%s20196_s20 + $0x330] sm:$0xf]  ;;  %v18532_v42 = vld [vmem:[%s20196_s20 + $0x334] sm:$0xf0] }
 0x447   : > { %5737 = vmatpush.bf16.msra.mxu3 %v14549_v43  ;;  %5712 = vmatpush.bf16.msra.mxu1 %v14413_v56  ;;  %v14325_v43 = vor.u32 %v18430_v24, %v14324_v33  ;;  %v14453_v56 = vor.u32 %v18462_v38, %v14452_v51  ;;  %v4642_v33 = vadd.f32 %v21385_v7, %v4629_v17  ;;  %v18518_v24 = vld [vmem:[%s20196_s20 + $0x2c4] sm:$0xf0]  ;;  %v18500_v38 = vld [vmem:[%s20196_s20 + $0x234] sm:$0xf0]  ;;  %v14668_v7 = vld [vmem:[%s20196_s20 + $0x2b0] sm:$0xf] }
 0x448   : > { %v14669_v36 = vor.u32 %v18516_v29, %v14668_v7  ;;  %v18510_v17 = vld [vmem:[%s20196_s20 + $0x284] sm:$0xf0]  ;;  %v18441_v29 = vld [vmem:[%s20196_s20 + $0x64] sm:$0xf] }
 0x449   : > { %5725 = vmatpush.bf16.msra.mxu2 %v14477_v4  ;;  %5700 = vmatpush.bf16.msra.mxu0 %v14341_v10  ;;  %v4908_v4 = vmax.f32 %v21166_v61, 0.0  ;;  %v21502_v61 = vpack.c.bf16 %v4906_v53, %v4906_v53  ;;  %v21504_v10 = vpack.c.bf16 %v4907_v31, %v4907_v31  ;;  %v4655_v41 = vadd.f32 %v21441_v28, %v4642_v33  ;;  %v21540_v52 = vpop.f32.mrf.mxu2  ;;  %v18514_v53 = vld [vmem:[%s20196_s20 + $0x2a4] sm:$0xf0]  ;;  %v14446_v33 = vld [vmem:[%s20196_s20 + $0xf8] sm:$0xf0] }
 0x44a   : > { %v4721_v50 = vpop.f32.mrf.mxu1 }
 0x44b   : > { %5738 = vmatpush.bf16.msra.mxu3 %v14541_v63  ;;  %5713 = vmatpush.bf16.msra.mxu1 %v14405_v12  ;;  %v14765_v63 = vor.u32 %v18540_v48, %v14764_v46  ;;  %v21506_v11 = vpack.c.bf16 %v4908_v4, %v4908_v4  ;;  %v14693_v12 = vor.u32 %v18522_v5, %v14692_v3  ;;  %v18498_v46 = vld [vmem:[%s20196_s20 + $0x224] sm:$0xf0]  ;;  %v14660_v48 = vld [vmem:[%s20196_s20 + $0x2a0] sm:$0xf]  ;;  %v21546_v31 = vpop.f32.mrf.mxu3  ;;  %v14716_v5 = vld [vmem:[%s20196_s20 + $0x310] sm:$0xf] }
 0x44c   : > { %v4668_v28 = vadd.f32 %v21446_v39, %v4655_v41  ;;  %v14597_v4 = vor.u32 %v18498_v46, %v14596_v44  ;;  %v14588_v39 = vld [vmem:[%s20196_s20 + $0x210] sm:$0xf]  ;;  %v14449_v41 = vor.u32 %v18459_v23, %v14446_v33  ;;  %v18473_v44 = vld [vmem:[%s20196_s20 + $0x164] sm:$0xf]  ;;  %v14502_v46 = vld [vmem:[%s20196_s20 + $0x168] sm:$0xf0] }
 0x44d   : > { %5726 = vmatpush.bf16.msra.mxu2 %v14469_v13  ;;  %5701 = vmatpush.bf16.msra.mxu0 %v14333_v49  ;;  %v14757_v13 = vor.u32 %v18538_v9, %v14756_v8  ;;  %v14676_v49 = vld [vmem:[%s20196_s20 + $0x2c0] sm:$0xf]  ;;  %v18528_v8 = vld [vmem:[%s20196_s20 + $0x314] sm:$0xf0]  ;;  %v14350_v23 = vld [vmem:[%s20196_s20 + $0x38] sm:$0xf0] }
 0x44e   : > { %v14677_v51 = vor.u32 %v18518_v24, %v14676_v49  ;;  %v4681_v3 = vadd.f32 %v21456_v62, %v4668_v28  ;;  %v21556_v9 = vld [vmem:[%s20188_s14] sm:$0xff]  ;;  %v14653_v62 = vor.u32 %v18512_v47, %v14652_v2 }
 0x44f   : > { %5739 = vmatpush.bf16.msra.mxu3 %v14533_v18  ;;  %5714 = vmatpush.bf16.msra.mxu1 %v14397_v25  ;;  %v18520_v18 = vld [vmem:[%s20196_s20 + $0x2d4] sm:$0xf0]  ;;  %v14740_v25 = vld [vmem:[%s20196_s20 + $0x340] sm:$0xf]  ;;  %v14828_v24 = vld [vmem:[%s20196_s20 + $0x3f0] sm:$0xf] }
 0x450   : > { %v14685_v0 = vor.u32 %v18520_v18, %v14684_v1  ;;  %v14717_v1 = vor.u32 %v18528_v8, %v14716_v5  ;;  %v14708_v18 = vld [vmem:[%s20196_s20 + $0x300] sm:$0xf]  ;;  %v14812_v2 = vld [vmem:[%s20196_s20 + $0x3d0] sm:$0xf]  ;;  %v18552_v50 = vld [vmem:[%s20196_s20 + $0x3d4] sm:$0xf0] }
 0x451   : > { %5727 = vmatpush.bf16.msra.mxu2 %v14461_v40  ;;  %5702 = vmatpush.bf16.msra.mxu0 %v14325_v43  ;;  %v18534_v40 = vld [vmem:[%s20196_s20 + $0x344] sm:$0xf0]  ;;  %v14733_v43 = vor.u32 %v18532_v42, %v14732_v30  ;;  %v4734_v20 = vpop.f32.mrf.mxu2  ;;  %v14374_v30 = vld [vmem:[%s20196_s20 + $0x68] sm:$0xf0]  ;;  %v14494_v47 = vld [vmem:[%s20196_s20 + $0x158] sm:$0xf0]  ;;  %v14813_v5 = vor.u32 %v18552_v50, %v14812_v2 }
 0x452   : > { %v14741_v15 = vor.u32 %v18534_v40, %v14740_v25  ;;  %v18556_v25 = vld [vmem:[%s20196_s20 + $0x3f4] sm:$0xf0]  ;;  %v14398_v2 = vld [vmem:[%s20196_s20 + $0x98] sm:$0xf0] }
 0x453   : > { %5740 = vmatpush.bf16.msra.mxu3 %v14525_v34  ;;  %5715 = vmatpush.bf16.msra.mxu1 %v14389_v55  ;;  %v14604_v34 = vld [vmem:[%s20196_s20 + $0x230] sm:$0xf]  ;;  %v14724_v55 = vld [vmem:[%s20196_s20 + $0x320] sm:$0xf]  ;;  %v4747_v37 = vpop.f32.mrf.mxu3 }
 0x454   : > { %5703 = vmatmul.bf16.vlgmr.msra.gmra.mxu0 %v21500_v54  ;;  %v14605_v58 = vor.u32 %v18500_v38, %v14604_v34  ;;  %v14709_v34 = vor.u32 %v18526_v19, %v14708_v18  ;;  %v18469_v18 = vld [vmem:[%s20196_s20 + $0x144] sm:$0xf]  ;;  %v14486_v19 = vld [vmem:[%s20196_s20 + $0x148] sm:$0xf0]  ;;  %v18451_v37 = vld [vmem:[%s20196_s20 + $0xb4] sm:$0xf] }
 0x455   : > { %5728 = vmatpush.bf16.msra.mxu2 %v14453_v56  ;;  %5747 = vmatpush.bf16.msrb.mxu0 %v14637_v59  ;;  %v18530_v56 = vld [vmem:[%s20196_s20 + $0x324] sm:$0xf0]  ;;  %v14661_v59 = vor.u32 %v18514_v53, %v14660_v48 }
 0x456   : > { %5716 = vmatmul.bf16.vlgmr.msra.gmra.mxu1 %v21502_v61  ;;  %v18554_v48 = vld [vmem:[%s20196_s20 + $0x3e4] sm:$0xf0] }
 0x457   : > { %5741 = vmatpush.bf16.msra.mxu3 %v14517_v57  ;;  %5760 = vmatpush.bf16.msrb.mxu1 %v14701_v60  ;;  %v4708_v57 = vpop.f32.mrf.mxu0  ;;  %v14725_v60 = vor.u32 %v18530_v56, %v14724_v55  ;;  %v14377_v55 = vor.u32 %v18441_v29, %v14374_v30  ;;  %v18449_v29 = vld [vmem:[%s20196_s20 + $0xa4] sm:$0xf] }
 0x458   : > { %5729 = vmatmul.bf16.vlgmr.msra.gmra.mxu2 %v21504_v10  ;;  %v14366_v57 = vld [vmem:[%s20196_s20 + $0x58] sm:$0xf0] }
 0x459   : > { %5773 = vmatpush.bf16.msrb.mxu2 %v14765_v63  ;;  %5748 = vmatpush.bf16.msrb.mxu0 %v14629_v45  ;;  %v18496_v63 = vld [vmem:[%s20196_s20 + $0x214] sm:$0xf0]  ;;  %v1503_v45 = vperm.slane %v21556_v9, 6 }
 0x45a   : > { %5742 = vmatmul.bf16.vlgmr.msra.gmra.mxu3 %v21506_v11 }
 0x45b   : > { %5761 = vmatpush.bf16.msrb.mxu1 %v14693_v12  ;;  %v14589_v12 = vor.u32 %v18496_v63, %v14588_v39  ;;  %v4707_v49 = vadd.f32 %v21526_v26, %v1503_v45  ;;  %v14645_v26 = vor.u32 %v18510_v17, %v14644_v16  ;;  %v14505_v39 = vor.u32 %v18473_v44, %v14502_v46  ;;  %v14430_v63 = vld [vmem:[%s20196_s20 + $0xd8] sm:$0xf0]  ;;  %v18437_v45 = vld [vmem:[%s20196_s20 + $0x44] sm:$0xf]  ;;  %v18550_v17 = vld [vmem:[%s20196_s20 + $0x3c4] sm:$0xf0] }
 0x45c   : > { %v18465_v46 = vld [vmem:[%s20196_s20 + $0x124] sm:$0xf] }
 0x45d   : > { %5774 = vmatpush.bf16.msrb.mxu2 %v14757_v13  ;;  %5749 = vmatpush.bf16.msrb.mxu0 %v14621_v21  ;;  %v14580_v13 = vld [vmem:[%s20196_s20 + $0x200] sm:$0xf]  ;;  %v4694_v21 = vadd.f32 %v21461_v6, %v4681_v3  ;;  %v4909_v6 = vmax.f32 %v21311_v35, 0.0  ;;  %v4720_v42 = vadd.f32 %v21531_v27, %v4707_v49  ;;  %v18471_v3 = vld [vmem:[%s20196_s20 + $0x154] sm:$0xf]  ;;  %v14489_v49 = vor.u32 %v18469_v18, %v14486_v19  ;;  %v4797_v44 = vpop.f32.mrf.mxu3 }
 0x45e   : > { %v14581_v40 = vor.u32 %v18494_v14, %v14580_v13  ;;  %v14820_v35 = vld [vmem:[%s20196_s20 + $0x3e0] sm:$0xf]  ;;  %v18453_v13 = vld [vmem:[%s20196_s20 + $0xc4] sm:$0xf]  ;;  %v14497_v16 = vor.u32 %v18471_v3, %v14494_v47  ;;  %v14780_v3 = vld [vmem:[%s20196_s20 + $0x390] sm:$0xf] }
 0x45f   : > { %5762 = vmatpush.bf16.msrb.mxu1 %v14685_v0  ;;  %v18443_v0 = vld [vmem:[%s20196_s20 + $0x74] sm:$0xf]  ;;  %v4910_v38 = vmax.f32 %v4694_v21, 0.0  ;;  %v21585_v28 = vpack.c.bf16 %v4909_v6, %v4909_v6  ;;  %v14821_v53 = vor.u32 %v18554_v48, %v14820_v35  ;;  %v14470_v48 = vld [vmem:[%s20196_s20 + $0x128] sm:$0xf0] }
 0x460   : > { %v18544_v47 = vld [vmem:[%s20196_s20 + $0x394] sm:$0xf0]  ;;  %v18461_v18 = vld [vmem:[%s20196_s20 + $0x104] sm:$0xf]  ;;  %v14454_v19 = vld [vmem:[%s20196_s20 + $0x108] sm:$0xf0] }
 0x461   : > { %5775 = vmatpush.bf16.msrb.mxu2 %v14749_v22  ;;  %5750 = vmatpush.bf16.msrb.mxu0 %v14613_v32  ;;  %v14382_v22 = vld [vmem:[%s20196_s20 + $0x78] sm:$0xf0]  ;;  %v18475_v32 = vld [vmem:[%s20196_s20 + $0x174] sm:$0xf]  ;;  %v21587_v27 = vpack.c.bf16 %v4910_v38, %v4910_v38 }
 0x462   : > { %v14385_v7 = vor.u32 %v18443_v0, %v14382_v22  ;;  %v4758_v0 = vpop.f32.mrf.mxu0  ;;  %v18435_v22 = vld [vmem:[%s20196_s20 + $0x34] sm:$0xf] }
 0x463   : > { %5763 = vmatpush.bf16.msrb.mxu1 %v14677_v51  ;;  %v14510_v51 = vld [vmem:[%s20196_s20 + $0x178] sm:$0xf0] }
 0x465   : > { %5776 = vmatpush.bf16.msrb.mxu2 %v14741_v15  ;;  %5751 = vmatpush.bf16.msrb.mxu0 %v14605_v58  ;;  %v14829_v15 = vor.u32 %v18556_v25, %v14828_v24  ;;  %v14513_v58 = vor.u32 %v18475_v32, %v14510_v51  ;;  %v4771_v24 = vpop.f32.mrf.mxu1  ;;  %v14414_v25 = vld [vmem:[%s20196_s20 + $0xb8] sm:$0xf0]  ;;  %v18548_v32 = vld [vmem:[%s20196_s20 + $0x3b4] sm:$0xf0]  ;;  %v18467_v51 = vld [vmem:[%s20196_s20 + $0x134] sm:$0xf] }
 0x466   : > { %v14417_v38 = vor.u32 %v18451_v37, %v14414_v25  ;;  %v18523_v37 = vld [vmem:[%s20196_s20 + $0x2f4] sm:$0xf]  ;;  %v14574_v25 = vld [vmem:[%s20196_s20 + $0x1f8] sm:$0xf0] }
 0x467   : > { %5764 = vmatpush.bf16.msrb.mxu1 %v14669_v36  ;;  %5786 = vmatpush.bf16.msrb.mxu3 %v14829_v15  ;;  %v18457_v36 = vld [vmem:[%s20196_s20 + $0xe4] sm:$0xf]  ;;  %v14478_v15 = vld [vmem:[%s20196_s20 + $0x138] sm:$0xf0] }
 0x468   : > { %v14481_v30 = vor.u32 %v18467_v51, %v14478_v15  ;;  %v14766_v51 = vld [vmem:[%s20196_s20 + $0x378] sm:$0xf0] }
 0x469   : > { %5777 = vmatpush.bf16.msrb.mxu2 %v14733_v43  ;;  %5752 = vmatpush.bf16.msrb.mxu0 %v14597_v4  ;;  %v14438_v43 = vld [vmem:[%s20196_s20 + $0xe8] sm:$0xf0]  ;;  %v18439_v4 = vld [vmem:[%s20196_s20 + $0x54] sm:$0xf] }
 0x46a   : > { %v14441_v56 = vor.u32 %v18457_v36, %v14438_v43  ;;  %v14788_v36 = vld [vmem:[%s20196_s20 + $0x3a0] sm:$0xf]  ;;  %v18546_v43 = vld [vmem:[%s20196_s20 + $0x3a4] sm:$0xf0] }
 0x46b   : > { %5765 = vmatpush.bf16.msrb.mxu1 %v14661_v59  ;;  %v18455_v59 = vld [vmem:[%s20196_s20 + $0xd4] sm:$0xf]  ;;  %5787 = vmatpush.bf16.msrb.mxu3 %v14821_v53  ;;  %v14789_v53 = vor.u32 %v18546_v43, %v14788_v36  ;;  %v14566_v36 = vld [vmem:[%s20196_s20 + $0x1e8] sm:$0xf0] }
 0x46c   : > { %v14433_v8 = vor.u32 %v18455_v59, %v14430_v63  ;;  %v14334_v59 = vld [vmem:[%s20196_s20 + $0x18] sm:$0xf0]  ;;  %v14473_v63 = vor.u32 %v18465_v46, %v14470_v48  ;;  %v14694_v43 = vld [vmem:[%s20196_s20 + $0x2e8] sm:$0xf0] }
 0x46d   : > { %5778 = vmatpush.bf16.msrb.mxu2 %v14725_v60  ;;  %5753 = vmatpush.bf16.msrb.mxu0 %v14589_v12  ;;  %v4733_v60 = vadd.f32 %v21540_v52, %v4720_v42  ;;  %v14369_v52 = vor.u32 %v18439_v4, %v14366_v57  ;;  %v14358_v12 = vld [vmem:[%s20196_s20 + $0x48] sm:$0xf0]  ;;  %v4784_v42 = vpop.f32.mrf.mxu2  ;;  %v18431_v57 = vld [vmem:[%s20196_s20 + $0x14] sm:$0xf]  ;;  %v4773_v50 = vpop.f32.mrf.mxu1 }
 0x46e   : > { %v14361_v21 = vor.u32 %v18437_v45, %v14358_v12  ;;  %v14781_v45 = vor.u32 %v18544_v47, %v14780_v3  ;;  %v18429_v12 = vld [vmem:[%s20196_s20 + $0x4] sm:$0xf] }
 0x46f   : > { %5766 = vmatpush.bf16.msrb.mxu1 %v14653_v62  ;;  %v4746_v14 = vadd.f32 %v21546_v31, %v4733_v60  ;;  %v14422_v62 = vld [vmem:[%s20196_s20 + $0xc8] sm:$0xf0]  ;;  %5788 = vmatpush.bf16.msrb.mxu3 %v14813_v5  ;;  %v18447_v60 = vld [vmem:[%s20196_s20 + $0x94] sm:$0xf]  ;;  %v18485_v47 = vld [vmem:[%s20196_s20 + $0x1c4] sm:$0xf] }
 0x470   : > { %v14425_v31 = vor.u32 %v18453_v13, %v14422_v62  ;;  %v14326_v13 = vld [vmem:[%s20196_s20 + $0x8] sm:$0xf0] }
 0x471   : > { %5779 = vmatpush.bf16.msrb.mxu2 %v14717_v1  ;;  %5754 = vmatpush.bf16.msrb.mxu0 %v14581_v40  ;;  %v14804_v1 = vld [vmem:[%s20196_s20 + $0x3c0] sm:$0xf]  ;;  %v4759_v33 = vadd.f32 %v4758_v0, %v4746_v14  ;;  %v14796_v40 = vld [vmem:[%s20196_s20 + $0x3b0] sm:$0xf]  ;;  %v18445_v14 = vld [vmem:[%s20196_s20 + $0x84] sm:$0xf] }
 0x472   : > { %v14805_v20 = vor.u32 %v18550_v17, %v14804_v1  ;;  %v14797_v6 = vor.u32 %v18548_v32, %v14796_v40  ;;  %v14337_v1 = vor.u32 %v18431_v57, %v14334_v59  ;;  %v14401_v17 = vor.u32 %v18447_v60, %v14398_v2  ;;  %v14702_v40 = vld [vmem:[%s20196_s20 + $0x2f8] sm:$0xf0]  ;;  %v18539_v32 = vld [vmem:[%s20196_s20 + $0x374] sm:$0xf] }
 0x473   : > { %5767 = vmatpush.bf16.msrb.mxu1 %v14645_v26  ;;  %v4772_v26 = vadd.f32 %v4771_v24, %v4759_v33  ;;  %v18491_v24 = vld [vmem:[%s20196_s20 + $0x1f4] sm:$0xf]  ;;  %v14622_v59 = vld [vmem:[%s20196_s20 + $0x258] sm:$0xf0] }
 0x474   : > { %5755 = vmatmul.bf16.vlgmr.msrb.gmra.mxu0 %v21585_v28  ;;  %5789 = vmatpush.bf16.msrb.mxu3 %v14805_v20  ;;  %v18507_v20 = vld [vmem:[%s20196_s20 + $0x274] sm:$0xf]  ;;  %v14577_v15 = vor.u32 %v18491_v24, %v14574_v25  ;;  %v14750_v2 = vld [vmem:[%s20196_s20 + $0x358] sm:$0xf0] }
 0x475   : > { %5780 = vmatpush.bf16.msrb.mxu2 %v14709_v34  ;;  %5799 = vmatpush.bf16.msra.mxu0 %v14385_v7  ;;  %v14353_v34 = vor.u32 %v18435_v22, %v14350_v23  ;;  %v18433_v7 = vld [vmem:[%s20196_s20 + $0x24] sm:$0xf]  ;;  %v4785_v35 = vadd.f32 %v4784_v42, %v4772_v26  ;;  %v4786_v0 = vpop.f32.mrf.mxu2  ;;  %v14772_v22 = vld [vmem:[%s20196_s20 + $0x380] sm:$0xf]  ;;  %v18542_v23 = vld [vmem:[%s20196_s20 + $0x384] sm:$0xf0] }
 0x476   : > { %5768 = vmatmul.bf16.vlgmr.msrb.gmra.mxu1 %v21587_v27  ;;  %v14773_v33 = vor.u32 %v18542_v23, %v14772_v22  ;;  %v18521_v42 = vld [vmem:[%s20196_s20 + $0x2e4] sm:$0xf]  ;;  %v18503_v57 = vld [vmem:[%s20196_s20 + $0x254] sm:$0xf]  ;;  %v14542_v22 = vld [vmem:[%s20196_s20 + $0x1b8] sm:$0xf0] }
 0x477   : > { %5812 = vmatpush.bf16.msra.mxu1 %v14449_v41  ;;  %v14342_v41 = vld [vmem:[%s20196_s20 + $0x28] sm:$0xf0]  ;;  %v18519_v60 = vld [vmem:[%s20196_s20 + $0x2d4] sm:$0xf]  ;;  %v14625_v3 = vor.u32 %v18503_v57, %v14622_v59  ;;  %v14670_v23 = vld [vmem:[%s20196_s20 + $0x2b8] sm:$0xf0] }
 0x478   : > { %5790 = vmatpush.bf16.msrb.mxu3 %v14797_v6  ;;  %v14329_v6 = vor.u32 %v18429_v12, %v14326_v13  ;;  %v14678_v12 = vld [vmem:[%s20196_s20 + $0x2c8] sm:$0xf0]  ;;  %v18533_v13 = vld [vmem:[%s20196_s20 + $0x344] sm:$0xf]  ;;  %v18483_v0 = vld [vmem:[%s20196_s20 + $0x1b4] sm:$0xf] }
 0x479   : > { %5825 = vmatpush.bf16.msra.mxu2 %v14513_v58  ;;  %5800 = vmatpush.bf16.msra.mxu0 %v14377_v55  ;;  %v14406_v58 = vld [vmem:[%s20196_s20 + $0xa8] sm:$0xf0]  ;;  %v4798_v55 = vadd.f32 %v4797_v44, %v4785_v35  ;;  %v18537_v35 = vld [vmem:[%s20196_s20 + $0x364] sm:$0xf]  ;;  %v14545_v24 = vor.u32 %v18483_v0, %v14542_v22 }
 0x47a   : > { %v14409_v4 = vor.u32 %v18449_v29, %v14406_v58  ;;  %v14705_v29 = vor.u32 %v18523_v37, %v14702_v40  ;;  %v18489_v58 = vld [vmem:[%s20196_s20 + $0x1e4] sm:$0xf]  ;;  %v14758_v44 = vld [vmem:[%s20196_s20 + $0x368] sm:$0xf0]  ;;  %v18531_v37 = vld [vmem:[%s20196_s20 + $0x334] sm:$0xf] }
 0x47b   : > { %5813 = vmatpush.bf16.msra.mxu1 %v14441_v56  ;;  %v14345_v56 = vor.u32 %v18433_v7, %v14342_v41  ;;  %v4911_v5 = vmax.f32 %v4798_v55, 0.0  ;;  %v18505_v7 = vld [vmem:[%s20196_s20 + $0x264] sm:$0xf]  ;;  %v14630_v41 = vld [vmem:[%s20196_s20 + $0x268] sm:$0xf0]  ;;  %v14569_v46 = vor.u32 %v18489_v58, %v14566_v36 }
 0x47c   : > { %5791 = vmatpush.bf16.msrb.mxu3 %v14789_v53  ;;  %v14633_v48 = vor.u32 %v18505_v7, %v14630_v41  ;;  %v18487_v53 = vld [vmem:[%s20196_s20 + $0x1d4] sm:$0xf]  ;;  %v14558_v55 = vld [vmem:[%s20196_s20 + $0x1d8] sm:$0xf0]  ;;  %v18497_v40 = vld [vmem:[%s20196_s20 + $0x224] sm:$0xf] }
 0x47d   : > { %5826 = vmatpush.bf16.msra.mxu2 %v14505_v39  ;;  %5801 = vmatpush.bf16.msra.mxu0 %v14369_v52  ;;  %v4760_v39 = vpop.f32.mrf.mxu0  ;;  %v18463_v52 = vld [vmem:[%s20196_s20 + $0x114] sm:$0xf]  ;;  %v21637_v62 = vpack.c.bf16 %v4911_v5, %v4911_v5  ;;  %v14561_v50 = vor.u32 %v18487_v53, %v14558_v55  ;;  %v14550_v5 = vld [vmem:[%s20196_s20 + $0x1c8] sm:$0xf0]  ;;  %v4836_v41 = vpop.f32.mrf.mxu2  ;;  %v14590_v36 = vld [vmem:[%s20196_s20 + $0x218] sm:$0xf0] }
 0x47e   : > { %v14686_v39 = vld [vmem:[%s20196_s20 + $0x2d8] sm:$0xf0]  ;;  %v14726_v7 = vld [vmem:[%s20196_s20 + $0x328] sm:$0xf0]  ;;  %v18495_v58 = vld [vmem:[%s20196_s20 + $0x214] sm:$0xf] }
 0x47f   : > { %5814 = vmatpush.bf16.msra.mxu1 %v14433_v8  ;;  %v14462_v8 = vld [vmem:[%s20196_s20 + $0x118] sm:$0xf0]  ;;  %5781 = vmatmul.bf16.vlgmr.msrb.gmra.mxu2 %v21637_v62 }
 0x480   : > { %5792 = vmatpush.bf16.msrb.mxu3 %v14781_v45  ;;  %v18517_v45 = vld [vmem:[%s20196_s20 + $0x2c4] sm:$0xf]  ;;  %v14526_v53 = vld [vmem:[%s20196_s20 + $0x198] sm:$0xf0] }
 0x481   : > { %5827 = vmatpush.bf16.msra.mxu2 %v14497_v16  ;;  %5802 = vmatpush.bf16.msra.mxu0 %v14361_v21  ;;  %v14390_v16 = vld [vmem:[%s20196_s20 + $0x88] sm:$0xf0]  ;;  %v14465_v21 = vor.u32 %v18463_v52, %v14462_v8  ;;  %v14654_v55 = vld [vmem:[%s20196_s20 + $0x298] sm:$0xf0] }
 0x482   : > { %v14393_v26 = vor.u32 %v18445_v14, %v14390_v16  ;;  %v14614_v8 = vld [vmem:[%s20196_s20 + $0x248] sm:$0xf0]  ;;  %v14553_v16 = vor.u32 %v18485_v47, %v14550_v5  ;;  %v18509_v47 = vld [vmem:[%s20196_s20 + $0x284] sm:$0xf] }
 0x483   : > { %5815 = vmatpush.bf16.msra.mxu1 %v14425_v31  ;;  %v14638_v31 = vld [vmem:[%s20196_s20 + $0x278] sm:$0xf0]  ;;  %v14742_v14 = vld [vmem:[%s20196_s20 + $0x348] sm:$0xf0]  ;;  %v18477_v5 = vld [vmem:[%s20196_s20 + $0x184] sm:$0xf] }
 0x484   : > { %5793 = vmatpush.bf16.msrb.mxu3 %v14773_v33  ;;  %v21689_v33 = vpop.f32.mrf.mxu1 }
 0x485   : > { %5828 = vmatpush.bf16.msra.mxu2 %v14489_v49  ;;  %5803 = vmatpush.bf16.msra.mxu0 %v14353_v34  ;;  %v4799_v49 = vpop.f32.mrf.mxu3  ;;  %v14457_v34 = vor.u32 %v18461_v18, %v14454_v19  ;;  %v14606_v18 = vld [vmem:[%s20196_s20 + $0x238] sm:$0xf0]  ;;  %v14681_v19 = vor.u32 %v18517_v45, %v14678_v12  ;;  %v4838_v45 = vpop.f32.mrf.mxu2 }
 0x486   : > { %v14734_v49 = vld [vmem:[%s20196_s20 + $0x338] sm:$0xf0] }
 0x487   : > { %5816 = vmatpush.bf16.msra.mxu1 %v14417_v38  ;;  %v14641_v38 = vor.u32 %v18507_v20, %v14638_v31  ;;  %v14745_v20 = vor.u32 %v18533_v13, %v14742_v14  ;;  %v21681_v31 = vpop.f32.mrf.mxu0 }
 0x488   : > { %5838 = vmatpush.bf16.msra.mxu3 %v14577_v15  ;;  %v18513_v15 = vld [vmem:[%s20196_s20 + $0x2a4] sm:$0xf] }
 0x489   : > { %5829 = vmatpush.bf16.msra.mxu2 %v14481_v30  ;;  %5804 = vmatpush.bf16.msra.mxu0 %v14345_v56  ;;  %v14769_v30 = vor.u32 %v18539_v32, %v14766_v51  ;;  %v14697_v56 = vor.u32 %v18521_v42, %v14694_v43  ;;  %v14598_v32 = vld [vmem:[%s20196_s20 + $0x228] sm:$0xf0]  ;;  %v14737_v51 = vor.u32 %v18531_v37, %v14734_v49 }
 0x48a   : > { %v14601_v42 = vor.u32 %v18497_v40, %v14598_v32  ;;  %v18553_v32 = vld [vmem:[%s20196_s20 + $0x3e4] sm:$0xf] }
 0x48b   : > { %5817 = vmatpush.bf16.msra.mxu1 %v14409_v4  ;;  %v14761_v4 = vor.u32 %v18537_v35, %v14758_v44  ;;  %v18511_v44 = vld [vmem:[%s20196_s20 + $0x294] sm:$0xf] }
 0x48c   : > { %5839 = vmatpush.bf16.msra.mxu3 %v14569_v46  ;;  %v4825_v57 = vpop.f32.mrf.mxu1 }
 0x48d   : > { %5830 = vmatpush.bf16.msra.mxu2 %v14473_v63  ;;  %5805 = vmatpush.bf16.msra.mxu0 %v14337_v1  ;;  %v18535_v63 = vld [vmem:[%s20196_s20 + $0x354] sm:$0xf]  ;;  %v14782_v57 = vld [vmem:[%s20196_s20 + $0x398] sm:$0xf0] }
 0x48e   : > { %v14753_v52 = vor.u32 %v18535_v63, %v14750_v2  ;;  %v18493_v63 = vld [vmem:[%s20196_s20 + $0x204] sm:$0xf]  ;;  %v14582_v2 = vld [vmem:[%s20196_s20 + $0x208] sm:$0xf0] }
 0x48f   : > { %5818 = vmatpush.bf16.msra.mxu1 %v14401_v17  ;;  %v18499_v17 = vld [vmem:[%s20196_s20 + $0x234] sm:$0xf]  ;;  %v4812_v46 = vpop.f32.mrf.mxu0 }
 0x490   : > { %5840 = vmatpush.bf16.msra.mxu3 %v14561_v50  ;;  %v14609_v25 = vor.u32 %v18499_v17, %v14606_v18  ;;  %v14657_v50 = vor.u32 %v18511_v44, %v14654_v55  ;;  %v18545_v46 = vld [vmem:[%s20196_s20 + $0x3a4] sm:$0xf] }
 0x491   : > { %5831 = vmatpush.bf16.msra.mxu2 %v14465_v21  ;;  %5806 = vmatpush.bf16.msra.mxu0 %v14329_v6  ;;  %v18515_v21 = vld [vmem:[%s20196_s20 + $0x2b4] sm:$0xf]  ;;  %v18481_v6 = vld [vmem:[%s20196_s20 + $0x1a4] sm:$0xf] }
 0x493   : > { %5819 = vmatpush.bf16.msra.mxu1 %v14393_v26  ;;  %v14534_v26 = vld [vmem:[%s20196_s20 + $0x1a8] sm:$0xf0] }
 0x494   : > { %5807 = vmatmul.bf16.vlgmr.msra.gmra.mxu0 %v21500_v54  ;;  %v14689_v54 = vor.u32 %v18519_v60, %v14686_v39  ;;  %5841 = vmatpush.bf16.msra.mxu3 %v14553_v16  ;;  %v1504_v60 = vperm.slane %v21556_v9, 7  ;;  %v14593_v39 = vor.u32 %v18495_v58, %v14590_v36  ;;  %v14585_v9 = vor.u32 %v18493_v63, %v14582_v2  ;;  %v14798_v58 = vld [vmem:[%s20196_s20 + $0x3b8] sm:$0xf0] }
 0x495   : > { %5832 = vmatpush.bf16.msra.mxu2 %v14457_v34  ;;  %5851 = vmatpush.bf16.msrb.mxu0 %v14641_v38  ;;  %v14662_v34 = vld [vmem:[%s20196_s20 + $0x2a8] sm:$0xf0]  ;;  %v18529_v38 = vld [vmem:[%s20196_s20 + $0x324] sm:$0xf] }
 0x496   : > { %5820 = vmatmul.bf16.vlgmr.msra.gmra.mxu1 %v21502_v61  ;;  %v18501_v61 = vld [vmem:[%s20196_s20 + $0x244] sm:$0xf]  ;;  %v14665_v43 = vor.u32 %v18513_v15, %v14662_v34  ;;  %v14729_v35 = vor.u32 %v18529_v38, %v14726_v7  ;;  %v14814_v34 = vld [vmem:[%s20196_s20 + $0x3d8] sm:$0xf0] }
 0x497   : > { %5864 = vmatpush.bf16.msrb.mxu1 %v14705_v29  ;;  %v14617_v1 = vor.u32 %v18501_v61, %v14614_v8  ;;  %v4849_v29 = vpop.f32.mrf.mxu3  ;;  %v18525_v61 = vld [vmem:[%s20196_s20 + $0x304] sm:$0xf]  ;;  %v14710_v8 = vld [vmem:[%s20196_s20 + $0x308] sm:$0xf0] }
 0x498   : > { %5833 = vmatmul.bf16.vlgmr.msra.gmra.mxu2 %v21504_v10  ;;  %v14673_v10 = vor.u32 %v18515_v21, %v14670_v23  ;;  %5842 = vmatpush.bf16.msra.mxu3 %v14545_v24  ;;  %v14713_v16 = vor.u32 %v18525_v61, %v14710_v8  ;;  %v18555_v24 = vld [vmem:[%s20196_s20 + $0x3f4] sm:$0xf]  ;;  %v18549_v7 = vld [vmem:[%s20196_s20 + $0x3c4] sm:$0xf] }
 0x499   : > { %5877 = vmatpush.bf16.msrb.mxu2 %v14769_v30  ;;  %5852 = vmatpush.bf16.msrb.mxu0 %v14633_v48  ;;  %v14537_v30 = vor.u32 %v18481_v6, %v14534_v26  ;;  %v18479_v48 = vld [vmem:[%s20196_s20 + $0x194] sm:$0xf] }
 0x49a   : > { %v14529_v59 = vor.u32 %v18479_v48, %v14526_v53  ;;  %v18551_v26 = vld [vmem:[%s20196_s20 + $0x3d4] sm:$0xf]  ;;  %v14790_v48 = vld [vmem:[%s20196_s20 + $0x3a8] sm:$0xf0] }
 0x49b   : > { %5865 = vmatpush.bf16.msrb.mxu1 %v14697_v56  ;;  %v18527_v56 = vld [vmem:[%s20196_s20 + $0x314] sm:$0xf]  ;;  %v14817_v38 = vor.u32 %v18551_v26, %v14814_v34 }
 0x49c   : > { %5843 = vmatpush.bf16.msra.mxu3 %v14537_v30 }
 0x49d   : > { %5878 = vmatpush.bf16.msrb.mxu2 %v14761_v4  ;;  %5853 = vmatpush.bf16.msrb.mxu0 %v14625_v3  ;;  %v14718_v4 = vld [vmem:[%s20196_s20 + $0x318] sm:$0xf0] }
 0x49e   : > { %v14721_v3 = vor.u32 %v18527_v56, %v14718_v4  ;;  %v14793_v56 = vor.u32 %v18545_v46, %v14790_v48  ;;  %v18543_v4 = vld [vmem:[%s20196_s20 + $0x394] sm:$0xf]  ;;  %v18565_v46 = vld [vmem:[%s20207_s1 + $0x44] sm:$0xf] }
 0x49f   : > { %5866 = vmatpush.bf16.msrb.mxu1 %v14689_v54  ;;  %v14518_v54 = vld [vmem:[%s20196_s20 + $0x188] sm:$0xf0]  ;;  %v4851_v12 = vpop.f32.mrf.mxu3 }
 0x4a0   : > { %5844 = vmatpush.bf16.msra.mxu3 %v14529_v59  ;;  %v14521_v13 = vor.u32 %v18477_v5, %v14518_v54 }
 0x4a1   : > { %5879 = vmatpush.bf16.msrb.mxu2 %v14753_v52  ;;  %5854 = vmatpush.bf16.msrb.mxu0 %v14617_v1  ;;  %v14646_v52 = vld [vmem:[%s20196_s20 + $0x288] sm:$0xf0]  ;;  %v4811_v1 = vadd.f32 %v21681_v31, %v1504_v60 }
 0x4a2   : > { %v14649_v14 = vor.u32 %v18509_v47, %v14646_v52  ;;  %v14774_v47 = vld [vmem:[%s20196_s20 + $0x388] sm:$0xf0] }
 0x4a3   : > { %5867 = vmatpush.bf16.msrb.mxu1 %v14681_v19  ;;  %v4824_v17 = vadd.f32 %v21689_v33, %v4811_v1  ;;  %v18585_v1 = vld [vmem:[%s20207_s1 + $0xe4] sm:$0xf] }
 0x4a4   : > { %5845 = vmatpush.bf16.msra.mxu3 %v14521_v13 }
 0x4a5   : > { %5880 = vmatpush.bf16.msrb.mxu2 %v14745_v20  ;;  %5855 = vmatpush.bf16.msrb.mxu0 %v14609_v25  ;;  %v4837_v18 = vadd.f32 %v4836_v41, %v4824_v17  ;;  %v14806_v41 = vld [vmem:[%s20196_s20 + $0x3c8] sm:$0xf0] }
 0x4a6   : > { %v14809_v30 = vor.u32 %v18549_v7, %v14806_v41  ;;  %v14884_v7 = vld [vmem:[%s20207_s1 + $0x60] sm:$0xf]  ;;  %v18571_v41 = vld [vmem:[%s20207_s1 + $0x6c] sm:$0xf0] }
 0x4a7   : > { %5868 = vmatpush.bf16.msrb.mxu1 %v14673_v10  ;;  %v4850_v19 = vadd.f32 %v4849_v29, %v4837_v18  ;;  %v14822_v10 = vld [vmem:[%s20196_s20 + $0x3e8] sm:$0xf0]  ;;  %v21730_v29 = vld [vmem:[%s20199_s0] sm:$0x3]  ;;  %v14950_v18 = vld [vmem:[%s20207_s1 + $0xf0] sm:$0xf0] }
 0x4a8   : > { %v14825_v6 = vor.u32 %v18553_v32, %v14822_v10  ;;  %v5051_v36 = vperm.slane %v21730_v29, 0  ;;  %v18575_v32 = vld [vmem:[%s20207_s1 + $0x8c] sm:$0xf0]  ;;  %v18573_v10 = vld [vmem:[%s20207_s1 + $0x84] sm:$0xf]  ;;  %s23649_s0 = sld [smem:[#allocation41_spill]] }
 0x4a9   : > { %5881 = vmatpush.bf16.msrb.mxu2 %v14737_v51  ;;  %5856 = vmatpush.bf16.msrb.mxu0 %v14601_v42  ;;  %v18547_v42 = vld [vmem:[%s20196_s20 + $0x3b4] sm:$0xf] }
 0x4ab   : > { %5869 = vmatpush.bf16.msrb.mxu1 %v14665_v43  ;;  %v14801_v43 = vor.u32 %v18547_v42, %v14798_v58  ;;  %v14885_v42 = vor.u32 %v18571_v41, %v14884_v7  ;;  %v14886_v58 = vld [vmem:[%s20207_s1 + $0x70] sm:$0xf0]  ;;  %v18611_v7 = vld [vmem:[%s20207_s1 + $0x1ac] sm:$0xf0]  ;;  %v18609_v41 = vld [vmem:[%s20207_s1 + $0x1a4] sm:$0xf] }
 0x4ad   : > { %5882 = vmatpush.bf16.msrb.mxu2 %v14729_v35  ;;  %5857 = vmatpush.bf16.msrb.mxu0 %v14593_v39  ;;  %v14785_v39 = vor.u32 %v18543_v4, %v14782_v57  ;;  %v14852_v57 = vld [vmem:[%s20207_s1 + $0x20] sm:$0xf] }
 0x4ae   : > { %s946_s3 = scalar_lea.vmem %s23649_s0, %s17915_s29 }
 0x4af   : > { %5870 = vmatpush.bf16.msrb.mxu1 %v14657_v50 }
 0x4b1   : > { %5883 = vmatpush.bf16.msrb.mxu2 %v14721_v3  ;;  %5858 = vmatpush.bf16.msrb.mxu0 %v14585_v9  ;;  %v4862_v20 = vpop.f32.mrf.mxu0  ;;  %v18541_v3 = vld [vmem:[%s20196_s20 + $0x384] sm:$0xf] }
 0x4b2   : > { %v4863_v31 = vadd.f32 %v4862_v20, %v4850_v19  ;;  %v14932_v19 = vld [vmem:[%s20207_s1 + $0xc0] sm:$0xf]  ;;  %v18583_v20 = vld [vmem:[%s20207_s1 + $0xcc] sm:$0xf0] }
 0x4b3   : > { %5871 = vmatpush.bf16.msrb.mxu1 %v14649_v14  ;;  %v4875_v21 = vpop.f32.mrf.mxu1  ;;  %v14948_v14 = vld [vmem:[%s20207_s1 + $0xe0] sm:$0xf] }
 0x4b4   : > { %5859 = vmatmul.bf16.vlgmr.msrb.gmra.mxu0 %v21585_v28  ;;  %v4876_v0 = vadd.f32 %v4875_v21, %v4863_v31  ;;  %v14953_v21 = vor.u32 %v18585_v1, %v14950_v18  ;;  %v18581_v31 = vld [vmem:[%s20207_s1 + $0xc4] sm:$0xf] }
 0x4b5   : > { %5884 = vmatpush.bf16.msrb.mxu2 %v14713_v16  ;;  %v18587_v16 = vld [vmem:[%s20207_s1 + $0xec] sm:$0xf0]  ;;  %v18617_v18 = vld [vmem:[%s20207_s1 + $0x1e4] sm:$0xf] }
 0x4b6   : > { %5872 = vmatmul.bf16.vlgmr.msrb.gmra.mxu1 %v21587_v27  ;;  %v14830_v27 = vld [vmem:[%s20196_s20 + $0x3f8] sm:$0xf0]  ;;  %v14949_v17 = vor.u32 %v18587_v16, %v14948_v14  ;;  %v15076_v14 = vld [vmem:[%s20207_s1 + $0x1e0] sm:$0xf] }
 0x4b7   : > { %v14833_v25 = vor.u32 %v18555_v24, %v14830_v27  ;;  %v14918_v24 = vld [vmem:[%s20207_s1 + $0xb0] sm:$0xf0] }
 0x4b8   : > { %5885 = vmatmul.bf16.vlgmr.msrb.gmra.mxu2 %v21637_v62  ;;  %6299 = vmatpush.bf16.msra.mxu0 %v14949_v17  ;;  %v18619_v17 = vld [vmem:[%s20207_s1 + $0x1ec] sm:$0xf0] }
 0x4b9   : > { %v4864_v49 = vpop.f32.mrf.mxu0  ;;  %6325 = vmatpush.bf16.msra.mxu2 %v14953_v21 }
 0x4ba   : > { %v18579_v49 = vld [vmem:[%s20207_s1 + $0xac] sm:$0xf0] }
 0x4bb   : > { %v4888_v22 = vpop.f32.mrf.mxu2  ;;  %v4877_v28 = vpop.f32.mrf.mxu1 }
 0x4bc   : > { %v4889_v23 = vadd.f32 %v4888_v22, %v4876_v0  ;;  %v14934_v0 = vld [vmem:[%s20207_s1 + $0xd0] sm:$0xf0]  ;;  %v14933_v22 = vor.u32 %v18583_v20, %v14932_v19  ;;  %v18577_v28 = vld [vmem:[%s20207_s1 + $0xa4] sm:$0xf]  ;;  %v15077_v20 = vor.u32 %v18619_v17, %v15076_v14  ;;  %v14878_v17 = vld [vmem:[%s20207_s1 + $0x58] sm:$0xf0] }
 0x4bd   : > { %v4901_v37 = vpop.f32.mrf.mxu3  ;;  %v14921_v27 = vor.u32 %v18577_v28, %v14918_v24  ;;  %v15078_v19 = vld [vmem:[%s20207_s1 + $0x1f0] sm:$0xf0] }
 0x4be   : > { %v4902_v33 = vadd.f32 %v4901_v37, %v4889_v23  ;;  %v14937_v23 = vor.u32 %v18581_v31, %v14934_v0  ;;  %6300 = vmatpush.bf16.msra.mxu0 %v14933_v22  ;;  %v14916_v37 = vld [vmem:[%s20207_s1 + $0xa0] sm:$0xf]  ;;  %v15081_v21 = vor.u32 %v18617_v18, %v15078_v19  ;;  %v14940_v31 = vld [vmem:[%s20207_s1 + $0xc8] sm:$0xf]  ;;  %v18584_v0 = vld [vmem:[%s20207_s1 + $0xd4] sm:$0xf0]  ;;  %6312 = vmatpush.bf16.msra.mxu1 %v15077_v20 }
 0x4bf   : > { %v18582_v22 = vld [vmem:[%s20207_s1 + $0xcc] sm:$0xf]  ;;  %v14941_v28 = vor.u32 %v18584_v0, %v14940_v31  ;;  %v15062_v24 = vld [vmem:[%s20207_s1 + $0x1d0] sm:$0xf0]  ;;  %v14996_v18 = vld [vmem:[%s20207_s1 + $0x140] sm:$0xf] }
 0x4c0   : > { %v4912_v62 = vmax.f32 %v4902_v33, 0.0  ;;  %6326 = vmatpush.bf16.msra.mxu2 %v14937_v23  ;;  %v14917_v33 = vor.u32 %v18579_v49, %v14916_v37  ;;  %v14942_v23 = vld [vmem:[%s20207_s1 + $0xd8] sm:$0xf0]  ;;  %v15060_v37 = vld [vmem:[%s20207_s1 + $0x1c0] sm:$0xf] }
 0x4c1   : > { %v18615_v49 = vld [vmem:[%s20207_s1 + $0x1cc] sm:$0xf0]  ;;  %v18597_v31 = vld [vmem:[%s20207_s1 + $0x144] sm:$0xf]  ;;  %v14998_v0 = vld [vmem:[%s20207_s1 + $0x150] sm:$0xf0] }
 0x4c2   : > { %v4920_v40 = vpack.c.bf16 %v4912_v62, %v4912_v62  ;;  %6301 = vmatpush.bf16.msra.mxu0 %v14917_v33  ;;  %v5052_v62 = vperm.slane %v21730_v29, 1  ;;  %v18569_v29 = vld [vmem:[%s20207_s1 + $0x64] sm:$0xf] }
 0x4c3   : > { %v4890_v51 = vpop.f32.mrf.mxu2  ;;  %v18613_v33 = vld [vmem:[%s20207_s1 + $0x1c4] sm:$0xf] }
 0x4c4   : > { %5794 = vmatmul.bf16.vlgmr.msrb.gmra.mxu3 %v4920_v40  ;;  %6327 = vmatpush.bf16.msra.mxu2 %v14921_v27  ;;  %v14945_v27 = vor.u32 %v18582_v22, %v14942_v23 }
 0x4c5   : > { %v4903_v15 = vpop.f32.mrf.mxu3  ;;  %5890 = vmatpush.bf16.msrb.mxu3 %v14833_v25 }
 0x4c6   : > { %v14902_v15 = vld [vmem:[%s20207_s1 + $0x90] sm:$0xf0] }
 0x4c7   : > { %v14905_v34 = vor.u32 %v18573_v10, %v14902_v15  ;;  %v15065_v10 = vor.u32 %v18613_v33, %v15062_v24  ;;  %v14926_v15 = vld [vmem:[%s20207_s1 + $0xb8] sm:$0xf0]  ;;  %v18562_v33 = vld [vmem:[%s20207_s1 + $0x2c] sm:$0xf] }
 0x4c9   : > { %5891 = vmatpush.bf16.msrb.mxu3 %v14825_v6  ;;  %6328 = vmatpush.bf16.msra.mxu2 %v14905_v34 }
 0x4cd   : > { %5892 = vmatpush.bf16.msrb.mxu3 %v14817_v38 }
 0x4d1   : > { %5893 = vmatpush.bf16.msrb.mxu3 %v14809_v30  ;;  %v5704_v35 = vpop.f32.mrf.mxu0 }
 0x4d2   : > { %v5705_v53 = vadd.f32 %v5704_v35, %v5051_v36  ;;  %v14889_v36 = vor.u32 %v18569_v29, %v14886_v58  ;;  %v14868_v35 = vld [vmem:[%s20207_s1 + $0x40] sm:$0xf]  ;;  %v18576_v58 = vld [vmem:[%s20207_s1 + $0x94] sm:$0xf0] }
 0x4d3   : > { %v5717_v44 = vpop.f32.mrf.mxu1 }
 0x4d4   : > { %5846 = vmatmul.bf16.vlgmr.msra.gmra.mxu3 %v21506_v11  ;;  %v5718_v55 = vadd.f32 %v5717_v44, %v5705_v53  ;;  %v14777_v11 = vor.u32 %v18541_v3, %v14774_v47  ;;  %6329 = vmatpush.bf16.msra.mxu2 %v14889_v36  ;;  %v18567_v44 = vld [vmem:[%s20207_s1 + $0x4c] sm:$0xf0]  ;;  %v14870_v53 = vld [vmem:[%s20207_s1 + $0x50] sm:$0xf0]  ;;  %v18557_v47 = vld [vmem:[%s20207_s1 + $0x4] sm:$0xf] }
 0x4d5   : > { %5894 = vmatpush.bf16.msrb.mxu3 %v14801_v43  ;;  %v14869_v48 = vor.u32 %v18567_v44, %v14868_v35  ;;  %v14873_v4 = vor.u32 %v18565_v46, %v14870_v53  ;;  %v18559_v3 = vld [vmem:[%s20207_s1 + $0xc] sm:$0xf0]  ;;  %v18574_v35 = vld [vmem:[%s20207_s1 + $0x8c] sm:$0xf]  ;;  %v14910_v44 = vld [vmem:[%s20207_s1 + $0x98] sm:$0xf0] }
 0x4d8   : > { %6330 = vmatpush.bf16.msra.mxu2 %v14873_v4  ;;  %v18605_v4 = vld [vmem:[%s20207_s1 + $0x184] sm:$0xf] }
 0x4d9   : > { %5895 = vmatpush.bf16.msrb.mxu3 %v14793_v56  ;;  %v5706_v2 = vpop.f32.mrf.mxu0 }
 0x4db   : > { %v5730_v59 = vpop.f32.mrf.mxu2  ;;  %v5719_v50 = vpop.f32.mrf.mxu1 }
 0x4dc   : > { %v5731_v63 = vadd.f32 %v5730_v59, %v5718_v55  ;;  %v18563_v59 = vld [vmem:[%s20207_s1 + $0x2c] sm:$0xf0]  ;;  %v14836_v50 = vld [vmem:[%s20207_s1] sm:$0xf] }
 0x4dd   : > { %v5743_v60 = vpop.f32.mrf.mxu3  ;;  %5896 = vmatpush.bf16.msrb.mxu3 %v14785_v39  ;;  %v14853_v39 = vor.u32 %v18563_v59, %v14852_v57  ;;  %v15030_v59 = vld [vmem:[%s20207_s1 + $0x190] sm:$0xf0] }
 0x4de   : > { %v5744_v5 = vadd.f32 %v5743_v60, %v5731_v63  ;;  %v18561_v60 = vld [vmem:[%s20207_s1 + $0x24] sm:$0xf]  ;;  %v14854_v63 = vld [vmem:[%s20207_s1 + $0x30] sm:$0xf0] }
 0x4df   : > { %v14857_v2 = vor.u32 %v18561_v60, %v14854_v63  ;;  %v14892_v60 = vld [vmem:[%s20207_s1 + $0x68] sm:$0xf]  ;;  %v15033_v63 = vor.u32 %v18605_v4, %v15030_v59 }
 0x4e1   : > { %5897 = vmatpush.bf16.msrb.mxu3 %v14777_v11  ;;  %v14838_v11 = vld [vmem:[%s20207_s1 + $0x10] sm:$0xf0]  ;;  %6331 = vmatpush.bf16.msra.mxu2 %v14857_v2 }
 0x4e3   : > { %v5732_v54 = vpop.f32.mrf.mxu2 }
 0x4e4   : > { %5898 = vmatmul.bf16.vlgmr.msrb.gmra.mxu3 %v4920_v40  ;;  %v14900_v40 = vld [vmem:[%s20207_s1 + $0x80] sm:$0xf]  ;;  %v14956_v54 = vld [vmem:[%s20207_s1 + $0xe8] sm:$0xf] }
 0x4e5   : > { %v5745_v52 = vpop.f32.mrf.mxu3  ;;  %v14901_v51 = vor.u32 %v18575_v32, %v14900_v40  ;;  %v14924_v40 = vld [vmem:[%s20207_s1 + $0xa8] sm:$0xf]  ;;  %v18580_v32 = vld [vmem:[%s20207_s1 + $0xb4] sm:$0xf0]  ;;  %6338 = vmatpush.bf16.msra.mxu3 %v15081_v21  ;;  %v18599_v21 = vld [vmem:[%s20207_s1 + $0x14c] sm:$0xf0] }
 0x4e6   : > { %v18588_v52 = vld [vmem:[%s20207_s1 + $0xf4] sm:$0xf0]  ;;  %v14997_v23 = vor.u32 %v18599_v21, %v14996_v18 }
 0x4e7   : > { %6302 = vmatpush.bf16.msra.mxu0 %v14901_v51  ;;  %v18578_v51 = vld [vmem:[%s20207_s1 + $0xac] sm:$0xf] }
 0x4e8   : > { %v14929_v34 = vor.u32 %v18578_v51, %v14926_v15  ;;  %v14982_v15 = vld [vmem:[%s20207_s1 + $0x130] sm:$0xf0] }
 0x4e9   : > { %6339 = vmatpush.bf16.msra.mxu3 %v15065_v10  ;;  %v18593_v10 = vld [vmem:[%s20207_s1 + $0x124] sm:$0xf] }
 0x4eb   : > { %6303 = vmatpush.bf16.msra.mxu0 %v14885_v42  ;;  %v14908_v42 = vld [vmem:[%s20207_s1 + $0x88] sm:$0xf] }
 0x4ef   : > { %6304 = vmatpush.bf16.msra.mxu0 %v14869_v48  ;;  %v14913_v48 = vor.u32 %v18574_v35, %v14910_v44  ;;  %v14966_v35 = vld [vmem:[%s20207_s1 + $0x110] sm:$0xf0] }
 0x4f1   : > { %v5756_v61 = vpop.f32.mrf.mxu0 }
 0x4f2   : > { %v5757_v8 = vadd.f32 %v5756_v61, %v5744_v5  ;;  %v14837_v5 = vor.u32 %v18559_v3, %v14836_v50  ;;  %v18570_v50 = vld [vmem:[%s20207_s1 + $0x6c] sm:$0xf]  ;;  %v14894_v3 = vld [vmem:[%s20207_s1 + $0x78] sm:$0xf0] }
 0x4f3   : > { %v5769_v45 = vpop.f32.mrf.mxu1  ;;  %6305 = vmatpush.bf16.msra.mxu0 %v14853_v39  ;;  %v18572_v39 = vld [vmem:[%s20207_s1 + $0x74] sm:$0xf0] }
 0x4f4   : > { %v21742_v12 = vadd.f32 %v5769_v45, %v5757_v8  ;;  %v14841_v8 = vor.u32 %v18557_v47, %v14838_v11  ;;  %v14957_v45 = vor.u32 %v18588_v52, %v14956_v54  ;;  %v14893_v2 = vor.u32 %v18572_v39, %v14892_v60  ;;  %v18603_v11 = vld [vmem:[%s20207_s1 + $0x16c] sm:$0xf0]  ;;  %v18601_v54 = vld [vmem:[%s20207_s1 + $0x164] sm:$0xf]  ;;  %v15068_v60 = vld [vmem:[%s20207_s1 + $0x1c8] sm:$0xf] }
 0x4f5   : > { %v14897_v47 = vor.u32 %v18570_v50, %v14894_v3  ;;  %v18616_v39 = vld [vmem:[%s20207_s1 + $0x1d4] sm:$0xf0]  ;;  %v15070_v50 = vld [vmem:[%s20207_s1 + $0x1d8] sm:$0xf0]  ;;  %v15052_v3 = vld [vmem:[%s20207_s1 + $0x1a8] sm:$0xf] }
 0x4f6   : > { %6332 = vmatpush.bf16.msra.mxu2 %v14841_v8  ;;  %v14876_v8 = vld [vmem:[%s20207_s1 + $0x48] sm:$0xf] }
 0x4f7   : > { %6306 = vmatpush.bf16.msra.mxu0 %v14837_v5  ;;  %v15012_v5 = vld [vmem:[%s20207_s1 + $0x160] sm:$0xf] }
 0x4f8   : > { %v15013_v52 = vor.u32 %v18603_v11, %v15012_v5  ;;  %v18610_v11 = vld [vmem:[%s20207_s1 + $0x1ac] sm:$0xf] }
 0x4f9   : > { %v5758_v13 = vpop.f32.mrf.mxu0 }
 0x4fa   : > { %v18586_v13 = vld [vmem:[%s20207_s1 + $0xec] sm:$0xf] }
 0x4fb   : > { %v5771_v9 = vpop.f32.mrf.mxu1  ;;  %6351 = vmatpush.bf16.msrb.mxu0 %v14957_v45  ;;  %v18568_v45 = vld [vmem:[%s20207_s1 + $0x54] sm:$0xf0] }
 0x4fc   : > { %v14958_v9 = vld [vmem:[%s20207_s1 + $0xf8] sm:$0xf0]  ;;  %v14877_v14 = vor.u32 %v18568_v45, %v14876_v8 }
 0x4fd   : > { %v14961_v1 = vor.u32 %v18586_v13, %v14958_v9 }
 0x4ff   : > { %6377 = vmatpush.bf16.msrb.mxu2 %v14961_v1  ;;  %6352 = vmatpush.bf16.msrb.mxu0 %v14941_v28  ;;  %v18566_v1 = vld [vmem:[%s20207_s1 + $0x4c] sm:$0xf]  ;;  %v18564_v28 = vld [vmem:[%s20207_s1 + $0x34] sm:$0xf0] }
 0x500   : > { %v14881_v20 = vor.u32 %v18566_v1, %v14878_v17  ;;  %v18608_v1 = vld [vmem:[%s20207_s1 + $0x194] sm:$0xf0]  ;;  %v18606_v17 = vld [vmem:[%s20207_s1 + $0x18c] sm:$0xf] }
 0x502   : > { %v21757_v25 = vpop.f32.mrf.mxu2 }
 0x503   : > { %6378 = vmatpush.bf16.msrb.mxu2 %v14945_v27  ;;  %v14862_v27 = vld [vmem:[%s20207_s1 + $0x38] sm:$0xf0]  ;;  %v5783_v8 = vadd.f32 %v21757_v25, %v21742_v12  ;;  %v15020_v12 = vld [vmem:[%s20207_s1 + $0x168] sm:$0xf]  ;;  %v18604_v25 = vld [vmem:[%s20207_s1 + $0x174] sm:$0xf0] }
 0x507   : > { %6379 = vmatpush.bf16.msrb.mxu2 %v14929_v34 }
 0x50a   : > { %v5784_v43 = vpop.f32.mrf.mxu2 }
 0x50b   : > { %v14909_v43 = vor.u32 %v18576_v58, %v14908_v42  ;;  %6380 = vmatpush.bf16.msrb.mxu2 %v14913_v48  ;;  %v14964_v42 = vld [vmem:[%s20207_s1 + $0x100] sm:$0xf]  ;;  %v18591_v58 = vld [vmem:[%s20207_s1 + $0x10c] sm:$0xf0]  ;;  %v15084_v48 = vld [vmem:[%s20207_s1 + $0x1e8] sm:$0xf] }
 0x50f   : > { %6381 = vmatpush.bf16.msrb.mxu2 %v14897_v47  ;;  %v18612_v47 = vld [vmem:[%s20207_s1 + $0x1b4] sm:$0xf0] }
 0x511   : > { %v5808_v6 = vpop.f32.mrf.mxu0 }
 0x512   : > { %v5809_v38 = vadd.f32 %v5808_v6, %v5052_v62  ;;  %v15061_v62 = vor.u32 %v18615_v49, %v15060_v37  ;;  %v15001_v37 = vor.u32 %v18597_v31, %v14998_v0  ;;  %v14860_v49 = vld [vmem:[%s20207_s1 + $0x28] sm:$0xf]  ;;  %v18602_v31 = vld [vmem:[%s20207_s1 + $0x16c] sm:$0xf]  ;;  %v15021_v0 = vor.u32 %v18604_v25, %v15020_v12 }
 0x513   : > { %v5821_v26 = vpop.f32.mrf.mxu1  ;;  %6382 = vmatpush.bf16.msrb.mxu2 %v14881_v20  ;;  %v14861_v24 = vor.u32 %v18564_v28, %v14860_v49  ;;  %v15004_v49 = vld [vmem:[%s20207_s1 + $0x148] sm:$0xf]  ;;  %v18600_v28 = vld [vmem:[%s20207_s1 + $0x154] sm:$0xf0] }
 0x514   : > { %v5822_v30 = vadd.f32 %v5821_v26, %v5809_v38  ;;  %v14925_v26 = vor.u32 %v18580_v32, %v14924_v40  ;;  %6313 = vmatpush.bf16.msra.mxu1 %v15061_v62  ;;  %v15044_v38 = vld [vmem:[%s20207_s1 + $0x1a0] sm:$0xf]  ;;  %v14865_v62 = vor.u32 %v18562_v33, %v14862_v27  ;;  %v18595_v32 = vld [vmem:[%s20207_s1 + $0x12c] sm:$0xf0]  ;;  %v18598_v33 = vld [vmem:[%s20207_s1 + $0x14c] sm:$0xf] }
 0x515   : > { %v15045_v29 = vor.u32 %v18611_v7, %v15044_v38  ;;  %v14980_v40 = vld [vmem:[%s20207_s1 + $0x120] sm:$0xf]  ;;  %v14985_v38 = vor.u32 %v18593_v10, %v14982_v15  ;;  %v15006_v27 = vld [vmem:[%s20207_s1 + $0x158] sm:$0xf0]  ;;  %v18594_v10 = vld [vmem:[%s20207_s1 + $0x12c] sm:$0xf] }
 0x516   : > { %6353 = vmatpush.bf16.msrb.mxu0 %v14925_v26  ;;  %v14981_v51 = vor.u32 %v18595_v32, %v14980_v40  ;;  %v18560_v26 = vld [vmem:[%s20207_s1 + $0x14] sm:$0xf0]  ;;  %v15009_v32 = vor.u32 %v18598_v33, %v15006_v27  ;;  %v15108_v25 = vld [vmem:[%s20216_s23 + $0x20] sm:$0xf]  ;;  %v18684_v27 = vld [vmem:[%s20216_s23 + $0x1f4] sm:$0xf0] }
 0x517   : > { %6383 = vmatpush.bf16.msrb.mxu2 %v14865_v62  ;;  %v14988_v62 = vld [vmem:[%s20207_s1 + $0x128] sm:$0xf]  ;;  %v18596_v40 = vld [vmem:[%s20207_s1 + $0x134] sm:$0xf0] }
 0x518   : > { %6314 = vmatpush.bf16.msra.mxu1 %v15045_v29  ;;  %v14846_v29 = vld [vmem:[%s20207_s1 + $0x18] sm:$0xf0]  ;;  %v14989_v15 = vor.u32 %v18596_v40, %v14988_v62  ;;  %v15340_v33 = vld [vmem:[%s20216_s23 + $0x1f0] sm:$0xf]  ;;  %v18624_v40 = vld [vmem:[%s20216_s23 + $0x14] sm:$0xf0] }
 0x519   : > { %v5810_v55 = vpop.f32.mrf.mxu0  ;;  %v15100_v62 = vld [vmem:[%s20216_s23 + $0x10] sm:$0xf] }
 0x51a   : > { %6354 = vmatpush.bf16.msrb.mxu0 %v14909_v43  ;;  %v15028_v55 = vld [vmem:[%s20207_s1 + $0x180] sm:$0xf]  ;;  %v14965_v43 = vor.u32 %v18591_v58, %v14964_v42  ;;  %v15148_v58 = vld [vmem:[%s20216_s23 + $0x70] sm:$0xf] }
 0x51b   : > { %v5823_v56 = vpop.f32.mrf.mxu1  ;;  %v5834_v61 = vpop.f32.mrf.mxu2 }
 0x51c   : > { %v21784_v16 = vadd.f32 %v5834_v61, %v5822_v30  ;;  %v15046_v30 = vld [vmem:[%s20207_s1 + $0x1b0] sm:$0xf0]  ;;  %v18607_v56 = vld [vmem:[%s20207_s1 + $0x18c] sm:$0xf0] }
 0x51d   : > { %v15049_v36 = vor.u32 %v18609_v41, %v15046_v30  ;;  %v15029_v57 = vor.u32 %v18607_v56, %v15028_v55  ;;  %v15014_v61 = vld [vmem:[%s20207_s1 + $0x170] sm:$0xf0]  ;;  %v18558_v41 = vld [vmem:[%s20207_s1 + $0xc] sm:$0xf]  ;;  %v18620_v55 = vld [vmem:[%s20207_s1 + $0x1f4] sm:$0xf0] }
 0x51e   : > { %6355 = vmatpush.bf16.msrb.mxu0 %v14893_v2  ;;  %v15017_v9 = vor.u32 %v18601_v54, %v15014_v61  ;;  %v14849_v30 = vor.u32 %v18558_v41, %v14846_v29  ;;  %v18618_v56 = vld [vmem:[%s20207_s1 + $0x1ec] sm:$0xf]  ;;  %v15085_v4 = vor.u32 %v18620_v55, %v15084_v48  ;;  %v15069_v2 = vor.u32 %v18616_v39, %v15068_v60  ;;  %v15054_v54 = vld [vmem:[%s20207_s1 + $0x1b8] sm:$0xf0]  ;;  %v15212_v39 = vld [vmem:[%s20216_s23 + $0xf0] sm:$0xf] }
 0x51f   : > { %6340 = vmatpush.bf16.msra.mxu3 %v15049_v36  ;;  %6315 = vmatpush.bf16.msra.mxu1 %v15029_v57  ;;  %v18589_v36 = vld [vmem:[%s20207_s1 + $0x104] sm:$0xf]  ;;  %v15086_v57 = vld [vmem:[%s20207_s1 + $0x1f8] sm:$0xf0]  ;;  %v15057_v61 = vor.u32 %v18610_v11, %v15054_v54  ;;  %v15124_v11 = vld [vmem:[%s20216_s23 + $0x40] sm:$0xf] }
 0x520   : > { %6384 = vmatpush.bf16.msrb.mxu2 %v14849_v30  ;;  %v14969_v44 = vor.u32 %v18589_v36, %v14966_v35  ;;  %v15089_v59 = vor.u32 %v18618_v56, %v15086_v57  ;;  %v18636_v36 = vld [vmem:[%s20216_s23 + $0x74] sm:$0xf0]  ;;  %v18630_v54 = vld [vmem:[%s20216_s23 + $0x44] sm:$0xf0] }
 0x521   : > { %v15149_v35 = vor.u32 %v18636_v36, %v15148_v58  ;;  %v15252_v58 = vld [vmem:[%s20216_s23 + $0x140] sm:$0xf] }
 0x522   : > { %6356 = vmatpush.bf16.msrb.mxu0 %v14877_v14  ;;  %v15036_v14 = vld [vmem:[%s20207_s1 + $0x188] sm:$0xf] }
 0x523   : > { %v5836_v6 = vpop.f32.mrf.mxu2  ;;  %6341 = vmatpush.bf16.msra.mxu3 %v15033_v63  ;;  %6316 = vmatpush.bf16.msra.mxu1 %v15013_v52  ;;  %v18614_v63 = vld [vmem:[%s20207_s1 + $0x1cc] sm:$0xf]  ;;  %v15053_v52 = vor.u32 %v18612_v47, %v15052_v3  ;;  %v15037_v18 = vor.u32 %v18608_v1, %v15036_v14  ;;  %v18650_v47 = vld [vmem:[%s20216_s23 + $0xe4] sm:$0xf0]  ;;  %v18628_v14 = vld [vmem:[%s20216_s23 + $0x34] sm:$0xf0] }
 0x524   : > { %v14844_v6 = vld [vmem:[%s20207_s1 + $0x8] sm:$0xf]  ;;  %v15073_v5 = vor.u32 %v18614_v63, %v15070_v50  ;;  %v18652_v63 = vld [vmem:[%s20216_s23 + $0xf4] sm:$0xf0]  ;;  %v15276_v1 = vld [vmem:[%s20216_s23 + $0x170] sm:$0xf] }
 0x525   : > { %v14845_v7 = vor.u32 %v18560_v26, %v14844_v6  ;;  %v14972_v6 = vld [vmem:[%s20207_s1 + $0x108] sm:$0xf]  ;;  %v18592_v26 = vld [vmem:[%s20207_s1 + $0x114] sm:$0xf0]  ;;  %v18632_v50 = vld [vmem:[%s20216_s23 + $0x54] sm:$0xf0] }
 0x526   : > { %6357 = vmatpush.bf16.msrb.mxu0 %v14861_v24  ;;  %v15005_v24 = vor.u32 %v18600_v28, %v15004_v49  ;;  %v14973_v29 = vor.u32 %v18592_v26, %v14972_v6  ;;  %v15180_v49 = vld [vmem:[%s20216_s23 + $0xb0] sm:$0xf]  ;;  %v18644_v28 = vld [vmem:[%s20216_s23 + $0xb4] sm:$0xf0]  ;;  %v15172_v6 = vld [vmem:[%s20216_s23 + $0xa0] sm:$0xf] }
 0x527   : > { %6342 = vmatpush.bf16.msra.mxu3 %v15017_v9  ;;  %6317 = vmatpush.bf16.msra.mxu1 %v14997_v23 }
 0x52a   : > { %6358 = vmatpush.bf16.msrb.mxu0 %v14845_v7  ;;  %v14974_v7 = vld [vmem:[%s20207_s1 + $0x118] sm:$0xf0] }
 0x52b   : > { %6343 = vmatpush.bf16.msra.mxu3 %v15001_v37  ;;  %6318 = vmatpush.bf16.msra.mxu1 %v14981_v51  ;;  %v14990_v51 = vld [vmem:[%s20207_s1 + $0x138] sm:$0xf0] }
 0x52f   : > { %6344 = vmatpush.bf16.msra.mxu3 %v14985_v38  ;;  %6319 = vmatpush.bf16.msra.mxu1 %v14965_v43  ;;  %v18590_v38 = vld [vmem:[%s20207_s1 + $0x10c] sm:$0xf]  ;;  %v15140_v43 = vld [vmem:[%s20216_s23 + $0x60] sm:$0xf] }
 0x530   : > { %v14977_v30 = vor.u32 %v18590_v38, %v14974_v7  ;;  %v15332_v38 = vld [vmem:[%s20216_s23 + $0x1e0] sm:$0xf]  ;;  %v18682_v7 = vld [vmem:[%s20216_s23 + $0x1e4] sm:$0xf0] }
 0x531   : > { %v21809_v46 = vpop.f32.mrf.mxu0 }
 0x533   : > { %v21811_v53 = vpop.f32.mrf.mxu1  ;;  %6345 = vmatpush.bf16.msra.mxu3 %v14969_v44  ;;  %6364 = vmatpush.bf16.msrb.mxu1 %v15085_v4  ;;  %v18634_v44 = vld [vmem:[%s20216_s23 + $0x64] sm:$0xf0] }
 0x534   : > { %v15141_v56 = vor.u32 %v18634_v44, %v15140_v43  ;;  %v18662_v43 = vld [vmem:[%s20216_s23 + $0x144] sm:$0xf0]  ;;  %v15150_v44 = vld [vmem:[%s20216_s23 + $0x78] sm:$0xf0] }
 0x537   : > { %6390 = vmatpush.bf16.msrb.mxu3 %v15089_v59  ;;  %6365 = vmatpush.bf16.msrb.mxu1 %v15069_v2  ;;  %v15132_v2 = vld [vmem:[%s20216_s23 + $0x50] sm:$0xf] }
 0x538   : > { %v15133_v3 = vor.u32 %v18632_v50, %v15132_v2  ;;  %v15142_v2 = vld [vmem:[%s20216_s23 + $0x68] sm:$0xf0]  ;;  %v15156_v50 = vld [vmem:[%s20216_s23 + $0x80] sm:$0xf] }
 0x539   : > { %v5862_v19 = vpop.f32.mrf.mxu0 }
 0x53a   : > { %v15038_v19 = vld [vmem:[%s20207_s1 + $0x198] sm:$0xf0] }
 0x53b   : > { %v21827_v13 = vpop.f32.mrf.mxu2  ;;  %v5875_v22 = vpop.f32.mrf.mxu1  ;;  %6391 = vmatpush.bf16.msrb.mxu3 %v15073_v5  ;;  %6366 = vmatpush.bf16.msrb.mxu1 %v15053_v52  ;;  %v15041_v21 = vor.u32 %v18606_v17, %v15038_v19  ;;  %v15125_v52 = vor.u32 %v18630_v54, %v15124_v11  ;;  %v18668_v17 = vld [vmem:[%s20216_s23 + $0x174] sm:$0xf0] }
 0x53c   : > { %v15022_v22 = vld [vmem:[%s20207_s1 + $0x178] sm:$0xf0]  ;;  %v15277_v19 = vor.u32 %v18668_v17, %v15276_v1  ;;  %v15134_v17 = vld [vmem:[%s20216_s23 + $0x58] sm:$0xf0]  ;;  %s23650_s1 = sld [smem:[#allocation42_spill]] }
 0x53d   : > { %v15025_v23 = vor.u32 %v18602_v31, %v15022_v22  ;;  %v18626_v31 = vld [vmem:[%s20216_s23 + $0x24] sm:$0xf0]  ;;  %v18631_v1 = vld [vmem:[%s20216_s23 + $0x54] sm:$0xf] }
 0x53e   : > { %v15109_v22 = vor.u32 %v18626_v31, %v15108_v25  ;;  %v18649_v25 = vld [vmem:[%s20216_s23 + $0xe4] sm:$0xf]  ;;  %v15206_v31 = vld [vmem:[%s20216_s23 + $0xe8] sm:$0xf0] }
 0x53f   : > { %6392 = vmatpush.bf16.msrb.mxu3 %v15057_v61  ;;  %6367 = vmatpush.bf16.msrb.mxu1 %v15037_v18  ;;  %v15196_v61 = vld [vmem:[%s20216_s23 + $0xd0] sm:$0xf] }
 0x542   : > { %s23361_s13 = scalar_lea.vmem %s23650_s1, %s17914_s26 }
 0x543   : > { %v5888_v34 = vpop.f32.mrf.mxu2  ;;  %6393 = vmatpush.bf16.msrb.mxu3 %v15041_v21  ;;  %6368 = vmatpush.bf16.msrb.mxu1 %v15021_v0  ;;  %v18646_v21 = vld [vmem:[%s20216_s23 + $0xc4] sm:$0xf0]  ;;  %v15268_v0 = vld [vmem:[%s20216_s23 + $0x160] sm:$0xf] }
 0x544   : > { %v14993_v34 = vor.u32 %v18594_v10, %v14990_v51  ;;  %v15101_v10 = vor.u32 %v18624_v40, %v15100_v62  ;;  %v15260_v51 = vld [vmem:[%s20216_s23 + $0x150] sm:$0xf]  ;;  %v18647_v40 = vld [vmem:[%s20216_s23 + $0xd4] sm:$0xf] }
 0x547   : > { %v5795_v45 = vpop.f32.mrf.mxu3  ;;  %6394 = vmatpush.bf16.msrb.mxu3 %v15025_v23  ;;  %6369 = vmatpush.bf16.msrb.mxu1 %v15005_v24  ;;  %v18666_v23 = vld [vmem:[%s20216_s23 + $0x164] sm:$0xf0]  ;;  %v15181_v24 = vor.u32 %v18644_v28, %v15180_v49  ;;  %v18629_v49 = vld [vmem:[%s20216_s23 + $0x44] sm:$0xf]  ;;  %v15126_v28 = vld [vmem:[%s20216_s23 + $0x48] sm:$0xf0] }
 0x548   : > { %v5796_v9 = vadd.f32 %v5795_v45, %v5783_v8  ;;  %v18648_v8 = vld [vmem:[%s20216_s23 + $0xd4] sm:$0xf0]  ;;  %v15116_v45 = vld [vmem:[%s20216_s23 + $0x30] sm:$0xf] }
 0x549   : > { %v15117_v18 = vor.u32 %v18628_v14, %v15116_v45  ;;  %v15236_v45 = vld [vmem:[%s20216_s23 + $0x120] sm:$0xf] }
 0x54a   : > { %v5903_v20 = vpack.c.bf16 %v5796_v9, %v5796_v9  ;;  %v15197_v9 = vor.u32 %v18648_v8, %v15196_v61  ;;  %v15214_v61 = vld [vmem:[%s20216_s23 + $0xf8] sm:$0xf0] }
 0x54b   : > { %6395 = vmatpush.bf16.msrb.mxu3 %v15009_v32  ;;  %6370 = vmatpush.bf16.msrb.mxu1 %v14989_v15  ;;  %v15341_v32 = vor.u32 %v18684_v27, %v15340_v33  ;;  %v18664_v15 = vld [vmem:[%s20216_s23 + $0x154] sm:$0xf0]  ;;  %v15129_v33 = vor.u32 %v18629_v49, %v15126_v28  ;;  %v18674_v27 = vld [vmem:[%s20216_s23 + $0x1a4] sm:$0xf0]  ;;  %v18679_v49 = vld [vmem:[%s20216_s23 + $0x1d4] sm:$0xf] }
 0x54c   : > { %6307 = vmatmul.bf16.vlgmr.msra.gmra.mxu0 %v5903_v20  ;;  %6333 = vmatmul.bf16.vlgmr.msra.gmra.mxu2 %v5903_v20  ;;  %v15261_v26 = vor.u32 %v18664_v15, %v15260_v51  ;;  %v15220_v15 = vld [vmem:[%s20216_s23 + $0x100] sm:$0xf] }
 0x54d   : > { %6801 = vmatpush.bf16.msra.mxu0 %v15149_v35  ;;  %6827 = vmatpush.bf16.msra.mxu2 %v15277_v19  ;;  %v18635_v35 = vld [vmem:[%s20216_s23 + $0x74] sm:$0xf]  ;;  %v15137_v19 = vor.u32 %v18631_v1, %v15134_v17  ;;  %v18681_v1 = vld [vmem:[%s20216_s23 + $0x1e4] sm:$0xf] }
 0x54f   : > { %v5797_v37 = vpop.f32.mrf.mxu3  ;;  %6396 = vmatpush.bf16.msrb.mxu3 %v14993_v34  ;;  %6371 = vmatpush.bf16.msrb.mxu1 %v14973_v29  ;;  %v18642_v34 = vld [vmem:[%s20216_s23 + $0xa4] sm:$0xf0]  ;;  %v15333_v29 = vor.u32 %v18682_v7, %v15332_v38  ;;  %v15118_v38 = vld [vmem:[%s20216_s23 + $0x38] sm:$0xf0]  ;;  %v18667_v7 = vld [vmem:[%s20216_s23 + $0x174] sm:$0xf] }
 0x550   : > { %v15269_v37 = vor.u32 %v18666_v23, %v15268_v0  ;;  %v15209_v0 = vor.u32 %v18649_v25, %v15206_v31  ;;  %v18656_v23 = vld [vmem:[%s20216_s23 + $0x114] sm:$0xf0]  ;;  %v18661_v25 = vld [vmem:[%s20216_s23 + $0x144] sm:$0xf] }
 0x551   : > { %6802 = vmatpush.bf16.msra.mxu0 %v15141_v56  ;;  %v15164_v56 = vld [vmem:[%s20216_s23 + $0x90] sm:$0xf] }
 0x552   : > { %6828 = vmatpush.bf16.msra.mxu2 %v15269_v37 }
 0x553   : > { %6397 = vmatpush.bf16.msrb.mxu3 %v14977_v30  ;;  %v15092_v30 = vld [vmem:[%s20216_s23] sm:$0xf] }
 0x555   : > { %6803 = vmatpush.bf16.msra.mxu0 %v15133_v3  ;;  %v18638_v3 = vld [vmem:[%s20216_s23 + $0x84] sm:$0xf0] }
 0x556   : > { %6829 = vmatpush.bf16.msra.mxu2 %v15261_v26  ;;  %v15157_v11 = vor.u32 %v18638_v3, %v15156_v50  ;;  %v15342_v3 = vld [vmem:[%s20216_s23 + $0x1f8] sm:$0xf0] }
 0x557   : > { %v5847_v41 = vpop.f32.mrf.mxu3 }
 0x558   : > { %v5848_v42 = vadd.f32 %v5847_v41, %v21784_v16  ;;  %v15173_v41 = vor.u32 %v18642_v34, %v15172_v6  ;;  %v18654_v6 = vld [vmem:[%s20216_s23 + $0x104] sm:$0xf0]  ;;  %v18627_v34 = vld [vmem:[%s20216_s23 + $0x34] sm:$0xf] }
 0x559   : > { %6804 = vmatpush.bf16.msra.mxu0 %v15125_v52  ;;  %v18651_v52 = vld [vmem:[%s20216_s23 + $0xf4] sm:$0xf]  ;;  %v15221_v26 = vor.u32 %v18654_v6, %v15220_v15  ;;  %v18637_v6 = vld [vmem:[%s20216_s23 + $0x84] sm:$0xf] }
 0x55a   : > { %v5861_v48 = vadd.f32 %v21809_v46, %v5848_v42  ;;  %v18622_v42 = vld [vmem:[%s20216_s23 + $0x4] sm:$0xf0]  ;;  %v15217_v8 = vor.u32 %v18651_v52, %v15214_v61 }
 0x55b   : > { %v15093_v36 = vor.u32 %v18622_v42, %v15092_v30  ;;  %v15278_v30 = vld [vmem:[%s20216_s23 + $0x178] sm:$0xf0]  ;;  %v15292_v42 = vld [vmem:[%s20216_s23 + $0x190] sm:$0xf] }
 0x55c   : > { %6359 = vmatmul.bf16.vlgmr.msrb.gmra.mxu0 %v5903_v20  ;;  %6385 = vmatmul.bf16.vlgmr.msrb.gmra.mxu2 %v5903_v20  ;;  %v5874_v16 = vadd.f32 %v21811_v53, %v5861_v48  ;;  %v15213_v53 = vor.u32 %v18652_v63, %v15212_v39  ;;  %v15188_v20 = vld [vmem:[%s20216_s23 + $0xc0] sm:$0xf]  ;;  %v15253_v48 = vor.u32 %v18662_v43, %v15252_v58  ;;  %v18672_v58 = vld [vmem:[%s20216_s23 + $0x194] sm:$0xf0] }
 0x55d   : > { %v15189_v12 = vor.u32 %v18646_v21, %v15188_v20  ;;  %6805 = vmatpush.bf16.msra.mxu0 %v15117_v18  ;;  %v15308_v20 = vld [vmem:[%s20216_s23 + $0x1b0] sm:$0xf]  ;;  %v18676_v21 = vld [vmem:[%s20216_s23 + $0x1b4] sm:$0xf0]  ;;  %v15293_v43 = vor.u32 %v18672_v58, %v15292_v42  ;;  %v15238_v42 = vld [vmem:[%s20216_s23 + $0x128] sm:$0xf0] }
 0x55e   : > { %v5887_v4 = vadd.f32 %v21827_v13, %v5874_v16  ;;  %v15204_v13 = vld [vmem:[%s20216_s23 + $0xe0] sm:$0xf]  ;;  %v18640_v16 = vld [vmem:[%s20216_s23 + $0x94] sm:$0xf0]  ;;  %6830 = vmatpush.bf16.msra.mxu2 %v15253_v48 }
 0x55f   : > { %v5849_v55 = vpop.f32.mrf.mxu3  ;;  %v15205_v5 = vor.u32 %v18650_v47, %v15204_v13  ;;  %v15316_v47 = vld [vmem:[%s20216_s23 + $0x1c0] sm:$0xf] }
 0x560   : > { %v15153_v55 = vor.u32 %v18635_v35, %v15150_v44  ;;  %v18645_v35 = vld [vmem:[%s20216_s23 + $0xc4] sm:$0xf]  ;;  %v15190_v44 = vld [vmem:[%s20216_s23 + $0xc8] sm:$0xf0] }
 0x561   : > { %6806 = vmatpush.bf16.msra.mxu0 %v15109_v22  ;;  %v15228_v22 = vld [vmem:[%s20216_s23 + $0x110] sm:$0xf]  ;;  %v15193_v48 = vor.u32 %v18645_v35, %v15190_v44 }
 0x562   : > { %v15229_v37 = vor.u32 %v18656_v23, %v15228_v22  ;;  %v18639_v23 = vld [vmem:[%s20216_s23 + $0x94] sm:$0xf] }
 0x565   : > { %6807 = vmatpush.bf16.msra.mxu0 %v15101_v10 }
 0x567   : > { %v5899_v57 = vpop.f32.mrf.mxu3 }
 0x568   : > { %v5900_v59 = vadd.f32 %v5899_v57, %v5887_v4  ;;  %v15324_v4 = vld [vmem:[%s20216_s23 + $0x1d0] sm:$0xf]  ;;  %v15165_v57 = vor.u32 %v18640_v16, %v15164_v56  ;;  %v15110_v56 = vld [vmem:[%s20216_s23 + $0x28] sm:$0xf0]  ;;  %v18665_v16 = vld [vmem:[%s20216_s23 + $0x164] sm:$0xf] }
 0x569   : > { %6808 = vmatpush.bf16.msra.mxu0 %v15093_v36  ;;  %v15281_v36 = vor.u32 %v18667_v7, %v15278_v30  ;;  %v15318_v7 = vld [vmem:[%s20216_s23 + $0x1c8] sm:$0xf0]  ;;  %v18657_v30 = vld [vmem:[%s20216_s23 + $0x124] sm:$0xf] }
 0x56a   : > { %v5904_v60 = vpack.c.bf16 %v5900_v59, %v5900_v59  ;;  %v18680_v59 = vld [vmem:[%s20216_s23 + $0x1d4] sm:$0xf0]  ;;  %v15241_v58 = vor.u32 %v18657_v30, %v15238_v42  ;;  %v15796_v30 = vld [vmem:[%s20225_s21 + $0x380] sm:$0xf] }
 0x56b   : > { %v15325_v39 = vor.u32 %v18680_v59, %v15324_v4  ;;  %v15284_v59 = vld [vmem:[%s20216_s23 + $0x180] sm:$0xf]  ;;  %v18801_v42 = vld [vmem:[%s20225_s21 + $0x39c] sm:$0xf0] }
 0x56c   : > { %6320 = vmatmul.bf16.vlgmr.msra.gmra.mxu1 %v5904_v60  ;;  %6346 = vmatmul.bf16.vlgmr.msra.gmra.mxu3 %v5904_v60 }
 0x56d   : > { %6814 = vmatpush.bf16.msra.mxu1 %v15213_v53  ;;  %6840 = vmatpush.bf16.msra.mxu3 %v15341_v32  ;;  %v18633_v53 = vld [vmem:[%s20216_s23 + $0x64] sm:$0xf]  ;;  %v15198_v32 = vld [vmem:[%s20216_s23 + $0xd8] sm:$0xf0] }
 0x56e   : > { %6853 = vmatpush.bf16.msrb.mxu0 %v15153_v55  ;;  %v15145_v13 = vor.u32 %v18633_v53, %v15142_v2  ;;  %v15201_v51 = vor.u32 %v18647_v40, %v15198_v32  ;;  %v18625_v55 = vld [vmem:[%s20216_s23 + $0x24] sm:$0xf]  ;;  %v15182_v53 = vld [vmem:[%s20216_s23 + $0xb8] sm:$0xf0]  ;;  %v18683_v2 = vld [vmem:[%s20216_s23 + $0x1f4] sm:$0xf] }
 0x56f   : > { %v5901_v46 = vpop.f32.mrf.mxu3  ;;  %v15113_v4 = vor.u32 %v18625_v55, %v15110_v56  ;;  %v15246_v40 = vld [vmem:[%s20216_s23 + $0x138] sm:$0xf0]  ;;  %v18673_v56 = vld [vmem:[%s20216_s23 + $0x1a4] sm:$0xf] }
 0x570   : > { %v18660_v46 = vld [vmem:[%s20216_s23 + $0x134] sm:$0xf0]  ;;  %v15230_v55 = vld [vmem:[%s20216_s23 + $0x118] sm:$0xf0] }
 0x571   : > { %6815 = vmatpush.bf16.msra.mxu1 %v15205_v5  ;;  %6841 = vmatpush.bf16.msra.mxu3 %v15333_v29  ;;  %v18678_v5 = vld [vmem:[%s20216_s23 + $0x1c4] sm:$0xf0]  ;;  %v15121_v29 = vor.u32 %v18627_v34, %v15118_v38  ;;  %v22008_v32 = vld [vmem:[%s20210_s25] sm:$0xf]  ;;  %v18677_v34 = vld [vmem:[%s20216_s23 + $0x1c4] sm:$0xf] }
 0x572   : > { %v15317_v54 = vor.u32 %v18678_v5, %v15316_v47  ;;  %6854 = vmatpush.bf16.msrb.mxu0 %v15145_v13  ;;  %v15345_v47 = vor.u32 %v18683_v2, %v15342_v3  ;;  %v18623_v5 = vld [vmem:[%s20216_s23 + $0x14] sm:$0xf] }
 0x573   : > { %v18671_v2 = vld [vmem:[%s20216_s23 + $0x194] sm:$0xf] }
 0x575   : > { %6816 = vmatpush.bf16.msra.mxu1 %v15197_v9  ;;  %6842 = vmatpush.bf16.msra.mxu3 %v15325_v39  ;;  %v18658_v9 = vld [vmem:[%s20216_s23 + $0x124] sm:$0xf0] }
 0x576   : > { %v15237_v14 = vor.u32 %v18658_v9, %v15236_v45  ;;  %6855 = vmatpush.bf16.msrb.mxu0 %v15137_v19  ;;  %v18641_v9 = vld [vmem:[%s20216_s23 + $0xa4] sm:$0xf]  ;;  %v15334_v19 = vld [vmem:[%s20216_s23 + $0x1e8] sm:$0xf0] }
 0x579   : > { %6817 = vmatpush.bf16.msra.mxu1 %v15189_v12  ;;  %6843 = vmatpush.bf16.msra.mxu3 %v15317_v54  ;;  %v15309_v12 = vor.u32 %v18676_v21, %v15308_v20  ;;  %v18663_v54 = vld [vmem:[%s20216_s23 + $0x154] sm:$0xf]  ;;  %v15337_v20 = vor.u32 %v18681_v1, %v15334_v19  ;;  %v18621_v21 = vld [vmem:[%s20216_s23 + $0x4] sm:$0xf] }
 0x57a   : > { %6856 = vmatpush.bf16.msrb.mxu0 %v15129_v33  ;;  %v18745_v19 = vld [vmem:[%s20225_s21 + $0x1dc] sm:$0xf0] }
 0x57c   : > { %6372 = vmatmul.bf16.vlgmr.msrb.gmra.mxu1 %v5904_v60  ;;  %6398 = vmatmul.bf16.vlgmr.msrb.gmra.mxu3 %v5904_v60  ;;  %v15244_v60 = vld [vmem:[%s20216_s23 + $0x130] sm:$0xf] }
 0x57d   : > { %6818 = vmatpush.bf16.msra.mxu1 %v15181_v24  ;;  %v15245_v63 = vor.u32 %v18660_v46, %v15244_v60  ;;  %6844 = vmatpush.bf16.msra.mxu3 %v15309_v12  ;;  %v15300_v24 = vld [vmem:[%s20216_s23 + $0x1a0] sm:$0xf]  ;;  %v18670_v60 = vld [vmem:[%s20216_s23 + $0x184] sm:$0xf0]  ;;  %v15094_v12 = vld [vmem:[%s20216_s23 + $0x8] sm:$0xf0] }
 0x57e   : > { %v15301_v62 = vor.u32 %v18674_v27, %v15300_v24  ;;  %6857 = vmatpush.bf16.msrb.mxu0 %v15121_v29  ;;  %v15285_v39 = vor.u32 %v18670_v60, %v15284_v59  ;;  %v15097_v31 = vor.u32 %v18621_v21, %v15094_v12  ;;  %v15326_v24 = vld [vmem:[%s20216_s23 + $0x1d8] sm:$0xf0]  ;;  %v15321_v29 = vor.u32 %v18677_v34, %v15318_v7  ;;  %v18653_v60 = vld [vmem:[%s20216_s23 + $0x104] sm:$0xf] }
 0x57f   : > { %6831 = vmatpush.bf16.msra.mxu2 %v15245_v63  ;;  %v18643_v63 = vld [vmem:[%s20216_s23 + $0xb4] sm:$0xf]  ;;  %v15329_v27 = vor.u32 %v18679_v49, %v15326_v24  ;;  %v15540_v12 = vld [vmem:[%s20225_s21 + $0x180] sm:$0xf] }
 0x580   : > { %v15185_v13 = vor.u32 %v18643_v63, %v15182_v53  ;;  %v15508_v24 = vld [vmem:[%s20225_s21 + $0x140] sm:$0xf] }
 0x581   : > { %6819 = vmatpush.bf16.msra.mxu1 %v15173_v41  ;;  %6845 = vmatpush.bf16.msra.mxu3 %v15301_v62  ;;  %v18659_v62 = vld [vmem:[%s20216_s23 + $0x134] sm:$0xf]  ;;  %v15476_v7 = vld [vmem:[%s20225_s21 + $0x100] sm:$0xf] }
 0x582   : > { %6858 = vmatpush.bf16.msrb.mxu0 %v15113_v4  ;;  %v15249_v15 = vor.u32 %v18659_v62, %v15246_v40  ;;  %v15828_v40 = vld [vmem:[%s20225_s21 + $0x3c0] sm:$0xf] }
 0x583   : > { %6832 = vmatpush.bf16.msra.mxu2 %v15237_v14  ;;  %v15174_v14 = vld [vmem:[%s20216_s23 + $0xa8] sm:$0xf0] }
 0x584   : > { %v15177_v17 = vor.u32 %v18641_v9, %v15174_v14 }
 0x585   : > { %6820 = vmatpush.bf16.msra.mxu1 %v15165_v57  ;;  %6846 = vmatpush.bf16.msra.mxu3 %v15293_v43  ;;  %v15270_v57 = vld [vmem:[%s20216_s23 + $0x168] sm:$0xf0]  ;;  %v15310_v43 = vld [vmem:[%s20216_s23 + $0x1b8] sm:$0xf0] }
 0x586   : > { %v15273_v46 = vor.u32 %v18665_v16, %v15270_v57  ;;  %v15302_v57 = vld [vmem:[%s20216_s23 + $0x1a8] sm:$0xf0] }
 0x587   : > { %6833 = vmatpush.bf16.msra.mxu2 %v15229_v37  ;;  %v15166_v37 = vld [vmem:[%s20216_s23 + $0x98] sm:$0xf0]  ;;  %v15305_v53 = vor.u32 %v18673_v56, %v15302_v57 }
 0x588   : > { %v15169_v33 = vor.u32 %v18639_v23, %v15166_v37  ;;  %v18741_v23 = vld [vmem:[%s20225_s21 + $0x1c4] sm:$0xf] }
 0x589   : > { %6821 = vmatpush.bf16.msra.mxu1 %v15157_v11  ;;  %v15102_v11 = vld [vmem:[%s20216_s23 + $0x18] sm:$0xf0]  ;;  %6847 = vmatpush.bf16.msra.mxu3 %v15285_v39  ;;  %v5972_v39 = vperm.slane %v22008_v32, 1 }
 0x58a   : > { %v15105_v61 = vor.u32 %v18623_v5, %v15102_v11 }
 0x58b   : > { %6834 = vmatpush.bf16.msra.mxu2 %v15221_v26  ;;  %v15158_v26 = vld [vmem:[%s20216_s23 + $0x88] sm:$0xf0] }
 0x58c   : > { %6859 = vmatpush.bf16.msrb.mxu0 %v15105_v61  ;;  %v15161_v38 = vor.u32 %v18637_v6, %v15158_v26  ;;  %v18669_v61 = vld [vmem:[%s20216_s23 + $0x184] sm:$0xf] }
 0x58d   : > { %6866 = vmatpush.bf16.msrb.mxu1 %v15217_v8  ;;  %v15262_v8 = vld [vmem:[%s20216_s23 + $0x158] sm:$0xf0]  ;;  %6892 = vmatpush.bf16.msrb.mxu3 %v15345_v47 }
 0x58e   : > { %v15265_v45 = vor.u32 %v18663_v54, %v15262_v8  ;;  %v15286_v8 = vld [vmem:[%s20216_s23 + $0x188] sm:$0xf0] }
 0x58f   : > { %6879 = vmatpush.bf16.msrb.mxu2 %v15281_v36  ;;  %v18675_v36 = vld [vmem:[%s20216_s23 + $0x1b4] sm:$0xf]  ;;  %v15289_v14 = vor.u32 %v18669_v61, %v15286_v8  ;;  %v18789_v61 = vld [vmem:[%s20225_s21 + $0x344] sm:$0xf] }
 0x590   : > { %6860 = vmatpush.bf16.msrb.mxu0 %v15097_v31  ;;  %v15313_v44 = vor.u32 %v18675_v36, %v15310_v43  ;;  %v18725_v36 = vld [vmem:[%s20225_s21 + $0x144] sm:$0xf] }
 0x591   : > { %6867 = vmatpush.bf16.msrb.mxu1 %v15209_v0  ;;  %v15254_v0 = vld [vmem:[%s20216_s23 + $0x148] sm:$0xf0]  ;;  %6893 = vmatpush.bf16.msrb.mxu3 %v15337_v20  ;;  %v15830_v43 = vld [vmem:[%s20225_s21 + $0x3e0] sm:$0xf0] }
 0x592   : > { %v15257_v22 = vor.u32 %v18661_v25, %v15254_v0  ;;  %v18737_v25 = vld [vmem:[%s20225_s21 + $0x19c] sm:$0xf0]  ;;  %v5974_v0 = vperm.slane %v22008_v32, 3  ;;  %v15766_v8 = vld [vmem:[%s20225_s21 + $0x360] sm:$0xf0] }
 0x593   : > { %6880 = vmatpush.bf16.msrb.mxu2 %v15273_v46  ;;  %v15222_v46 = vld [vmem:[%s20216_s23 + $0x108] sm:$0xf0]  ;;  %v15541_v37 = vor.u32 %v18737_v25, %v15540_v12  ;;  %v18701_v12 = vld [vmem:[%s20225_s21 + $0x84] sm:$0xf] }
 0x594   : > { %v15225_v3 = vor.u32 %v18653_v60, %v15222_v46  ;;  %v18793_v60 = vld [vmem:[%s20225_s21 + $0x35c] sm:$0xf0]  ;;  %v15414_v25 = vld [vmem:[%s20225_s21 + $0xa0] sm:$0xf0] }
 0x595   : > { %6868 = vmatpush.bf16.msrb.mxu1 %v15201_v51  ;;  %6894 = vmatpush.bf16.msrb.mxu3 %v15329_v27  ;;  %v18729_v27 = vld [vmem:[%s20225_s21 + $0x15c] sm:$0xf0] }
 0x597   : > { %6881 = vmatpush.bf16.msrb.mxu2 %v15265_v45 }
 0x599   : > { %6869 = vmatpush.bf16.msrb.mxu1 %v15193_v48  ;;  %6895 = vmatpush.bf16.msrb.mxu3 %v15321_v29  ;;  %v18655_v48 = vld [vmem:[%s20216_s23 + $0x114] sm:$0xf] }
 0x59a   : > { %v15233_v4 = vor.u32 %v18655_v48, %v15230_v55  ;;  %v15510_v55 = vld [vmem:[%s20225_s21 + $0x160] sm:$0xf0] }
 0x59b   : > { %6882 = vmatpush.bf16.msrb.mxu2 %v15257_v22 }
 0x59d   : > { %6870 = vmatpush.bf16.msrb.mxu1 %v15185_v13  ;;  %6896 = vmatpush.bf16.msrb.mxu3 %v15313_v44 }
 0x59f   : > { %6883 = vmatpush.bf16.msrb.mxu2 %v15249_v15 }
 0x5a1   : > { %6871 = vmatpush.bf16.msrb.mxu1 %v15177_v17  ;;  %6897 = vmatpush.bf16.msrb.mxu3 %v15305_v53  ;;  %v15572_v17 = vld [vmem:[%s20225_s21 + $0x1c0] sm:$0xf]  ;;  %v18797_v53 = vld [vmem:[%s20225_s21 + $0x384] sm:$0xf] }
 0x5a2   : > { %v15573_v21 = vor.u32 %v18745_v19, %v15572_v17  ;;  %v18697_v17 = vld [vmem:[%s20225_s21 + $0x5c] sm:$0xf0]  ;;  %v15769_v19 = vor.u32 %v18789_v61, %v15766_v8  ;;  %v15484_v61 = vld [vmem:[%s20225_s21 + $0x108] sm:$0xf] }
 0x5a3   : > { %6884 = vmatpush.bf16.msrb.mxu2 %v15241_v58 }
 0x5a5   : > { %6872 = vmatpush.bf16.msrb.mxu1 %v15169_v33  ;;  %v15574_v33 = vld [vmem:[%s20225_s21 + $0x1e0] sm:$0xf0] }
 0x5a6   : > { %v15577_v15 = vor.u32 %v18741_v23, %v15574_v33  ;;  %v15732_v33 = vld [vmem:[%s20225_s21 + $0x300] sm:$0xf] }
 0x5a7   : > { %6885 = vmatpush.bf16.msrb.mxu2 %v15233_v4  ;;  %v15764_v4 = vld [vmem:[%s20225_s21 + $0x340] sm:$0xf] }
 0x5a9   : > { %6873 = vmatpush.bf16.msrb.mxu1 %v15161_v38  ;;  %v15542_v38 = vld [vmem:[%s20225_s21 + $0x1a0] sm:$0xf0] }
 0x5ab   : > { %6886 = vmatpush.bf16.msrb.mxu2 %v15225_v3 }
 0x5c9   : > { %v21949_v18 = vpop.f32.mrf.mxu0 }
 0x5cf   : > { %v21963_v10 = vpop.f32.mrf.mxu2 }
 0x5d1   : > { %v6310_v41 = vpop.f32.mrf.mxu0 }
 0x5d2   : > { %v5971_v41 = vperm.slane %v22008_v32, 0 }
 0x5d4   : > { %v6309_v16 = vadd.f32 %v21949_v18, %v5971_v41  ;;  %v6335_v18 = vadd.f32 %v21963_v10, %v5972_v39  ;;  %v5973_v10 = vperm.slane %v22008_v32, 2  ;;  %v15509_v32 = vor.u32 %v18729_v27, %v15508_v24  ;;  %v18721_v41 = vld [vmem:[%s20225_s21 + $0x11c] sm:$0xf0] }
 0x5d5   : > { %v15477_v56 = vor.u32 %v18721_v41, %v15476_v7  ;;  %v15765_v39 = vor.u32 %v18793_v60, %v15764_v4  ;;  %v18785_v27 = vld [vmem:[%s20225_s21 + $0x31c] sm:$0xf0]  ;;  %v15582_v7 = vld [vmem:[%s20225_s21 + $0x1e8] sm:$0xf0]  ;;  %v15670_v60 = vld [vmem:[%s20225_s21 + $0x2a0] sm:$0xf0] }
 0x5d7   : > { %v6336_v50 = vpop.f32.mrf.mxu2 }
 0x5d8   : > { %v15294_v50 = vld [vmem:[%s20216_s23 + $0x198] sm:$0xf0] }
 0x5d9   : > { %v21988_v52 = vpop.f32.mrf.mxu0  ;;  %v15297_v5 = vor.u32 %v18671_v2, %v15294_v50  ;;  %v15798_v2 = vld [vmem:[%s20225_s21 + $0x3a0] sm:$0xf0]  ;;  %v15513_v50 = vor.u32 %v18725_v36, %v15510_v55  ;;  %v18734_v55 = vld [vmem:[%s20225_s21 + $0x18c] sm:$0xf] }
 0x5da   : > { %v6361_v31 = vadd.f32 %v21988_v52, %v5973_v10  ;;  %v18733_v52 = vld [vmem:[%s20225_s21 + $0x184] sm:$0xf] }
 0x5db   : > { %6898 = vmatpush.bf16.msrb.mxu3 %v15297_v5  ;;  %v15545_v48 = vor.u32 %v18733_v52, %v15542_v38  ;;  %v18705_v5 = vld [vmem:[%s20225_s21 + $0x9c] sm:$0xf0]  ;;  %v15446_v10 = vld [vmem:[%s20225_s21 + $0xe0] sm:$0xf0]  ;;  %v18742_v38 = vld [vmem:[%s20225_s21 + $0x1cc] sm:$0xf] }
 0x5dc   : > { %v18781_v52 = vld [vmem:[%s20225_s21 + $0x304] sm:$0xf] }
 0x5df   : > { %v22002_v28 = vpop.f32.mrf.mxu2  ;;  %6899 = vmatpush.bf16.msrb.mxu3 %v15289_v14 }
 0x5e0   : > { %v6387_v26 = vadd.f32 %v22002_v28, %v5974_v0  ;;  %v18805_v28 = vld [vmem:[%s20225_s21 + $0x3c4] sm:$0xf] }
 0x5e1   : > { %v6362_v51 = vpop.f32.mrf.mxu0  ;;  %v15833_v46 = vor.u32 %v18805_v28, %v15830_v43  ;;  %v18693_v0 = vld [vmem:[%s20225_s21 + $0x44] sm:$0xf]  ;;  %v15548_v43 = vld [vmem:[%s20225_s21 + $0x188] sm:$0xf] }
 0x5e2   : > { %v18809_v51 = vld [vmem:[%s20225_s21 + $0x3dc] sm:$0xf0]  ;;  %v15702_v28 = vld [vmem:[%s20225_s21 + $0x2e0] sm:$0xf0] }
 0x5e3   : > { %v15829_v6 = vor.u32 %v18809_v51, %v15828_v40  ;;  %v15350_v40 = vld [vmem:[%s20225_s21 + $0x20] sm:$0xf0]  ;;  %v15733_v51 = vor.u32 %v18785_v27, %v15732_v33  ;;  %v18806_v27 = vld [vmem:[%s20225_s21 + $0x3cc] sm:$0xf] }
 0x5e7   : > { %v6388_v35 = vpop.f32.mrf.mxu2 }
 0x5e8   : > { %v15797_v35 = vor.u32 %v18801_v42, %v15796_v30  ;;  %v15700_v30 = vld [vmem:[%s20225_s21 + $0x2c0] sm:$0xf] }
 0x5e9   : > { %v6321_v59 = vpop.f32.mrf.mxu1  ;;  %v18777_v42 = vld [vmem:[%s20225_s21 + $0x2dc] sm:$0xf0] }
 0x5ea   : > { %v6322_v63 = vadd.f32 %v6321_v59, %v6309_v16  ;;  %v15444_v16 = vld [vmem:[%s20225_s21 + $0xc0] sm:$0xf]  ;;  %v15701_v36 = vor.u32 %v18777_v42, %v15700_v30  ;;  %v15806_v30 = vld [vmem:[%s20225_s21 + $0x3a8] sm:$0xf0] }
 0x5eb   : > { %v18713_v59 = vld [vmem:[%s20225_s21 + $0xdc] sm:$0xf0] }
 0x5ec   : > { %v6403_v13 = vmax.f32 %v6322_v63, 0.0  ;;  %v15445_v3 = vor.u32 %v18713_v59, %v15444_v16  ;;  %v15668_v16 = vld [vmem:[%s20225_s21 + $0x280] sm:$0xf]  ;;  %v18765_v59 = vld [vmem:[%s20225_s21 + $0x284] sm:$0xf] }
 0x5ee   : > { %v6407_v47 = vpack.c.bf16 %v6403_v13, %v6403_v13  ;;  %v18717_v13 = vld [vmem:[%s20225_s21 + $0x104] sm:$0xf] }
 0x5ef   : > { %v6347_v11 = vpop.f32.mrf.mxu3 }
 0x5f0   : > { %v6348_v54 = vadd.f32 %v6347_v11, %v6335_v18  ;;  %6809 = vmatmul.bf16.vlgmr.msra.gmra.mxu0 %v6407_v47  ;;  %v15478_v18 = vld [vmem:[%s20225_s21 + $0x120] sm:$0xf0] }
 0x5f1   : > { %v6323_v45 = vpop.f32.mrf.mxu1  ;;  %7700 = vmatpush.bf16.msra.mxu0 %v15573_v21 }
 0x5f2   : > { %v6404_v9 = vmax.f32 %v6348_v54, 0.0  ;;  %v15801_v54 = vor.u32 %v18797_v53, %v15798_v2  ;;  %v15481_v45 = vor.u32 %v18717_v13, %v15478_v18  ;;  %v18730_v53 = vld [vmem:[%s20225_s21 + $0x164] sm:$0xf0]  ;;  %v18726_v2 = vld [vmem:[%s20225_s21 + $0x14c] sm:$0xf] }
 0x5f3   : > { %v15518_v13 = vld [vmem:[%s20225_s21 + $0x168] sm:$0xf0]  ;;  %v15636_v18 = vld [vmem:[%s20225_s21 + $0x240] sm:$0xf] }
 0x5f4   : > { %v22033_v1 = vpack.c.bf16 %v6404_v9, %v6404_v9  ;;  %v18709_v9 = vld [vmem:[%s20225_s21 + $0xc4] sm:$0xf] }
 0x5f5   : > { %7701 = vmatpush.bf16.msra.mxu0 %v15541_v37  ;;  %v15348_v37 = vld [vmem:[%s20225_s21] sm:$0xf] }
 0x5f6   : > { %6822 = vmatmul.bf16.vlgmr.msra.gmra.mxu1 %v22033_v1 }
 0x5f7   : > { %v6349_v20 = vpop.f32.mrf.mxu3  ;;  %7713 = vmatpush.bf16.msra.mxu1 %v15829_v6  ;;  %v15580_v6 = vld [vmem:[%s20225_s21 + $0x1c8] sm:$0xf] }
 0x5f8   : > { %v15449_v20 = vor.u32 %v18709_v9, %v15446_v10  ;;  %v18718_v9 = vld [vmem:[%s20225_s21 + $0x10c] sm:$0xf] }
 0x5f9   : > { %v6373_v22 = vpop.f32.mrf.mxu1  ;;  %7702 = vmatpush.bf16.msra.mxu0 %v15509_v32  ;;  %v15734_v32 = vld [vmem:[%s20225_s21 + $0x320] sm:$0xf0] }
 0x5fa   : > { %v6374_v49 = vadd.f32 %v6373_v22, %v6361_v31  ;;  %v15417_v31 = vor.u32 %v18701_v12, %v15414_v25  ;;  %v15382_v22 = vld [vmem:[%s20225_s21 + $0x60] sm:$0xf0]  ;;  %v15452_v25 = vld [vmem:[%s20225_s21 + $0xc8] sm:$0xf] }
 0x5fb   : > { %7714 = vmatpush.bf16.msra.mxu1 %v15797_v35  ;;  %v15385_v23 = vor.u32 %v18693_v0, %v15382_v22  ;;  %v18738_v35 = vld [vmem:[%s20225_s21 + $0x1a4] sm:$0xf0]  ;;  %v15606_v12 = vld [vmem:[%s20225_s21 + $0x220] sm:$0xf0] }
 0x5fc   : > { %v6405_v62 = vmax.f32 %v6374_v49, 0.0  ;;  %v18689_v49 = vld [vmem:[%s20225_s21 + $0x1c] sm:$0xf0] }
 0x5fd   : > { %7703 = vmatpush.bf16.msra.mxu0 %v15477_v56  ;;  %v15349_v24 = vor.u32 %v18689_v49, %v15348_v37  ;;  %v15550_v56 = vld [vmem:[%s20225_s21 + $0x1a8] sm:$0xf0]  ;;  %v18810_v37 = vld [vmem:[%s20225_s21 + $0x3e4] sm:$0xf0] }
 0x5fe   : > { %v22050_v34 = vpack.c.bf16 %v6405_v62, %v6405_v62  ;;  %v18685_v62 = vld [vmem:[%s20225_s21 + $0x4] sm:$0xf]  ;;  %v15553_v4 = vor.u32 %v18734_v55, %v15550_v56  ;;  %v18710_v49 = vld [vmem:[%s20225_s21 + $0xcc] sm:$0xf] }
 0x5ff   : > { %v6399_v29 = vpop.f32.mrf.mxu3  ;;  %7715 = vmatpush.bf16.msra.mxu1 %v15765_v39  ;;  %v15673_v39 = vor.u32 %v18765_v59, %v15670_v60  ;;  %v15356_v59 = vld [vmem:[%s20225_s21 + $0x8] sm:$0xf] }
 0x600   : > { %v6400_v58 = vadd.f32 %v6399_v29, %v6387_v26  ;;  %6835 = vmatmul.bf16.vlgmr.msra.gmra.mxu2 %v22050_v34  ;;  %6861 = vmatmul.bf16.vlgmr.msrb.gmra.mxu0 %v6407_v47  ;;  %v15412_v47 = vld [vmem:[%s20225_s21 + $0x80] sm:$0xf]  ;;  %v15737_v26 = vor.u32 %v18781_v52, %v15734_v32  ;;  %v15585_v29 = vor.u32 %v18742_v38, %v15582_v7  ;;  %v18706_v52 = vld [vmem:[%s20225_s21 + $0xa4] sm:$0xf0]  ;;  %v15422_v38 = vld [vmem:[%s20225_s21 + $0xa8] sm:$0xf0] }
 0x601   : > { %v6375_v44 = vpop.f32.mrf.mxu1  ;;  %7726 = vmatpush.bf16.msra.mxu2 %v15577_v15  ;;  %7704 = vmatpush.bf16.msra.mxu0 %v15445_v3  ;;  %v15413_v14 = vor.u32 %v18705_v5, %v15412_v47  ;;  %v15353_v15 = vor.u32 %v18685_v62, %v15350_v40  ;;  %v15521_v3 = vor.u32 %v18726_v2, %v15518_v13  ;;  %v18761_v47 = vld [vmem:[%s20225_s21 + $0x25c] sm:$0xf0]  ;;  %v18757_v5 = vld [vmem:[%s20225_s21 + $0x244] sm:$0xf]  ;;  %v15838_v62 = vld [vmem:[%s20225_s21 + $0x3e8] sm:$0xf0] }
 0x602   : > { %v6406_v57 = vmax.f32 %v6400_v58, 0.0  ;;  %v18773_v58 = vld [vmem:[%s20225_s21 + $0x2c4] sm:$0xf]  ;;  %v15804_v32 = vld [vmem:[%s20225_s21 + $0x388] sm:$0xf] }
 0x603   : > { %7716 = vmatpush.bf16.msra.mxu1 %v15733_v51  ;;  %v15705_v44 = vor.u32 %v18773_v58, %v15702_v28  ;;  %v15841_v51 = vor.u32 %v18806_v27, %v15838_v62  ;;  %v15388_v58 = vld [vmem:[%s20225_s21 + $0x48] sm:$0xf]  ;;  %v18686_v2 = vld [vmem:[%s20225_s21 + $0xc] sm:$0xf]  ;;  %v6475_v27 = vld [vmem:[%s20219_s30] sm:$0x3] }
 0x604   : > { %v6410_v63 = vpack.c.bf16 %v6406_v57, %v6406_v57  ;;  %v18769_v57 = vld [vmem:[%s20225_s21 + $0x29c] sm:$0xf0]  ;;  %v15772_v28 = vld [vmem:[%s20225_s21 + $0x348] sm:$0xf] }
 0x605   : > { %7727 = vmatpush.bf16.msra.mxu2 %v15545_v48  ;;  %7705 = vmatpush.bf16.msra.mxu0 %v15413_v14  ;;  %v15549_v48 = vor.u32 %v18738_v35, %v15548_v43  ;;  %v15486_v14 = vld [vmem:[%s20225_s21 + $0x128] sm:$0xf0]  ;;  %v18794_v35 = vld [vmem:[%s20225_s21 + $0x364] sm:$0xf0] }
 0x606   : > { %6848 = vmatmul.bf16.vlgmr.msra.gmra.mxu3 %v6410_v63  ;;  %6874 = vmatmul.bf16.vlgmr.msrb.gmra.mxu1 %v22033_v1  ;;  %v15380_v1 = vld [vmem:[%s20225_s21 + $0x40] sm:$0xf]  ;;  %v15773_v55 = vor.u32 %v18794_v35, %v15772_v28  ;;  %v18690_v60 = vld [vmem:[%s20225_s21 + $0x24] sm:$0xf0] }
 0x607   : > { %v6401_v11 = vpop.f32.mrf.mxu3  ;;  %7739 = vmatpush.bf16.msra.mxu3 %v15833_v46  ;;  %v15381_v21 = vor.u32 %v18697_v17, %v15380_v1  ;;  %7717 = vmatpush.bf16.msra.mxu1 %v15701_v36  ;;  %v15669_v46 = vor.u32 %v18769_v57, %v15668_v16  ;;  %v15489_v1 = vor.u32 %v18718_v9, %v15486_v14  ;;  %v15604_v17 = vld [vmem:[%s20225_s21 + $0x200] sm:$0xf]  ;;  %v18698_v36 = vld [vmem:[%s20225_s21 + $0x64] sm:$0xf0]  ;;  %v18790_v16 = vld [vmem:[%s20225_s21 + $0x34c] sm:$0xf] }
 0x608   : > { %v15637_v11 = vor.u32 %v18761_v47, %v15636_v18  ;;  %v15389_v43 = vor.u32 %v18698_v36, %v15388_v58  ;;  %v18782_v18 = vld [vmem:[%s20225_s21 + $0x30c] sm:$0xf]  ;;  %v15590_v58 = vld [vmem:[%s20225_s21 + $0x1f0] sm:$0xf0] }
 0x609   : > { %7728 = vmatpush.bf16.msra.mxu2 %v15513_v50  ;;  %7706 = vmatpush.bf16.msra.mxu0 %v15381_v21  ;;  %v15742_v47 = vld [vmem:[%s20225_s21 + $0x328] sm:$0xf0] }
 0x60b   : > { %7740 = vmatpush.bf16.msra.mxu3 %v15801_v54  ;;  %7718 = vmatpush.bf16.msra.mxu1 %v15669_v46  ;;  %v15638_v54 = vld [vmem:[%s20225_s21 + $0x260] sm:$0xf0]  ;;  %v15740_v46 = vld [vmem:[%s20225_s21 + $0x308] sm:$0xf] }
 0x60c   : > { %v15641_v8 = vor.u32 %v18757_v5, %v15638_v54  ;;  %v15745_v5 = vor.u32 %v18782_v18, %v15742_v47  ;;  %v18778_v54 = vld [vmem:[%s20225_s21 + $0x2e4] sm:$0xf0]  ;;  %v15492_v47 = vld [vmem:[%s20225_s21 + $0x110] sm:$0xf] }
 0x60d   : > { %7729 = vmatpush.bf16.msra.mxu2 %v15481_v45  ;;  %7707 = vmatpush.bf16.msra.mxu0 %v15349_v24  ;;  %v18722_v45 = vld [vmem:[%s20225_s21 + $0x124] sm:$0xf0]  ;;  %v15454_v24 = vld [vmem:[%s20225_s21 + $0xe8] sm:$0xf0] }
 0x60e   : > { %v15485_v10 = vor.u32 %v18722_v45, %v15484_v61  ;;  %v15457_v40 = vor.u32 %v18710_v49, %v15454_v24  ;;  %v18774_v61 = vld [vmem:[%s20225_s21 + $0x2cc] sm:$0xf]  ;;  %v18754_v24 = vld [vmem:[%s20225_s21 + $0x224] sm:$0xf0] }
 0x60f   : > { %7741 = vmatpush.bf16.msra.mxu3 %v15769_v19  ;;  %7719 = vmatpush.bf16.msra.mxu1 %v15637_v11  ;;  %v18753_v19 = vld [vmem:[%s20225_s21 + $0x21c] sm:$0xf0]  ;;  %v15708_v11 = vld [vmem:[%s20225_s21 + $0x2c8] sm:$0xf]  ;;  %v15710_v45 = vld [vmem:[%s20225_s21 + $0x2e8] sm:$0xf0] }
 0x610   : > { %6887 = vmatmul.bf16.vlgmr.msrb.gmra.mxu2 %v22050_v34  ;;  %v18746_v34 = vld [vmem:[%s20225_s21 + $0x1e4] sm:$0xf0]  ;;  %v15605_v21 = vor.u32 %v18753_v19, %v15604_v17  ;;  %v15713_v9 = vor.u32 %v18774_v61, %v15710_v45  ;;  %v18766_v17 = vld [vmem:[%s20225_s21 + $0x28c] sm:$0xf]  ;;  %v15494_v61 = vld [vmem:[%s20225_s21 + $0x130] sm:$0xf0] }
 0x611   : > { %7730 = vmatpush.bf16.msra.mxu2 %v15449_v20  ;;  %v15581_v41 = vor.u32 %v18746_v34, %v15580_v6  ;;  %v18749_v20 = vld [vmem:[%s20225_s21 + $0x204] sm:$0xf]  ;;  %v18702_v34 = vld [vmem:[%s20225_s21 + $0x8c] sm:$0xf] }
 0x612   : > { %v15609_v0 = vor.u32 %v18749_v20, %v15606_v12 }
 0x613   : > { %7742 = vmatpush.bf16.msra.mxu3 %v15737_v26  ;;  %7752 = vmatpush.bf16.msrb.mxu0 %v15581_v41  ;;  %v18802_v26 = vld [vmem:[%s20225_s21 + $0x3a4] sm:$0xf0]  ;;  %v15425_v41 = vor.u32 %v18702_v34, %v15422_v38 }
 0x614   : > { %7720 = vmatpush.bf16.msra.mxu1 %v15605_v21  ;;  %v15805_v7 = vor.u32 %v18802_v26, %v15804_v32  ;;  %v15678_v21 = vld [vmem:[%s20225_s21 + $0x2a8] sm:$0xf0]  ;;  %v6477_v32 = vperm.slane %v6475_v27, 0 }
 0x615   : > { %7731 = vmatpush.bf16.msra.mxu2 %v15417_v31  ;;  %v18714_v31 = vld [vmem:[%s20225_s21 + $0xe4] sm:$0xf0]  ;;  %v15681_v12 = vor.u32 %v18766_v17, %v15678_v21  ;;  %v18711_v21 = vld [vmem:[%s20225_s21 + $0xd4] sm:$0xf] }
 0x616   : > { %6900 = vmatmul.bf16.vlgmr.msrb.gmra.mxu3 %v6410_v63  ;;  %v15516_v63 = vld [vmem:[%s20225_s21 + $0x148] sm:$0xf]  ;;  %v15453_v22 = vor.u32 %v18714_v31, %v15452_v25 }
 0x617   : > { %7743 = vmatpush.bf16.msra.mxu3 %v15705_v44  ;;  %7753 = vmatpush.bf16.msrb.mxu0 %v15549_v48  ;;  %v15517_v50 = vor.u32 %v18730_v53, %v15516_v63  ;;  %v18694_v44 = vld [vmem:[%s20225_s21 + $0x4c] sm:$0xf]  ;;  %v15357_v63 = vor.u32 %v18690_v60, %v15356_v59  ;;  %v18786_v53 = vld [vmem:[%s20225_s21 + $0x324] sm:$0xf0]  ;;  %v6478_v59 = vperm.slane %v6475_v27, 1 }
 0x618   : > { %v15390_v48 = vld [vmem:[%s20225_s21 + $0x68] sm:$0xf0]  ;;  %v15741_v13 = vor.u32 %v18786_v53, %v15740_v46  ;;  %v15644_v25 = vld [vmem:[%s20225_s21 + $0x248] sm:$0xf]  ;;  %v18727_v53 = vld [vmem:[%s20225_s21 + $0x154] sm:$0xf] }
 0x619   : > { %7732 = vmatpush.bf16.msra.mxu2 %v15385_v23  ;;  %v15836_v23 = vld [vmem:[%s20225_s21 + $0x3c8] sm:$0xf]  ;;  %v15393_v56 = vor.u32 %v18694_v44, %v15390_v48  ;;  %v18707_v27 = vld [vmem:[%s20225_s21 + $0xac] sm:$0xf0] }
 0x61a   : > { %v15837_v33 = vor.u32 %v18810_v37, %v15836_v23  ;;  %v18762_v31 = vld [vmem:[%s20225_s21 + $0x264] sm:$0xf0]  ;;  %v15646_v23 = vld [vmem:[%s20225_s21 + $0x268] sm:$0xf0] }
 0x61b   : > { %7744 = vmatpush.bf16.msra.mxu3 %v15673_v39  ;;  %7754 = vmatpush.bf16.msrb.mxu0 %v15517_v50  ;;  %v15358_v50 = vld [vmem:[%s20225_s21 + $0x28] sm:$0xf0] }
 0x61c   : > { %7765 = vmatpush.bf16.msrb.mxu1 %v15837_v33  ;;  %v15612_v33 = vld [vmem:[%s20225_s21 + $0x208] sm:$0xf] }
 0x61d   : > { %7733 = vmatpush.bf16.msra.mxu2 %v15353_v15  ;;  %v15420_v15 = vld [vmem:[%s20225_s21 + $0x88] sm:$0xf] }
 0x61e   : > { %v15421_v6 = vor.u32 %v18706_v52, %v15420_v15  ;;  %v15614_v15 = vld [vmem:[%s20225_s21 + $0x228] sm:$0xf0] }
 0x61f   : > { %7745 = vmatpush.bf16.msra.mxu3 %v15641_v8  ;;  %7755 = vmatpush.bf16.msrb.mxu0 %v15485_v10  ;;  %v15709_v8 = vor.u32 %v18778_v54, %v15708_v11  ;;  %v15676_v10 = vld [vmem:[%s20225_s21 + $0x288] sm:$0xf]  ;;  %v18723_v11 = vld [vmem:[%s20225_s21 + $0x12c] sm:$0xf0]  ;;  %v18719_v54 = vld [vmem:[%s20225_s21 + $0x114] sm:$0xf] }
 0x620   : > { %7766 = vmatpush.bf16.msrb.mxu1 %v15805_v7  ;;  %v15493_v45 = vor.u32 %v18723_v11, %v15492_v47  ;;  %v15598_v47 = vld [vmem:[%s20225_s21 + $0x1f8] sm:$0xf0] }
 0x621   : > { %7778 = vmatpush.bf16.msrb.mxu2 %v15585_v29  ;;  %v18798_v29 = vld [vmem:[%s20225_s21 + $0x38c] sm:$0xf] }
 0x622   : > { %v15809_v42 = vor.u32 %v18798_v29, %v15806_v30  ;;  %v18747_v30 = vld [vmem:[%s20225_s21 + $0x1ec] sm:$0xf0] }
 0x623   : > { %7746 = vmatpush.bf16.msra.mxu3 %v15609_v0  ;;  %7756 = vmatpush.bf16.msrb.mxu0 %v15453_v22  ;;  %v18758_v0 = vld [vmem:[%s20225_s21 + $0x24c] sm:$0xf]  ;;  %v15645_v22 = vor.u32 %v18762_v31, %v15644_v25  ;;  %v15462_v25 = vld [vmem:[%s20225_s21 + $0xf0] sm:$0xf0] }
 0x624   : > { %7767 = vmatpush.bf16.msrb.mxu1 %v15773_v55  ;;  %v15649_v37 = vor.u32 %v18758_v0, %v15646_v23  ;;  %v15556_v55 = vld [vmem:[%s20225_s21 + $0x190] sm:$0xf]  ;;  %v18807_v31 = vld [vmem:[%s20225_s21 + $0x3d4] sm:$0xf] }
 0x625   : > { %7779 = vmatpush.bf16.msrb.mxu2 %v15553_v4  ;;  %v15774_v4 = vld [vmem:[%s20225_s21 + $0x368] sm:$0xf0]  ;;  %v15846_v0 = vld [vmem:[%s20225_s21 + $0x3f0] sm:$0xf0] }
 0x626   : > { %v15777_v57 = vor.u32 %v18790_v16, %v15774_v4  ;;  %v18739_v16 = vld [vmem:[%s20225_s21 + $0x1ac] sm:$0xf0]  ;;  %v18735_v4 = vld [vmem:[%s20225_s21 + $0x194] sm:$0xf] }
 0x627   : > { %7791 = vmatpush.bf16.msrb.mxu3 %v15841_v51  ;;  %7757 = vmatpush.bf16.msrb.mxu0 %v15421_v6  ;;  %v18750_v51 = vld [vmem:[%s20225_s21 + $0x20c] sm:$0xf]  ;;  %v15557_v60 = vor.u32 %v18739_v16, %v15556_v55 }
 0x628   : > { %7768 = vmatpush.bf16.msrb.mxu1 %v15741_v13  ;;  %v15617_v52 = vor.u32 %v18750_v51, %v15614_v15  ;;  %v15812_v51 = vld [vmem:[%s20225_s21 + $0x390] sm:$0xf] }
 0x629   : > { %7780 = vmatpush.bf16.msrb.mxu2 %v15521_v3  ;;  %v15361_v3 = vor.u32 %v18686_v2, %v15358_v50  ;;  %v15526_v2 = vld [vmem:[%s20225_s21 + $0x170] sm:$0xf0]  ;;  %v18803_v15 = vld [vmem:[%s20225_s21 + $0x3ac] sm:$0xf0] }
 0x62a   : > { %v15529_v18 = vor.u32 %v18727_v53, %v15526_v2  ;;  %v15366_v53 = vld [vmem:[%s20225_s21 + $0x30] sm:$0xf0] }
 0x62b   : > { %7792 = vmatpush.bf16.msrb.mxu3 %v15809_v42  ;;  %7758 = vmatpush.bf16.msrb.mxu0 %v15389_v43  ;;  %v18743_v42 = vld [vmem:[%s20225_s21 + $0x1d4] sm:$0xf] }
 0x62c   : > { %7769 = vmatpush.bf16.msrb.mxu1 %v15709_v8  ;;  %v15593_v48 = vor.u32 %v18743_v42, %v15590_v58  ;;  %v18783_v2 = vld [vmem:[%s20225_s21 + $0x314] sm:$0xf] }
 0x62d   : > { %7781 = vmatpush.bf16.msrb.mxu2 %v15489_v1  ;;  %v18770_v1 = vld [vmem:[%s20225_s21 + $0x2a4] sm:$0xf0] }
 0x62e   : > { %v15677_v20 = vor.u32 %v18770_v1, %v15676_v10  ;;  %v15460_v10 = vld [vmem:[%s20225_s21 + $0xd0] sm:$0xf] }
 0x62f   : > { %7793 = vmatpush.bf16.msrb.mxu3 %v15777_v57  ;;  %7759 = vmatpush.bf16.msrb.mxu0 %v15357_v63  ;;  %v15558_v57 = vld [vmem:[%s20225_s21 + $0x1b0] sm:$0xf0]  ;;  %v18731_v63 = vld [vmem:[%s20225_s21 + $0x16c] sm:$0xf0] }
 0x630   : > { %7770 = vmatpush.bf16.msrb.mxu1 %v15677_v20  ;;  %v15561_v46 = vor.u32 %v18735_v4, %v15558_v57  ;;  %v18715_v1 = vld [vmem:[%s20225_s21 + $0xec] sm:$0xf0] }
 0x631   : > { %7782 = vmatpush.bf16.msrb.mxu2 %v15457_v40  ;;  %v15613_v40 = vor.u32 %v18754_v24, %v15612_v33  ;;  %v18811_v20 = vld [vmem:[%s20225_s21 + $0x3ec] sm:$0xf0] }
 0x632   : > { %v15428_v24 = vld [vmem:[%s20225_s21 + $0x90] sm:$0xf] }
 0x633   : > { %7794 = vmatpush.bf16.msrb.mxu3 %v15745_v5  ;;  %v15364_v4 = vld [vmem:[%s20225_s21 + $0x10] sm:$0xf] }
 0x634   : > { %7771 = vmatpush.bf16.msrb.mxu1 %v15645_v22  ;;  %v18691_v57 = vld [vmem:[%s20225_s21 + $0x2c] sm:$0xf0] }
 0x635   : > { %7783 = vmatpush.bf16.msrb.mxu2 %v15425_v41  ;;  %v15588_v41 = vld [vmem:[%s20225_s21 + $0x1d0] sm:$0xf] }
 0x636   : > { %v15589_v44 = vor.u32 %v18747_v30, %v15588_v41  ;;  %v15396_v41 = vld [vmem:[%s20225_s21 + $0x50] sm:$0xf] }
 0x637   : > { %7795 = vmatpush.bf16.msrb.mxu3 %v15713_v9  ;;  %v15497_v9 = vor.u32 %v18719_v54, %v15494_v61 }
 0x638   : > { %7772 = vmatpush.bf16.msrb.mxu1 %v15613_v40  ;;  %v15849_v40 = vor.u32 %v18807_v31, %v15846_v0  ;;  %v15684_v31 = vld [vmem:[%s20225_s21 + $0x290] sm:$0xf] }
 0x639   : > { %7784 = vmatpush.bf16.msrb.mxu2 %v15393_v56  ;;  %v18771_v0 = vld [vmem:[%s20225_s21 + $0x2ac] sm:$0xf0] }
 0x63b   : > { %7796 = vmatpush.bf16.msrb.mxu3 %v15681_v12 }
 0x63d   : > { %7785 = vmatpush.bf16.msrb.mxu2 %v15361_v3 }
 0x63f   : > { %7797 = vmatpush.bf16.msrb.mxu3 %v15649_v37 }
 0x643   : > { %7798 = vmatpush.bf16.msrb.mxu3 %v15617_v52  ;;  %v18703_v52 = vld [vmem:[%s20225_s21 + $0x94] sm:$0xf] }
 0x66d   : > { %v6810_v39 = vpop.f32.mrf.mxu0 }
 0x66e   : > { %v6811_v34 = vadd.f32 %v6810_v39, %v6477_v32  ;;  %v15524_v39 = vld [vmem:[%s20225_s21 + $0x150] sm:$0xf] }
 0x66f   : > { %v15525_v3 = vor.u32 %v18731_v63, %v15524_v39  ;;  %v18787_v39 = vld [vmem:[%s20225_s21 + $0x32c] sm:$0xf0]  ;;  %v18687_v63 = vld [vmem:[%s20225_s21 + $0x14] sm:$0xf] }
 0x670   : > { %v15369_v54 = vor.u32 %v18687_v63, %v15366_v53  ;;  %v15854_v63 = vld [vmem:[%s20225_s21 + $0x3f8] sm:$0xf0] }
 0x673   : > { %v6823_v14 = vpop.f32.mrf.mxu1 }
 0x674   : > { %v6824_v7 = vadd.f32 %v6823_v14, %v6811_v34  ;;  %v15814_v34 = vld [vmem:[%s20225_s21 + $0x3b0] sm:$0xf0] }
 0x675   : > { %v6812_v19 = vpop.f32.mrf.mxu0 }
 0x676   : > { %v15844_v19 = vld [vmem:[%s20225_s21 + $0x3d0] sm:$0xf] }
 0x677   : > { %v15845_v33 = vor.u32 %v18811_v20, %v15844_v19  ;;  %v18740_v19 = vld [vmem:[%s20225_s21 + $0x1b4] sm:$0xf0]  ;;  %v18736_v20 = vld [vmem:[%s20225_s21 + $0x19c] sm:$0xf] }
 0x67b   : > { %v6825_v49 = vpop.f32.mrf.mxu1 }
 0x67c   : > { %v15461_v49 = vor.u32 %v18715_v1, %v15460_v10  ;;  %v18775_v10 = vld [vmem:[%s20225_s21 + $0x2d4] sm:$0xf] }
 0x67d   : > { %v6862_v62 = vpop.f32.mrf.mxu0  ;;  %v15718_v1 = vld [vmem:[%s20225_s21 + $0x2f0] sm:$0xf0] }
 0x67e   : > { %v6863_v5 = vadd.f32 %v6862_v62, %v6478_v59  ;;  %v15465_v62 = vor.u32 %v18711_v21, %v15462_v25  ;;  %v15748_v59 = vld [vmem:[%s20225_s21 + $0x310] sm:$0xf]  ;;  %v15566_v21 = vld [vmem:[%s20225_s21 + $0x1b8] sm:$0xf0]  ;;  %v15721_v25 = vor.u32 %v18775_v10, %v15718_v1  ;;  %v15404_v1 = vld [vmem:[%s20225_s21 + $0x58] sm:$0xf] }
 0x67f   : > { %v15749_v11 = vor.u32 %v18787_v39, %v15748_v59  ;;  %v18712_v59 = vld [vmem:[%s20225_s21 + $0xdc] sm:$0xf] }
 0x680   : > { %v18808_v39 = vld [vmem:[%s20225_s21 + $0x3dc] sm:$0xf] }
 0x683   : > { %v6836_v6 = vpop.f32.mrf.mxu2  ;;  %v6875_v26 = vpop.f32.mrf.mxu1 }
 0x684   : > { %v6837_v29 = vadd.f32 %v6836_v6, %v6824_v7  ;;  %v6876_v8 = vadd.f32 %v6875_v26, %v6863_v5  ;;  %v15430_v6 = vld [vmem:[%s20225_s21 + $0xb0] sm:$0xf0]  ;;  %v15813_v7 = vor.u32 %v18803_v15, %v15812_v51  ;;  %v15365_v5 = vor.u32 %v18691_v57, %v15364_v4  ;;  %v18812_v4 = vld [vmem:[%s20225_s21 + $0x3f4] sm:$0xf0] }
 0x685   : > { %v6864_v38 = vpop.f32.mrf.mxu0  ;;  %v18799_v26 = vld [vmem:[%s20225_s21 + $0x394] sm:$0xf]  ;;  %v15433_v42 = vor.u32 %v18703_v52, %v15430_v6  ;;  %v15685_v51 = vor.u32 %v18771_v0, %v15684_v31  ;;  %v15652_v52 = vld [vmem:[%s20225_s21 + $0x250] sm:$0xf]  ;;  %v18716_v57 = vld [vmem:[%s20225_s21 + $0xf4] sm:$0xf0] }
 0x686   : > { %v15429_v38 = vor.u32 %v18707_v27, %v15428_v24  ;;  %v15817_v58 = vor.u32 %v18799_v26, %v15814_v34  ;;  %v15532_v24 = vld [vmem:[%s20225_s21 + $0x158] sm:$0xf]  ;;  %v18759_v34 = vld [vmem:[%s20225_s21 + $0x254] sm:$0xf]  ;;  %v18792_v31 = vld [vmem:[%s20225_s21 + $0x35c] sm:$0xf] }
 0x687   : > { %v18732_v27 = vld [vmem:[%s20225_s21 + $0x174] sm:$0xf0]  ;;  %v15790_v0 = vld [vmem:[%s20225_s21 + $0x378] sm:$0xf0] }
 0x688   : > { %v15533_v6 = vor.u32 %v18732_v27, %v15532_v24  ;;  %v18692_v24 = vld [vmem:[%s20225_s21 + $0x34] sm:$0xf0] }
 0x689   : > { %v6849_v36 = vpop.f32.mrf.mxu3  ;;  %v15756_v27 = vld [vmem:[%s20225_s21 + $0x318] sm:$0xf] }
 0x68a   : > { %v22177_v28 = vadd.f32 %v6849_v36, %v6837_v29  ;;  %v18699_v29 = vld [vmem:[%s20225_s21 + $0x6c] sm:$0xf0] }
 0x68b   : > { %v6838_v43 = vpop.f32.mrf.mxu2  ;;  %v6877_v35 = vpop.f32.mrf.mxu1  ;;  %v15780_v36 = vld [vmem:[%s20225_s21 + $0x350] sm:$0xf]  ;;  %v15397_v55 = vor.u32 %v18699_v29, %v15396_v41  ;;  %v18724_v41 = vld [vmem:[%s20225_s21 + $0x134] sm:$0xf0]  ;;  %v18720_v29 = vld [vmem:[%s20225_s21 + $0x11c] sm:$0xf] }
 0x68c   : > { %v22182_v56 = vpack.c.bf16 %v22177_v28, %v22177_v28  ;;  %v18695_v43 = vld [vmem:[%s20225_s21 + $0x54] sm:$0xf] }
 0x68d   : > { %v15398_v35 = vld [vmem:[%s20225_s21 + $0x70] sm:$0xf0] }
 0x68e   : > { %7708 = vmatmul.bf16.vlgmr.msra.gmra.mxu0 %v22182_v56  ;;  %7734 = vmatmul.bf16.vlgmr.msra.gmra.mxu2 %v22182_v56 }
 0x68f   : > { %7804 = vmatpush.bf16.msra.mxu0 %v15589_v44  ;;  %7830 = vmatpush.bf16.msra.mxu2 %v15593_v48  ;;  %v18791_v44 = vld [vmem:[%s20225_s21 + $0x354] sm:$0xf] }
 0x690   : > { %v15782_v48 = vld [vmem:[%s20225_s21 + $0x370] sm:$0xf0] }
 0x691   : > { %v6851_v50 = vpop.f32.mrf.mxu3 }
 0x692   : > { %v15750_v50 = vld [vmem:[%s20225_s21 + $0x330] sm:$0xf0] }
 0x693   : > { %7805 = vmatpush.bf16.msra.mxu0 %v15557_v60  ;;  %7831 = vmatpush.bf16.msra.mxu2 %v15561_v46  ;;  %v6888_v13 = vpop.f32.mrf.mxu2  ;;  %v15401_v60 = vor.u32 %v18695_v43, %v15398_v35  ;;  %v15785_v46 = vor.u32 %v18791_v44, %v15782_v48  ;;  %v15753_v61 = vor.u32 %v18783_v2, %v15750_v50  ;;  %v18751_v43 = vld [vmem:[%s20225_s21 + $0x214] sm:$0xf] }
 0x694   : > { %v6889_v14 = vadd.f32 %v6888_v13, %v6876_v8  ;;  %v15596_v13 = vld [vmem:[%s20225_s21 + $0x1d8] sm:$0xf]  ;;  %v15716_v8 = vld [vmem:[%s20225_s21 + $0x2d0] sm:$0xf]  ;;  %v15622_v35 = vld [vmem:[%s20225_s21 + $0x230] sm:$0xf0] }
 0x695   : > { %v15625_v53 = vor.u32 %v18751_v43, %v15622_v35  ;;  %v18865_v43 = vld [vmem:[%s20235_s15 + $0x19c] sm:$0xf0] }
 0x697   : > { %7806 = vmatpush.bf16.msra.mxu0 %v15525_v3  ;;  %7832 = vmatpush.bf16.msra.mxu2 %v15529_v18  ;;  %v18748_v3 = vld [vmem:[%s20225_s21 + $0x1f4] sm:$0xf0]  ;;  %v18744_v18 = vld [vmem:[%s20225_s21 + $0x1dc] sm:$0xf] }
 0x699   : > { %v6901_v17 = vpop.f32.mrf.mxu3 }
 0x69a   : > { %v6902_v12 = vadd.f32 %v6901_v17, %v6889_v14  ;;  %v15601_v14 = vor.u32 %v18744_v18, %v15598_v47  ;;  %v15564_v17 = vld [vmem:[%s20225_s21 + $0x198] sm:$0xf] }
 0x69b   : > { %7807 = vmatpush.bf16.msra.mxu0 %v15493_v45  ;;  %7833 = vmatpush.bf16.msra.mxu2 %v15497_v9  ;;  %v6890_v22 = vpop.f32.mrf.mxu2  ;;  %v18779_v45 = vld [vmem:[%s20225_s21 + $0x2ec] sm:$0xf0]  ;;  %v15597_v9 = vor.u32 %v18748_v3, %v15596_v13  ;;  %v15436_v3 = vld [vmem:[%s20225_s21 + $0x98] sm:$0xf] }
 0x69c   : > { %v6907_v23 = vrot.slane %v6902_v12, 6  ;;  %v22209_v37 = vpack.c.bf16 %v6902_v12, %v6902_v12  ;;  %v15717_v12 = vor.u32 %v18779_v45, %v15716_v8  ;;  %v15565_v22 = vor.u32 %v18740_v19, %v15564_v17  ;;  %v15820_v18 = vld [vmem:[%s20225_s21 + $0x398] sm:$0xf]  ;;  %v18800_v8 = vld [vmem:[%s20225_s21 + $0x39c] sm:$0xf] }
 0x69d   : > { %v18804_v47 = vld [vmem:[%s20225_s21 + $0x3b4] sm:$0xf0]  ;;  %v15822_v45 = vld [vmem:[%s20225_s21 + $0x3b8] sm:$0xf0] }
 0x69e   : > { %v6909_v32 = vsel %vm6908_vm0, %v22177_v28, %v6907_v23  ;;  %7721 = vmatmul.bf16.vlgmr.msra.gmra.mxu1 %v22209_v37  ;;  %7747 = vmatmul.bf16.vlgmr.msra.gmra.mxu3 %v22209_v37  ;;  %v18795_v28 = vld [vmem:[%s20225_s21 + $0x36c] sm:$0xf0]  ;;  %v15569_v23 = vor.u32 %v18736_v20, %v15566_v21  ;;  %v15788_v17 = vld [vmem:[%s20225_s21 + $0x358] sm:$0xf]  ;;  %v15825_v20 = vor.u32 %v18800_v8, %v15822_v45  ;;  %v18752_v45 = vld [vmem:[%s20225_s21 + $0x21c] sm:$0xf] }
 0x69f   : > { %6911 = vst [vmem:[%s946_s3] sm:$0xf] %v6909_v32  ;;  %7760 = vmatmul.bf16.vlgmr.msrb.gmra.mxu0 %v22182_v56  ;;  %7786 = vmatmul.bf16.vlgmr.msrb.gmra.mxu2 %v22182_v56  ;;  %v15781_v16 = vor.u32 %v18795_v28, %v15780_v36  ;;  %v18763_v32 = vld [vmem:[%s20225_s21 + $0x26c] sm:$0xf0]  ;;  %v18796_v19 = vld [vmem:[%s20225_s21 + $0x374] sm:$0xf0] }
 0x6a0   : > { %7808 = vmatpush.bf16.msra.mxu0 %v15461_v49  ;;  %7817 = vmatpush.bf16.msra.mxu1 %v15845_v33  ;;  %v18767_v49 = vld [vmem:[%s20225_s21 + $0x294] sm:$0xf]  ;;  %v18755_v28 = vld [vmem:[%s20225_s21 + $0x22c] sm:$0xf0]  ;;  %v18700_v21 = vld [vmem:[%s20225_s21 + $0x74] sm:$0xf0] }
 0x6a1   : > { %7834 = vmatpush.bf16.msra.mxu2 %v15465_v62  ;;  %7843 = vmatpush.bf16.msra.mxu3 %v15849_v40  ;;  %v6903_v30 = vpop.f32.mrf.mxu3  ;;  %v15686_v33 = vld [vmem:[%s20225_s21 + $0x2b0] sm:$0xf0]  ;;  %v18728_v62 = vld [vmem:[%s20225_s21 + $0x15c] sm:$0xf]  ;;  %v18756_v8 = vld [vmem:[%s20225_s21 + $0x234] sm:$0xf0] }
 0x6a2   : > { %v15534_v40 = vld [vmem:[%s20225_s21 + $0x178] sm:$0xf0]  ;;  %v15689_v15 = vor.u32 %v18767_v49, %v15686_v33  ;;  %v15405_v49 = vor.u32 %v18700_v21, %v15404_v1  ;;  %v18937_v1 = vld [vmem:[%s20235_s15 + $0x3dc] sm:$0xf0] }
 0x6a3   : > { %v15537_v26 = vor.u32 %v18728_v62, %v15534_v40  ;;  %v15502_v30 = vld [vmem:[%s20225_s21 + $0x138] sm:$0xf0]  ;;  %v18788_v62 = vld [vmem:[%s20225_s21 + $0x334] sm:$0xf0]  ;;  %v15793_v40 = vor.u32 %v18792_v31, %v15790_v0  ;;  %v18929_v31 = vld [vmem:[%s20235_s15 + $0x39c] sm:$0xf0] }
 0x6a4   : > { %7809 = vmatpush.bf16.msra.mxu0 %v15429_v38  ;;  %7818 = vmatpush.bf16.msra.mxu1 %v15813_v7  ;;  %v15654_v38 = vld [vmem:[%s20225_s21 + $0x270] sm:$0xf0]  ;;  %v15500_v7 = vld [vmem:[%s20225_s21 + $0x118] sm:$0xf]  ;;  %v15505_v48 = vor.u32 %v18720_v29, %v15502_v30 }
 0x6a5   : > { %7835 = vmatpush.bf16.msra.mxu2 %v15433_v42  ;;  %7844 = vmatpush.bf16.msra.mxu3 %v15817_v58  ;;  %v15653_v42 = vor.u32 %v18763_v32, %v15652_v52  ;;  %v15620_v58 = vld [vmem:[%s20225_s21 + $0x210] sm:$0xf]  ;;  %v15657_v36 = vor.u32 %v18759_v34, %v15654_v38  ;;  %v15501_v44 = vor.u32 %v18724_v41, %v15500_v7  ;;  %v18784_v52 = vld [vmem:[%s20225_s21 + $0x31c] sm:$0xf]  ;;  %v15724_v29 = vld [vmem:[%s20225_s21 + $0x2d8] sm:$0xf] }
 0x6a6   : > { %v15758_v32 = vld [vmem:[%s20225_s21 + $0x338] sm:$0xf0]  ;;  %v15757_v34 = vor.u32 %v18788_v62, %v15756_v27  ;;  %v18780_v30 = vld [vmem:[%s20225_s21 + $0x2f4] sm:$0xf0]  ;;  %v15892_v62 = vld [vmem:[%s20235_s15 + $0x40] sm:$0xf] }
 0x6a7   : > { %v15761_v41 = vor.u32 %v18784_v52, %v15758_v32  ;;  %v15725_v35 = vor.u32 %v18780_v30, %v15724_v29  ;;  %v18913_v52 = vld [vmem:[%s20235_s15 + $0x31c] sm:$0xf0] }
 0x6a8   : > { %7810 = vmatpush.bf16.msra.mxu0 %v15397_v55  ;;  %7819 = vmatpush.bf16.msra.mxu1 %v15781_v16  ;;  %v15468_v55 = vld [vmem:[%s20225_s21 + $0xd8] sm:$0xf] }
 0x6a9   : > { %7836 = vmatpush.bf16.msra.mxu2 %v15401_v60  ;;  %7845 = vmatpush.bf16.msra.mxu3 %v15785_v46  ;;  %v15852_v16 = vld [vmem:[%s20225_s21 + $0x3d8] sm:$0xf]  ;;  %v15470_v60 = vld [vmem:[%s20225_s21 + $0xf8] sm:$0xf0]  ;;  %v15621_v46 = vor.u32 %v18755_v28, %v15620_v58  ;;  %v15469_v50 = vor.u32 %v18716_v57, %v15468_v55  ;;  %v16052_v28 = vld [vmem:[%s20235_s15 + $0x180] sm:$0xf] }
 0x6aa   : > { %v15853_v2 = vor.u32 %v18812_v4, %v15852_v16  ;;  %v15473_v13 = vor.u32 %v18712_v59, %v15470_v60  ;;  %v18772_v55 = vld [vmem:[%s20225_s21 + $0x2b4] sm:$0xf0]  ;;  %v18768_v16 = vld [vmem:[%s20225_s21 + $0x29c] sm:$0xf]  ;;  %v16053_v4 = vor.u32 %v18865_v43, %v16052_v28  ;;  %v16020_v59 = vld [vmem:[%s20235_s15 + $0x140] sm:$0xf] }
 0x6ab   : > { %v15694_v57 = vld [vmem:[%s20225_s21 + $0x2b8] sm:$0xf0]  ;;  %v18857_v60 = vld [vmem:[%s20235_s15 + $0x15c] sm:$0xf0] }
 0x6ac   : > { %7811 = vmatpush.bf16.msra.mxu0 %v15365_v5  ;;  %7820 = vmatpush.bf16.msra.mxu1 %v15749_v11  ;;  %v15857_v5 = vor.u32 %v18808_v39, %v15854_v63  ;;  %v18708_v11 = vld [vmem:[%s20225_s21 + $0xb4] sm:$0xf0]  ;;  %v16148_v43 = vld [vmem:[%s20235_s15 + $0x240] sm:$0xf] }
 0x6ad   : > { %7837 = vmatpush.bf16.msra.mxu2 %v15369_v54  ;;  %7846 = vmatpush.bf16.msra.mxu3 %v15753_v61  ;;  %v18704_v54 = vld [vmem:[%s20225_s21 + $0x9c] sm:$0xf]  ;;  %v15660_v39 = vld [vmem:[%s20225_s21 + $0x258] sm:$0xf] }
 0x6ae   : > { %7773 = vmatmul.bf16.vlgmr.msrb.gmra.mxu1 %v22209_v37  ;;  %7799 = vmatmul.bf16.vlgmr.msrb.gmra.mxu3 %v22209_v37  ;;  %v15438_v61 = vld [vmem:[%s20225_s21 + $0xb8] sm:$0xf0]  ;;  %v18764_v63 = vld [vmem:[%s20225_s21 + $0x274] sm:$0xf0] }
 0x6af   : > { %7812 = vmatmul.bf16.vlgmr.msra.gmra.mxu0 %v22182_v56  ;;  %v15441_v10 = vor.u32 %v18704_v54, %v15438_v61  ;;  %v15628_v61 = vld [vmem:[%s20225_s21 + $0x218] sm:$0xf] }
 0x6b0   : > { %7856 = vmatpush.bf16.msrb.mxu0 %v15597_v9  ;;  %7821 = vmatpush.bf16.msra.mxu1 %v15717_v12  ;;  %v15821_v9 = vor.u32 %v18804_v47, %v15820_v18  ;;  %v18696_v12 = vld [vmem:[%s20225_s21 + $0x5c] sm:$0xf]  ;;  %v15988_v18 = vld [vmem:[%s20235_s15 + $0x100] sm:$0xf] }
 0x6b1   : > { %7882 = vmatpush.bf16.msrb.mxu2 %v15601_v14  ;;  %7847 = vmatpush.bf16.msra.mxu3 %v15721_v25  ;;  %v15437_v14 = vor.u32 %v18708_v11, %v15436_v3  ;;  %v15406_v25 = vld [vmem:[%s20225_s21 + $0x78] sm:$0xf0]  ;;  %v16596_v3 = vld [vmem:[%s20235_s15 + $0x5c0] sm:$0xf]  ;;  %v15661_v11 = vor.u32 %v18764_v63, %v15660_v39 }
 0x6b2   : > { %7838 = vmatmul.bf16.vlgmr.msra.gmra.mxu2 %v22182_v56  ;;  %v15409_v33 = vor.u32 %v18696_v12, %v15406_v25  ;;  %v18849_v47 = vld [vmem:[%s20235_s15 + $0x11c] sm:$0xf0] }
 0x6b3   : > { %v16308_v25 = vld [vmem:[%s20235_s15 + $0x380] sm:$0xf] }
 0x6b4   : > { %7857 = vmatpush.bf16.msrb.mxu0 %v15565_v22  ;;  %7822 = vmatpush.bf16.msra.mxu1 %v15685_v51  ;;  %v15789_v22 = vor.u32 %v18796_v19, %v15788_v17  ;;  %v18688_v51 = vld [vmem:[%s20225_s21 + $0x1c] sm:$0xf]  ;;  %v15956_v17 = vld [vmem:[%s20235_s15 + $0xc0] sm:$0xf] }
 0x6b5   : > { %7883 = vmatpush.bf16.msrb.mxu2 %v15569_v23  ;;  %7848 = vmatpush.bf16.msra.mxu3 %v15689_v15  ;;  %v15372_v23 = vld [vmem:[%s20225_s21 + $0x18] sm:$0xf]  ;;  %v15374_v15 = vld [vmem:[%s20225_s21 + $0x38] sm:$0xf0]  ;;  %v18841_v19 = vld [vmem:[%s20235_s15 + $0xdc] sm:$0xf0] }
 0x6b6   : > { %v15373_v38 = vor.u32 %v18692_v24, %v15372_v23  ;;  %v15377_v7 = vor.u32 %v18688_v51, %v15374_v15  ;;  %v15957_v0 = vor.u32 %v18841_v19, %v15956_v17  ;;  %v18833_v23 = vld [vmem:[%s20235_s15 + $0x9c] sm:$0xf0] }
 0x6b7   : > { %v18921_v24 = vld [vmem:[%s20235_s15 + $0x35c] sm:$0xf0] }
 0x6b8   : > { %7858 = vmatpush.bf16.msrb.mxu0 %v15533_v6  ;;  %7823 = vmatpush.bf16.msra.mxu1 %v15653_v42  ;;  %v16084_v6 = vld [vmem:[%s20235_s15 + $0x1c0] sm:$0xf]  ;;  %v18776_v42 = vld [vmem:[%s20225_s21 + $0x2dc] sm:$0xf] }
 0x6b9   : > { %7884 = vmatpush.bf16.msrb.mxu2 %v15537_v26  ;;  %7849 = vmatpush.bf16.msra.mxu3 %v15657_v36  ;;  %v18873_v26 = vld [vmem:[%s20235_s15 + $0x1dc] sm:$0xf0]  ;;  %v15726_v36 = vld [vmem:[%s20225_s21 + $0x2f8] sm:$0xf0] }
 0x6ba   : > { %v16085_v58 = vor.u32 %v18873_v26, %v16084_v6  ;;  %v16244_v15 = vld [vmem:[%s20235_s15 + $0x300] sm:$0xf] }
 0x6bb   : > { %v15860_v6 = vld [vmem:[%s20235_s15] sm:$0xf] }
 0x6bc   : > { %7859 = vmatpush.bf16.msrb.mxu0 %v15501_v44  ;;  %7824 = vmatpush.bf16.msra.mxu1 %v15621_v46  ;;  %v15729_v44 = vor.u32 %v18776_v42, %v15726_v36  ;;  %v18817_v26 = vld [vmem:[%s20235_s15 + $0x1c] sm:$0xf0] }
 0x6bd   : > { %7885 = vmatpush.bf16.msrb.mxu2 %v15505_v48  ;;  %7850 = vmatpush.bf16.msra.mxu3 %v15625_v53  ;;  %v15692_v48 = vld [vmem:[%s20225_s21 + $0x298] sm:$0xf]  ;;  %v15697_v53 = vor.u32 %v18768_v16, %v15694_v57  ;;  %v15861_v29 = vor.u32 %v18817_v26, %v15860_v6  ;;  %v18897_v36 = vld [vmem:[%s20235_s15 + $0x29c] sm:$0xf0] }
 0x6be   : > { %v15693_v46 = vor.u32 %v18772_v55, %v15692_v48  ;;  %v18993_v48 = vld [vmem:[%s20235_s15 + $0x59c] sm:$0xf0] }
 0x6bf   : > { %7825 = vmatmul.bf16.vlgmr.msra.gmra.mxu1 %v22209_v37  ;;  %v17076_v55 = vld [vmem:[%s20235_s15 + $0x980] sm:$0xf] }
 0x6c0   : > { %7869 = vmatpush.bf16.msrb.mxu1 %v15853_v2  ;;  %7860 = vmatpush.bf16.msrb.mxu0 %v15469_v50  ;;  %v18760_v2 = vld [vmem:[%s20225_s21 + $0x25c] sm:$0xf]  ;;  %v16116_v39 = vld [vmem:[%s20235_s15 + $0x200] sm:$0xf] }
 0x6c1   : > { %7886 = vmatpush.bf16.msrb.mxu2 %v15473_v13  ;;  %7895 = vmatpush.bf16.msrb.mxu3 %v15857_v5  ;;  %v15662_v50 = vld [vmem:[%s20225_s21 + $0x278] sm:$0xf0]  ;;  %v16021_v13 = vor.u32 %v18857_v60, %v16020_v59  ;;  %v16852_v59 = vld [vmem:[%s20235_s15 + $0x7c0] sm:$0xf] }
 0x6c2   : > { %7851 = vmatmul.bf16.vlgmr.msra.gmra.mxu3 %v22209_v37  ;;  %v15665_v54 = vor.u32 %v18760_v2, %v15662_v50  ;;  %v19065_v60 = vld [vmem:[%s20235_s15 + $0x7dc] sm:$0xf0] }
 0x6c3   : > { %v16853_v63 = vor.u32 %v19065_v60, %v16852_v59  ;;  %v18985_v2 = vld [vmem:[%s20235_s15 + $0x55c] sm:$0xf0] }
 0x6c4   : > { %7870 = vmatpush.bf16.msrb.mxu1 %v15821_v9  ;;  %7861 = vmatpush.bf16.msrb.mxu0 %v15437_v14  ;;  %v15989_v9 = vor.u32 %v18849_v47, %v15988_v18  ;;  %v15630_v14 = vld [vmem:[%s20225_s21 + $0x238] sm:$0xf0]  ;;  %v18881_v50 = vld [vmem:[%s20235_s15 + $0x21c] sm:$0xf0] }
 0x6c5   : > { %7887 = vmatpush.bf16.msrb.mxu2 %v15441_v10  ;;  %7896 = vmatpush.bf16.msrb.mxu3 %v15825_v20  ;;  %v16340_v10 = vld [vmem:[%s20235_s15 + $0x3c0] sm:$0xf]  ;;  %v15629_v20 = vor.u32 %v18756_v8, %v15628_v61  ;;  %v15633_v21 = vor.u32 %v18752_v45, %v15630_v14  ;;  %v16117_v61 = vor.u32 %v18881_v50, %v16116_v39 }
 0x6c6   : > { %v16341_v12 = vor.u32 %v18937_v1, %v16340_v10  ;;  %v19113_v18 = vld [vmem:[%s20235_s15 + $0x95c] sm:$0xf0] }
 0x6c7   : > { %v17364_v47 = vld [vmem:[%s20235_s15 + $0xbc0] sm:$0xf] }
 0x6c8   : > { %7871 = vmatpush.bf16.msrb.mxu1 %v15789_v22  ;;  %7862 = vmatpush.bf16.msrb.mxu0 %v15405_v49  ;;  %v15924_v22 = vld [vmem:[%s20235_s15 + $0x80] sm:$0xf]  ;;  %v16309_v49 = vor.u32 %v18929_v31, %v16308_v25 }
 0x6c9   : > { %7888 = vmatpush.bf16.msrb.mxu2 %v15409_v33  ;;  %7897 = vmatpush.bf16.msrb.mxu3 %v15793_v40  ;;  %v16276_v33 = vld [vmem:[%s20235_s15 + $0x340] sm:$0xf]  ;;  %v15925_v27 = vor.u32 %v18833_v23, %v15924_v22 }
 0x6ca   : > { %v18825_v40 = vld [vmem:[%s20235_s15 + $0x5c] sm:$0xf0]  ;;  %v16277_v51 = vor.u32 %v18921_v24, %v16276_v33 }
 0x6cb   : > { %v15893_v32 = vor.u32 %v18825_v40, %v15892_v62  ;;  %v16500_v45 = vld [vmem:[%s20235_s15 + $0x500] sm:$0xf] }
 0x6cc   : > { %7872 = vmatpush.bf16.msrb.mxu1 %v15757_v34  ;;  %7863 = vmatpush.bf16.msrb.mxu0 %v15373_v38  ;;  %v17108_v34 = vld [vmem:[%s20235_s15 + $0x9c0] sm:$0xf] }
 0x6cd   : > { %7889 = vmatpush.bf16.msrb.mxu2 %v15377_v7  ;;  %7898 = vmatpush.bf16.msrb.mxu3 %v15761_v41  ;;  %v19129_v38 = vld [vmem:[%s20235_s15 + $0x9dc] sm:$0xf0]  ;;  %v16245_v7 = vor.u32 %v18913_v52, %v16244_v15 }
 0x6ce   : > { %v16212_v41 = vld [vmem:[%s20235_s15 + $0x2c0] sm:$0xf]  ;;  %v17109_v30 = vor.u32 %v19129_v38, %v17108_v34 }
 0x6cf   : > { %7864 = vmatmul.bf16.vlgmr.msrb.gmra.mxu0 %v22182_v56  ;;  %v17012_v1 = vld [vmem:[%s20235_s15 + $0x900] sm:$0xf] }
 0x6d0   : > { %11014 = vmatpush.bf16.msra.mxu0 %v16085_v58  ;;  %7890 = vmatmul.bf16.vlgmr.msrb.gmra.mxu2 %v22182_v56  ;;  %v19001_v56 = vld [vmem:[%s20235_s15 + $0x5dc] sm:$0xf0] }
 0x6d1   : > { %7873 = vmatpush.bf16.msrb.mxu1 %v15725_v35  ;;  %7899 = vmatpush.bf16.msrb.mxu3 %v15729_v44  ;;  %v16597_v5 = vor.u32 %v19001_v56, %v16596_v3  ;;  %v16180_v58 = vld [vmem:[%s20235_s15 + $0x280] sm:$0xf] }
 0x6d2   : > { %v16181_v28 = vor.u32 %v18897_v36, %v16180_v58  ;;  %v18889_v35 = vld [vmem:[%s20235_s15 + $0x25c] sm:$0xf0] }
 0x6d3   : > { %11040 = vmatpush.bf16.msra.mxu2 %v16597_v5  ;;  %v16564_v44 = vld [vmem:[%s20235_s15 + $0x580] sm:$0xf] }
 0x6d4   : > { %11015 = vmatpush.bf16.msra.mxu0 %v16053_v4  ;;  %v16565_v16 = vor.u32 %v18993_v48, %v16564_v44  ;;  %v19121_v4 = vld [vmem:[%s20235_s15 + $0x99c] sm:$0xf0] }
 0x6d5   : > { %7874 = vmatpush.bf16.msrb.mxu1 %v15693_v46  ;;  %7900 = vmatpush.bf16.msrb.mxu3 %v15697_v53  ;;  %v17077_v57 = vor.u32 %v19121_v4, %v17076_v55  ;;  %v16149_v46 = vor.u32 %v18889_v35, %v16148_v43  ;;  %v16532_v53 = vld [vmem:[%s20235_s15 + $0x540] sm:$0xf] }
 0x6d6   : > { %v17044_v3 = vld [vmem:[%s20235_s15 + $0x940] sm:$0xf] }
 0x6d7   : > { %11041 = vmatpush.bf16.msra.mxu2 %v16565_v16  ;;  %v19193_v56 = vld [vmem:[%s20235_s15 + $0xbdc] sm:$0xf0]  ;;  %v17045_v5 = vor.u32 %v19113_v18, %v17044_v3 }
 0x6d8   : > { %11016 = vmatpush.bf16.msra.mxu0 %v16021_v13  ;;  %v16533_v13 = vor.u32 %v18985_v2, %v16532_v53  ;;  %v17365_v14 = vor.u32 %v19193_v56, %v17364_v47  ;;  %v19105_v17 = vld [vmem:[%s20235_s15 + $0x91c] sm:$0xf0] }
 0x6d9   : > { %7875 = vmatpush.bf16.msrb.mxu1 %v15661_v11  ;;  %7901 = vmatpush.bf16.msrb.mxu3 %v15665_v54  ;;  %v16820_v11 = vld [vmem:[%s20235_s15 + $0x780] sm:$0xf] }
 0x6da   : > { %v19057_v54 = vld [vmem:[%s20235_s15 + $0x79c] sm:$0xf0] }
 0x6db   : > { %11042 = vmatpush.bf16.msra.mxu2 %v16533_v13  ;;  %v16821_v8 = vor.u32 %v19057_v54, %v16820_v11  ;;  %v16788_v19 = vld [vmem:[%s20235_s15 + $0x740] sm:$0xf] }
 0x6dc   : > { %11017 = vmatpush.bf16.msra.mxu0 %v15989_v9  ;;  %v18977_v9 = vld [vmem:[%s20235_s15 + $0x51c] sm:$0xf0] }
 0x6dd   : > { %7876 = vmatpush.bf16.msrb.mxu1 %v15629_v20  ;;  %7902 = vmatpush.bf16.msrb.mxu3 %v15633_v21  ;;  %v16501_v10 = vor.u32 %v18977_v9, %v16500_v45  ;;  %v17332_v20 = vld [vmem:[%s20235_s15 + $0xb80] sm:$0xf] }
 0x6de   : > { %v19185_v21 = vld [vmem:[%s20235_s15 + $0xb9c] sm:$0xf0] }
 0x6df   : > { %v19049_v25 = vld [vmem:[%s20235_s15 + $0x75c] sm:$0xf0]  ;;  %11043 = vmatpush.bf16.msra.mxu2 %v16501_v10  ;;  %v17333_v24 = vor.u32 %v19185_v21, %v17332_v20 }
 0x6e0   : > { %11018 = vmatpush.bf16.msra.mxu0 %v15957_v0  ;;  %7877 = vmatmul.bf16.vlgmr.msrb.gmra.mxu1 %v22209_v37  ;;  %v16789_v31 = vor.u32 %v19049_v25, %v16788_v19  ;;  %v16468_v0 = vld [vmem:[%s20235_s15 + $0x4c0] sm:$0xf] }
 0x6e1   : > { %11027 = vmatpush.bf16.msra.mxu1 %v16341_v12  ;;  %7903 = vmatmul.bf16.vlgmr.msrb.gmra.mxu3 %v22209_v37  ;;  %v18905_v37 = vld [vmem:[%s20235_s15 + $0x2dc] sm:$0xf0]  ;;  %v17013_v12 = vor.u32 %v19105_v17, %v17012_v1 }
 0x6e2   : > { %v16213_v42 = vor.u32 %v18905_v37, %v16212_v41  ;;  %11053 = vmatpush.bf16.msra.mxu3 %v16853_v63  ;;  %v18969_v22 = vld [vmem:[%s20235_s15 + $0x4dc] sm:$0xf0] }
 0x6e3   : > { %v16980_v23 = vld [vmem:[%s20235_s15 + $0x8c0] sm:$0xf] }
 0x6e4   : > { %11019 = vmatpush.bf16.msra.mxu0 %v15925_v27  ;;  %v19097_v33 = vld [vmem:[%s20235_s15 + $0x8dc] sm:$0xf0] }
 0x6e5   : > { %11028 = vmatpush.bf16.msra.mxu1 %v16309_v49  ;;  %v16469_v49 = vor.u32 %v18969_v22, %v16468_v0  ;;  %v17300_v27 = vld [vmem:[%s20235_s15 + $0xb40] sm:$0xf]  ;;  %v16981_v62 = vor.u32 %v19097_v33, %v16980_v23 }
 0x6e6   : > { %11054 = vmatpush.bf16.msra.mxu3 %v16821_v8  ;;  %v19177_v40 = vld [vmem:[%s20235_s15 + $0xb5c] sm:$0xf0] }
 0x6e7   : > { %v19041_v15 = vld [vmem:[%s20235_s15 + $0x71c] sm:$0xf0]  ;;  %11044 = vmatpush.bf16.msra.mxu2 %v16469_v49 }
 0x6e8   : > { %11020 = vmatpush.bf16.msra.mxu0 %v15893_v32  ;;  %v17301_v32 = vor.u32 %v19177_v40, %v17300_v27  ;;  %v17268_v6 = vld [vmem:[%s20235_s15 + $0xb00] sm:$0xf] }
 0x6e9   : > { %11029 = vmatpush.bf16.msra.mxu1 %v16277_v51  ;;  %v16756_v51 = vld [vmem:[%s20235_s15 + $0x700] sm:$0xf] }
 0x6ea   : > { %11055 = vmatpush.bf16.msra.mxu3 %v16789_v31  ;;  %v16757_v52 = vor.u32 %v19041_v15, %v16756_v51  ;;  %v16436_v26 = vld [vmem:[%s20235_s15 + $0x480] sm:$0xf] }
 0x6eb   : > { %v18961_v34 = vld [vmem:[%s20235_s15 + $0x49c] sm:$0xf0] }
 0x6ec   : > { %11021 = vmatpush.bf16.msra.mxu0 %v15861_v29  ;;  %v19169_v38 = vld [vmem:[%s20235_s15 + $0xb1c] sm:$0xf0] }
 0x6ed   : > { %11030 = vmatpush.bf16.msra.mxu1 %v16245_v7  ;;  %v16437_v7 = vor.u32 %v18961_v34, %v16436_v26  ;;  %v16948_v41 = vld [vmem:[%s20235_s15 + $0x880] sm:$0xf]  ;;  %v17269_v36 = vor.u32 %v19169_v38, %v17268_v6  ;;  %v22441_v26 = vld [vmem:[%s806_s4] sm:$0xff] }
 0x6ee   : > { %11056 = vmatpush.bf16.msra.mxu3 %v16757_v52  ;;  %v19089_v37 = vld [vmem:[%s20235_s15 + $0x89c] sm:$0xf0] }
 0x6ef   : > { %v16949_v29 = vor.u32 %v19089_v37, %v16948_v41  ;;  %11045 = vmatpush.bf16.msra.mxu2 %v16437_v7  ;;  %v18953_v43 = vld [vmem:[%s20235_s15 + $0x45c] sm:$0xf0] }
 0x6f0   : > { %11066 = vmatpush.bf16.msrb.mxu0 %v17109_v30  ;;  %v16724_v30 = vld [vmem:[%s20235_s15 + $0x6c0] sm:$0xf] }
 0x6f1   : > { %11031 = vmatpush.bf16.msra.mxu1 %v16213_v42  ;;  %v19033_v42 = vld [vmem:[%s20235_s15 + $0x6dc] sm:$0xf0] }
 0x6f2   : > { %v16725_v58 = vor.u32 %v19033_v42, %v16724_v30  ;;  %v16916_v35 = vld [vmem:[%s20235_s15 + $0x840] sm:$0xf]  ;;  %v7044_v30 = vperm.slane %v22441_v26, 0 }
 0x6f3   : > { %v17236_v44 = vld [vmem:[%s20235_s15 + $0xac0] sm:$0xf] }
 0x6f4   : > { %11067 = vmatpush.bf16.msrb.mxu0 %v17077_v57  ;;  %11057 = vmatpush.bf16.msra.mxu3 %v16725_v58  ;;  %v19161_v48 = vld [vmem:[%s20235_s15 + $0xadc] sm:$0xf0] }
 0x6f5   : > { %11032 = vmatpush.bf16.msra.mxu1 %v16181_v28  ;;  %v16404_v28 = vld [vmem:[%s20235_s15 + $0x440] sm:$0xf]  ;;  %v17237_v39 = vor.u32 %v19161_v48, %v17236_v44 }
 0x6f6   : > { %v16405_v55 = vor.u32 %v18953_v43, %v16404_v28  ;;  %v19081_v16 = vld [vmem:[%s20235_s15 + $0x85c] sm:$0xf0] }
 0x6f7   : > { %v16917_v4 = vor.u32 %v19081_v16, %v16916_v35  ;;  %v16692_v57 = vld [vmem:[%s20235_s15 + $0x680] sm:$0xf] }
 0x6f8   : > { %11068 = vmatpush.bf16.msrb.mxu0 %v17045_v5  ;;  %v19025_v59 = vld [vmem:[%s20235_s15 + $0x69c] sm:$0xf0]  ;;  %11046 = vmatpush.bf16.msra.mxu2 %v16405_v55 }
 0x6f9   : > { %11033 = vmatpush.bf16.msra.mxu1 %v16149_v46  ;;  %v16693_v60 = vor.u32 %v19025_v59, %v16692_v57  ;;  %v17204_v46 = vld [vmem:[%s20235_s15 + $0xa80] sm:$0xf]  ;;  %v7045_v59 = vperm.slane %v22441_v26, 1 }
 0x6fa   : > { %v19153_v63 = vld [vmem:[%s20235_s15 + $0xa9c] sm:$0xf0] }
 0x6fb   : > { %v16372_v53 = vld [vmem:[%s20235_s15 + $0x400] sm:$0xf]  ;;  %11058 = vmatpush.bf16.msra.mxu3 %v16693_v60  ;;  %v17205_v8 = vor.u32 %v19153_v63, %v17204_v46  ;;  %v16086_v63 = vld [vmem:[%s20235_s15 + $0x1e0] sm:$0xf0] }
 0x6fc   : > { %11069 = vmatpush.bf16.msrb.mxu0 %v17013_v12  ;;  %v18945_v2 = vld [vmem:[%s20235_s15 + $0x41c] sm:$0xf0] }
 0x6fd   : > { %11034 = vmatpush.bf16.msra.mxu1 %v16117_v61  ;;  %v16373_v50 = vor.u32 %v18945_v2, %v16372_v53  ;;  %v16884_v13 = vld [vmem:[%s20235_s15 + $0x800] sm:$0xf] }
 0x6fe   : > { %v19073_v3 = vld [vmem:[%s20235_s15 + $0x81c] sm:$0xf0] }
 0x6ff   : > { %v17620_v18 = vld [vmem:[%s20235_s15 + $0xdc0] sm:$0xf]  ;;  %v16885_v47 = vor.u32 %v19073_v3, %v16884_v13  ;;  %11047 = vmatpush.bf16.msra.mxu2 %v16373_v50 }
 0x700   : > { %11070 = vmatpush.bf16.msrb.mxu0 %v16981_v62  ;;  %v19257_v56 = vld [vmem:[%s20235_s15 + $0xddc] sm:$0xf0] }
 0x701   : > { %11079 = vmatpush.bf16.msrb.mxu1 %v17365_v14  ;;  %v16660_v5 = vld [vmem:[%s20235_s15 + $0x640] sm:$0xf]  ;;  %v17621_v54 = vor.u32 %v19257_v56, %v17620_v18 }
 0x702   : > { %v19017_v11 = vld [vmem:[%s20235_s15 + $0x65c] sm:$0xf0] }
 0x703   : > { %v16661_v61 = vor.u32 %v19017_v11, %v16660_v5  ;;  %v17588_v45 = vld [vmem:[%s20235_s15 + $0xd80] sm:$0xf]  ;;  %11092 = vmatpush.bf16.msrb.mxu2 %v17621_v54  ;;  %v18861_v54 = vld [vmem:[%s20235_s15 + $0x184] sm:$0xf] }
 0x704   : > { %11071 = vmatpush.bf16.msrb.mxu0 %v16949_v29  ;;  %v19249_v9 = vld [vmem:[%s20235_s15 + $0xd9c] sm:$0xf0] }
 0x705   : > { %11080 = vmatpush.bf16.msrb.mxu1 %v17333_v24  ;;  %11059 = vmatpush.bf16.msra.mxu3 %v16661_v61  ;;  %v17172_v14 = vld [vmem:[%s20235_s15 + $0xa40] sm:$0xf]  ;;  %v17589_v1 = vor.u32 %v19249_v9, %v17588_v45  ;;  %v16054_v61 = vld [vmem:[%s20235_s15 + $0x1a0] sm:$0xf0] }
 0x706   : > { %v19145_v10 = vld [vmem:[%s20235_s15 + $0xa5c] sm:$0xf0] }
 0x707   : > { %v16628_v17 = vld [vmem:[%s20235_s15 + $0x600] sm:$0xf]  ;;  %v17173_v12 = vor.u32 %v19145_v10, %v17172_v14  ;;  %11093 = vmatpush.bf16.msrb.mxu2 %v17589_v1 }
 0x708   : > { %11072 = vmatpush.bf16.msrb.mxu0 %v16917_v4  ;;  %v19009_v19 = vld [vmem:[%s20235_s15 + $0x61c] sm:$0xf0] }
 0x709   : > { %11081 = vmatpush.bf16.msrb.mxu1 %v17301_v32  ;;  %v16629_v21 = vor.u32 %v19009_v19, %v16628_v17  ;;  %v17140_v25 = vld [vmem:[%s20235_s15 + $0xa00] sm:$0xf]  ;;  %v18933_v17 = vld [vmem:[%s20235_s15 + $0x3c4] sm:$0xf] }
 0x70a   : > { %v17876_v31 = vld [vmem:[%s20235_s15 + $0xfc0] sm:$0xf]  ;;  %v16342_v19 = vld [vmem:[%s20235_s15 + $0x3e0] sm:$0xf0] }
 0x70b   : > { %v7709_v20 = vpop.f32.mrf.mxu0  ;;  %v19321_v0 = vld [vmem:[%s20235_s15 + $0xfdc] sm:$0xf0]  ;;  %11060 = vmatpush.bf16.msra.mxu3 %v16629_v21 }
 0x70c   : > { %11073 = vmatpush.bf16.msrb.mxu0 %v16885_v47  ;;  %v19137_v22 = vld [vmem:[%s20235_s15 + $0xa1c] sm:$0xf0]  ;;  %v17877_v23 = vor.u32 %v19321_v0, %v17876_v31  ;;  %v7710_v48 = vadd.f32 %v7709_v20, %v7044_v30  ;;  %v16278_v30 = vld [vmem:[%s20235_s15 + $0x360] sm:$0xf0] }
 0x70d   : > { %11082 = vmatpush.bf16.msrb.mxu1 %v17269_v36  ;;  %v17556_v49 = vld [vmem:[%s20235_s15 + $0xd40] sm:$0xf]  ;;  %v17141_v40 = vor.u32 %v19137_v22, %v17140_v25 }
 0x70e   : > { %v19241_v33 = vld [vmem:[%s20235_s15 + $0xd5c] sm:$0xf0] }
 0x70f   : > { %v17557_v24 = vor.u32 %v19241_v33, %v17556_v49  ;;  %11105 = vmatpush.bf16.msrb.mxu3 %v17877_v23  ;;  %v17844_v27 = vld [vmem:[%s20235_s15 + $0xf80] sm:$0xf]  ;;  %v18853_v23 = vld [vmem:[%s20235_s15 + $0x144] sm:$0xf] }
 0x710   : > { %v19313_v62 = vld [vmem:[%s20235_s15 + $0xf9c] sm:$0xf0]  ;;  %v16022_v49 = vld [vmem:[%s20235_s15 + $0x160] sm:$0xf0] }
 0x711   : > { %11083 = vmatpush.bf16.msrb.mxu1 %v17237_v39  ;;  %v17845_v51 = vor.u32 %v19313_v62, %v17844_v27  ;;  %v7735_v15 = vpop.f32.mrf.mxu2  ;;  %11094 = vmatpush.bf16.msrb.mxu2 %v17557_v24  ;;  %v17524_v52 = vld [vmem:[%s20235_s15 + $0xd00] sm:$0xf]  ;;  %v18869_v39 = vld [vmem:[%s20235_s15 + $0x1c4] sm:$0xf]  ;;  %v16345_v24 = vor.u32 %v18933_v17, %v16342_v19 }
 0x712   : > { %v19233_v32 = vld [vmem:[%s20235_s15 + $0xd1c] sm:$0xf0]  ;;  %v16089_v18 = vor.u32 %v18869_v39, %v16086_v63  ;;  %v7736_v5 = vadd.f32 %v7735_v15, %v7045_v59  ;;  %v18925_v62 = vld [vmem:[%s20235_s15 + $0x384] sm:$0xf]  ;;  %v16025_v15 = vor.u32 %v18853_v23, %v16022_v49  ;;  %v7048_v23 = vperm.slane %v22441_v26, 4 }
 0x713   : > { %v17525_v6 = vor.u32 %v19233_v32, %v17524_v52  ;;  %v7711_v34 = vpop.f32.mrf.mxu0  ;;  %11106 = vmatpush.bf16.msrb.mxu3 %v17845_v51  ;;  %v17812_v38 = vld [vmem:[%s20235_s15 + $0xf40] sm:$0xf]  ;;  %v7046_v51 = vperm.slane %v22441_v26, 2  ;;  %v16246_v59 = vld [vmem:[%s20235_s15 + $0x320] sm:$0xf0] }
 0x714   : > { %v19305_v7 = vld [vmem:[%s20235_s15 + $0xf5c] sm:$0xf0]  ;;  %v15990_v34 = vld [vmem:[%s20235_s15 + $0x120] sm:$0xf0] }
 0x715   : > { %11084 = vmatpush.bf16.msrb.mxu1 %v17205_v8  ;;  %v17813_v41 = vor.u32 %v19305_v7, %v17812_v38  ;;  %11095 = vmatpush.bf16.msrb.mxu2 %v17525_v6  ;;  %v17492_v37 = vld [vmem:[%s20235_s15 + $0xcc0] sm:$0xf]  ;;  %v18845_v6 = vld [vmem:[%s20235_s15 + $0x104] sm:$0xf] }
 0x716   : > { %v19225_v29 = vld [vmem:[%s20235_s15 + $0xcdc] sm:$0xf0]  ;;  %v18829_v39 = vld [vmem:[%s20235_s15 + $0x84] sm:$0xf] }
 0x717   : > { %v17493_v42 = vor.u32 %v19225_v29, %v17492_v37  ;;  %11107 = vmatpush.bf16.msrb.mxu3 %v17813_v41  ;;  %v17780_v58 = vld [vmem:[%s20235_s15 + $0xf00] sm:$0xf]  ;;  %v18917_v29 = vld [vmem:[%s20235_s15 + $0x344] sm:$0xf] }
 0x718   : > { %v19297_v36 = vld [vmem:[%s20235_s15 + $0xf1c] sm:$0xf0]  ;;  %v15926_v63 = vld [vmem:[%s20235_s15 + $0xa0] sm:$0xf0] }
 0x719   : > { %11085 = vmatpush.bf16.msrb.mxu1 %v17173_v12  ;;  %v17781_v28 = vor.u32 %v19297_v36, %v17780_v58  ;;  %v7737_v43 = vpop.f32.mrf.mxu2  ;;  %11096 = vmatpush.bf16.msrb.mxu2 %v17493_v42  ;;  %v17460_v35 = vld [vmem:[%s20235_s15 + $0xc80] sm:$0xf]  ;;  %v16057_v12 = vor.u32 %v18861_v54, %v16054_v61  ;;  %v15993_v58 = vor.u32 %v18845_v6, %v15990_v34  ;;  %v16502_v6 = vld [vmem:[%s20235_s15 + $0x520] sm:$0xf0] }
 0x71a   : > { %v19217_v44 = vld [vmem:[%s20235_s15 + $0xc9c] sm:$0xf0]  ;;  %v15958_v43 = vld [vmem:[%s20235_s15 + $0xe0] sm:$0xf0]  ;;  %v15929_v61 = vor.u32 %v18829_v39, %v15926_v63 }
 0x71b   : > { %v17461_v55 = vor.u32 %v19217_v44, %v17460_v35  ;;  %v7722_v16 = vpop.f32.mrf.mxu1  ;;  %11108 = vmatpush.bf16.msrb.mxu3 %v17781_v28  ;;  %v17748_v4 = vld [vmem:[%s20235_s15 + $0xec0] sm:$0xf]  ;;  %v18837_v28 = vld [vmem:[%s20235_s15 + $0xc4] sm:$0xf]  ;;  %v7047_v35 = vperm.slane %v22441_v26, 3 }
 0x71c   : > { %v19289_v57 = vld [vmem:[%s20235_s15 + $0xedc] sm:$0xf0]  ;;  %v7723_v60 = vadd.f32 %v7722_v16, %v7710_v48  ;;  %v7761_v46 = vpop.f32.mrf.mxu0  ;;  %v18997_v16 = vld [vmem:[%s20235_s15 + $0x5c4] sm:$0xf] }
 0x71d   : > { %11086 = vmatpush.bf16.msrb.mxu1 %v17141_v40  ;;  %v17749_v53 = vor.u32 %v19289_v57, %v17748_v4  ;;  %11097 = vmatpush.bf16.msrb.mxu2 %v17461_v55  ;;  %v17428_v2 = vld [vmem:[%s20235_s15 + $0xc40] sm:$0xf]  ;;  %v16310_v40 = vld [vmem:[%s20235_s15 + $0x3a0] sm:$0xf0]  ;;  %v7762_v42 = vadd.f32 %v7761_v46, %v7046_v51  ;;  %v16281_v55 = vor.u32 %v18917_v29, %v16278_v30 }
 0x71e   : > { %v19209_v50 = vld [vmem:[%s20235_s15 + $0xc5c] sm:$0xf0]  ;;  %v7908_v13 = vmax.f32 %v7723_v60, 0.0  ;;  %v16313_v41 = vor.u32 %v18925_v62, %v16310_v40  ;;  %v16598_v4 = vld [vmem:[%s20235_s15 + $0x5e0] sm:$0xf0]  ;;  %v15961_v46 = vor.u32 %v18837_v28, %v15958_v43 }
 0x71f   : > { %v17429_v3 = vor.u32 %v19209_v50, %v17428_v2  ;;  %11109 = vmatpush.bf16.msrb.mxu3 %v17749_v53  ;;  %v17716_v47 = vld [vmem:[%s20235_s15 + $0xe80] sm:$0xf]  ;;  %v18909_v57 = vld [vmem:[%s20235_s15 + $0x304] sm:$0xf]  ;;  %v16601_v53 = vor.u32 %v18997_v16, %v16598_v4  ;;  %v7049_v4 = vperm.slane %v22441_v26, 5 }
 0x720   : > { %v19281_v56 = vld [vmem:[%s20235_s15 + $0xe9c] sm:$0xf0]  ;;  %v22461_v11 = vpack.c.bf16 %v7908_v13, %v7908_v13  ;;  %v16249_v13 = vor.u32 %v18909_v57, %v16246_v59  ;;  %v16822_v62 = vld [vmem:[%s20235_s15 + $0x7a0] sm:$0xf0] }
 0x721   : > { %v17717_v8 = vor.u32 %v19281_v56, %v17716_v47  ;;  %v7748_v45 = vpop.f32.mrf.mxu3  ;;  %11098 = vmatpush.bf16.msrb.mxu2 %v17429_v3  ;;  %v17396_v9 = vld [vmem:[%s20235_s15 + $0xc00] sm:$0xf]  ;;  %v18989_v3 = vld [vmem:[%s20235_s15 + $0x584] sm:$0xf] }
 0x722   : > { %v19201_v14 = vld [vmem:[%s20235_s15 + $0xc1c] sm:$0xf0]  ;;  %v7749_v10 = vadd.f32 %v7748_v45, %v7736_v5  ;;  %v7787_v1 = vpop.f32.mrf.mxu2  ;;  %11022 = vmatmul.bf16.vlgmr.msra.gmra.mxu0 %v22461_v11  ;;  %v18901_v56 = vld [vmem:[%s20235_s15 + $0x2c4] sm:$0xf] }
 0x723   : > { %v17397_v20 = vor.u32 %v19201_v14, %v17396_v9  ;;  %v7724_v21 = vpop.f32.mrf.mxu1  ;;  %11118 = vmatpush.bf16.msra.mxu0 %v16089_v18  ;;  %11110 = vmatpush.bf16.msrb.mxu3 %v17717_v8  ;;  %v17684_v25 = vld [vmem:[%s20235_s15 + $0xe40] sm:$0xf]  ;;  %v7788_v2 = vadd.f32 %v7787_v1, %v7047_v35  ;;  %v16566_v18 = vld [vmem:[%s20235_s15 + $0x5a0] sm:$0xf0] }
 0x724   : > { %v19273_v31 = vld [vmem:[%s20235_s15 + $0xe5c] sm:$0xf0]  ;;  %v7909_v0 = vmax.f32 %v7749_v10, 0.0  ;;  %v7763_v22 = vpop.f32.mrf.mxu0  ;;  %v16214_v5 = vld [vmem:[%s20235_s15 + $0x2e0] sm:$0xf0]  ;;  %v16569_v17 = vor.u32 %v18989_v3, %v16566_v18 }
 0x725   : > { %v17685_v33 = vor.u32 %v19273_v31, %v17684_v25  ;;  %11099 = vmatpush.bf16.msrb.mxu2 %v17397_v20  ;;  %v17652_v52 = vld [vmem:[%s20235_s15 + $0xe00] sm:$0xf]  ;;  %v19061_v8 = vld [vmem:[%s20235_s15 + $0x7c4] sm:$0xf]  ;;  %v16217_v21 = vor.u32 %v18901_v56, %v16214_v5 }
 0x726   : > { %v22474_v27 = vpack.c.bf16 %v7909_v0, %v7909_v0  ;;  %v19265_v32 = vld [vmem:[%s20235_s15 + $0xe1c] sm:$0xf0]  ;;  %v16854_v45 = vld [vmem:[%s20235_s15 + $0x7e0] sm:$0xf0] }
 0x727   : > { %11119 = vmatpush.bf16.msra.mxu0 %v16057_v12  ;;  %11111 = vmatpush.bf16.msrb.mxu3 %v17685_v33  ;;  %v17653_v38 = vor.u32 %v19265_v32, %v17652_v52  ;;  %v18821_v10 = vld [vmem:[%s20235_s15 + $0x44] sm:$0xf]  ;;  %v16857_v22 = vor.u32 %v19061_v8, %v16854_v45 }
 0x728   : > { %11035 = vmatmul.bf16.vlgmr.msra.gmra.mxu1 %v22474_v27  ;;  %v15894_v1 = vld [vmem:[%s20235_s15 + $0x60] sm:$0xf0] }
 0x729   : > { %v7750_v7 = vpop.f32.mrf.mxu3  ;;  %11131 = vmatpush.bf16.msra.mxu1 %v16345_v24  ;;  %v18981_v12 = vld [vmem:[%s20235_s15 + $0x544] sm:$0xf]  ;;  %v15897_v33 = vor.u32 %v18821_v10, %v15894_v1 }
 0x72a   : > { %v7789_v37 = vpop.f32.mrf.mxu2  ;;  %v16534_v25 = vld [vmem:[%s20235_s15 + $0x560] sm:$0xf0] }
 0x72b   : > { %11120 = vmatpush.bf16.msra.mxu0 %v16025_v15  ;;  %11112 = vmatpush.bf16.msrb.mxu3 %v17653_v38  ;;  %v7774_v36 = vpop.f32.mrf.mxu1  ;;  %v18893_v31 = vld [vmem:[%s20235_s15 + $0x284] sm:$0xf]  ;;  %v16537_v15 = vor.u32 %v18981_v12, %v16534_v25 }
 0x72c   : > { %v7775_v44 = vadd.f32 %v7774_v36, %v7762_v42  ;;  %v22489_v48 = vpop.f32.mrf.mxu0  ;;  %v16182_v0 = vld [vmem:[%s20235_s15 + $0x2a0] sm:$0xf0] }
 0x72d   : > { %11132 = vmatpush.bf16.msra.mxu1 %v16313_v41  ;;  %v19053_v24 = vld [vmem:[%s20235_s15 + $0x784] sm:$0xf]  ;;  %v16185_v52 = vor.u32 %v18893_v31, %v16182_v0  ;;  %v7814_v37 = vadd.f32 %v22489_v48, %v7048_v23 }
 0x72e   : > { %v7910_v60 = vmax.f32 %v7775_v44, 0.0  ;;  %v18813_v40 = vld [vmem:[%s20235_s15 + $0x4] sm:$0xf]  ;;  %v16825_v41 = vor.u32 %v19053_v24, %v16822_v62 }
 0x72f   : > { %11121 = vmatpush.bf16.msra.mxu0 %v15993_v58  ;;  %v15862_v51 = vld [vmem:[%s20235_s15 + $0x20] sm:$0xf0] }
 0x730   : > { %v22497_v50 = vpack.c.bf16 %v7910_v60, %v7910_v60  ;;  %v18973_v32 = vld [vmem:[%s20235_s15 + $0x504] sm:$0xf]  ;;  %v15865_v29 = vor.u32 %v18813_v40, %v15862_v51 }
 0x731   : > { %11133 = vmatpush.bf16.msra.mxu1 %v16281_v55  ;;  %v7800_v47 = vpop.f32.mrf.mxu3  ;;  %v18885_v38 = vld [vmem:[%s20235_s15 + $0x244] sm:$0xf]  ;;  %v16505_v43 = vor.u32 %v18973_v32, %v16502_v6 }
 0x732   : > { %v7801_v54 = vadd.f32 %v7800_v47, %v7788_v2  ;;  %11048 = vmatmul.bf16.vlgmr.msra.gmra.mxu2 %v22497_v50  ;;  %v16150_v7 = vld [vmem:[%s20235_s15 + $0x260] sm:$0xf0] }
 0x733   : > { %11122 = vmatpush.bf16.msra.mxu0 %v15961_v46  ;;  %v7776_v14 = vpop.f32.mrf.mxu1  ;;  %11144 = vmatpush.bf16.msra.mxu2 %v16601_v53  ;;  %v19045_v30 = vld [vmem:[%s20235_s15 + $0x744] sm:$0xf]  ;;  %v16153_v55 = vor.u32 %v18885_v38, %v16150_v7 }
 0x734   : > { %v7911_v19 = vmax.f32 %v7801_v54, 0.0  ;;  %v7815_v20 = vpop.f32.mrf.mxu0  ;;  %v16790_v42 = vld [vmem:[%s20235_s15 + $0x760] sm:$0xf0] }
 0x735   : > { %v22506_v9 = vpop.f32.mrf.mxu2  ;;  %11134 = vmatpush.bf16.msra.mxu1 %v16249_v13  ;;  %v19125_v28 = vld [vmem:[%s20235_s15 + $0x9c4] sm:$0xf]  ;;  %v16793_v60 = vor.u32 %v19045_v30, %v16790_v42 }
 0x736   : > { %v22515_v49 = vpack.c.bf16 %v7911_v19, %v7911_v19  ;;  %v17110_v44 = vld [vmem:[%s20235_s15 + $0x9e0] sm:$0xf0]  ;;  %v7840_v54 = vadd.f32 %v22506_v9, %v7049_v4 }
 0x737   : > { %11123 = vmatpush.bf16.msra.mxu0 %v15929_v61  ;;  %11145 = vmatpush.bf16.msra.mxu2 %v16569_v17  ;;  %v18965_v16 = vld [vmem:[%s20235_s15 + $0x4c4] sm:$0xf]  ;;  %v17113_v53 = vor.u32 %v19125_v28, %v17110_v44 }
 0x738   : > { %11061 = vmatmul.bf16.vlgmr.msra.gmra.mxu3 %v22515_v49  ;;  %v16470_v48 = vld [vmem:[%s20235_s15 + $0x4e0] sm:$0xf0] }
 0x739   : > { %11135 = vmatpush.bf16.msra.mxu1 %v16217_v21  ;;  %v7802_v34 = vpop.f32.mrf.mxu3  ;;  %11157 = vmatpush.bf16.msra.mxu3 %v16857_v22  ;;  %v18877_v57 = vld [vmem:[%s20235_s15 + $0x204] sm:$0xf]  ;;  %v16473_v13 = vor.u32 %v18965_v16, %v16470_v48 }
 0x73a   : > { %v16118_v59 = vld [vmem:[%s20235_s15 + $0x220] sm:$0xf0] }
 0x73b   : > { %11124 = vmatpush.bf16.msra.mxu0 %v15897_v33  ;;  %11146 = vmatpush.bf16.msra.mxu2 %v16537_v15  ;;  %v19037_v39 = vld [vmem:[%s20235_s15 + $0x704] sm:$0xf]  ;;  %v16121_v47 = vor.u32 %v18877_v57, %v16118_v59 }
 0x73c   : > { %v7826_v36 = vpop.f32.mrf.mxu1  ;;  %v16758_v63 = vld [vmem:[%s20235_s15 + $0x720] sm:$0xf0] }
 0x73d   : > { %v7841_v58 = vpop.f32.mrf.mxu2  ;;  %v7827_v35 = vadd.f32 %v7826_v36, %v7814_v37  ;;  %11136 = vmatpush.bf16.msra.mxu1 %v16185_v52  ;;  %11158 = vmatpush.bf16.msra.mxu3 %v16825_v41  ;;  %v19117_v2 = vld [vmem:[%s20235_s15 + $0x984] sm:$0xf]  ;;  %v16761_v61 = vor.u32 %v19037_v39, %v16758_v63 }
 0x73e   : > { %v17078_v18 = vld [vmem:[%s20235_s15 + $0x9a0] sm:$0xf0] }
 0x73f   : > { %v7912_v46 = vmax.f32 %v7827_v35, 0.0  ;;  %11125 = vmatpush.bf16.msra.mxu0 %v15865_v29  ;;  %11147 = vmatpush.bf16.msra.mxu2 %v16505_v43  ;;  %v18957_v56 = vld [vmem:[%s20235_s15 + $0x484] sm:$0xf]  ;;  %v17081_v17 = vor.u32 %v19117_v2, %v17078_v18 }
 0x740   : > { %v16438_v5 = vld [vmem:[%s20235_s15 + $0x4a0] sm:$0xf0] }
 0x741   : > { %v22539_v3 = vpack.c.bf16 %v7912_v46, %v7912_v46  ;;  %11137 = vmatpush.bf16.msra.mxu1 %v16153_v55  ;;  %11159 = vmatpush.bf16.msra.mxu3 %v16793_v60  ;;  %v19029_v45 = vld [vmem:[%s20235_s15 + $0x6c4] sm:$0xf]  ;;  %v16441_v9 = vor.u32 %v18957_v56, %v16438_v5  ;;  %v7050_v5 = vperm.slane %v22441_v26, 6 }
 0x742   : > { %v16726_v14 = vld [vmem:[%s20235_s15 + $0x6e0] sm:$0xf0] }
 0x743   : > { %11074 = vmatmul.bf16.vlgmr.msrb.gmra.mxu0 %v22539_v3  ;;  %v19189_v19 = vld [vmem:[%s20235_s15 + $0xbc4] sm:$0xf]  ;;  %11148 = vmatpush.bf16.msra.mxu2 %v16473_v13  ;;  %v16729_v22 = vor.u32 %v19029_v45, %v16726_v14 }
 0x744   : > { %11170 = vmatpush.bf16.msrb.mxu0 %v17113_v53  ;;  %v7828_v1 = vpop.f32.mrf.mxu1  ;;  %v17366_v20 = vld [vmem:[%s20235_s15 + $0xbe0] sm:$0xf0] }
 0x745   : > { %v7852_v8 = vpop.f32.mrf.mxu3  ;;  %v19109_v21 = vld [vmem:[%s20235_s15 + $0x944] sm:$0xf]  ;;  %11138 = vmatpush.bf16.msra.mxu1 %v16121_v47  ;;  %11160 = vmatpush.bf16.msra.mxu3 %v16761_v61  ;;  %v17369_v23 = vor.u32 %v19189_v19, %v17366_v20 }
 0x746   : > { %v7853_v10 = vadd.f32 %v7852_v8, %v7840_v54  ;;  %v17046_v12 = vld [vmem:[%s20235_s15 + $0x960] sm:$0xf0] }
 0x747   : > { %v18949_v25 = vld [vmem:[%s20235_s15 + $0x444] sm:$0xf]  ;;  %v17049_v40 = vor.u32 %v19109_v21, %v17046_v12  ;;  %11149 = vmatpush.bf16.msra.mxu2 %v16441_v9  ;;  %v16092_v9 = vld [vmem:[%s20235_s15 + $0x1c8] sm:$0xf] }
 0x748   : > { %v16406_v31 = vld [vmem:[%s20235_s15 + $0x460] sm:$0xf0]  ;;  %v7913_v0 = vmax.f32 %v7853_v10, 0.0  ;;  %11171 = vmatpush.bf16.msrb.mxu0 %v17081_v17  ;;  %v18874_v12 = vld [vmem:[%s20235_s15 + $0x1e4] sm:$0xf0] }
 0x749   : > { %v19021_v33 = vld [vmem:[%s20235_s15 + $0x684] sm:$0xf]  ;;  %v16409_v32 = vor.u32 %v18949_v25, %v16406_v31  ;;  %11161 = vmatpush.bf16.msra.mxu3 %v16729_v22 }
 0x74a   : > { %v16694_v24 = vld [vmem:[%s20235_s15 + $0x6a0] sm:$0xf0]  ;;  %v22556_v62 = vpack.c.bf16 %v7913_v0, %v7913_v0 }
 0x74b   : > { %v19181_v51 = vld [vmem:[%s20235_s15 + $0xb84] sm:$0xf]  ;;  %v16697_v41 = vor.u32 %v19021_v33, %v16694_v24  ;;  %11150 = vmatpush.bf16.msra.mxu2 %v16409_v32  ;;  %v16060_v32 = vld [vmem:[%s20235_s15 + $0x188] sm:$0xf] }
 0x74c   : > { %v17334_v15 = vld [vmem:[%s20235_s15 + $0xba0] sm:$0xf0]  ;;  %v7865_v7 = vpop.f32.mrf.mxu0  ;;  %11087 = vmatmul.bf16.vlgmr.msrb.gmra.mxu1 %v22556_v62  ;;  %11172 = vmatpush.bf16.msrb.mxu0 %v17049_v40 }
 0x74d   : > { %v19101_v52 = vld [vmem:[%s20235_s15 + $0x904] sm:$0xf]  ;;  %11183 = vmatpush.bf16.msrb.mxu1 %v17369_v23  ;;  %v7854_v37 = vpop.f32.mrf.mxu3  ;;  %v17337_v29 = vor.u32 %v19181_v51, %v17334_v15  ;;  %11162 = vmatpush.bf16.msra.mxu3 %v16697_v41  ;;  %v7866_v17 = vadd.f32 %v7865_v7, %v7050_v5  ;;  %v7051_v23 = vperm.slane %v22441_v26, 7  ;;  %v16093_v15 = vor.u32 %v18874_v12, %v16092_v9  ;;  %v15996_v5 = vld [vmem:[%s20235_s15 + $0x108] sm:$0xf] }
 0x74e   : > { %v17014_v6 = vld [vmem:[%s20235_s15 + $0x920] sm:$0xf0] }
 0x74f   : > { %v18941_v34 = vld [vmem:[%s20235_s15 + $0x404] sm:$0xf]  ;;  %v17017_v58 = vor.u32 %v19101_v52, %v17014_v6  ;;  %v18866_v6 = vld [vmem:[%s20235_s15 + $0x1a4] sm:$0xf0] }
 0x750   : > { %v16374_v38 = vld [vmem:[%s20235_s15 + $0x420] sm:$0xf0] }
 0x751   : > { %v19013_v30 = vld [vmem:[%s20235_s15 + $0x644] sm:$0xf]  ;;  %v16377_v43 = vor.u32 %v18941_v34, %v16374_v38  ;;  %11184 = vmatpush.bf16.msrb.mxu1 %v17337_v29  ;;  %11173 = vmatpush.bf16.msrb.mxu0 %v17017_v58 }
 0x752   : > { %v16662_v42 = vld [vmem:[%s20235_s15 + $0x660] sm:$0xf0] }
 0x753   : > { %v19173_v36 = vld [vmem:[%s20235_s15 + $0xb44] sm:$0xf]  ;;  %v16665_v55 = vor.u32 %v19013_v30, %v16662_v42  ;;  %v7891_v57 = vpop.f32.mrf.mxu2  ;;  %11151 = vmatpush.bf16.msra.mxu2 %v16377_v43  ;;  %11126 = vmatmul.bf16.vlgmr.msra.gmra.mxu0 %v22461_v11  ;;  %v16061_v42 = vor.u32 %v18866_v6, %v16060_v32 }
 0x754   : > { %v17302_v28 = vld [vmem:[%s20235_s15 + $0xb60] sm:$0xf0]  ;;  %v7867_v53 = vpop.f32.mrf.mxu0  ;;  %v7892_v41 = vadd.f32 %v7891_v57, %v7051_v23 }
 0x755   : > { %v19093_v35 = vld [vmem:[%s20235_s15 + $0x8c4] sm:$0xf]  ;;  %v17305_v16 = vor.u32 %v19173_v36, %v17302_v28  ;;  %11163 = vmatpush.bf16.msra.mxu3 %v16665_v55  ;;  %v16348_v36 = vld [vmem:[%s20235_s15 + $0x3c8] sm:$0xf] }
 0x756   : > { %v16982_v44 = vld [vmem:[%s20235_s15 + $0x8e0] sm:$0xf0]  ;;  %v18938_v28 = vld [vmem:[%s20235_s15 + $0x3e4] sm:$0xf0] }
 0x757   : > { %v19005_v48 = vld [vmem:[%s20235_s15 + $0x604] sm:$0xf]  ;;  %v16985_v59 = vor.u32 %v19093_v35, %v16982_v44  ;;  %11185 = vmatpush.bf16.msrb.mxu1 %v17305_v16  ;;  %v16028_v16 = vld [vmem:[%s20235_s15 + $0x148] sm:$0xf] }
 0x758   : > { %v16630_v4 = vld [vmem:[%s20235_s15 + $0x620] sm:$0xf0] }
 0x759   : > { %v19165_v60 = vld [vmem:[%s20235_s15 + $0xb04] sm:$0xf]  ;;  %v16633_v2 = vor.u32 %v19005_v48, %v16630_v4  ;;  %11174 = vmatpush.bf16.msrb.mxu0 %v16985_v59  ;;  %v18858_v48 = vld [vmem:[%s20235_s15 + $0x164] sm:$0xf0] }
 0x75a   : > { %v17270_v46 = vld [vmem:[%s20235_s15 + $0xb20] sm:$0xf0] }
 0x75b   : > { %v19085_v39 = vld [vmem:[%s20235_s15 + $0x884] sm:$0xf]  ;;  %v17273_v13 = vor.u32 %v19165_v60, %v17270_v46  ;;  %11164 = vmatpush.bf16.msra.mxu3 %v16633_v2  ;;  %v7893_v45 = vpop.f32.mrf.mxu2  ;;  %v16349_v46 = vor.u32 %v18938_v28, %v16348_v36  ;;  %v16316_v2 = vld [vmem:[%s20235_s15 + $0x388] sm:$0xf] }
 0x75c   : > { %v16950_v63 = vld [vmem:[%s20235_s15 + $0x8a0] sm:$0xf0]  ;;  %11139 = vmatmul.bf16.vlgmr.msra.gmra.mxu1 %v22474_v27 }
 0x75d   : > { %v16953_v18 = vor.u32 %v19085_v39, %v16950_v63  ;;  %v19157_v47 = vld [vmem:[%s20235_s15 + $0xac4] sm:$0xf]  ;;  %11186 = vmatpush.bf16.msrb.mxu1 %v17273_v13  ;;  %v7878_v21 = vpop.f32.mrf.mxu1  ;;  %v16029_v63 = vor.u32 %v18858_v48, %v16028_v16  ;;  %v18930_v13 = vld [vmem:[%s20235_s15 + $0x3a4] sm:$0xf0] }
 0x75e   : > { %v17238_v56 = vld [vmem:[%s20235_s15 + $0xae0] sm:$0xf0]  ;;  %v7879_v25 = vadd.f32 %v7878_v21, %v7866_v17  ;;  %v16317_v45 = vor.u32 %v18930_v13, %v16316_v2  ;;  %v16284_v17 = vld [vmem:[%s20235_s15 + $0x348] sm:$0xf] }
 0x75f   : > { %v19077_v54 = vld [vmem:[%s20235_s15 + $0x844] sm:$0xf]  ;;  %v17241_v8 = vor.u32 %v19157_v47, %v17238_v56  ;;  %11175 = vmatpush.bf16.msrb.mxu0 %v16953_v18  ;;  %v18818_v2 = vld [vmem:[%s20235_s15 + $0x24] sm:$0xf0] }
 0x760   : > { %v16918_v61 = vld [vmem:[%s20235_s15 + $0x860] sm:$0xf0]  ;;  %v7914_v51 = vmax.f32 %v7879_v25, 0.0  ;;  %v16604_v13 = vld [vmem:[%s20235_s15 + $0x5c8] sm:$0xf] }
 0x761   : > { %v16921_v14 = vor.u32 %v19077_v54, %v16918_v61  ;;  %v19149_v10 = vld [vmem:[%s20235_s15 + $0xa84] sm:$0xf]  ;;  %11187 = vmatpush.bf16.msrb.mxu1 %v17241_v8  ;;  %v18850_v54 = vld [vmem:[%s20235_s15 + $0x124] sm:$0xf0] }
 0x762   : > { %v17206_v1 = vld [vmem:[%s20235_s15 + $0xaa0] sm:$0xf0]  ;;  %v22597_v34 = vpack.c.bf16 %v7914_v51, %v7914_v51 }
 0x763   : > { %v19069_v19 = vld [vmem:[%s20235_s15 + $0x804] sm:$0xf]  ;;  %v17209_v31 = vor.u32 %v19149_v10, %v17206_v1  ;;  %11176 = vmatpush.bf16.msrb.mxu0 %v16921_v14  ;;  %v15997_v1 = vor.u32 %v18850_v54, %v15996_v5  ;;  %v17116_v5 = vld [vmem:[%s20235_s15 + $0x9c8] sm:$0xf] }
 0x764   : > { %v16886_v20 = vld [vmem:[%s20235_s15 + $0x820] sm:$0xf0]  ;;  %v7904_v30 = vpop.f32.mrf.mxu3  ;;  %11100 = vmatmul.bf16.vlgmr.msrb.gmra.mxu2 %v22597_v34  ;;  %v19130_v54 = vld [vmem:[%s20235_s15 + $0x9e4] sm:$0xf0] }
 0x765   : > { %v19253_v0 = vld [vmem:[%s20235_s15 + $0xdc4] sm:$0xf]  ;;  %v16889_v33 = vor.u32 %v19069_v19, %v16886_v20  ;;  %11188 = vmatpush.bf16.msrb.mxu1 %v17209_v31  ;;  %v7905_v43 = vadd.f32 %v7904_v30, %v7892_v41  ;;  %v7880_v35 = vpop.f32.mrf.mxu1  ;;  %v18922_v19 = vld [vmem:[%s20235_s15 + $0x364] sm:$0xf0] }
 0x766   : > { %v17622_v22 = vld [vmem:[%s20235_s15 + $0xde0] sm:$0xf0]  ;;  %v15964_v31 = vld [vmem:[%s20235_s15 + $0xc8] sm:$0xf] }
 0x767   : > { %v19141_v24 = vld [vmem:[%s20235_s15 + $0xa44] sm:$0xf]  ;;  %v17625_v52 = vor.u32 %v19253_v0, %v17622_v22  ;;  %11177 = vmatpush.bf16.msrb.mxu0 %v16889_v33  ;;  %v7915_v60 = vmax.f32 %v7905_v43, 0.0  ;;  %v18842_v0 = vld [vmem:[%s20235_s15 + $0xe4] sm:$0xf0]  ;;  %v16285_v22 = vor.u32 %v18922_v19, %v16284_v17 }
 0x768   : > { %v17174_v40 = vld [vmem:[%s20235_s15 + $0xa60] sm:$0xf0]  ;;  %v16252_v33 = vld [vmem:[%s20235_s15 + $0x308] sm:$0xf]  ;;  %v15965_v51 = vor.u32 %v18842_v0, %v15964_v31 }
 0x769   : > { %v17177_v38 = vor.u32 %v19141_v24, %v17174_v40  ;;  %v19245_v7 = vld [vmem:[%s20235_s15 + $0xd84] sm:$0xf]  ;;  %11196 = vmatpush.bf16.msrb.mxu2 %v17625_v52  ;;  %v22616_v18 = vpack.c.bf16 %v7915_v60, %v7915_v60  ;;  %v18914_v24 = vld [vmem:[%s20235_s15 + $0x324] sm:$0xf0] }
 0x76a   : > { %v17590_v26 = vld [vmem:[%s20235_s15 + $0xda0] sm:$0xf0]  ;;  %11178 = vmatmul.bf16.vlgmr.msrb.gmra.mxu0 %v22539_v3  ;;  %v15900_v35 = vld [vmem:[%s20235_s15 + $0x48] sm:$0xf] }
 0x76b   : > { %v19133_v37 = vld [vmem:[%s20235_s15 + $0xa04] sm:$0xf]  ;;  %11222 = vmatpush.bf16.msra.mxu0 %v16093_v15  ;;  %v17593_v44 = vor.u32 %v19245_v7, %v17590_v26  ;;  %11189 = vmatpush.bf16.msrb.mxu1 %v17177_v38  ;;  %v15932_v38 = vld [vmem:[%s20235_s15 + $0x88] sm:$0xf]  ;;  %v16253_v26 = vor.u32 %v18914_v24, %v16252_v33 }
 0x76c   : > { %v17142_v29 = vld [vmem:[%s20235_s15 + $0xa20] sm:$0xf0]  ;;  %11113 = vmatmul.bf16.vlgmr.msrb.gmra.mxu3 %v22616_v18  ;;  %v7906_v14 = vpop.f32.mrf.mxu3  ;;  %v18834_v7 = vld [vmem:[%s20235_s15 + $0xa4] sm:$0xf0] }
 0x76d   : > { %v19317_v58 = vld [vmem:[%s20235_s15 + $0xfc4] sm:$0xf]  ;;  %v17145_v4 = vor.u32 %v19133_v37, %v17142_v29  ;;  %11197 = vmatpush.bf16.msrb.mxu2 %v17593_v44  ;;  %v16220_v37 = vld [vmem:[%s20235_s15 + $0x2c8] sm:$0xf] }
 0x76e   : > { %v17878_v55 = vld [vmem:[%s20235_s15 + $0xfe0] sm:$0xf0]  ;;  %v18906_v29 = vld [vmem:[%s20235_s15 + $0x2e4] sm:$0xf0] }
 0x76f   : > { %v19237_v57 = vld [vmem:[%s20235_s15 + $0xd44] sm:$0xf]  ;;  %11223 = vmatpush.bf16.msra.mxu0 %v16061_v42  ;;  %v17881_v39 = vor.u32 %v19317_v58, %v17878_v55  ;;  %11190 = vmatpush.bf16.msrb.mxu1 %v17145_v4  ;;  %v15933_v42 = vor.u32 %v18834_v7, %v15932_v38  ;;  %v18826_v44 = vld [vmem:[%s20235_s15 + $0x64] sm:$0xf0]  ;;  %v16221_v55 = vor.u32 %v18906_v29, %v16220_v37 }
 0x770   : > { %v17558_v59 = vld [vmem:[%s20235_s15 + $0xd60] sm:$0xf0]  ;;  %v16188_v4 = vld [vmem:[%s20235_s15 + $0x288] sm:$0xf]  ;;  %v15901_v60 = vor.u32 %v18826_v44, %v15900_v35 }
 0x771   : > { %v19309_v53 = vld [vmem:[%s20235_s15 + $0xf84] sm:$0xf]  ;;  %v17561_v47 = vor.u32 %v19237_v57, %v17558_v59  ;;  %11209 = vmatpush.bf16.msrb.mxu3 %v17881_v39  ;;  %v18898_v57 = vld [vmem:[%s20235_s15 + $0x2a4] sm:$0xf0] }
 0x772   : > { %v17846_v56 = vld [vmem:[%s20235_s15 + $0xfa0] sm:$0xf0]  ;;  %11191 = vmatmul.bf16.vlgmr.msrb.gmra.mxu1 %v22556_v62  ;;  %v19122_v31 = vld [vmem:[%s20235_s15 + $0x9a4] sm:$0xf0] }
 0x773   : > { %v19229_v61 = vld [vmem:[%s20235_s15 + $0xd04] sm:$0xf]  ;;  %11235 = vmatpush.bf16.msra.mxu1 %v16349_v46  ;;  %11224 = vmatpush.bf16.msra.mxu0 %v16029_v63  ;;  %v17849_v10 = vor.u32 %v19309_v53, %v17846_v56  ;;  %v15868_v53 = vld [vmem:[%s20235_s15 + $0x8] sm:$0xf] }
 0x774   : > { %v17526_v8 = vld [vmem:[%s20235_s15 + $0xd20] sm:$0xf0]  ;;  %11198 = vmatpush.bf16.msrb.mxu2 %v17561_v47  ;;  %v16189_v47 = vor.u32 %v18898_v57, %v16188_v4  ;;  %v19002_v56 = vld [vmem:[%s20235_s15 + $0x5e4] sm:$0xf0] }
 0x775   : > { %v17529_v20 = vor.u32 %v19229_v61, %v17526_v8  ;;  %v19301_v21 = vld [vmem:[%s20235_s15 + $0xf44] sm:$0xf]  ;;  %11210 = vmatpush.bf16.msrb.mxu3 %v17849_v10  ;;  %11152 = vmatmul.bf16.vlgmr.msra.gmra.mxu2 %v22497_v50  ;;  %v16156_v8 = vld [vmem:[%s20235_s15 + $0x248] sm:$0xf]  ;;  %v15869_v10 = vor.u32 %v18818_v2, %v15868_v53  ;;  %v16605_v19 = vor.u32 %v19002_v56, %v16604_v13 }
 0x776   : > { %v17814_v9 = vld [vmem:[%s20235_s15 + $0xf60] sm:$0xf0]  ;;  %v18882_v33 = vld [vmem:[%s20235_s15 + $0x224] sm:$0xf0] }
 0x777   : > { %v19221_v12 = vld [vmem:[%s20235_s15 + $0xcc4] sm:$0xf]  ;;  %11236 = vmatpush.bf16.msra.mxu1 %v16317_v45  ;;  %11225 = vmatpush.bf16.msra.mxu0 %v15997_v1  ;;  %v17817_v23 = vor.u32 %v19301_v21, %v17814_v9  ;;  %v18890_v45 = vld [vmem:[%s20235_s15 + $0x264] sm:$0xf0] }
 0x778   : > { %v17494_v25 = vld [vmem:[%s20235_s15 + $0xce0] sm:$0xf0]  ;;  %11199 = vmatpush.bf16.msrb.mxu2 %v17529_v20  ;;  %v17117_v20 = vor.u32 %v19130_v54, %v17116_v5  ;;  %v16572_v21 = vld [vmem:[%s20235_s15 + $0x588] sm:$0xf]  ;;  %v16157_v9 = vor.u32 %v18890_v45, %v16156_v8 }
 0x779   : > { %v17497_v40 = vor.u32 %v19221_v12, %v17494_v25  ;;  %v19293_v15 = vld [vmem:[%s20235_s15 + $0xf04] sm:$0xf]  ;;  %11211 = vmatpush.bf16.msrb.mxu3 %v17817_v23  ;;  %v18994_v12 = vld [vmem:[%s20235_s15 + $0x5a4] sm:$0xf0] }
 0x77a   : > { %v17782_v52 = vld [vmem:[%s20235_s15 + $0xf20] sm:$0xf0]  ;;  %v17084_v25 = vld [vmem:[%s20235_s15 + $0x988] sm:$0xf] }
 0x77b   : > { %v19213_v32 = vld [vmem:[%s20235_s15 + $0xc84] sm:$0xf]  ;;  %11237 = vmatpush.bf16.msra.mxu1 %v16285_v22  ;;  %v17785_v41 = vor.u32 %v19293_v15, %v17782_v52  ;;  %11226 = vmatpush.bf16.msra.mxu0 %v15965_v51  ;;  %v16124_v23 = vld [vmem:[%s20235_s15 + $0x208] sm:$0xf]  ;;  %v16573_v15 = vor.u32 %v18994_v12, %v16572_v21  ;;  %v17085_v52 = vor.u32 %v19122_v31, %v17084_v25 }
 0x77c   : > { %v17462_v6 = vld [vmem:[%s20235_s15 + $0xca0] sm:$0xf0]  ;;  %11200 = vmatpush.bf16.msrb.mxu2 %v17497_v40  ;;  %11165 = vmatmul.bf16.vlgmr.msra.gmra.mxu3 %v22515_v49  ;;  %v17372_v40 = vld [vmem:[%s20235_s15 + $0xbc8] sm:$0xf]  ;;  %v16125_v38 = vor.u32 %v18882_v33, %v16124_v23 }
 0x77d   : > { %v17465_v30 = vor.u32 %v19213_v32, %v17462_v6  ;;  %v19285_v58 = vld [vmem:[%s20235_s15 + $0xec4] sm:$0xf]  ;;  %11212 = vmatpush.bf16.msrb.mxu3 %v17785_v41  ;;  %v19194_v51 = vld [vmem:[%s20235_s15 + $0xbe4] sm:$0xf0] }
 0x77e   : > { %v17750_v36 = vld [vmem:[%s20235_s15 + $0xee0] sm:$0xf0]  ;;  %v16860_v32 = vld [vmem:[%s20235_s15 + $0x7c8] sm:$0xf]  ;;  %v17373_v37 = vor.u32 %v19194_v51, %v17372_v40 }
 0x77f   : > { %v19205_v28 = vld [vmem:[%s20235_s15 + $0xc44] sm:$0xf]  ;;  %11238 = vmatpush.bf16.msra.mxu1 %v16253_v26  ;;  %v17753_v16 = vor.u32 %v19285_v58, %v17750_v36  ;;  %11227 = vmatpush.bf16.msra.mxu0 %v15933_v42  ;;  %v19066_v6 = vld [vmem:[%s20235_s15 + $0x7e4] sm:$0xf0] }
 0x780   : > { %v17430_v43 = vld [vmem:[%s20235_s15 + $0xc60] sm:$0xf0]  ;;  %11201 = vmatpush.bf16.msrb.mxu2 %v17465_v30  ;;  %v16540_v7 = vld [vmem:[%s20235_s15 + $0x548] sm:$0xf]  ;;  %v16861_v42 = vor.u32 %v19066_v6, %v16860_v32 }
 0x781   : > { %v19277_v48 = vld [vmem:[%s20235_s15 + $0xe84] sm:$0xf]  ;;  %v17433_v59 = vor.u32 %v19205_v28, %v17430_v43  ;;  %11213 = vmatpush.bf16.msrb.mxu3 %v17753_v16  ;;  %v18986_v26 = vld [vmem:[%s20235_s15 + $0x564] sm:$0xf0] }
 0x782   : > { %v17718_v46 = vld [vmem:[%s20235_s15 + $0xea0] sm:$0xf0]  ;;  %v17052_v29 = vld [vmem:[%s20235_s15 + $0x948] sm:$0xf]  ;;  %v16541_v28 = vor.u32 %v18986_v26, %v16540_v7 }
 0x783   : > { %v19197_v39 = vld [vmem:[%s20235_s15 + $0xc04] sm:$0xf]  ;;  %11239 = vmatpush.bf16.msra.mxu1 %v16221_v55  ;;  %v17721_v61 = vor.u32 %v19277_v48, %v17718_v46  ;;  %11228 = vmatpush.bf16.msra.mxu0 %v15901_v60  ;;  %v19114_v30 = vld [vmem:[%s20235_s15 + $0x964] sm:$0xf0] }
 0x784   : > { %v17398_v63 = vld [vmem:[%s20235_s15 + $0xc20] sm:$0xf0]  ;;  %11202 = vmatpush.bf16.msrb.mxu2 %v17433_v59  ;;  %v17340_v58 = vld [vmem:[%s20235_s15 + $0xb88] sm:$0xf]  ;;  %v17053_v44 = vor.u32 %v19114_v30, %v17052_v29 }
 0x785   : > { %v17401_v14 = vor.u32 %v19197_v39, %v17398_v63  ;;  %v19269_v1 = vld [vmem:[%s20235_s15 + $0xe44] sm:$0xf]  ;;  %11214 = vmatpush.bf16.msrb.mxu3 %v17721_v61  ;;  %v19186_v36 = vld [vmem:[%s20235_s15 + $0xba4] sm:$0xf0] }
 0x786   : > { %v17686_v17 = vld [vmem:[%s20235_s15 + $0xe60] sm:$0xf0]  ;;  %v16828_v43 = vld [vmem:[%s20235_s15 + $0x788] sm:$0xf]  ;;  %v17341_v48 = vor.u32 %v19186_v36, %v17340_v58 }
 0x787   : > { %11240 = vmatpush.bf16.msra.mxu1 %v16189_v47  ;;  %v17689_v0 = vor.u32 %v19269_v1, %v17686_v17  ;;  %v19261_v22 = vld [vmem:[%s20235_s15 + $0xe04] sm:$0xf]  ;;  %11229 = vmatpush.bf16.msra.mxu0 %v15869_v10  ;;  %v19058_v35 = vld [vmem:[%s20235_s15 + $0x7a4] sm:$0xf0] }
 0x788   : > { %11203 = vmatpush.bf16.msrb.mxu2 %v17401_v14  ;;  %v17654_v24 = vld [vmem:[%s20235_s15 + $0xe20] sm:$0xf0]  ;;  %v16508_v55 = vld [vmem:[%s20235_s15 + $0x508] sm:$0xf]  ;;  %v16829_v59 = vor.u32 %v19058_v35, %v16828_v43 }
 0x789   : > { %11215 = vmatpush.bf16.msrb.mxu3 %v17689_v0  ;;  %v17657_v41 = vor.u32 %v19261_v22, %v17654_v24  ;;  %v18978_v16 = vld [vmem:[%s20235_s15 + $0x524] sm:$0xf0] }
 0x78a   : > { %11230 = vmatmul.bf16.vlgmr.msra.gmra.mxu0 %v22461_v11  ;;  %v17020_v4 = vld [vmem:[%s20235_s15 + $0x908] sm:$0xf]  ;;  %v16509_v39 = vor.u32 %v18978_v16, %v16508_v55  ;;  %v16094_v16 = vld [vmem:[%s20235_s15 + $0x1e8] sm:$0xf0] }
 0x78b   : > { %11274 = vmatpush.bf16.msrb.mxu0 %v17117_v20  ;;  %11241 = vmatpush.bf16.msra.mxu1 %v16157_v9  ;;  %v19106_v57 = vld [vmem:[%s20235_s15 + $0x924] sm:$0xf0] }
 0x78c   : > { %11248 = vmatpush.bf16.msra.mxu2 %v16605_v19  ;;  %v17308_v60 = vld [vmem:[%s20235_s15 + $0xb48] sm:$0xf]  ;;  %v17021_v2 = vor.u32 %v19106_v57, %v17020_v4 }
 0x78d   : > { %11204 = vmatmul.bf16.vlgmr.msrb.gmra.mxu2 %v22597_v34  ;;  %11216 = vmatpush.bf16.msrb.mxu3 %v17657_v41  ;;  %v19178_v46 = vld [vmem:[%s20235_s15 + $0xb64] sm:$0xf0] }
 0x78e   : > { %v16796_v63 = vld [vmem:[%s20235_s15 + $0x748] sm:$0xf]  ;;  %v17309_v56 = vor.u32 %v19178_v46, %v17308_v60 }
 0x78f   : > { %11275 = vmatpush.bf16.msrb.mxu0 %v17085_v52  ;;  %11242 = vmatpush.bf16.msra.mxu1 %v16125_v38  ;;  %v19050_v53 = vld [vmem:[%s20235_s15 + $0x764] sm:$0xf0] }
 0x790   : > { %11249 = vmatpush.bf16.msra.mxu2 %v16573_v15  ;;  %11217 = vmatmul.bf16.vlgmr.msrb.gmra.mxu3 %v22616_v18  ;;  %v16476_v13 = vld [vmem:[%s20235_s15 + $0x4c8] sm:$0xf]  ;;  %v16797_v61 = vor.u32 %v19050_v53, %v16796_v63 }
 0x791   : > { %11261 = vmatpush.bf16.msra.mxu3 %v16861_v42  ;;  %v18970_v47 = vld [vmem:[%s20235_s15 + $0x4e4] sm:$0xf0] }
 0x792   : > { %11243 = vmatmul.bf16.vlgmr.msra.gmra.mxu1 %v22474_v27  ;;  %v16988_v5 = vld [vmem:[%s20235_s15 + $0x8c8] sm:$0xf]  ;;  %v16477_v14 = vor.u32 %v18970_v47, %v16476_v13 }
 0x793   : > { %11287 = vmatpush.bf16.msrb.mxu1 %v17373_v37  ;;  %11276 = vmatpush.bf16.msrb.mxu0 %v17053_v44  ;;  %v19098_v54 = vld [vmem:[%s20235_s15 + $0x8e4] sm:$0xf0]  ;;  %v18870_v44 = vld [vmem:[%s20235_s15 + $0x1cc] sm:$0xf] }
 0x794   : > { %11250 = vmatpush.bf16.msra.mxu2 %v16541_v28  ;;  %v17276_v8 = vld [vmem:[%s20235_s15 + $0xb08] sm:$0xf]  ;;  %v16989_v17 = vor.u32 %v19098_v54, %v16988_v5  ;;  %v16097_v53 = vor.u32 %v18870_v44, %v16094_v16  ;;  %v16062_v54 = vld [vmem:[%s20235_s15 + $0x1a8] sm:$0xf0] }
 0x795   : > { %11262 = vmatpush.bf16.msra.mxu3 %v16829_v59  ;;  %v19170_v45 = vld [vmem:[%s20235_s15 + $0xb24] sm:$0xf0] }
 0x796   : > { %v16764_v10 = vld [vmem:[%s20235_s15 + $0x708] sm:$0xf]  ;;  %v17277_v21 = vor.u32 %v19170_v45, %v17276_v8 }
 0x797   : > { %11288 = vmatpush.bf16.msrb.mxu1 %v17341_v48  ;;  %v19042_v1 = vld [vmem:[%s20235_s15 + $0x724] sm:$0xf0]  ;;  %11277 = vmatpush.bf16.msrb.mxu0 %v17021_v2 }
 0x798   : > { %11251 = vmatpush.bf16.msra.mxu2 %v16509_v39  ;;  %v16444_v19 = vld [vmem:[%s20235_s15 + $0x488] sm:$0xf]  ;;  %v16765_v25 = vor.u32 %v19042_v1, %v16764_v10  ;;  %v16350_v10 = vld [vmem:[%s20235_s15 + $0x3e8] sm:$0xf0] }
 0x799   : > { %v18962_v20 = vld [vmem:[%s20235_s15 + $0x4a4] sm:$0xf0]  ;;  %11263 = vmatpush.bf16.msra.mxu3 %v16797_v61 }
 0x79a   : > { %v16956_v9 = vld [vmem:[%s20235_s15 + $0x888] sm:$0xf]  ;;  %v16445_v22 = vor.u32 %v18962_v20, %v16444_v19 }
 0x79b   : > { %11289 = vmatpush.bf16.msrb.mxu1 %v17309_v56  ;;  %v19090_v12 = vld [vmem:[%s20235_s15 + $0x8a4] sm:$0xf0]  ;;  %11278 = vmatpush.bf16.msrb.mxu0 %v16989_v17  ;;  %v18862_v56 = vld [vmem:[%s20235_s15 + $0x18c] sm:$0xf] }
 0x79c   : > { %v17244_v31 = vld [vmem:[%s20235_s15 + $0xac8] sm:$0xf]  ;;  %11252 = vmatpush.bf16.msra.mxu2 %v16477_v14  ;;  %v16957_v24 = vor.u32 %v19090_v12, %v16956_v9  ;;  %v18934_v14 = vld [vmem:[%s20235_s15 + $0x3cc] sm:$0xf]  ;;  %v16065_v20 = vor.u32 %v18862_v56, %v16062_v54 }
 0x79d   : > { %v19162_v0 = vld [vmem:[%s20235_s15 + $0xae4] sm:$0xf0]  ;;  %11264 = vmatpush.bf16.msra.mxu3 %v16765_v25 }
 0x79e   : > { %v16732_v23 = vld [vmem:[%s20235_s15 + $0x6c8] sm:$0xf]  ;;  %v17245_v15 = vor.u32 %v19162_v0, %v17244_v31  ;;  %v16353_v0 = vor.u32 %v18934_v14, %v16350_v10  ;;  %v18902_v10 = vld [vmem:[%s20235_s15 + $0x2cc] sm:$0xf] }
 0x79f   : > { %v19034_v33 = vld [vmem:[%s20235_s15 + $0x6e4] sm:$0xf0]  ;;  %11290 = vmatpush.bf16.msrb.mxu1 %v17277_v21  ;;  %11279 = vmatpush.bf16.msrb.mxu0 %v16957_v24  ;;  %v11023_v24 = vpop.f32.mrf.mxu0 }
 0x7a0   : > { %v16412_v40 = vld [vmem:[%s20235_s15 + $0x448] sm:$0xf]  ;;  %v16733_v6 = vor.u32 %v19034_v33, %v16732_v23  ;;  %11253 = vmatpush.bf16.msra.mxu2 %v16445_v22  ;;  %v18854_v22 = vld [vmem:[%s20235_s15 + $0x14c] sm:$0xf] }
 0x7a1   : > { %v18954_v51 = vld [vmem:[%s20235_s15 + $0x464] sm:$0xf0]  ;;  %v16030_v23 = vld [vmem:[%s20235_s15 + $0x168] sm:$0xf0] }
 0x7a2   : > { %v16924_v52 = vld [vmem:[%s20235_s15 + $0x848] sm:$0xf]  ;;  %v16413_v26 = vor.u32 %v18954_v51, %v16412_v40  ;;  %11265 = vmatpush.bf16.msra.mxu3 %v16733_v6  ;;  %v18926_v40 = vld [vmem:[%s20235_s15 + $0x38c] sm:$0xf] }
 0x7a3   : > { %v19082_v32 = vld [vmem:[%s20235_s15 + $0x864] sm:$0xf0]  ;;  %11291 = vmatpush.bf16.msrb.mxu1 %v17245_v15  ;;  %v16318_v51 = vld [vmem:[%s20235_s15 + $0x3a8] sm:$0xf0] }
 0x7a4   : > { %v17212_v38 = vld [vmem:[%s20235_s15 + $0xa88] sm:$0xf]  ;;  %v16925_v30 = vor.u32 %v19082_v32, %v16924_v52  ;;  %11254 = vmatpush.bf16.msra.mxu2 %v16413_v26 }
 0x7a5   : > { %v19154_v7 = vld [vmem:[%s20235_s15 + $0xaa4] sm:$0xf0]  ;;  %v11036_v44 = vpop.f32.mrf.mxu1 }
 0x7a6   : > { %v16700_v41 = vld [vmem:[%s20235_s15 + $0x688] sm:$0xf]  ;;  %v17213_v28 = vor.u32 %v19154_v7, %v17212_v38  ;;  %11280 = vmatpush.bf16.msrb.mxu0 %v16925_v30  ;;  %v16033_v38 = vor.u32 %v18854_v22, %v16030_v23  ;;  %v18822_v22 = vld [vmem:[%s20235_s15 + $0x4c] sm:$0xf] }
 0x7a7   : > { %v19026_v37 = vld [vmem:[%s20235_s15 + $0x6a4] sm:$0xf0]  ;;  %v15902_v23 = vld [vmem:[%s20235_s15 + $0x68] sm:$0xf0] }
 0x7a8   : > { %v16380_v29 = vld [vmem:[%s20235_s15 + $0x408] sm:$0xf]  ;;  %v16701_v55 = vor.u32 %v19026_v37, %v16700_v41  ;;  %11292 = vmatpush.bf16.msrb.mxu1 %v17213_v28  ;;  %v16321_v41 = vor.u32 %v18926_v40, %v16318_v51  ;;  %v18846_v37 = vld [vmem:[%s20235_s15 + $0x10c] sm:$0xf] }
 0x7a9   : > { %v18946_v42 = vld [vmem:[%s20235_s15 + $0x424] sm:$0xf0]  ;;  %v16190_v40 = vld [vmem:[%s20235_s15 + $0x2a8] sm:$0xf0] }
 0x7aa   : > { %v16892_v58 = vld [vmem:[%s20235_s15 + $0x808] sm:$0xf]  ;;  %v16381_v57 = vor.u32 %v18946_v42, %v16380_v29  ;;  %11266 = vmatpush.bf16.msra.mxu3 %v16701_v55  ;;  %v15998_v29 = vld [vmem:[%s20235_s15 + $0x128] sm:$0xf0] }
 0x7ab   : > { %v19074_v36 = vld [vmem:[%s20235_s15 + $0x824] sm:$0xf0]  ;;  %v18918_v42 = vld [vmem:[%s20235_s15 + $0x34c] sm:$0xf]  ;;  %v16001_v55 = vor.u32 %v18846_v37, %v15998_v29 }
 0x7ac   : > { %v17628_v43 = vld [vmem:[%s20235_s15 + $0xdc8] sm:$0xf]  ;;  %v16893_v46 = vor.u32 %v19074_v36, %v16892_v58  ;;  %11255 = vmatpush.bf16.msra.mxu2 %v16381_v57  ;;  %v16286_v58 = vld [vmem:[%s20235_s15 + $0x368] sm:$0xf0] }
 0x7ad   : > { %v19258_v35 = vld [vmem:[%s20235_s15 + $0xde4] sm:$0xf0]  ;;  %v16289_v57 = vor.u32 %v18918_v42, %v16286_v58  ;;  %v18998_v37 = vld [vmem:[%s20235_s15 + $0x5cc] sm:$0xf] }
 0x7ae   : > { %v17180_v48 = vld [vmem:[%s20235_s15 + $0xa48] sm:$0xf]  ;;  %v17629_v39 = vor.u32 %v19258_v35, %v17628_v43  ;;  %11281 = vmatpush.bf16.msrb.mxu0 %v16893_v46  ;;  %v16606_v29 = vld [vmem:[%s20235_s15 + $0x5e8] sm:$0xf0] }
 0x7af   : > { %v19146_v4 = vld [vmem:[%s20235_s15 + $0xa64] sm:$0xf0]  ;;  %11256 = vmatmul.bf16.vlgmr.msra.gmra.mxu2 %v22497_v50  ;;  %v17118_v58 = vld [vmem:[%s20235_s15 + $0x9e8] sm:$0xf0] }
 0x7b0   : > { %v16668_v59 = vld [vmem:[%s20235_s15 + $0x648] sm:$0xf]  ;;  %v17181_v2 = vor.u32 %v19146_v4, %v17180_v48  ;;  %11300 = vmatpush.bf16.msrb.mxu2 %v17629_v39  ;;  %v11025_v39 = vpop.f32.mrf.mxu0 }
 0x7b1   : > { %v19018_v60 = vld [vmem:[%s20235_s15 + $0x664] sm:$0xf0]  ;;  %11282 = vmatmul.bf16.vlgmr.msrb.gmra.mxu0 %v22539_v3 }
 0x7b2   : > { %v17596_v63 = vld [vmem:[%s20235_s15 + $0xd88] sm:$0xf]  ;;  %v16669_v5 = vor.u32 %v19018_v60, %v16668_v59  ;;  %11326 = vmatpush.bf16.msra.mxu0 %v16097_v53  ;;  %11293 = vmatpush.bf16.msrb.mxu1 %v17181_v2  ;;  %v18838_v59 = vld [vmem:[%s20235_s15 + $0xcc] sm:$0xf] }
 0x7b3   : > { %v19250_v13 = vld [vmem:[%s20235_s15 + $0xda4] sm:$0xf0]  ;;  %v15966_v60 = vld [vmem:[%s20235_s15 + $0xe8] sm:$0xf0] }
 0x7b4   : > { %v16636_v47 = vld [vmem:[%s20235_s15 + $0x608] sm:$0xf]  ;;  %v17597_v1 = vor.u32 %v19250_v13, %v17596_v63  ;;  %11267 = vmatpush.bf16.msra.mxu3 %v16669_v5  ;;  %v18910_v63 = vld [vmem:[%s20235_s15 + $0x30c] sm:$0xf]  ;;  %v15969_v56 = vor.u32 %v18838_v59, %v15966_v60 }
 0x7b5   : > { %v17148_v61 = vld [vmem:[%s20235_s15 + $0xa08] sm:$0xf]  ;;  %v16254_v53 = vld [vmem:[%s20235_s15 + $0x328] sm:$0xf0] }
 0x7b6   : > { %v19138_v8 = vld [vmem:[%s20235_s15 + $0xa24] sm:$0xf0]  ;;  %11301 = vmatpush.bf16.msrb.mxu2 %v17597_v1  ;;  %11327 = vmatpush.bf16.msra.mxu0 %v16065_v20  ;;  %v16222_v1 = vld [vmem:[%s20235_s15 + $0x2e8] sm:$0xf0] }
 0x7b7   : > { %v19010_v45 = vld [vmem:[%s20235_s15 + $0x624] sm:$0xf0]  ;;  %v17149_v21 = vor.u32 %v19138_v8, %v17148_v61  ;;  %v16257_v61 = vor.u32 %v18910_v63, %v16254_v53  ;;  %v18830_v8 = vld [vmem:[%s20235_s15 + $0x8c] sm:$0xf] }
 0x7b8   : > { %v17884_v17 = vld [vmem:[%s20235_s15 + $0xfc8] sm:$0xf]  ;;  %v16637_v31 = vor.u32 %v19010_v45, %v16636_v47  ;;  %v15934_v45 = vld [vmem:[%s20235_s15 + $0xa8] sm:$0xf0] }
 0x7b9   : > { %v19322_v19 = vld [vmem:[%s20235_s15 + $0xfe4] sm:$0xf0]  ;;  %11294 = vmatpush.bf16.msrb.mxu1 %v17149_v21  ;;  %v11038_v21 = vpop.f32.mrf.mxu1  ;;  %v19118_v63 = vld [vmem:[%s20235_s15 + $0x98c] sm:$0xf] }
 0x7ba   : > { %v22748_v9 = vld [vmem:[%s20239_s6] sm:$0xff]  ;;  %v17885_v33 = vor.u32 %v19322_v19, %v17884_v17  ;;  %11268 = vmatpush.bf16.msra.mxu3 %v16637_v31  ;;  %11328 = vmatpush.bf16.msra.mxu0 %v16033_v38 }
 0x7bb   : > { %v17564_v12 = vld [vmem:[%s20235_s15 + $0xd48] sm:$0xf]  ;;  %v8438_v15 = vperm.slane %v22748_v9, 0  ;;  %v19110_v21 = vld [vmem:[%s20235_s15 + $0x94c] sm:$0xf] }
 0x7bc   : > { %v19242_v25 = vld [vmem:[%s20235_s15 + $0xd64] sm:$0xf0]  ;;  %11295 = vmatmul.bf16.vlgmr.msrb.gmra.mxu1 %v22556_v62 }
 0x7bd   : > { %v17565_v52 = vor.u32 %v19242_v25, %v17564_v12  ;;  %v17852_v32 = vld [vmem:[%s20235_s15 + $0xf88] sm:$0xf]  ;;  %11339 = vmatpush.bf16.msra.mxu1 %v16353_v0  ;;  %v11024_v36 = vadd.f32 %v11023_v24, %v8438_v15  ;;  %11269 = vmatmul.bf16.vlgmr.msra.gmra.mxu3 %v22515_v49  ;;  %v15937_v12 = vor.u32 %v18830_v8, %v15934_v45  ;;  %v18894_v24 = vld [vmem:[%s20235_s15 + $0x28c] sm:$0xf] }
 0x7be   : > { %v19314_v6 = vld [vmem:[%s20235_s15 + $0xfa4] sm:$0xf0]  ;;  %11313 = vmatpush.bf16.msrb.mxu3 %v17885_v33  ;;  %11329 = vmatpush.bf16.msra.mxu0 %v16001_v55  ;;  %v16225_v0 = vor.u32 %v18902_v10, %v16222_v1  ;;  %v19062_v45 = vld [vmem:[%s20235_s15 + $0x7cc] sm:$0xf] }
 0x7bf   : > { %v17532_v7 = vld [vmem:[%s20235_s15 + $0xd08] sm:$0xf]  ;;  %v17853_v30 = vor.u32 %v19314_v6, %v17852_v32  ;;  %11302 = vmatpush.bf16.msrb.mxu2 %v17565_v52  ;;  %v22773_v4 = vadd.f32 %v11036_v44, %v11024_v36  ;;  %v15905_v6 = vor.u32 %v18822_v22, %v15902_v23  ;;  %v18886_v36 = vld [vmem:[%s20235_s15 + $0x24c] sm:$0xf] }
 0x7c0   : > { %v19234_v26 = vld [vmem:[%s20235_s15 + $0xd24] sm:$0xf0]  ;;  %v18982_v1 = vld [vmem:[%s20235_s15 + $0x54c] sm:$0xf] }
 0x7c1   : > { %v17533_v28 = vor.u32 %v19234_v26, %v17532_v7  ;;  %v17820_v43 = vld [vmem:[%s20235_s15 + $0xf48] sm:$0xf]  ;;  %11340 = vmatpush.bf16.msra.mxu1 %v16321_v41  ;;  %v18814_v7 = vld [vmem:[%s20235_s15 + $0xc] sm:$0xf]  ;;  %v16193_v41 = vor.u32 %v18894_v24, %v16190_v40 }
 0x7c2   : > { %v19306_v35 = vld [vmem:[%s20235_s15 + $0xf64] sm:$0xf0]  ;;  %11314 = vmatpush.bf16.msrb.mxu3 %v17853_v30  ;;  %11330 = vmatpush.bf16.msra.mxu0 %v15969_v56  ;;  %v15870_v26 = vld [vmem:[%s20235_s15 + $0x28] sm:$0xf0] }
 0x7c3   : > { %v17500_v16 = vld [vmem:[%s20235_s15 + $0xcc8] sm:$0xf]  ;;  %v17821_v46 = vor.u32 %v19306_v35, %v17820_v43  ;;  %11303 = vmatpush.bf16.msrb.mxu2 %v17533_v28  ;;  %v19126_v30 = vld [vmem:[%s20235_s15 + $0x9cc] sm:$0xf]  ;;  %v15873_v55 = vor.u32 %v18814_v7, %v15870_v26  ;;  %v11075_v26 = vpop.f32.mrf.mxu0 }
 0x7c4   : > { %v19226_v48 = vld [vmem:[%s20235_s15 + $0xce4] sm:$0xf0]  ;;  %v16158_v28 = vld [vmem:[%s20235_s15 + $0x268] sm:$0xf0]  ;;  %v17121_v59 = vor.u32 %v19126_v30, %v17118_v58 }
 0x7c5   : > { %v17501_v2 = vor.u32 %v19226_v48, %v17500_v16  ;;  %v17788_v13 = vld [vmem:[%s20235_s15 + $0xf08] sm:$0xf]  ;;  %11341 = vmatpush.bf16.msra.mxu1 %v16289_v57  ;;  %v16609_v16 = vor.u32 %v18998_v37, %v16606_v29  ;;  %v18990_v48 = vld [vmem:[%s20235_s15 + $0x58c] sm:$0xf]  ;;  %v11049_v57 = vpop.f32.mrf.mxu2  ;;  %v16161_v60 = vor.u32 %v18886_v36, %v16158_v28 }
 0x7c6   : > { %v19298_v47 = vld [vmem:[%s20235_s15 + $0xf24] sm:$0xf0]  ;;  %11315 = vmatpush.bf16.msrb.mxu3 %v17821_v46  ;;  %11331 = vmatpush.bf16.msra.mxu0 %v15937_v12  ;;  %v16574_v46 = vld [vmem:[%s20235_s15 + $0x5a8] sm:$0xf0]  ;;  %v11050_v53 = vadd.f32 %v11049_v57, %v22773_v4 }
 0x7c7   : > { %v17468_v5 = vld [vmem:[%s20235_s15 + $0xc88] sm:$0xf]  ;;  %v17789_v14 = vor.u32 %v19298_v47, %v17788_v13  ;;  %11304 = vmatpush.bf16.msrb.mxu2 %v17501_v2  ;;  %v17086_v13 = vld [vmem:[%s20235_s15 + $0x9a8] sm:$0xf0]  ;;  %v16577_v8 = vor.u32 %v18990_v48, %v16574_v46 }
 0x7c8   : > { %v19218_v54 = vld [vmem:[%s20235_s15 + $0xca4] sm:$0xf0]  ;;  %v18878_v47 = vld [vmem:[%s20235_s15 + $0x20c] sm:$0xf]  ;;  %v17089_v4 = vor.u32 %v19118_v63, %v17086_v13 }
 0x7c9   : > { %v17469_v17 = vor.u32 %v19218_v54, %v17468_v5  ;;  %v17756_v19 = vld [vmem:[%s20235_s15 + $0xec8] sm:$0xf]  ;;  %11342 = vmatpush.bf16.msra.mxu1 %v16257_v61  ;;  %v16126_v56 = vld [vmem:[%s20235_s15 + $0x228] sm:$0xf0] }
 0x7ca   : > { %v19290_v20 = vld [vmem:[%s20235_s15 + $0xee4] sm:$0xf0]  ;;  %11316 = vmatpush.bf16.msrb.mxu3 %v17789_v14  ;;  %11332 = vmatpush.bf16.msra.mxu0 %v15905_v6  ;;  %v19190_v54 = vld [vmem:[%s20235_s15 + $0xbcc] sm:$0xf]  ;;  %v16129_v10 = vor.u32 %v18878_v47, %v16126_v56  ;;  %v11088_v47 = vpop.f32.mrf.mxu1 }
 0x7cb   : > { %v17436_v25 = vld [vmem:[%s20235_s15 + $0xc48] sm:$0xf]  ;;  %v17757_v33 = vor.u32 %v19290_v20, %v17756_v19  ;;  %11305 = vmatpush.bf16.msrb.mxu2 %v17469_v17  ;;  %v17374_v61 = vld [vmem:[%s20235_s15 + $0xbe8] sm:$0xf0] }
 0x7cc   : > { %v19210_v31 = vld [vmem:[%s20235_s15 + $0xc64] sm:$0xf0]  ;;  %v16862_v14 = vld [vmem:[%s20235_s15 + $0x7e8] sm:$0xf0]  ;;  %v17377_v20 = vor.u32 %v19190_v54, %v17374_v61 }
 0x7cd   : > { %v17437_v51 = vor.u32 %v19210_v31, %v17436_v25  ;;  %v17724_v15 = vld [vmem:[%s20235_s15 + $0xe88] sm:$0xf]  ;;  %11343 = vmatpush.bf16.msra.mxu1 %v16225_v0  ;;  %v16542_v17 = vld [vmem:[%s20235_s15 + $0x568] sm:$0xf0]  ;;  %v11062_v25 = vpop.f32.mrf.mxu3  ;;  %v16865_v31 = vor.u32 %v19062_v45, %v16862_v14 }
 0x7ce   : > { %v19282_v52 = vld [vmem:[%s20235_s15 + $0xea4] sm:$0xf0]  ;;  %11317 = vmatpush.bf16.msrb.mxu3 %v17757_v33  ;;  %11333 = vmatpush.bf16.msra.mxu0 %v15873_v55  ;;  %v17054_v12 = vld [vmem:[%s20235_s15 + $0x968] sm:$0xf0]  ;;  %v11063_v23 = vadd.f32 %v11062_v25, %v11050_v53  ;;  %v16545_v33 = vor.u32 %v18982_v1, %v16542_v17 }
 0x7cf   : > { %v17404_v32 = vld [vmem:[%s20235_s15 + $0xc08] sm:$0xf]  ;;  %v17725_v42 = vor.u32 %v19282_v52, %v17724_v15  ;;  %11306 = vmatpush.bf16.msrb.mxu2 %v17437_v51  ;;  %v19182_v0 = vld [vmem:[%s20235_s15 + $0xb8c] sm:$0xf]  ;;  %v11051_v51 = vpop.f32.mrf.mxu2  ;;  %v17057_v15 = vor.u32 %v19110_v21, %v17054_v12 }
 0x7d0   : > { %v19202_v38 = vld [vmem:[%s20235_s15 + $0xc24] sm:$0xf0]  ;;  %v17342_v22 = vld [vmem:[%s20235_s15 + $0xba8] sm:$0xf0]  ;;  %v11076_v30 = vadd.f32 %v11075_v26, %v11063_v23 }
 0x7d1   : > { %v17405_v43 = vor.u32 %v19202_v38, %v17404_v32  ;;  %v17692_v35 = vld [vmem:[%s20235_s15 + $0xe48] sm:$0xf]  ;;  %11344 = vmatpush.bf16.msra.mxu1 %v16193_v41  ;;  %11334 = vmatmul.bf16.vlgmr.msra.gmra.mxu0 %v22461_v11  ;;  %v19054_v24 = vld [vmem:[%s20235_s15 + $0x78c] sm:$0xf]  ;;  %v17345_v6 = vor.u32 %v19182_v0, %v17342_v22 }
 0x7d2   : > { %v19274_v44 = vld [vmem:[%s20235_s15 + $0xe64] sm:$0xf0]  ;;  %11318 = vmatpush.bf16.msrb.mxu3 %v17725_v42  ;;  %11378 = vmatpush.bf16.msrb.mxu0 %v17121_v59  ;;  %v16830_v40 = vld [vmem:[%s20235_s15 + $0x7a8] sm:$0xf0]  ;;  %v22854_v61 = vadd.f32 %v11088_v47, %v11076_v30 }
 0x7d3   : > { %v17660_v39 = vld [vmem:[%s20235_s15 + $0xe08] sm:$0xf]  ;;  %v17693_v2 = vor.u32 %v19274_v44, %v17692_v35  ;;  %11307 = vmatpush.bf16.msrb.mxu2 %v17405_v43  ;;  %v18974_v52 = vld [vmem:[%s20235_s15 + $0x50c] sm:$0xf]  ;;  %v16833_v41 = vor.u32 %v19054_v24, %v16830_v40 }
 0x7d4   : > { %v19266_v5 = vld [vmem:[%s20235_s15 + $0xe24] sm:$0xf0]  ;;  %v16510_v32 = vld [vmem:[%s20235_s15 + $0x528] sm:$0xf0] }
 0x7d5   : > { %11345 = vmatpush.bf16.msra.mxu1 %v16161_v60  ;;  %v17661_v19 = vor.u32 %v19266_v5, %v17660_v39  ;;  %v19102_v38 = vld [vmem:[%s20235_s15 + $0x90c] sm:$0xf]  ;;  %v16513_v42 = vor.u32 %v18974_v52, %v16510_v32  ;;  %v11064_v48 = vpop.f32.mrf.mxu3 }
 0x7d6   : > { %11319 = vmatpush.bf16.msrb.mxu3 %v17693_v2  ;;  %11308 = vmatmul.bf16.vlgmr.msrb.gmra.mxu2 %v22597_v34  ;;  %v17022_v7 = vld [vmem:[%s20235_s15 + $0x928] sm:$0xf0] }
 0x7d7   : > { %11352 = vmatpush.bf16.msra.mxu2 %v16609_v16  ;;  %11379 = vmatpush.bf16.msrb.mxu0 %v17089_v4  ;;  %v19174_v37 = vld [vmem:[%s20235_s15 + $0xb4c] sm:$0xf]  ;;  %v17025_v28 = vor.u32 %v19102_v38, %v17022_v7  ;;  %v11090_v38 = vpop.f32.mrf.mxu1 }
 0x7d8   : > { %v17310_v29 = vld [vmem:[%s20235_s15 + $0xb68] sm:$0xf0]  ;;  %v16004_v38 = vld [vmem:[%s20235_s15 + $0x110] sm:$0xf] }
 0x7d9   : > { %11346 = vmatpush.bf16.msra.mxu1 %v16129_v10  ;;  %v19046_v58 = vld [vmem:[%s20235_s15 + $0x74c] sm:$0xf]  ;;  %v17313_v44 = vor.u32 %v19174_v37, %v17310_v29  ;;  %v16100_v37 = vld [vmem:[%s20235_s15 + $0x1d0] sm:$0xf] }
 0x7da   : > { %11320 = vmatpush.bf16.msrb.mxu3 %v17661_v19  ;;  %v16798_v36 = vld [vmem:[%s20235_s15 + $0x768] sm:$0xf0] }
 0x7db   : > { %11353 = vmatpush.bf16.msra.mxu2 %v16577_v8  ;;  %11380 = vmatpush.bf16.msrb.mxu0 %v17057_v15  ;;  %v18966_v43 = vld [vmem:[%s20235_s15 + $0x4cc] sm:$0xf]  ;;  %v16801_v57 = vor.u32 %v19046_v58, %v16798_v36  ;;  %v11077_v8 = vpop.f32.mrf.mxu0 }
 0x7dc   : > { %11347 = vmatmul.bf16.vlgmr.msra.gmra.mxu1 %v22474_v27  ;;  %v16478_v35 = vld [vmem:[%s20235_s15 + $0x4e8] sm:$0xf0] }
 0x7dd   : > { %11391 = vmatpush.bf16.msrb.mxu1 %v17377_v20  ;;  %11321 = vmatmul.bf16.vlgmr.msrb.gmra.mxu3 %v22616_v18  ;;  %v19094_v55 = vld [vmem:[%s20235_s15 + $0x8cc] sm:$0xf]  ;;  %v16481_v46 = vor.u32 %v18966_v43, %v16478_v35 }
 0x7de   : > { %11365 = vmatpush.bf16.msra.mxu3 %v16865_v31  ;;  %v16990_v16 = vld [vmem:[%s20235_s15 + $0x8e8] sm:$0xf0] }
 0x7df   : > { %11354 = vmatpush.bf16.msra.mxu2 %v16545_v33  ;;  %v19166_v59 = vld [vmem:[%s20235_s15 + $0xb0c] sm:$0xf]  ;;  %11381 = vmatpush.bf16.msrb.mxu0 %v17025_v28  ;;  %v16993_v53 = vor.u32 %v19094_v55, %v16990_v16 }
 0x7e0   : > { %v17278_v60 = vld [vmem:[%s20235_s15 + $0xb28] sm:$0xf0] }
 0x7e1   : > { %11392 = vmatpush.bf16.msrb.mxu1 %v17345_v6  ;;  %v19038_v39 = vld [vmem:[%s20235_s15 + $0x70c] sm:$0xf]  ;;  %v17281_v56 = vor.u32 %v19166_v59, %v17278_v60 }
 0x7e2   : > { %11366 = vmatpush.bf16.msra.mxu3 %v16833_v41  ;;  %v16766_v63 = vld [vmem:[%s20235_s15 + $0x728] sm:$0xf0] }
 0x7e3   : > { %11355 = vmatpush.bf16.msra.mxu2 %v16513_v42  ;;  %v18958_v2 = vld [vmem:[%s20235_s15 + $0x48c] sm:$0xf]  ;;  %v16769_v45 = vor.u32 %v19038_v39, %v16766_v63  ;;  %11382 = vmatpush.bf16.msrb.mxu0 %v16993_v53  ;;  %v11127_v29 = vpop.f32.mrf.mxu0  ;;  %v18875_v42 = vld [vmem:[%s20235_s15 + $0x1ec] sm:$0xf0] }
 0x7e4   : > { %v16446_v13 = vld [vmem:[%s20235_s15 + $0x4a8] sm:$0xf0]  ;;  %v16068_v39 = vld [vmem:[%s20235_s15 + $0x190] sm:$0xf] }
 0x7e5   : > { %11393 = vmatpush.bf16.msrb.mxu1 %v17313_v44  ;;  %v19086_v5 = vld [vmem:[%s20235_s15 + $0x88c] sm:$0xf]  ;;  %v16449_v10 = vor.u32 %v18958_v2, %v16446_v13  ;;  %v8439_v44 = vperm.slane %v22748_v9, 1  ;;  %v18867_v53 = vld [vmem:[%s20235_s15 + $0x1ac] sm:$0xf0] }
 0x7e6   : > { %v16958_v54 = vld [vmem:[%s20235_s15 + $0x8a8] sm:$0xf0]  ;;  %11367 = vmatpush.bf16.msra.mxu3 %v16801_v57  ;;  %v16101_v57 = vor.u32 %v18875_v42, %v16100_v37  ;;  %v18923_v37 = vld [vmem:[%s20235_s15 + $0x36c] sm:$0xf0] }
 0x7e7   : > { %v19158_v14 = vld [vmem:[%s20235_s15 + $0xacc] sm:$0xf]  ;;  %11356 = vmatpush.bf16.msra.mxu2 %v16481_v46  ;;  %v16961_v19 = vor.u32 %v19086_v5, %v16958_v54  ;;  %v18939_v5 = vld [vmem:[%s20235_s15 + $0x3ec] sm:$0xf0]  ;;  %v11128_v54 = vadd.f32 %v11127_v29, %v8439_v44 }
 0x7e8   : > { %v17246_v4 = vld [vmem:[%s20235_s15 + $0xae8] sm:$0xf0] }
 0x7e9   : > { %v19030_v1 = vld [vmem:[%s20235_s15 + $0x6cc] sm:$0xf]  ;;  %11394 = vmatpush.bf16.msrb.mxu1 %v17281_v56  ;;  %v17249_v12 = vor.u32 %v19158_v14, %v17246_v4  ;;  %11383 = vmatpush.bf16.msrb.mxu0 %v16961_v19  ;;  %v16356_v56 = vld [vmem:[%s20235_s15 + $0x3d0] sm:$0xf]  ;;  %v11140_v4 = vpop.f32.mrf.mxu1 }
 0x7ea   : > { %v16734_v17 = vld [vmem:[%s20235_s15 + $0x6e8] sm:$0xf0]  ;;  %11368 = vmatpush.bf16.msra.mxu3 %v16769_v45 }
 0x7eb   : > { %v18950_v20 = vld [vmem:[%s20235_s15 + $0x44c] sm:$0xf]  ;;  %v16737_v0 = vor.u32 %v19030_v1, %v16734_v17  ;;  %11357 = vmatpush.bf16.msra.mxu2 %v16449_v10  ;;  %v16069_v10 = vor.u32 %v18867_v53, %v16068_v39 }
 0x7ec   : > { %v16414_v21 = vld [vmem:[%s20235_s15 + $0x468] sm:$0xf0] }
 0x7ed   : > { %v19078_v25 = vld [vmem:[%s20235_s15 + $0x84c] sm:$0xf]  ;;  %v16417_v33 = vor.u32 %v18950_v20, %v16414_v21  ;;  %11395 = vmatpush.bf16.msrb.mxu1 %v17249_v12  ;;  %v22896_v20 = vadd.f32 %v11140_v4, %v11128_v54  ;;  %v11129_v21 = vpop.f32.mrf.mxu0 }
 0x7ee   : > { %v16926_v31 = vld [vmem:[%s20235_s15 + $0x868] sm:$0xf0]  ;;  %11369 = vmatpush.bf16.msra.mxu3 %v16737_v0  ;;  %v18859_v0 = vld [vmem:[%s20235_s15 + $0x16c] sm:$0xf0] }
 0x7ef   : > { %v19150_v22 = vld [vmem:[%s20235_s15 + $0xa8c] sm:$0xf]  ;;  %v16929_v15 = vor.u32 %v19078_v25, %v16926_v31  ;;  %11358 = vmatpush.bf16.msra.mxu2 %v16417_v33  ;;  %v16357_v25 = vor.u32 %v18939_v5, %v16356_v56  ;;  %v16036_v31 = vld [vmem:[%s20235_s15 + $0x150] sm:$0xf] }
 0x7f0   : > { %v17214_v23 = vld [vmem:[%s20235_s15 + $0xaa8] sm:$0xf0]  ;;  %v18931_v33 = vld [vmem:[%s20235_s15 + $0x3ac] sm:$0xf0] }
 0x7f1   : > { %v19022_v24 = vld [vmem:[%s20235_s15 + $0x68c] sm:$0xf]  ;;  %v17217_v7 = vor.u32 %v19150_v22, %v17214_v23  ;;  %11384 = vmatpush.bf16.msrb.mxu0 %v16929_v15  ;;  %v16324_v23 = vld [vmem:[%s20235_s15 + $0x390] sm:$0xf]  ;;  %v16037_v15 = vor.u32 %v18859_v0, %v16036_v31 }
 0x7f2   : > { %v16702_v40 = vld [vmem:[%s20235_s15 + $0x6a8] sm:$0xf0]  ;;  %v15940_v56 = vld [vmem:[%s20235_s15 + $0x90] sm:$0xf] }
 0x7f3   : > { %v18942_v51 = vld [vmem:[%s20235_s15 + $0x40c] sm:$0xf]  ;;  %v16705_v30 = vor.u32 %v19022_v24, %v16702_v40  ;;  %11396 = vmatpush.bf16.msrb.mxu1 %v17217_v7  ;;  %v18851_v7 = vld [vmem:[%s20235_s15 + $0x12c] sm:$0xf0] }
 0x7f4   : > { %v16382_v52 = vld [vmem:[%s20235_s15 + $0x428] sm:$0xf0]  ;;  %v18835_v5 = vld [vmem:[%s20235_s15 + $0xac] sm:$0xf0] }
 0x7f5   : > { %v19070_v32 = vld [vmem:[%s20235_s15 + $0x80c] sm:$0xf]  ;;  %v16385_v28 = vor.u32 %v18942_v51, %v16382_v52  ;;  %11370 = vmatpush.bf16.msra.mxu3 %v16705_v30  ;;  %v15908_v31 = vld [vmem:[%s20235_s15 + $0x50] sm:$0xf] }
 0x7f6   : > { %v16894_v6 = vld [vmem:[%s20235_s15 + $0x828] sm:$0xf0]  ;;  %v18827_v0 = vld [vmem:[%s20235_s15 + $0x6c] sm:$0xf0] }
 0x7f7   : > { %v19254_v26 = vld [vmem:[%s20235_s15 + $0xdcc] sm:$0xf]  ;;  %v16897_v55 = vor.u32 %v19070_v32, %v16894_v6  ;;  %11359 = vmatpush.bf16.msra.mxu2 %v16385_v28  ;;  %v16325_v6 = vor.u32 %v18931_v33, %v16324_v23  ;;  %v16196_v23 = vld [vmem:[%s20235_s15 + $0x290] sm:$0xf] }
 0x7f8   : > { %v17630_v41 = vld [vmem:[%s20235_s15 + $0xde8] sm:$0xf0]  ;;  %v18899_v33 = vld [vmem:[%s20235_s15 + $0x2ac] sm:$0xf0] }
 0x7f9   : > { %v19142_v58 = vld [vmem:[%s20235_s15 + $0xa4c] sm:$0xf]  ;;  %v17633_v16 = vor.u32 %v19254_v26, %v17630_v41  ;;  %11385 = vmatpush.bf16.msrb.mxu0 %v16897_v55  ;;  %v16292_v41 = vld [vmem:[%s20235_s15 + $0x350] sm:$0xf] }
 0x7fa   : > { %v17182_v36 = vld [vmem:[%s20235_s15 + $0xa68] sm:$0xf0]  ;;  %11360 = vmatmul.bf16.vlgmr.msra.gmra.mxu2 %v22497_v50  ;;  %v16293_v44 = vor.u32 %v18923_v37, %v16292_v41  ;;  %v15972_v55 = vld [vmem:[%s20235_s15 + $0xd0] sm:$0xf]  ;;  %v16197_v37 = vor.u32 %v18899_v33, %v16196_v23 }
 0x7fb   : > { %v19014_v43 = vld [vmem:[%s20235_s15 + $0x64c] sm:$0xf]  ;;  %v17185_v59 = vor.u32 %v19142_v58, %v17182_v36  ;;  %11404 = vmatpush.bf16.msrb.mxu2 %v17633_v16  ;;  %v11142_v58 = vpop.f32.mrf.mxu1  ;;  %v16005_v36 = vor.u32 %v18851_v7, %v16004_v38  ;;  %v18843_v16 = vld [vmem:[%s20235_s15 + $0xec] sm:$0xf0] }
 0x7fc   : > { %v16670_v35 = vld [vmem:[%s20235_s15 + $0x668] sm:$0xf0]  ;;  %11386 = vmatmul.bf16.vlgmr.msrb.gmra.mxu0 %v22539_v3  ;;  %v15876_v38 = vld [vmem:[%s20235_s15 + $0x10] sm:$0xf] }
 0x7fd   : > { %v19246_v48 = vld [vmem:[%s20235_s15 + $0xd8c] sm:$0xf]  ;;  %v16673_v63 = vor.u32 %v19014_v43, %v16670_v35  ;;  %11430 = vmatpush.bf16.msra.mxu0 %v16101_v57  ;;  %11397 = vmatpush.bf16.msrb.mxu1 %v17185_v59  ;;  %v22917_v35 = vpop.f32.mrf.mxu0  ;;  %v16260_v57 = vld [vmem:[%s20235_s15 + $0x310] sm:$0xf] }
 0x7fe   : > { %v17598_v60 = vld [vmem:[%s20235_s15 + $0xda8] sm:$0xf0]  ;;  %v18915_v59 = vld [vmem:[%s20235_s15 + $0x32c] sm:$0xf0] }
 0x7ff   : > { %v19006_v46 = vld [vmem:[%s20235_s15 + $0x60c] sm:$0xf]  ;;  %v17601_v8 = vor.u32 %v19246_v48, %v17598_v60  ;;  %11371 = vmatpush.bf16.msra.mxu3 %v16673_v63  ;;  %v15973_v63 = vor.u32 %v18843_v16, %v15972_v55  ;;  %v18819_v7 = vld [vmem:[%s20235_s15 + $0x2c] sm:$0xf0] }
 0x800   : > { %v19134_v2 = vld [vmem:[%s20235_s15 + $0xa0c] sm:$0xf]  ;;  %v17060_v23 = vld [vmem:[%s20235_s15 + $0x950] sm:$0xf] }
 0x801   : > { %v17150_v13 = vld [vmem:[%s20235_s15 + $0xa28] sm:$0xf0]  ;;  %11405 = vmatpush.bf16.msrb.mxu2 %v17601_v8  ;;  %11431 = vmatpush.bf16.msra.mxu0 %v16069_v10  ;;  %v19115_v33 = vld [vmem:[%s20235_s15 + $0x96c] sm:$0xf0] }
 0x802   : > { %v16638_v47 = vld [vmem:[%s20235_s15 + $0x628] sm:$0xf0]  ;;  %v17153_v1 = vor.u32 %v19134_v2, %v17150_v13  ;;  %v11101_v13 = vpop.f32.mrf.mxu2 }
 0x803   : > { %v19318_v45 = vld [vmem:[%s20235_s15 + $0xfcc] sm:$0xf]  ;;  %v16641_v12 = vor.u32 %v19006_v46, %v16638_v47  ;;  %v16261_v47 = vor.u32 %v18915_v59, %v16260_v57  ;;  %v11102_v54 = vadd.f32 %v11101_v13, %v22854_v61  ;;  %v15877_v57 = vor.u32 %v18819_v7, %v15876_v38  ;;  %v18979_v38 = vld [vmem:[%s20235_s15 + $0x52c] sm:$0xf0] }
 0x804   : > { %v17886_v14 = vld [vmem:[%s20235_s15 + $0xfe8] sm:$0xf0]  ;;  %11398 = vmatpush.bf16.msrb.mxu1 %v17153_v1 }
 0x805   : > { %v19238_v17 = vld [vmem:[%s20235_s15 + $0xd4c] sm:$0xf]  ;;  %v17889_v22 = vor.u32 %v19318_v45, %v17886_v14  ;;  %11372 = vmatpush.bf16.msra.mxu3 %v16641_v12  ;;  %11432 = vmatpush.bf16.msra.mxu0 %v16037_v15  ;;  %v16228_v45 = vld [vmem:[%s20235_s15 + $0x2d0] sm:$0xf]  ;;  %v11181_v12 = vpop.f32.mrf.mxu0 }
 0x806   : > { %v17566_v19 = vld [vmem:[%s20235_s15 + $0xd68] sm:$0xf0]  ;;  %v18907_v14 = vld [vmem:[%s20235_s15 + $0x2ec] sm:$0xf0] }
 0x807   : > { %v17569_v24 = vor.u32 %v19238_v17, %v17566_v19  ;;  %v19310_v40 = vld [vmem:[%s20235_s15 + $0xf8c] sm:$0xf]  ;;  %11399 = vmatmul.bf16.vlgmr.msrb.gmra.mxu1 %v22556_v62  ;;  %v22934_v17 = vpop.f32.mrf.mxu1  ;;  %v15941_v19 = vor.u32 %v18835_v5, %v15940_v56  ;;  %v16132_v56 = vld [vmem:[%s20235_s15 + $0x210] sm:$0xf] }
 0x808   : > { %v17854_v51 = vld [vmem:[%s20235_s15 + $0xfa8] sm:$0xf0]  ;;  %11443 = vmatpush.bf16.msra.mxu1 %v16357_v25  ;;  %11373 = vmatmul.bf16.vlgmr.msra.gmra.mxu3 %v22515_v49  ;;  %v16229_v25 = vor.u32 %v18907_v14, %v16228_v45  ;;  %v18883_v5 = vld [vmem:[%s20235_s15 + $0x22c] sm:$0xf0] }
 0x809   : > { %v19230_v52 = vld [vmem:[%s20235_s15 + $0xd0c] sm:$0xf]  ;;  %11417 = vmatpush.bf16.msrb.mxu3 %v17889_v22  ;;  %v17857_v26 = vor.u32 %v19310_v40, %v17854_v51  ;;  %11406 = vmatpush.bf16.msrb.mxu2 %v17569_v24  ;;  %v19195_v45 = vld [vmem:[%s20235_s15 + $0xbec] sm:$0xf0] }
 0x80a   : > { %v17534_v32 = vld [vmem:[%s20235_s15 + $0xd28] sm:$0xf0]  ;;  %11433 = vmatpush.bf16.msra.mxu0 %v16005_v36  ;;  %v11103_v41 = vpop.f32.mrf.mxu2  ;;  %v19131_v36 = vld [vmem:[%s20235_s15 + $0x9ec] sm:$0xf0] }
 0x80b   : > { %v17537_v29 = vor.u32 %v19230_v52, %v17534_v32  ;;  %v19302_v30 = vld [vmem:[%s20235_s15 + $0xf4c] sm:$0xf]  ;;  %v11114_v52 = vpop.f32.mrf.mxu3  ;;  %v15909_v32 = vor.u32 %v18827_v0, %v15908_v31  ;;  %v16548_v12 = vld [vmem:[%s20235_s15 + $0x550] sm:$0xf] }
 0x80c   : > { %v17822_v42 = vld [vmem:[%s20235_s15 + $0xf68] sm:$0xf0]  ;;  %11444 = vmatpush.bf16.msra.mxu1 %v16325_v6  ;;  %v17028_v41 = vld [vmem:[%s20235_s15 + $0x910] sm:$0xf] }
 0x80d   : > { %v19222_v28 = vld [vmem:[%s20235_s15 + $0xccc] sm:$0xf]  ;;  %11418 = vmatpush.bf16.msrb.mxu3 %v17857_v26  ;;  %v17825_v48 = vor.u32 %v19302_v30, %v17822_v42  ;;  %11407 = vmatpush.bf16.msrb.mxu2 %v17537_v29  ;;  %v22948_v26 = vadd.f32 %v11114_v52, %v11102_v54  ;;  %v16612_v29 = vld [vmem:[%s20235_s15 + $0x5d0] sm:$0xf] }
 0x80e   : > { %v17502_v43 = vld [vmem:[%s20235_s15 + $0xce8] sm:$0xf0]  ;;  %11434 = vmatpush.bf16.msra.mxu0 %v15973_v63  ;;  %v19003_v30 = vld [vmem:[%s20235_s15 + $0x5ec] sm:$0xf0] }
 0x80f   : > { %v17505_v60 = vor.u32 %v19222_v28, %v17502_v43  ;;  %v19294_v46 = vld [vmem:[%s20235_s15 + $0xf0c] sm:$0xf]  ;;  %v17124_v42 = vld [vmem:[%s20235_s15 + $0x9d0] sm:$0xf]  ;;  %v16613_v59 = vor.u32 %v19003_v30, %v16612_v29 }
 0x810   : > { %v17790_v39 = vld [vmem:[%s20235_s15 + $0xf28] sm:$0xf0]  ;;  %11445 = vmatpush.bf16.msra.mxu1 %v16293_v44  ;;  %v16164_v28 = vld [vmem:[%s20235_s15 + $0x250] sm:$0xf] }
 0x811   : > { %v19214_v53 = vld [vmem:[%s20235_s15 + $0xc8c] sm:$0xf]  ;;  %11419 = vmatpush.bf16.msrb.mxu3 %v17825_v48  ;;  %v17793_v8 = vor.u32 %v19294_v46, %v17790_v39  ;;  %11408 = vmatpush.bf16.msrb.mxu2 %v17505_v60  ;;  %v18891_v43 = vld [vmem:[%s20235_s15 + $0x26c] sm:$0xf0]  ;;  %v11194_v48 = vpop.f32.mrf.mxu1  ;;  %v17125_v46 = vor.u32 %v19131_v36, %v17124_v42 }
 0x812   : > { %v17470_v2 = vld [vmem:[%s20235_s15 + $0xca8] sm:$0xf0]  ;;  %11435 = vmatpush.bf16.msra.mxu0 %v15941_v19  ;;  %v16580_v60 = vld [vmem:[%s20235_s15 + $0x590] sm:$0xf]  ;;  %v16165_v39 = vor.u32 %v18891_v43, %v16164_v28  ;;  %v11153_v19 = vpop.f32.mrf.mxu2 }
 0x813   : > { %v17473_v4 = vor.u32 %v19214_v53, %v17470_v2  ;;  %v19286_v10 = vld [vmem:[%s20235_s15 + $0xecc] sm:$0xf]  ;;  %v18995_v63 = vld [vmem:[%s20235_s15 + $0x5ac] sm:$0xf0]  ;;  %v11116_v14 = vpop.f32.mrf.mxu3  ;;  %v11154_v31 = vadd.f32 %v11153_v19, %v22896_v20 }
 0x814   : > { %v17758_v1 = vld [vmem:[%s20235_s15 + $0xee8] sm:$0xf0]  ;;  %11446 = vmatpush.bf16.msra.mxu1 %v16261_v47  ;;  %v17092_v2 = vld [vmem:[%s20235_s15 + $0x990] sm:$0xf] }
 0x815   : > { %v19206_v21 = vld [vmem:[%s20235_s15 + $0xc4c] sm:$0xf]  ;;  %11420 = vmatpush.bf16.msrb.mxu3 %v17793_v8  ;;  %v17761_v22 = vor.u32 %v19286_v10, %v17758_v1  ;;  %11409 = vmatpush.bf16.msrb.mxu2 %v17473_v4  ;;  %v19123_v47 = vld [vmem:[%s20235_s15 + $0x9ac] sm:$0xf0]  ;;  %v16581_v4 = vor.u32 %v18995_v63, %v16580_v60 }
 0x816   : > { %v17438_v61 = vld [vmem:[%s20235_s15 + $0xc68] sm:$0xf0]  ;;  %11436 = vmatpush.bf16.msra.mxu0 %v15909_v32  ;;  %v17380_v8 = vld [vmem:[%s20235_s15 + $0xbd0] sm:$0xf]  ;;  %v17061_v32 = vor.u32 %v19115_v33, %v17060_v23 }
 0x817   : > { %v17441_v24 = vor.u32 %v19206_v21, %v17438_v61  ;;  %v19278_v40 = vld [vmem:[%s20235_s15 + $0xe8c] sm:$0xf]  ;;  %v16868_v10 = vld [vmem:[%s20235_s15 + $0x7d0] sm:$0xf]  ;;  %v17093_v21 = vor.u32 %v19123_v47, %v17092_v2  ;;  %v16133_v61 = vor.u32 %v18883_v5, %v16132_v56  ;;  %v11231_v47 = vpop.f32.mrf.mxu0 }
 0x818   : > { %v17726_v51 = vld [vmem:[%s20235_s15 + $0xea8] sm:$0xf0]  ;;  %11447 = vmatpush.bf16.msra.mxu1 %v16229_v25  ;;  %v19067_v1 = vld [vmem:[%s20235_s15 + $0x7ec] sm:$0xf0] }
 0x819   : > { %v19198_v15 = vld [vmem:[%s20235_s15 + $0xc0c] sm:$0xf]  ;;  %11421 = vmatpush.bf16.msrb.mxu3 %v17761_v22  ;;  %v17729_v58 = vor.u32 %v19278_v40, %v17726_v51  ;;  %11410 = vmatpush.bf16.msrb.mxu2 %v17441_v24  ;;  %v18987_v25 = vld [vmem:[%s20235_s15 + $0x56c] sm:$0xf0]  ;;  %v17381_v22 = vor.u32 %v19195_v45, %v17380_v8  ;;  %v16869_v24 = vor.u32 %v19067_v1, %v16868_v10 }
 0x81a   : > { %v17406_v6 = vld [vmem:[%s20235_s15 + $0xc28] sm:$0xf0]  ;;  %11437 = vmatpush.bf16.msra.mxu0 %v15877_v57  ;;  %v17348_v40 = vld [vmem:[%s20235_s15 + $0xb90] sm:$0xf] }
 0x81b   : > { %v17409_v44 = vor.u32 %v19198_v15, %v17406_v6  ;;  %v19270_v55 = vld [vmem:[%s20235_s15 + $0xe4c] sm:$0xf]  ;;  %v19187_v51 = vld [vmem:[%s20235_s15 + $0xbac] sm:$0xf0]  ;;  %v16549_v15 = vor.u32 %v18987_v25, %v16548_v12 }
 0x81c   : > { %v17694_v16 = vld [vmem:[%s20235_s15 + $0xe68] sm:$0xf0]  ;;  %11448 = vmatpush.bf16.msra.mxu1 %v16197_v37  ;;  %v16836_v20 = vld [vmem:[%s20235_s15 + $0x790] sm:$0xf]  ;;  %v17349_v7 = vor.u32 %v19187_v51, %v17348_v40 }
 0x81d   : > { %v19262_v53 = vld [vmem:[%s20235_s15 + $0xe0c] sm:$0xf]  ;;  %11422 = vmatpush.bf16.msrb.mxu3 %v17729_v58  ;;  %v17697_v13 = vor.u32 %v19270_v55, %v17694_v16  ;;  %11411 = vmatpush.bf16.msrb.mxu2 %v17409_v44  ;;  %v19059_v52 = vld [vmem:[%s20235_s15 + $0x7ac] sm:$0xf0]  ;;  %v11166_v58 = vpop.f32.mrf.mxu3  ;;  %v11155_v55 = vpop.f32.mrf.mxu2 }
 0x81e   : > { %v17662_v54 = vld [vmem:[%s20235_s15 + $0xe28] sm:$0xf0]  ;;  %11482 = vmatpush.bf16.msrb.mxu0 %v17125_v46  ;;  %v16516_v6 = vld [vmem:[%s20235_s15 + $0x510] sm:$0xf]  ;;  %v16837_v29 = vor.u32 %v19059_v52, %v16836_v20  ;;  %v11167_v44 = vadd.f32 %v11166_v58, %v11154_v31 }
 0x81f   : > { %v17665_v0 = vor.u32 %v19262_v53, %v17662_v54  ;;  %11438 = vmatmul.bf16.vlgmr.msra.gmra.mxu0 %v22461_v11  ;;  %v19107_v37 = vld [vmem:[%s20235_s15 + $0x92c] sm:$0xf0]  ;;  %v16517_v36 = vor.u32 %v18979_v38, %v16516_v6 }
 0x820   : > { %11449 = vmatpush.bf16.msra.mxu1 %v16165_v39  ;;  %11412 = vmatmul.bf16.vlgmr.msrb.gmra.mxu2 %v22597_v34  ;;  %v17316_v30 = vld [vmem:[%s20235_s15 + $0xb50] sm:$0xf]  ;;  %v17029_v16 = vor.u32 %v19107_v37, %v17028_v41  ;;  %v11180_v39 = vadd.f32 %v22917_v35, %v11167_v44 }
 0x821   : > { %11456 = vmatpush.bf16.msra.mxu2 %v16613_v59  ;;  %11423 = vmatpush.bf16.msrb.mxu3 %v17697_v13  ;;  %v19179_v42 = vld [vmem:[%s20235_s15 + $0xb6c] sm:$0xf0]  ;;  %v8440_v13 = vperm.slane %v22748_v9, 2 }
 0x822   : > { %11483 = vmatpush.bf16.msrb.mxu0 %v17093_v21  ;;  %v16804_v28 = vld [vmem:[%s20235_s15 + $0x750] sm:$0xf]  ;;  %v17317_v59 = vor.u32 %v19179_v42, %v17316_v30  ;;  %v11193_v35 = vadd.f32 %v22934_v17, %v11180_v39 }
 0x823   : > { %v19051_v43 = vld [vmem:[%s20235_s15 + $0x76c] sm:$0xf0] }
 0x824   : > { %11450 = vmatpush.bf16.msra.mxu1 %v16133_v61  ;;  %v16484_v48 = vld [vmem:[%s20235_s15 + $0x4d0] sm:$0xf]  ;;  %v16805_v63 = vor.u32 %v19051_v43, %v16804_v28  ;;  %v11232_v61 = vadd.f32 %v11231_v47, %v8440_v13 }
 0x825   : > { %11457 = vmatpush.bf16.msra.mxu2 %v16581_v4  ;;  %11424 = vmatpush.bf16.msrb.mxu3 %v17665_v0  ;;  %v18971_v57 = vld [vmem:[%s20235_s15 + $0x4ec] sm:$0xf0]  ;;  %v11168_v12 = vpop.f32.mrf.mxu3  ;;  %v11205_v0 = vpop.f32.mrf.mxu2 }
 0x826   : > { %11484 = vmatpush.bf16.msrb.mxu0 %v17061_v32  ;;  %v16996_v60 = vld [vmem:[%s20235_s15 + $0x8d0] sm:$0xf]  ;;  %v16485_v56 = vor.u32 %v18971_v57, %v16484_v48  ;;  %v11206_v40 = vadd.f32 %v11205_v0, %v11193_v35  ;;  %v16102_v57 = vld [vmem:[%s20235_s15 + $0x1f0] sm:$0xf0] }
 0x827   : > { %11451 = vmatmul.bf16.vlgmr.msra.gmra.mxu1 %v22474_v27  ;;  %v19099_v46 = vld [vmem:[%s20235_s15 + $0x8ec] sm:$0xf0]  ;;  %v18935_v12 = vld [vmem:[%s20235_s15 + $0x3d4] sm:$0xf] }
 0x828   : > { %11495 = vmatpush.bf16.msrb.mxu1 %v17381_v22  ;;  %11425 = vmatmul.bf16.vlgmr.msrb.gmra.mxu3 %v22616_v18  ;;  %v17284_v53 = vld [vmem:[%s20235_s15 + $0xb10] sm:$0xf]  ;;  %v16997_v8 = vor.u32 %v19099_v46, %v16996_v60  ;;  %v11244_v22 = vpop.f32.mrf.mxu1 }
 0x829   : > { %11469 = vmatpush.bf16.msra.mxu3 %v16869_v24  ;;  %11458 = vmatpush.bf16.msra.mxu2 %v16549_v15  ;;  %v19171_v2 = vld [vmem:[%s20235_s15 + $0xb2c] sm:$0xf0]  ;;  %v23012_v51 = vadd.f32 %v11244_v22, %v11232_v61 }
 0x82a   : > { %v16772_v5 = vld [vmem:[%s20235_s15 + $0x710] sm:$0xf]  ;;  %11485 = vmatpush.bf16.msrb.mxu0 %v17029_v16  ;;  %v17285_v4 = vor.u32 %v19171_v2, %v17284_v53  ;;  %v18871_v16 = vld [vmem:[%s20235_s15 + $0x1d4] sm:$0xf] }
 0x82b   : > { %v19043_v54 = vld [vmem:[%s20235_s15 + $0x72c] sm:$0xf0]  ;;  %v16105_v35 = vor.u32 %v18871_v16, %v16102_v57  ;;  %v16294_v16 = vld [vmem:[%s20235_s15 + $0x370] sm:$0xf0] }
 0x82c   : > { %11496 = vmatpush.bf16.msrb.mxu1 %v17349_v7  ;;  %v16452_v45 = vld [vmem:[%s20235_s15 + $0x490] sm:$0xf]  ;;  %v16773_v1 = vor.u32 %v19043_v54, %v16772_v5  ;;  %v11233_v7 = vpop.f32.mrf.mxu0 }
 0x82d   : > { %11470 = vmatpush.bf16.msra.mxu3 %v16837_v29  ;;  %11459 = vmatpush.bf16.msra.mxu2 %v16517_v36  ;;  %v18963_v14 = vld [vmem:[%s20235_s15 + $0x4ac] sm:$0xf0]  ;;  %v11218_v46 = vpop.f32.mrf.mxu3  ;;  %v11207_v13 = vpop.f32.mrf.mxu2  ;;  %v16326_v7 = vld [vmem:[%s20235_s15 + $0x3b0] sm:$0xf0] }
 0x82e   : > { %v16964_v10 = vld [vmem:[%s20235_s15 + $0x890] sm:$0xf]  ;;  %v16453_v25 = vor.u32 %v18963_v14, %v16452_v45  ;;  %11486 = vmatpush.bf16.msrb.mxu0 %v16997_v8  ;;  %v11219_v2 = vadd.f32 %v11218_v46, %v11206_v40 }
 0x82f   : > { %v19091_v9 = vld [vmem:[%s20235_s15 + $0x8ac] sm:$0xf0] }
 0x830   : > { %11497 = vmatpush.bf16.msrb.mxu1 %v17317_v59  ;;  %v17252_v19 = vld [vmem:[%s20235_s15 + $0xad0] sm:$0xf]  ;;  %v16965_v23 = vor.u32 %v19091_v9, %v16964_v10  ;;  %v11246_v47 = vpop.f32.mrf.mxu1  ;;  %v16070_v10 = vld [vmem:[%s20235_s15 + $0x1b0] sm:$0xf0]  ;;  %v11854_v9 = vrot.slane %v11219_v2, 6 }
 0x831   : > { %11471 = vmatpush.bf16.msra.mxu3 %v16805_v63  ;;  %v19163_v21 = vld [vmem:[%s20235_s15 + $0xaec] sm:$0xf0]  ;;  %11460 = vmatpush.bf16.msra.mxu2 %v16485_v56  ;;  %v15974_v2 = vld [vmem:[%s20235_s15 + $0xf0] sm:$0xf0] }
 0x832   : > { %v16740_v17 = vld [vmem:[%s20235_s15 + $0x6d0] sm:$0xf]  ;;  %v17253_v15 = vor.u32 %v19163_v21, %v17252_v19  ;;  %11487 = vmatpush.bf16.msrb.mxu0 %v16965_v23  ;;  %v18911_v47 = vld [vmem:[%s20235_s15 + $0x314] sm:$0xf] }
 0x833   : > { %v19035_v31 = vld [vmem:[%s20235_s15 + $0x6ec] sm:$0xf0] }
 0x834   : > { %v16420_v33 = vld [vmem:[%s20235_s15 + $0x450] sm:$0xf]  ;;  %11498 = vmatpush.bf16.msrb.mxu1 %v17285_v4  ;;  %v16741_v32 = vor.u32 %v19035_v31, %v16740_v17  ;;  %v18863_v4 = vld [vmem:[%s20235_s15 + $0x194] sm:$0xf]  ;;  %v23044_v17 = vsel %vm6908_vm0, %v22948_v26, %v11854_v9 }
 0x835   : > { %v18955_v24 = vld [vmem:[%s20235_s15 + $0x46c] sm:$0xf0]  ;;  %11472 = vmatpush.bf16.msra.mxu3 %v16773_v1  ;;  %11461 = vmatpush.bf16.msra.mxu2 %v16453_v25  ;;  %v16358_v25 = vld [vmem:[%s20235_s15 + $0x3f0] sm:$0xf0]  ;;  %v16073_v23 = vor.u32 %v18863_v4, %v16070_v10 }
 0x836   : > { %v16932_v20 = vld [vmem:[%s20235_s15 + $0x850] sm:$0xf]  ;;  %v16421_v41 = vor.u32 %v18955_v24, %v16420_v33  ;;  %v18831_v9 = vld [vmem:[%s20235_s15 + $0x94] sm:$0xf] }
 0x837   : > { %v19083_v52 = vld [vmem:[%s20235_s15 + $0x86c] sm:$0xf0] }
 0x838   : > { %v17220_v6 = vld [vmem:[%s20235_s15 + $0xa90] sm:$0xf]  ;;  %v16933_v42 = vor.u32 %v19083_v52, %v16932_v20  ;;  %11499 = vmatpush.bf16.msrb.mxu1 %v17253_v15  ;;  %v16361_v15 = vor.u32 %v18935_v12, %v16358_v25  ;;  %v18855_v20 = vld [vmem:[%s20235_s15 + $0x154] sm:$0xf] }
 0x839   : > { %v19155_v38 = vld [vmem:[%s20235_s15 + $0xaac] sm:$0xf0]  ;;  %11473 = vmatpush.bf16.msra.mxu3 %v16741_v32  ;;  %11462 = vmatpush.bf16.msra.mxu2 %v16421_v41  ;;  %v16038_v52 = vld [vmem:[%s20235_s15 + $0x170] sm:$0xf0]  ;;  %v11220_v32 = vpop.f32.mrf.mxu3 }
 0x83a   : > { %v16708_v37 = vld [vmem:[%s20235_s15 + $0x690] sm:$0xf]  ;;  %v17221_v43 = vor.u32 %v19155_v38, %v17220_v6  ;;  %11488 = vmatpush.bf16.msrb.mxu0 %v16933_v42  ;;  %v18927_v38 = vld [vmem:[%s20235_s15 + $0x394] sm:$0xf] }
 0x83b   : > { %v19027_v29 = vld [vmem:[%s20235_s15 + $0x6ac] sm:$0xf0]  ;;  %v18895_v32 = vld [vmem:[%s20235_s15 + $0x294] sm:$0xf] }
 0x83c   : > { %v16388_v30 = vld [vmem:[%s20235_s15 + $0x410] sm:$0xf]  ;;  %v16709_v48 = vor.u32 %v19027_v29, %v16708_v37  ;;  %11500 = vmatpush.bf16.msrb.mxu1 %v17221_v43  ;;  %v16006_v43 = vld [vmem:[%s20235_s15 + $0x130] sm:$0xf0] }
 0x83d   : > { %v18947_v58 = vld [vmem:[%s20235_s15 + $0x42c] sm:$0xf0] }
 0x83e   : > { %v16900_v36 = vld [vmem:[%s20235_s15 + $0x810] sm:$0xf]  ;;  %v16389_v39 = vor.u32 %v18947_v58, %v16388_v30  ;;  %11474 = vmatpush.bf16.msra.mxu3 %v16709_v48  ;;  %v16041_v30 = vor.u32 %v18855_v20, %v16038_v52  ;;  %v15910_v20 = vld [vmem:[%s20235_s15 + $0x70] sm:$0xf0] }
 0x83f   : > { %v19075_v28 = vld [vmem:[%s20235_s15 + $0x82c] sm:$0xf0] }
 0x840   : > { %v17636_v44 = vld [vmem:[%s20235_s15 + $0xdd0] sm:$0xf]  ;;  %v16901_v56 = vor.u32 %v19075_v28, %v16900_v36  ;;  %11463 = vmatpush.bf16.msra.mxu2 %v16389_v39  ;;  %v16329_v36 = vor.u32 %v18927_v38, %v16326_v7  ;;  %v18847_v28 = vld [vmem:[%s20235_s15 + $0x114] sm:$0xf] }
 0x841   : > { %v19259_v55 = vld [vmem:[%s20235_s15 + $0xdec] sm:$0xf0] }
 0x842   : > { %v17188_v59 = vld [vmem:[%s20235_s15 + $0xa50] sm:$0xf]  ;;  %v17637_v5 = vor.u32 %v19259_v55, %v17636_v44  ;;  %11489 = vmatpush.bf16.msrb.mxu0 %v16901_v56  ;;  %v18919_v55 = vld [vmem:[%s20235_s15 + $0x354] sm:$0xf] }
 0x843   : > { %v19147_v60 = vld [vmem:[%s20235_s15 + $0xa6c] sm:$0xf0]  ;;  %11464 = vmatmul.bf16.vlgmr.msra.gmra.mxu2 %v22497_v50  ;;  %v16262_v56 = vld [vmem:[%s20235_s15 + $0x330] sm:$0xf0] }
 0x844   : > { %v16676_v63 = vld [vmem:[%s20235_s15 + $0x650] sm:$0xf]  ;;  %v17189_v45 = vor.u32 %v19147_v60, %v17188_v59  ;;  %11508 = vmatpush.bf16.msrb.mxu2 %v17637_v5  ;;  %v16009_v60 = vor.u32 %v18847_v28, %v16006_v43  ;;  %v23074_v5 = vpop.f32.mrf.mxu0  ;;  %v16265_v10 = vor.u32 %v18911_v47, %v16262_v56  ;;  %v18999_v28 = vld [vmem:[%s20235_s15 + $0x5d4] sm:$0xf] }
 0x845   : > { %v19019_v53 = vld [vmem:[%s20235_s15 + $0x66c] sm:$0xf0]  ;;  %11490 = vmatmul.bf16.vlgmr.msrb.gmra.mxu0 %v22539_v3  ;;  %v16614_v43 = vld [vmem:[%s20235_s15 + $0x5f0] sm:$0xf0] }
 0x846   : > { %v17604_v54 = vld [vmem:[%s20235_s15 + $0xd90] sm:$0xf]  ;;  %v16677_v1 = vor.u32 %v19019_v53, %v16676_v63  ;;  %11534 = vmatpush.bf16.msra.mxu0 %v16105_v35  ;;  %11501 = vmatpush.bf16.msrb.mxu1 %v17189_v45  ;;  %v16297_v63 = vor.u32 %v18919_v55, %v16294_v16  ;;  %v18839_v53 = vld [vmem:[%s20235_s15 + $0xd4] sm:$0xf]  ;;  %v16617_v47 = vor.u32 %v18999_v28, %v16614_v43 }
 0x847   : > { %v19251_v8 = vld [vmem:[%s20235_s15 + $0xdac] sm:$0xf0]  ;;  %v15977_v45 = vor.u32 %v18839_v53, %v15974_v2  ;;  %v17126_v16 = vld [vmem:[%s20235_s15 + $0x9f0] sm:$0xf0] }
 0x848   : > { %v16644_v14 = vld [vmem:[%s20235_s15 + $0x610] sm:$0xf]  ;;  %v17605_v31 = vor.u32 %v19251_v8, %v17604_v54  ;;  %11475 = vmatpush.bf16.msra.mxu3 %v16677_v1  ;;  %v15942_v1 = vld [vmem:[%s20235_s15 + $0xb0] sm:$0xf0] }
 0x849   : > { %v17156_v19 = vld [vmem:[%s20235_s15 + $0xa10] sm:$0xf]  ;;  %v18991_v56 = vld [vmem:[%s20235_s15 + $0x594] sm:$0xf] }
 0x84a   : > { %v19139_v21 = vld [vmem:[%s20235_s15 + $0xa2c] sm:$0xf0]  ;;  %11509 = vmatpush.bf16.msrb.mxu2 %v17605_v31  ;;  %11535 = vmatpush.bf16.msra.mxu0 %v16073_v23  ;;  %v15945_v23 = vor.u32 %v18831_v9, %v15942_v1  ;;  %v17094_v9 = vld [vmem:[%s20235_s15 + $0x9b0] sm:$0xf0] }
 0x84b   : > { %v19011_v61 = vld [vmem:[%s20235_s15 + $0x62c] sm:$0xf0]  ;;  %v17157_v33 = vor.u32 %v19139_v21, %v17156_v19  ;;  %v18903_v21 = vld [vmem:[%s20235_s15 + $0x2d4] sm:$0xf] }
 0x84c   : > { %v17892_v0 = vld [vmem:[%s20235_s15 + $0xfd0] sm:$0xf]  ;;  %v16645_v26 = vor.u32 %v19011_v61, %v16644_v14  ;;  %v16230_v61 = vld [vmem:[%s20235_s15 + $0x2f0] sm:$0xf0]  ;;  %v11285_v38 = vpop.f32.mrf.mxu0 }
 0x84d   : > { %v19323_v22 = vld [vmem:[%s20235_s15 + $0xfec] sm:$0xf0]  ;;  %11502 = vmatpush.bf16.msrb.mxu1 %v17157_v33  ;;  %v18879_v1 = vld [vmem:[%s20235_s15 + $0x214] sm:$0xf] }
 0x84e   : > { %v17572_v24 = vld [vmem:[%s20235_s15 + $0xd50] sm:$0xf]  ;;  %v17893_v6 = vor.u32 %v19323_v22, %v17892_v0  ;;  %11476 = vmatpush.bf16.msra.mxu3 %v16645_v26  ;;  %11536 = vmatpush.bf16.msra.mxu0 %v16041_v30  ;;  %v11257_v0 = vpop.f32.mrf.mxu2  ;;  %v23086_v22 = vpop.f32.mrf.mxu1  ;;  %v16233_v26 = vor.u32 %v18903_v21, %v16230_v61  ;;  %v19191_v61 = vld [vmem:[%s20235_s15 + $0xbd4] sm:$0xf] }
 0x84f   : > { %v19243_v40 = vld [vmem:[%s20235_s15 + $0xd6c] sm:$0xf0]  ;;  %v17350_v38 = vld [vmem:[%s20235_s15 + $0xbb0] sm:$0xf0] }
 0x850   : > { %v17573_v41 = vor.u32 %v19243_v40, %v17572_v24  ;;  %v17860_v37 = vld [vmem:[%s20235_s15 + $0xf90] sm:$0xf]  ;;  %11503 = vmatmul.bf16.vlgmr.msrb.gmra.mxu1 %v22556_v62  ;;  %v11258_v40 = vadd.f32 %v11257_v0, %v23012_v51  ;;  %v16870_v0 = vld [vmem:[%s20235_s15 + $0x7f0] sm:$0xf0] }
 0x851   : > { %v19315_v29 = vld [vmem:[%s20235_s15 + $0xfac] sm:$0xf0]  ;;  %11547 = vmatpush.bf16.msra.mxu1 %v16361_v15  ;;  %11477 = vmatmul.bf16.vlgmr.msra.gmra.mxu3 %v22515_v49  ;;  %v18823_v15 = vld [vmem:[%s20235_s15 + $0x54] sm:$0xf] }
 0x852   : > { %v17540_v42 = vld [vmem:[%s20235_s15 + $0xd10] sm:$0xf]  ;;  %11521 = vmatpush.bf16.msrb.mxu3 %v17893_v6  ;;  %v17861_v44 = vor.u32 %v19315_v29, %v17860_v37  ;;  %11510 = vmatpush.bf16.msrb.mxu2 %v17573_v41  ;;  %v16198_v6 = vld [vmem:[%s20235_s15 + $0x2b0] sm:$0xf0]  ;;  %v15913_v29 = vor.u32 %v18823_v15, %v15910_v20 }
 0x853   : > { %v19235_v58 = vld [vmem:[%s20235_s15 + $0xd2c] sm:$0xf0]  ;;  %11537 = vmatpush.bf16.msra.mxu0 %v16009_v60  ;;  %v19111_v20 = vld [vmem:[%s20235_s15 + $0x954] sm:$0xf] }
 0x854   : > { %v17541_v48 = vor.u32 %v19235_v58, %v17540_v42  ;;  %v17828_v57 = vld [vmem:[%s20235_s15 + $0xf50] sm:$0xf]  ;;  %v18815_v42 = vld [vmem:[%s20235_s15 + $0x14] sm:$0xf] }
 0x855   : > { %v19307_v59 = vld [vmem:[%s20235_s15 + $0xf6c] sm:$0xf0]  ;;  %11548 = vmatpush.bf16.msra.mxu1 %v16329_v36  ;;  %v15878_v58 = vld [vmem:[%s20235_s15 + $0x30] sm:$0xf0]  ;;  %v16201_v36 = vor.u32 %v18895_v32, %v16198_v6 }
 0x856   : > { %v17508_v46 = vld [vmem:[%s20235_s15 + $0xcd0] sm:$0xf]  ;;  %11522 = vmatpush.bf16.msrb.mxu3 %v17861_v44  ;;  %v17829_v13 = vor.u32 %v19307_v59, %v17828_v57  ;;  %11511 = vmatpush.bf16.msrb.mxu2 %v17541_v48  ;;  %v19127_v44 = vld [vmem:[%s20235_s15 + $0x9d4] sm:$0xf]  ;;  %v11270_v59 = vpop.f32.mrf.mxu3  ;;  %v11259_v53 = vpop.f32.mrf.mxu2 }
 0x857   : > { %v19227_v39 = vld [vmem:[%s20235_s15 + $0xcec] sm:$0xf0]  ;;  %11538 = vmatpush.bf16.msra.mxu0 %v15977_v45  ;;  %v18887_v48 = vld [vmem:[%s20235_s15 + $0x254] sm:$0xf]  ;;  %v11298_v2 = vpop.f32.mrf.mxu1 }
 0x858   : > { %v17509_v54 = vor.u32 %v19227_v39, %v17508_v46  ;;  %v17796_v8 = vld [vmem:[%s20235_s15 + $0xf10] sm:$0xf]  ;;  %v16166_v57 = vld [vmem:[%s20235_s15 + $0x270] sm:$0xf0] }
 0x859   : > { %v19299_v35 = vld [vmem:[%s20235_s15 + $0xf2c] sm:$0xf0]  ;;  %11549 = vmatpush.bf16.msra.mxu1 %v16297_v63  ;;  %v11271_v63 = vadd.f32 %v11270_v59, %v11258_v40  ;;  %v16550_v40 = vld [vmem:[%s20235_s15 + $0x570] sm:$0xf0] }
 0x85a   : > { %v17476_v14 = vld [vmem:[%s20235_s15 + $0xc90] sm:$0xf]  ;;  %11523 = vmatpush.bf16.msrb.mxu3 %v17829_v13  ;;  %v17797_v19 = vor.u32 %v19299_v35, %v17796_v8  ;;  %11512 = vmatpush.bf16.msrb.mxu2 %v17509_v54  ;;  %v15881_v13 = vor.u32 %v18815_v42, %v15878_v58  ;;  %v17129_v54 = vor.u32 %v19127_v44, %v17126_v16  ;;  %v16582_v35 = vld [vmem:[%s20235_s15 + $0x5b0] sm:$0xf0] }
 0x85b   : > { %v19219_v4 = vld [vmem:[%s20235_s15 + $0xcac] sm:$0xf0]  ;;  %11539 = vmatpush.bf16.msra.mxu0 %v15945_v23  ;;  %v16169_v8 = vor.u32 %v18887_v48, %v16166_v57  ;;  %v19183_v6 = vld [vmem:[%s20235_s15 + $0xb94] sm:$0xf] }
 0x85c   : > { %v17477_v12 = vor.u32 %v19219_v4, %v17476_v14  ;;  %v17764_v25 = vld [vmem:[%s20235_s15 + $0xed0] sm:$0xf]  ;;  %v19119_v14 = vld [vmem:[%s20235_s15 + $0x994] sm:$0xf]  ;;  %v11284_v4 = vadd.f32 %v23074_v5, %v11271_v63  ;;  %v17353_v42 = vor.u32 %v19183_v6, %v17350_v38 }
 0x85d   : > { %v19291_v31 = vld [vmem:[%s20235_s15 + $0xeec] sm:$0xf0]  ;;  %11550 = vmatpush.bf16.msra.mxu1 %v16265_v10  ;;  %v17097_v23 = vor.u32 %v19119_v14, %v17094_v9  ;;  %v19103_v58 = vld [vmem:[%s20235_s15 + $0x914] sm:$0xf] }
 0x85e   : > { %v17444_v33 = vld [vmem:[%s20235_s15 + $0xc50] sm:$0xf]  ;;  %11524 = vmatpush.bf16.msrb.mxu3 %v17797_v19  ;;  %v17765_v52 = vor.u32 %v19291_v31, %v17764_v25  ;;  %11513 = vmatpush.bf16.msrb.mxu2 %v17477_v12  ;;  %v16134_v19 = vld [vmem:[%s20235_s15 + $0x230] sm:$0xf0]  ;;  %v16585_v25 = vor.u32 %v18991_v56, %v16582_v35  ;;  %v23123_v5 = vadd.f32 %v23086_v22, %v11284_v4 }
 0x85f   : > { %v19211_v24 = vld [vmem:[%s20235_s15 + $0xc6c] sm:$0xf0]  ;;  %11540 = vmatpush.bf16.msra.mxu0 %v15913_v29  ;;  %v17382_v12 = vld [vmem:[%s20235_s15 + $0xbf0] sm:$0xf0] }
 0x860   : > { %v17445_v7 = vor.u32 %v19211_v24, %v17444_v33  ;;  %v17732_v41 = vld [vmem:[%s20235_s15 + $0xe90] sm:$0xf]  ;;  %v19063_v31 = vld [vmem:[%s20235_s15 + $0x7d4] sm:$0xf]  ;;  %v16137_v33 = vor.u32 %v18879_v1, %v16134_v19  ;;  %v17385_v15 = vor.u32 %v19191_v61, %v17382_v12 }
 0x861   : > { %v19283_v51 = vld [vmem:[%s20235_s15 + $0xeac] sm:$0xf0]  ;;  %11551 = vmatpush.bf16.msra.mxu1 %v16233_v26  ;;  %v18983_v24 = vld [vmem:[%s20235_s15 + $0x554] sm:$0xf]  ;;  %v16873_v32 = vor.u32 %v19063_v31, %v16870_v0  ;;  %v23163_v31 = vpop.f32.mrf.mxu2  ;;  %v23165_v0 = vpop.f32.mrf.mxu1 }
 0x862   : > { %v17412_v37 = vld [vmem:[%s20235_s15 + $0xc10] sm:$0xf]  ;;  %11525 = vmatpush.bf16.msrb.mxu3 %v17765_v52  ;;  %v17733_v55 = vor.u32 %v19283_v51, %v17732_v41  ;;  %11514 = vmatpush.bf16.msrb.mxu2 %v17445_v7  ;;  %v17062_v22 = vld [vmem:[%s20235_s15 + $0x970] sm:$0xf0]  ;;  %v11272_v52 = vpop.f32.mrf.mxu3  ;;  %v16553_v7 = vor.u32 %v18983_v24, %v16550_v40 }
 0x863   : > { %v19203_v30 = vld [vmem:[%s20235_s15 + $0xc2c] sm:$0xf0]  ;;  %11541 = vmatpush.bf16.msra.mxu0 %v15881_v13  ;;  %v19055_v41 = vld [vmem:[%s20235_s15 + $0x794] sm:$0xf] }
 0x864   : > { %v17413_v60 = vor.u32 %v19203_v30, %v17412_v37  ;;  %v17700_v46 = vld [vmem:[%s20235_s15 + $0xe50] sm:$0xf]  ;;  %v16838_v51 = vld [vmem:[%s20235_s15 + $0x7b0] sm:$0xf0]  ;;  %v17065_v37 = vor.u32 %v19111_v20, %v17062_v22 }
 0x865   : > { %v19275_v39 = vld [vmem:[%s20235_s15 + $0xe6c] sm:$0xf0]  ;;  %11552 = vmatpush.bf16.msra.mxu1 %v16201_v36  ;;  %v18975_v29 = vld [vmem:[%s20235_s15 + $0x514] sm:$0xf]  ;;  %v16841_v28 = vor.u32 %v19055_v41, %v16838_v51 }
 0x866   : > { %v17668_v45 = vld [vmem:[%s20235_s15 + $0xe10] sm:$0xf]  ;;  %11526 = vmatpush.bf16.msrb.mxu3 %v17733_v55  ;;  %v17701_v10 = vor.u32 %v19275_v39, %v17700_v46  ;;  %11515 = vmatpush.bf16.msrb.mxu2 %v17413_v60  ;;  %v16518_v30 = vld [vmem:[%s20235_s15 + $0x530] sm:$0xf0] }
 0x867   : > { %v19267_v21 = vld [vmem:[%s20235_s15 + $0xe2c] sm:$0xf0]  ;;  %11586 = vmatpush.bf16.msrb.mxu0 %v17129_v54  ;;  %v17030_v36 = vld [vmem:[%s20235_s15 + $0x930] sm:$0xf0]  ;;  %v16521_v55 = vor.u32 %v18975_v29, %v16518_v30 }
 0x868   : > { %v17669_v26 = vor.u32 %v19267_v21, %v17668_v45  ;;  %11542 = vmatmul.bf16.vlgmr.msra.gmra.mxu0 %v22461_v11  ;;  %v19175_v43 = vld [vmem:[%s20235_s15 + $0xb54] sm:$0xf]  ;;  %v17033_v57 = vor.u32 %v19103_v58, %v17030_v36 }
 0x869   : > { %11553 = vmatpush.bf16.msra.mxu1 %v16169_v8  ;;  %11516 = vmatmul.bf16.vlgmr.msrb.gmra.mxu2 %v22597_v34  ;;  %v17318_v44 = vld [vmem:[%s20235_s15 + $0xb70] sm:$0xf0] }
 0x86a   : > { %11560 = vmatpush.bf16.msra.mxu2 %v16617_v47  ;;  %11527 = vmatpush.bf16.msrb.mxu3 %v17701_v10  ;;  %v19047_v16 = vld [vmem:[%s20235_s15 + $0x754] sm:$0xf]  ;;  %v17321_v46 = vor.u32 %v19175_v43, %v17318_v44  ;;  %v23151_v47 = vpop.f32.mrf.mxu0  ;;  %v18876_v44 = vld [vmem:[%s20235_s15 + $0x1f4] sm:$0xf0] }
 0x86b   : > { %11587 = vmatpush.bf16.msrb.mxu0 %v17097_v23  ;;  %v16806_v48 = vld [vmem:[%s20235_s15 + $0x770] sm:$0xf0] }
 0x86c   : > { %v18967_v59 = vld [vmem:[%s20235_s15 + $0x4d4] sm:$0xf]  ;;  %v16809_v53 = vor.u32 %v19047_v16, %v16806_v48  ;;  %v23185_v48 = vpop.f32.mrf.mxu3 }
 0x86d   : > { %11554 = vmatpush.bf16.msra.mxu1 %v16137_v33  ;;  %v16486_v60 = vld [vmem:[%s20235_s15 + $0x4f0] sm:$0xf0] }
 0x86e   : > { %11561 = vmatpush.bf16.msra.mxu2 %v16585_v25  ;;  %11528 = vmatpush.bf16.msrb.mxu3 %v17669_v26  ;;  %v19095_v39 = vld [vmem:[%s20235_s15 + $0x8d4] sm:$0xf]  ;;  %v16489_v56 = vor.u32 %v18967_v59, %v16486_v60 }
 0x86f   : > { %11588 = vmatpush.bf16.msrb.mxu0 %v17065_v37  ;;  %v16998_v63 = vld [vmem:[%s20235_s15 + $0x8f0] sm:$0xf0] }
 0x870   : > { %11555 = vmatmul.bf16.vlgmr.msra.gmra.mxu1 %v22474_v27  ;;  %v19167_v2 = vld [vmem:[%s20235_s15 + $0xb14] sm:$0xf]  ;;  %v17001_v35 = vor.u32 %v19095_v39, %v16998_v63  ;;  %v11350_v39 = vpop.f32.mrf.mxu1 }
 0x871   : > { %11599 = vmatpush.bf16.msrb.mxu1 %v17385_v15  ;;  %11529 = vmatmul.bf16.vlgmr.msrb.gmra.mxu3 %v22616_v18  ;;  %v17286_v13 = vld [vmem:[%s20235_s15 + $0xb30] sm:$0xf0]  ;;  %v15980_v39 = vld [vmem:[%s20235_s15 + $0xd8] sm:$0xf] }
 0x872   : > { %11573 = vmatpush.bf16.msra.mxu3 %v16873_v32  ;;  %11562 = vmatpush.bf16.msra.mxu2 %v16553_v7  ;;  %v19039_v54 = vld [vmem:[%s20235_s15 + $0x714] sm:$0xf]  ;;  %v17289_v4 = vor.u32 %v19167_v2, %v17286_v13  ;;  %v11337_v32 = vpop.f32.mrf.mxu0 }
 0x873   : > { %v16774_v8 = vld [vmem:[%s20235_s15 + $0x730] sm:$0xf0]  ;;  %11589 = vmatpush.bf16.msrb.mxu0 %v17033_v57  ;;  %v16332_v32 = vld [vmem:[%s20235_s15 + $0x398] sm:$0xf] }
 0x874   : > { %v18959_v45 = vld [vmem:[%s20235_s15 + $0x494] sm:$0xf]  ;;  %v16777_v1 = vor.u32 %v19039_v54, %v16774_v8 }
 0x875   : > { %11600 = vmatpush.bf16.msrb.mxu1 %v17353_v42  ;;  %v16454_v14 = vld [vmem:[%s20235_s15 + $0x4b0] sm:$0xf0] }
 0x876   : > { %11574 = vmatpush.bf16.msra.mxu3 %v16841_v28  ;;  %11563 = vmatpush.bf16.msra.mxu2 %v16521_v55  ;;  %v19087_v10 = vld [vmem:[%s20235_s15 + $0x894] sm:$0xf]  ;;  %v16457_v61 = vor.u32 %v18959_v45, %v16454_v14  ;;  %v16108_v28 = vld [vmem:[%s20235_s15 + $0x1d8] sm:$0xf] }
 0x877   : > { %v16966_v9 = vld [vmem:[%s20235_s15 + $0x8b0] sm:$0xf0]  ;;  %11590 = vmatpush.bf16.msrb.mxu0 %v17001_v35  ;;  %v16109_v13 = vor.u32 %v18876_v44, %v16108_v28  ;;  %v16076_v35 = vld [vmem:[%s20235_s15 + $0x198] sm:$0xf] }
 0x878   : > { %v19159_v19 = vld [vmem:[%s20235_s15 + $0xad4] sm:$0xf]  ;;  %v16969_v23 = vor.u32 %v19087_v10, %v16966_v9  ;;  %v18868_v14 = vld [vmem:[%s20235_s15 + $0x1b4] sm:$0xf0] }
 0x879   : > { %11601 = vmatpush.bf16.msrb.mxu1 %v17321_v46  ;;  %v17254_v21 = vld [vmem:[%s20235_s15 + $0xaf0] sm:$0xf0]  ;;  %v11311_v46 = vpop.f32.mrf.mxu2  ;;  %v16300_v28 = vld [vmem:[%s20235_s15 + $0x358] sm:$0xf] }
 0x87a   : > { %11575 = vmatpush.bf16.msra.mxu3 %v16809_v53  ;;  %11564 = vmatpush.bf16.msra.mxu2 %v16489_v56  ;;  %v19031_v12 = vld [vmem:[%s20235_s15 + $0x6d4] sm:$0xf]  ;;  %v17257_v40 = vor.u32 %v19159_v19, %v17254_v21  ;;  %v18940_v19 = vld [vmem:[%s20235_s15 + $0x3f4] sm:$0xf0] }
 0x87b   : > { %v16742_v25 = vld [vmem:[%s20235_s15 + $0x6f0] sm:$0xf0]  ;;  %11591 = vmatpush.bf16.msrb.mxu0 %v16969_v23 }
 0x87c   : > { %v18951_v33 = vld [vmem:[%s20235_s15 + $0x454] sm:$0xf]  ;;  %v16745_v20 = vor.u32 %v19031_v12, %v16742_v25  ;;  %v16077_v25 = vor.u32 %v18868_v14, %v16076_v35 }
 0x87d   : > { %v16422_v24 = vld [vmem:[%s20235_s15 + $0x470] sm:$0xf0]  ;;  %11602 = vmatpush.bf16.msrb.mxu1 %v17289_v4 }
 0x87e   : > { %v19079_v26 = vld [vmem:[%s20235_s15 + $0x854] sm:$0xf]  ;;  %11576 = vmatpush.bf16.msra.mxu3 %v16777_v1  ;;  %11565 = vmatpush.bf16.msra.mxu2 %v16457_v61  ;;  %v16425_v6 = vor.u32 %v18951_v33, %v16422_v24  ;;  %v16364_v1 = vld [vmem:[%s20235_s15 + $0x3d8] sm:$0xf] }
 0x87f   : > { %v16934_v15 = vld [vmem:[%s20235_s15 + $0x870] sm:$0xf0] }
 0x880   : > { %v19151_v22 = vld [vmem:[%s20235_s15 + $0xa94] sm:$0xf]  ;;  %v16937_v51 = vor.u32 %v19079_v26, %v16934_v15  ;;  %v16365_v26 = vor.u32 %v18940_v19, %v16364_v1  ;;  %v16044_v15 = vld [vmem:[%s20235_s15 + $0x158] sm:$0xf] }
 0x881   : > { %v17222_v52 = vld [vmem:[%s20235_s15 + $0xab0] sm:$0xf0]  ;;  %11603 = vmatpush.bf16.msrb.mxu1 %v17257_v40  ;;  %v18836_v1 = vld [vmem:[%s20235_s15 + $0xb4] sm:$0xf0] }
 0x882   : > { %v19023_v38 = vld [vmem:[%s20235_s15 + $0x694] sm:$0xf]  ;;  %v17225_v42 = vor.u32 %v19151_v22, %v17222_v52  ;;  %11577 = vmatpush.bf16.msra.mxu3 %v16745_v20  ;;  %11566 = vmatpush.bf16.msra.mxu2 %v16425_v6  ;;  %v18860_v20 = vld [vmem:[%s20235_s15 + $0x174] sm:$0xf0]  ;;  %v11324_v22 = vpop.f32.mrf.mxu3 }
 0x883   : > { %v16710_v7 = vld [vmem:[%s20235_s15 + $0x6b0] sm:$0xf0]  ;;  %11592 = vmatpush.bf16.msrb.mxu0 %v16937_v51  ;;  %v18932_v6 = vld [vmem:[%s20235_s15 + $0x3b4] sm:$0xf0]  ;;  %v16045_v51 = vor.u32 %v18860_v20, %v16044_v15 }
 0x884   : > { %v18943_v41 = vld [vmem:[%s20235_s15 + $0x414] sm:$0xf]  ;;  %v16713_v43 = vor.u32 %v19023_v38, %v16710_v7  ;;  %v15916_v22 = vld [vmem:[%s20235_s15 + $0x58] sm:$0xf] }
 0x885   : > { %v16390_v37 = vld [vmem:[%s20235_s15 + $0x430] sm:$0xf0]  ;;  %11604 = vmatpush.bf16.msrb.mxu1 %v17225_v42  ;;  %v16012_v42 = vld [vmem:[%s20235_s15 + $0x118] sm:$0xf] }
 0x886   : > { %v19071_v29 = vld [vmem:[%s20235_s15 + $0x814] sm:$0xf]  ;;  %v16393_v57 = vor.u32 %v18943_v41, %v16390_v37  ;;  %11578 = vmatpush.bf16.msra.mxu3 %v16713_v43  ;;  %v18924_v43 = vld [vmem:[%s20235_s15 + $0x374] sm:$0xf0] }
 0x887   : > { %v16902_v30 = vld [vmem:[%s20235_s15 + $0x830] sm:$0xf0]  ;;  %v16301_v46 = vor.u32 %v18924_v43, %v16300_v28  ;;  %v16620_v43 = vld [vmem:[%s20235_s15 + $0x5d8] sm:$0xf] }
 0x888   : > { %v19255_v58 = vld [vmem:[%s20235_s15 + $0xdd4] sm:$0xf]  ;;  %v16905_v63 = vor.u32 %v19071_v29, %v16902_v30  ;;  %11567 = vmatpush.bf16.msra.mxu2 %v16393_v57  ;;  %v16333_v30 = vor.u32 %v18932_v6, %v16332_v32  ;;  %v16204_v6 = vld [vmem:[%s20235_s15 + $0x298] sm:$0xf] }
 0x889   : > { %v17638_v36 = vld [vmem:[%s20235_s15 + $0xdf0] sm:$0xf0] }
 0x88a   : > { %v19143_v55 = vld [vmem:[%s20235_s15 + $0xa54] sm:$0xf]  ;;  %v17641_v53 = vor.u32 %v19255_v58, %v17638_v36  ;;  %11593 = vmatpush.bf16.msrb.mxu0 %v16905_v63  ;;  %v18852_v58 = vld [vmem:[%s20235_s15 + $0x134] sm:$0xf0] }
 0x88b   : > { %v17190_v16 = vld [vmem:[%s20235_s15 + $0xa70] sm:$0xf0]  ;;  %11568 = vmatmul.bf16.vlgmr.msra.gmra.mxu2 %v22497_v50  ;;  %v16013_v57 = vor.u32 %v18852_v58, %v16012_v42  ;;  %v18844_v63 = vld [vmem:[%s20235_s15 + $0xf4] sm:$0xf0] }
 0x88c   : > { %v19015_v59 = vld [vmem:[%s20235_s15 + $0x654] sm:$0xf]  ;;  %v17193_v56 = vor.u32 %v19143_v55, %v17190_v16  ;;  %11612 = vmatpush.bf16.msrb.mxu2 %v17641_v53  ;;  %v15884_v58 = vld [vmem:[%s20235_s15 + $0x18] sm:$0xf] }
 0x88d   : > { %v16678_v60 = vld [vmem:[%s20235_s15 + $0x670] sm:$0xf0]  ;;  %11594 = vmatmul.bf16.vlgmr.msrb.gmra.mxu0 %v22539_v3 }
 0x88e   : > { %v19247_v2 = vld [vmem:[%s20235_s15 + $0xd94] sm:$0xf]  ;;  %v16681_v45 = vor.u32 %v19015_v59, %v16678_v60  ;;  %11638 = vmatpush.bf16.msra.mxu0 %v16109_v13  ;;  %11605 = vmatpush.bf16.msrb.mxu1 %v17193_v56  ;;  %v18916_v13 = vld [vmem:[%s20235_s15 + $0x334] sm:$0xf0]  ;;  %v23227_v56 = vpop.f32.mrf.mxu0 }
 0x88f   : > { %v17606_v54 = vld [vmem:[%s20235_s15 + $0xdb0] sm:$0xf0] }
 0x890   : > { %v19007_v8 = vld [vmem:[%s20235_s15 + $0x614] sm:$0xf]  ;;  %v17609_v21 = vor.u32 %v19247_v2, %v17606_v54  ;;  %11579 = vmatpush.bf16.msra.mxu3 %v16681_v45  ;;  %v16268_v2 = vld [vmem:[%s20235_s15 + $0x318] sm:$0xf]  ;;  %v15981_v45 = vor.u32 %v18844_v63, %v15980_v39 }
 0x891   : > { %v19135_v4 = vld [vmem:[%s20235_s15 + $0xa14] sm:$0xf] }
 0x892   : > { %v17158_v10 = vld [vmem:[%s20235_s15 + $0xa30] sm:$0xf0]  ;;  %11613 = vmatpush.bf16.msrb.mxu2 %v17609_v21  ;;  %11639 = vmatpush.bf16.msra.mxu0 %v16077_v25  ;;  %v16236_v21 = vld [vmem:[%s20235_s15 + $0x2d8] sm:$0xf] }
 0x893   : > { %v16646_v9 = vld [vmem:[%s20235_s15 + $0x630] sm:$0xf0]  ;;  %v17161_v23 = vor.u32 %v19135_v4, %v17158_v10  ;;  %v16269_v10 = vor.u32 %v18916_v13, %v16268_v2 }
 0x894   : > { %v19319_v61 = vld [vmem:[%s20235_s15 + $0xfd4] sm:$0xf]  ;;  %v16649_v40 = vor.u32 %v19007_v8, %v16646_v9  ;;  %v15948_v9 = vld [vmem:[%s20235_s15 + $0x98] sm:$0xf] }
 0x895   : > { %v17894_v12 = vld [vmem:[%s20235_s15 + $0xff0] sm:$0xf0]  ;;  %11606 = vmatpush.bf16.msrb.mxu1 %v17161_v23 }
 0x896   : > { %v19239_v33 = vld [vmem:[%s20235_s15 + $0xd54] sm:$0xf]  ;;  %v17897_v52 = vor.u32 %v19319_v61, %v17894_v12  ;;  %11580 = vmatpush.bf16.msra.mxu3 %v16649_v40  ;;  %11640 = vmatpush.bf16.msra.mxu0 %v16045_v51  ;;  %v18908_v61 = vld [vmem:[%s20235_s15 + $0x2f4] sm:$0xf0]  ;;  %v15949_v40 = vor.u32 %v18836_v1, %v15948_v9 }
 0x897   : > { %v17574_v24 = vld [vmem:[%s20235_s15 + $0xd70] sm:$0xf0]  ;;  %v16237_v20 = vor.u32 %v18908_v61, %v16236_v21  ;;  %v17100_v9 = vld [vmem:[%s20235_s15 + $0x998] sm:$0xf] }
 0x898   : > { %v17577_v38 = vor.u32 %v19239_v33, %v17574_v24  ;;  %v19311_v7 = vld [vmem:[%s20235_s15 + $0xf94] sm:$0xf]  ;;  %11607 = vmatmul.bf16.vlgmr.msrb.gmra.mxu1 %v22556_v62  ;;  %v23239_v33 = vpop.f32.mrf.mxu2  ;;  %v23241_v24 = vpop.f32.mrf.mxu1  ;;  %v16140_v21 = vld [vmem:[%s20235_s15 + $0x218] sm:$0xf] }
 0x899   : > { %v17862_v41 = vld [vmem:[%s20235_s15 + $0xfb0] sm:$0xf0]  ;;  %11651 = vmatpush.bf16.msra.mxu1 %v16365_v26  ;;  %11581 = vmatmul.bf16.vlgmr.msra.gmra.mxu3 %v22515_v49  ;;  %v18884_v61 = vld [vmem:[%s20235_s15 + $0x234] sm:$0xf0] }
 0x89a   : > { %v19231_v37 = vld [vmem:[%s20235_s15 + $0xd14] sm:$0xf]  ;;  %11625 = vmatpush.bf16.msrb.mxu3 %v17897_v52  ;;  %v17865_v36 = vor.u32 %v19311_v7, %v17862_v41  ;;  %11614 = vmatpush.bf16.msrb.mxu2 %v17577_v38  ;;  %v18828_v52 = vld [vmem:[%s20235_s15 + $0x74] sm:$0xf0]  ;;  %v11389_v7 = vpop.f32.mrf.mxu0 }
 0x89b   : > { %v17542_v29 = vld [vmem:[%s20235_s15 + $0xd30] sm:$0xf0]  ;;  %11641 = vmatpush.bf16.msra.mxu0 %v16013_v57  ;;  %v18900_v38 = vld [vmem:[%s20235_s15 + $0x2b4] sm:$0xf0] }
 0x89c   : > { %v17545_v44 = vor.u32 %v19231_v37, %v17542_v29  ;;  %v19303_v55 = vld [vmem:[%s20235_s15 + $0xf54] sm:$0xf]  ;;  %v16205_v28 = vor.u32 %v18900_v38, %v16204_v6  ;;  %v19132_v57 = vld [vmem:[%s20235_s15 + $0x9f4] sm:$0xf0] }
 0x89d   : > { %v17830_v16 = vld [vmem:[%s20235_s15 + $0xf70] sm:$0xf0]  ;;  %11652 = vmatpush.bf16.msra.mxu1 %v16333_v30  ;;  %v15917_v30 = vor.u32 %v18828_v52, %v15916_v22  ;;  %v16141_v22 = vor.u32 %v18884_v61, %v16140_v21  ;;  %v16556_v52 = vld [vmem:[%s20235_s15 + $0x558] sm:$0xf] }
 0x89e   : > { %v19223_v59 = vld [vmem:[%s20235_s15 + $0xcd4] sm:$0xf]  ;;  %11626 = vmatpush.bf16.msrb.mxu3 %v17865_v36  ;;  %v17833_v53 = vor.u32 %v19303_v55, %v17830_v16  ;;  %11615 = vmatpush.bf16.msrb.mxu2 %v17545_v44  ;;  %v18820_v36 = vld [vmem:[%s20235_s15 + $0x34] sm:$0xf0] }
 0x89f   : > { %v17510_v60 = vld [vmem:[%s20235_s15 + $0xcf0] sm:$0xf0]  ;;  %11642 = vmatpush.bf16.msra.mxu0 %v15981_v45  ;;  %v19004_v44 = vld [vmem:[%s20235_s15 + $0x5f4] sm:$0xf0] }
 0x8a0   : > { %v17513_v54 = vor.u32 %v19223_v59, %v17510_v60  ;;  %v19295_v8 = vld [vmem:[%s20235_s15 + $0xf14] sm:$0xf]  ;;  %v17132_v55 = vld [vmem:[%s20235_s15 + $0x9d8] sm:$0xf]  ;;  %v11363_v2 = vpop.f32.mrf.mxu2  ;;  %v11402_v13 = vpop.f32.mrf.mxu1 }
 0x8a1   : > { %v17798_v35 = vld [vmem:[%s20235_s15 + $0xf30] sm:$0xf0]  ;;  %11653 = vmatpush.bf16.msra.mxu1 %v16301_v46  ;;  %v16172_v59 = vld [vmem:[%s20235_s15 + $0x258] sm:$0xf]  ;;  %v23261_v46 = vpop.f32.mrf.mxu3  ;;  %v17133_v45 = vor.u32 %v19132_v57, %v17132_v55 }
 0x8a2   : > { %v19215_v14 = vld [vmem:[%s20235_s15 + $0xc94] sm:$0xf]  ;;  %11627 = vmatpush.bf16.msrb.mxu3 %v17833_v53  ;;  %v17801_v19 = vor.u32 %v19295_v8, %v17798_v35  ;;  %11616 = vmatpush.bf16.msrb.mxu2 %v17513_v54  ;;  %v18892_v60 = vld [vmem:[%s20235_s15 + $0x274] sm:$0xf0]  ;;  %v15885_v54 = vor.u32 %v18820_v36, %v15884_v58  ;;  %v16621_v8 = vor.u32 %v19004_v44, %v16620_v43 }
 0x8a3   : > { %v17478_v4 = vld [vmem:[%s20235_s15 + $0xcb0] sm:$0xf0]  ;;  %11643 = vmatpush.bf16.msra.mxu0 %v15949_v40  ;;  %v16588_v35 = vld [vmem:[%s20235_s15 + $0x598] sm:$0xf] }
 0x8a4   : > { %v17481_v12 = vor.u32 %v19215_v14, %v17478_v4  ;;  %v19287_v25 = vld [vmem:[%s20235_s15 + $0xed4] sm:$0xf]  ;;  %v16173_v14 = vor.u32 %v18892_v60, %v16172_v59  ;;  %v18996_v4 = vld [vmem:[%s20235_s15 + $0x5b4] sm:$0xf0] }
 0x8a5   : > { %v17766_v23 = vld [vmem:[%s20235_s15 + $0xef0] sm:$0xf0]  ;;  %11654 = vmatpush.bf16.msra.mxu1 %v16269_v10  ;;  %v16589_v40 = vor.u32 %v18996_v4, %v16588_v35  ;;  %v17068_v7 = vld [vmem:[%s20235_s15 + $0x958] sm:$0xf] }
 0x8a6   : > { %v19207_v26 = vld [vmem:[%s20235_s15 + $0xc54] sm:$0xf]  ;;  %11628 = vmatpush.bf16.msrb.mxu3 %v17801_v19  ;;  %v17769_v32 = vor.u32 %v19287_v25, %v17766_v23  ;;  %11617 = vmatpush.bf16.msrb.mxu2 %v17481_v12  ;;  %v19124_v19 = vld [vmem:[%s20235_s15 + $0x9b4] sm:$0xf0] }
 0x8a7   : > { %v17446_v15 = vld [vmem:[%s20235_s15 + $0xc70] sm:$0xf0]  ;;  %11644 = vmatpush.bf16.msra.mxu0 %v15917_v30  ;;  %v17388_v25 = vld [vmem:[%s20235_s15 + $0xbd8] sm:$0xf] }
 0x8a8   : > { %v17449_v41 = vor.u32 %v19207_v26, %v17446_v15  ;;  %v19279_v51 = vld [vmem:[%s20235_s15 + $0xe94] sm:$0xf]  ;;  %v19196_v23 = vld [vmem:[%s20235_s15 + $0xbf4] sm:$0xf0] }
 0x8a9   : > { %v17734_v37 = vld [vmem:[%s20235_s15 + $0xeb0] sm:$0xf0]  ;;  %11655 = vmatpush.bf16.msra.mxu1 %v16237_v20  ;;  %v16876_v26 = vld [vmem:[%s20235_s15 + $0x7d8] sm:$0xf]  ;;  %v17101_v20 = vor.u32 %v19124_v19, %v17100_v9  ;;  %v17389_v38 = vor.u32 %v19196_v23, %v17388_v25 }
 0x8aa   : > { %v19199_v29 = vld [vmem:[%s20235_s15 + $0xc14] sm:$0xf]  ;;  %11629 = vmatpush.bf16.msrb.mxu3 %v17769_v32  ;;  %v17737_v16 = vor.u32 %v19279_v51, %v17734_v37  ;;  %11618 = vmatpush.bf16.msrb.mxu2 %v17449_v41  ;;  %v19068_v15 = vld [vmem:[%s20235_s15 + $0x7f4] sm:$0xf0]  ;;  %v23283_v51 = vld [vmem:[%s20239_s6] sm:$0xff] }
 0x8ab   : > { %v17414_v42 = vld [vmem:[%s20235_s15 + $0xc30] sm:$0xf0]  ;;  %11645 = vmatpush.bf16.msra.mxu0 %v15885_v54  ;;  %v18988_v32 = vld [vmem:[%s20235_s15 + $0x574] sm:$0xf0]  ;;  %v8441_v37 = vperm.slane %v23283_v51, 3  ;;  %v16877_v30 = vor.u32 %v19068_v15, %v16876_v26  ;;  %v8442_v61 = vperm.slane %v23283_v51, 4 }
 0x8ac   : > { %v17417_v39 = vor.u32 %v19199_v29, %v17414_v42  ;;  %v19271_v63 = vld [vmem:[%s20235_s15 + $0xe54] sm:$0xf]  ;;  %v19116_v41 = vld [vmem:[%s20235_s15 + $0x974] sm:$0xf0]  ;;  %v11376_v29 = vpop.f32.mrf.mxu3  ;;  %v16557_v36 = vor.u32 %v18988_v32, %v16556_v52 }
 0x8ad   : > { %v17702_v53 = vld [vmem:[%s20235_s15 + $0xe70] sm:$0xf0]  ;;  %11656 = vmatpush.bf16.msra.mxu1 %v16205_v28  ;;  %v17356_v42 = vld [vmem:[%s20235_s15 + $0xb98] sm:$0xf]  ;;  %v17069_v44 = vor.u32 %v19116_v41, %v17068_v7 }
 0x8ae   : > { %v19263_v10 = vld [vmem:[%s20235_s15 + $0xe14] sm:$0xf]  ;;  %11630 = vmatpush.bf16.msrb.mxu3 %v17737_v16  ;;  %v17705_v1 = vor.u32 %v19271_v63, %v17702_v53  ;;  %11619 = vmatpush.bf16.msrb.mxu2 %v17417_v39  ;;  %v19188_v58 = vld [vmem:[%s20235_s15 + $0xbb4] sm:$0xf0]  ;;  %v11336_v39 = vadd.f32 %v23151_v47, %v8441_v37 }
 0x8af   : > { %v17670_v12 = vld [vmem:[%s20235_s15 + $0xe30] sm:$0xf0]  ;;  %11690 = vmatpush.bf16.msrb.mxu0 %v17133_v45  ;;  %v16844_v28 = vld [vmem:[%s20235_s15 + $0x798] sm:$0xf]  ;;  %v17357_v57 = vor.u32 %v19188_v58, %v17356_v42  ;;  %v11413_v42 = vpop.f32.mrf.mxu2  ;;  %v11452_v58 = vpop.f32.mrf.mxu1 }
 0x8b0   : > { %v17673_v6 = vor.u32 %v19263_v10, %v17670_v12  ;;  %11646 = vmatmul.bf16.vlgmr.msra.gmra.mxu0 %v22461_v11  ;;  %v19060_v43 = vld [vmem:[%s20235_s15 + $0x7b4] sm:$0xf0]  ;;  %v11349_v35 = vadd.f32 %v23165_v0, %v11336_v39  ;;  %v11439_v12 = vpop.f32.mrf.mxu0 }
 0x8b1   : > { %11657 = vmatpush.bf16.msra.mxu1 %v16173_v14  ;;  %11620 = vmatmul.bf16.vlgmr.msrb.gmra.mxu2 %v22597_v34  ;;  %v16524_v55 = vld [vmem:[%s20235_s15 + $0x518] sm:$0xf]  ;;  %v16845_v63 = vor.u32 %v19060_v43, %v16844_v28  ;;  %v11440_v41 = vadd.f32 %v11439_v12, %v8442_v61 }
 0x8b2   : > { %11664 = vmatpush.bf16.msra.mxu2 %v16621_v8  ;;  %11631 = vmatpush.bf16.msrb.mxu3 %v17705_v1  ;;  %v18980_v16 = vld [vmem:[%s20235_s15 + $0x534] sm:$0xf0]  ;;  %v11362_v1 = vadd.f32 %v23239_v33, %v11349_v35 }
 0x8b3   : > { %11691 = vmatpush.bf16.msrb.mxu0 %v17101_v20  ;;  %v17036_v59 = vld [vmem:[%s20235_s15 + $0x918] sm:$0xf]  ;;  %v16525_v13 = vor.u32 %v18980_v16, %v16524_v55  ;;  %v23327_v55 = vadd.f32 %v11452_v58, %v11440_v41  ;;  %v16078_v41 = vld [vmem:[%s20235_s15 + $0x1b8] sm:$0xf0] }
 0x8b4   : > { %v19108_v60 = vld [vmem:[%s20235_s15 + $0x934] sm:$0xf0]  ;;  %v11375_v26 = vadd.f32 %v23261_v46, %v11362_v1  ;;  %v11426_v61 = vpop.f32.mrf.mxu3  ;;  %v18936_v58 = vld [vmem:[%s20235_s15 + $0x3dc] sm:$0xf] }
 0x8b5   : > { %11658 = vmatpush.bf16.msra.mxu1 %v16141_v22  ;;  %v17324_v53 = vld [vmem:[%s20235_s15 + $0xb58] sm:$0xf]  ;;  %v17037_v47 = vor.u32 %v19108_v60, %v17036_v59 }
 0x8b6   : > { %11665 = vmatpush.bf16.msra.mxu2 %v16589_v40  ;;  %11632 = vmatpush.bf16.msrb.mxu3 %v17673_v6  ;;  %v19180_v2 = vld [vmem:[%s20235_s15 + $0xb74] sm:$0xf0] }
 0x8b7   : > { %v16812_v54 = vld [vmem:[%s20235_s15 + $0x758] sm:$0xf]  ;;  %11692 = vmatpush.bf16.msrb.mxu0 %v17069_v44  ;;  %v17325_v4 = vor.u32 %v19180_v2, %v17324_v53  ;;  %v11310_v44 = vadd.f32 %v23163_v31, %v23123_v5 }
 0x8b8   : > { %11659 = vmatmul.bf16.vlgmr.msra.gmra.mxu1 %v22474_v27  ;;  %v19052_v8 = vld [vmem:[%s20235_s15 + $0x774] sm:$0xf0]  ;;  %v11441_v53 = vpop.f32.mrf.mxu0 }
 0x8b9   : > { %11703 = vmatpush.bf16.msrb.mxu1 %v17389_v38  ;;  %11633 = vmatmul.bf16.vlgmr.msrb.gmra.mxu3 %v22616_v18  ;;  %v16492_v45 = vld [vmem:[%s20235_s15 + $0x4d8] sm:$0xf]  ;;  %v16813_v19 = vor.u32 %v19052_v8, %v16812_v54 }
 0x8ba   : > { %11677 = vmatpush.bf16.msra.mxu3 %v16877_v30  ;;  %11666 = vmatpush.bf16.msra.mxu2 %v16557_v36  ;;  %v18972_v14 = vld [vmem:[%s20235_s15 + $0x4f4] sm:$0xf0]  ;;  %v11388_v30 = vadd.f32 %v23227_v56, %v11375_v26  ;;  %v11415_v26 = vpop.f32.mrf.mxu2 }
 0x8bb   : > { %v17004_v10 = vld [vmem:[%s20235_s15 + $0x8d8] sm:$0xf]  ;;  %v16493_v25 = vor.u32 %v18972_v14, %v16492_v45  ;;  %11693 = vmatpush.bf16.msrb.mxu0 %v17037_v47  ;;  %v18840_v26 = vld [vmem:[%s20235_s15 + $0xdc] sm:$0xf] }
 0x8bc   : > { %v19100_v9 = vld [vmem:[%s20235_s15 + $0x8f4] sm:$0xf0]  ;;  %v11401_v54 = vadd.f32 %v23241_v24, %v11388_v30 }
 0x8bd   : > { %11704 = vmatpush.bf16.msrb.mxu1 %v17357_v57  ;;  %v17292_v0 = vld [vmem:[%s20235_s15 + $0xb18] sm:$0xf]  ;;  %v17005_v33 = vor.u32 %v19100_v9, %v17004_v10  ;;  %v18872_v10 = vld [vmem:[%s20235_s15 + $0x1dc] sm:$0xf] }
 0x8be   : > { %11678 = vmatpush.bf16.msra.mxu3 %v16845_v63  ;;  %v19172_v21 = vld [vmem:[%s20235_s15 + $0xb34] sm:$0xf0]  ;;  %11667 = vmatpush.bf16.msra.mxu2 %v16525_v13  ;;  %v11323_v63 = vadd.f32 %v23185_v48, %v11310_v44  ;;  %v11414_v9 = vadd.f32 %v11413_v42, %v11401_v54  ;;  %v16334_v54 = vld [vmem:[%s20235_s15 + $0x3b8] sm:$0xf0] }
 0x8bf   : > { %v16780_v23 = vld [vmem:[%s20235_s15 + $0x718] sm:$0xf]  ;;  %v17293_v22 = vor.u32 %v19172_v21, %v17292_v0  ;;  %11694 = vmatpush.bf16.msrb.mxu0 %v17005_v33  ;;  %v11454_v33 = vpop.f32.mrf.mxu1 }
 0x8c0   : > { %v19044_v40 = vld [vmem:[%s20235_s15 + $0x734] sm:$0xf0]  ;;  %v11855_v21 = vrot.slane %v11323_v63, 4  ;;  %v15982_v33 = vld [vmem:[%s20235_s15 + $0xf8] sm:$0xf0] }
 0x8c1   : > { %v16460_v15 = vld [vmem:[%s20235_s15 + $0x498] sm:$0xf]  ;;  %11705 = vmatpush.bf16.msrb.mxu1 %v17325_v4  ;;  %v16781_v6 = vor.u32 %v19044_v40, %v16780_v23  ;;  %v11427_v40 = vadd.f32 %v11426_v61, %v11414_v9  ;;  %v16014_v9 = vld [vmem:[%s20235_s15 + $0x138] sm:$0xf0] }
 0x8c2   : > { %v18964_v20 = vld [vmem:[%s20235_s15 + $0x4b4] sm:$0xf0]  ;;  %11679 = vmatpush.bf16.msra.mxu3 %v16813_v19  ;;  %11668 = vmatpush.bf16.msra.mxu2 %v16493_v25  ;;  %v16110_v19 = vld [vmem:[%s20235_s15 + $0x1f8] sm:$0xf0] }
 0x8c3   : > { %v16972_v52 = vld [vmem:[%s20235_s15 + $0x898] sm:$0xf]  ;;  %v16461_v46 = vor.u32 %v18964_v20, %v16460_v15 }
 0x8c4   : > { %v19092_v32 = vld [vmem:[%s20235_s15 + $0x8b4] sm:$0xf0] }
 0x8c5   : > { %v17260_v38 = vld [vmem:[%s20235_s15 + $0xad8] sm:$0xf]  ;;  %v16973_v36 = vor.u32 %v19092_v32, %v16972_v52  ;;  %11706 = vmatpush.bf16.msrb.mxu1 %v17293_v22  ;;  %v16113_v32 = vor.u32 %v18872_v10, %v16110_v19  ;;  %v18848_v10 = vld [vmem:[%s20235_s15 + $0x11c] sm:$0xf] }
 0x8c6   : > { %v19164_v7 = vld [vmem:[%s20235_s15 + $0xaf4] sm:$0xf0]  ;;  %11680 = vmatpush.bf16.msra.mxu3 %v16781_v6  ;;  %11669 = vmatpush.bf16.msra.mxu2 %v16461_v46  ;;  %v11856_v46 = vrot.slane %v11427_v40, 2  ;;  %v18920_v19 = vld [vmem:[%s20235_s15 + $0x35c] sm:$0xf] }
 0x8c7   : > { %v16748_v37 = vld [vmem:[%s20235_s15 + $0x6d8] sm:$0xf]  ;;  %v17261_v16 = vor.u32 %v19164_v7, %v17260_v38  ;;  %11695 = vmatpush.bf16.msrb.mxu0 %v16973_v36  ;;  %v18864_v7 = vld [vmem:[%s20235_s15 + $0x19c] sm:$0xf] }
 0x8c8   : > { %v19036_v29 = vld [vmem:[%s20235_s15 + $0x6f4] sm:$0xf0]  ;;  %v16366_v36 = vld [vmem:[%s20235_s15 + $0x3f8] sm:$0xf0] }
 0x8c9   : > { %v16428_v28 = vld [vmem:[%s20235_s15 + $0x458] sm:$0xf]  ;;  %v16749_v59 = vor.u32 %v19036_v29, %v16748_v37  ;;  %11707 = vmatpush.bf16.msrb.mxu1 %v17261_v16  ;;  %v16369_v53 = vor.u32 %v18936_v58, %v16366_v36  ;;  %v18904_v58 = vld [vmem:[%s20235_s15 + $0x2dc] sm:$0xf] }
 0x8ca   : > { %v18956_v43 = vld [vmem:[%s20235_s15 + $0x474] sm:$0xf0]  ;;  %v16238_v36 = vld [vmem:[%s20235_s15 + $0x2f8] sm:$0xf0] }
 0x8cb   : > { %v16940_v57 = vld [vmem:[%s20235_s15 + $0x858] sm:$0xf]  ;;  %v16429_v5 = vor.u32 %v18956_v43, %v16428_v28  ;;  %11681 = vmatpush.bf16.msra.mxu3 %v16749_v59  ;;  %v11862_v28 = vsel %vm11861_vm1, %v11855_v21, %v11856_v46 }
 0x8cc   : > { %v19084_v56 = vld [vmem:[%s20235_s15 + $0x874] sm:$0xf0] }
 0x8cd   : > { %v17228_v60 = vld [vmem:[%s20235_s15 + $0xa98] sm:$0xf]  ;;  %v16941_v8 = vor.u32 %v19084_v56, %v16940_v57  ;;  %11670 = vmatpush.bf16.msra.mxu2 %v16429_v5  ;;  %v11864_v57 = vsel %vm11863_vm2, %v23044_v17, %v11862_v28  ;;  %v16081_v56 = vor.u32 %v18864_v7, %v16078_v41  ;;  %v18856_v5 = vld [vmem:[%s20235_s15 + $0x15c] sm:$0xf]  ;;  %v15985_v7 = vor.u32 %v18840_v26, %v15982_v33 }
 0x8ce   : > { %v19156_v39 = vld [vmem:[%s20235_s15 + $0xab4] sm:$0xf0]  ;;  %11870 = vst [vmem:[%s23361_s13] sm:$0xff] %v11864_v57  ;;  %v16046_v17 = vld [vmem:[%s20235_s15 + $0x178] sm:$0xf0]  ;;  %v23410_v57 = vpop.f32.mrf.mxu1 }
 0x8cf   : > { %v16716_v31 = vld [vmem:[%s20235_s15 + $0x698] sm:$0xf]  ;;  %v17229_v48 = vor.u32 %v19156_v39, %v17228_v60  ;;  %11696 = vmatpush.bf16.msrb.mxu0 %v16941_v8 }
 0x8d0   : > { %v19028_v2 = vld [vmem:[%s20235_s15 + $0x6b4] sm:$0xf0] }
 0x8d1   : > { %v16396_v13 = vld [vmem:[%s20235_s15 + $0x418] sm:$0xf]  ;;  %v16717_v1 = vor.u32 %v19028_v2, %v16716_v31  ;;  %11708 = vmatpush.bf16.msrb.mxu1 %v17229_v48  ;;  %v11428_v31 = vpop.f32.mrf.mxu3 }
 0x8d2   : > { %v18948_v35 = vld [vmem:[%s20235_s15 + $0x434] sm:$0xf0]  ;;  %v18896_v31 = vld [vmem:[%s20235_s15 + $0x29c] sm:$0xf] }
 0x8d3   : > { %v16908_v47 = vld [vmem:[%s20235_s15 + $0x818] sm:$0xf]  ;;  %v16397_v12 = vor.u32 %v18948_v35, %v16396_v13  ;;  %11682 = vmatpush.bf16.msra.mxu3 %v16717_v1  ;;  %v18928_v13 = vld [vmem:[%s20235_s15 + $0x39c] sm:$0xf] }
 0x8d4   : > { %v19076_v45 = vld [vmem:[%s20235_s15 + $0x834] sm:$0xf0] }
 0x8d5   : > { %v17644_v14 = vld [vmem:[%s20235_s15 + $0xdd8] sm:$0xf]  ;;  %v16909_v15 = vor.u32 %v19076_v45, %v16908_v47  ;;  %11671 = vmatpush.bf16.msra.mxu2 %v16397_v12  ;;  %v16049_v45 = vor.u32 %v18856_v5, %v16046_v17  ;;  %v16017_v12 = vor.u32 %v18848_v10, %v16014_v9  ;;  %v15918_v5 = vld [vmem:[%s20235_s15 + $0x78] sm:$0xf0] }
 0x8d6   : > { %v19260_v4 = vld [vmem:[%s20235_s15 + $0xdf4] sm:$0xf0]  ;;  %v19000_v10 = vld [vmem:[%s20235_s15 + $0x5dc] sm:$0xf]  ;;  %v11506_v33 = vpop.f32.mrf.mxu1 }
 0x8d7   : > { %v17196_v0 = vld [vmem:[%s20235_s15 + $0xa58] sm:$0xf]  ;;  %v17645_v20 = vor.u32 %v19260_v4, %v17644_v14  ;;  %11697 = vmatpush.bf16.msrb.mxu0 %v16909_v15  ;;  %v16337_v4 = vor.u32 %v18928_v13, %v16334_v54  ;;  %v16622_v9 = vld [vmem:[%s20235_s15 + $0x5f8] sm:$0xf0]  ;;  %v8443_v33 = vperm.slane %v23283_v51, 5 }
 0x8d8   : > { %v19148_v24 = vld [vmem:[%s20235_s15 + $0xa74] sm:$0xf0]  ;;  %11672 = vmatmul.bf16.vlgmr.msra.gmra.mxu2 %v22497_v50 }
 0x8d9   : > { %v16684_v25 = vld [vmem:[%s20235_s15 + $0x658] sm:$0xf]  ;;  %v17197_v6 = vor.u32 %v19148_v24, %v17196_v0  ;;  %11716 = vmatpush.bf16.msrb.mxu2 %v17645_v20  ;;  %v16302_v0 = vld [vmem:[%s20235_s15 + $0x378] sm:$0xf0] }
 0x8da   : > { %v19020_v23 = vld [vmem:[%s20235_s15 + $0x674] sm:$0xf0]  ;;  %11698 = vmatmul.bf16.vlgmr.msrb.gmra.mxu0 %v22539_v3  ;;  %v16305_v40 = vor.u32 %v18920_v19, %v16302_v0  ;;  %v18912_v20 = vld [vmem:[%s20235_s15 + $0x31c] sm:$0xf] }
 0x8db   : > { %v17612_v22 = vld [vmem:[%s20235_s15 + $0xd98] sm:$0xf]  ;;  %v16685_v37 = vor.u32 %v19020_v23, %v16684_v25  ;;  %11742 = vmatpush.bf16.msra.mxu0 %v16113_v32  ;;  %11709 = vmatpush.bf16.msrb.mxu1 %v17197_v6  ;;  %v17134_v0 = vld [vmem:[%s20235_s15 + $0x9f8] sm:$0xf0] }
 0x8dc   : > { %v19252_v52 = vld [vmem:[%s20235_s15 + $0xdb4] sm:$0xf0] }
 0x8dd   : > { %v16652_v38 = vld [vmem:[%s20235_s15 + $0x618] sm:$0xf]  ;;  %v17613_v43 = vor.u32 %v19252_v52, %v17612_v22  ;;  %11683 = vmatpush.bf16.msra.mxu3 %v16685_v37  ;;  %v16270_v22 = vld [vmem:[%s20235_s15 + $0x338] sm:$0xf0]  ;;  %v23398_v52 = vpop.f32.mrf.mxu0 }
 0x8de   : > { %v17164_v29 = vld [vmem:[%s20235_s15 + $0xa18] sm:$0xf]  ;;  %v16273_v37 = vor.u32 %v18912_v20, %v16270_v22  ;;  %v16625_v20 = vor.u32 %v19000_v10, %v16622_v9  ;;  %v18992_v22 = vld [vmem:[%s20235_s15 + $0x59c] sm:$0xf] }
 0x8df   : > { %v19140_v30 = vld [vmem:[%s20235_s15 + $0xa34] sm:$0xf0]  ;;  %11717 = vmatpush.bf16.msrb.mxu2 %v17613_v43  ;;  %11743 = vmatpush.bf16.msra.mxu0 %v16081_v56  ;;  %v19176_v10 = vld [vmem:[%s20235_s15 + $0xb5c] sm:$0xf] }
 0x8e0   : > { %v19012_v42 = vld [vmem:[%s20235_s15 + $0x634] sm:$0xf0]  ;;  %v17165_v59 = vor.u32 %v19140_v30, %v17164_v29  ;;  %v18832_v29 = vld [vmem:[%s20235_s15 + $0x9c] sm:$0xf] }
 0x8e1   : > { %v17900_v44 = vld [vmem:[%s20235_s15 + $0xfd8] sm:$0xf]  ;;  %v16653_v63 = vor.u32 %v19012_v42, %v16652_v38  ;;  %v15950_v30 = vld [vmem:[%s20235_s15 + $0xb8] sm:$0xf0] }
 0x8e2   : > { %v19324_v16 = vld [vmem:[%s20235_s15 + $0xff4] sm:$0xf0]  ;;  %11710 = vmatpush.bf16.msrb.mxu1 %v17165_v59  ;;  %v15953_v56 = vor.u32 %v18832_v29, %v15950_v30  ;;  %v17102_v29 = vld [vmem:[%s20235_s15 + $0x9b8] sm:$0xf0] }
 0x8e3   : > { %v17580_v60 = vld [vmem:[%s20235_s15 + $0xd58] sm:$0xf]  ;;  %v17901_v2 = vor.u32 %v19324_v16, %v17900_v44  ;;  %11684 = vmatpush.bf16.msra.mxu3 %v16653_v63  ;;  %11744 = vmatpush.bf16.msra.mxu0 %v16049_v45  ;;  %v11465_v16 = vpop.f32.mrf.mxu2  ;;  %v16241_v63 = vor.u32 %v18904_v58, %v16238_v36  ;;  %v18880_v30 = vld [vmem:[%s20235_s15 + $0x21c] sm:$0xf] }
 0x8e4   : > { %v19244_v39 = vld [vmem:[%s20235_s15 + $0xd74] sm:$0xf0]  ;;  %v19192_v36 = vld [vmem:[%s20235_s15 + $0xbdc] sm:$0xf] }
 0x8e5   : > { %v17581_v8 = vor.u32 %v19244_v39, %v17580_v60  ;;  %v17868_v35 = vld [vmem:[%s20235_s15 + $0xf98] sm:$0xf]  ;;  %11711 = vmatmul.bf16.vlgmr.msrb.gmra.mxu1 %v22556_v62  ;;  %v11466_v39 = vadd.f32 %v11465_v16, %v23327_v55  ;;  %v11493_v13 = vpop.f32.mrf.mxu0  ;;  %v16878_v16 = vld [vmem:[%s20235_s15 + $0x7f8] sm:$0xf0] }
 0x8e6   : > { %v19316_v47 = vld [vmem:[%s20235_s15 + $0xfb4] sm:$0xf0]  ;;  %11755 = vmatpush.bf16.msra.mxu1 %v16369_v53  ;;  %11685 = vmatmul.bf16.vlgmr.msra.gmra.mxu3 %v22515_v49  ;;  %v18824_v53 = vld [vmem:[%s20235_s15 + $0x5c] sm:$0xf] }
 0x8e7   : > { %v17548_v48 = vld [vmem:[%s20235_s15 + $0xd18] sm:$0xf]  ;;  %11729 = vmatpush.bf16.msrb.mxu3 %v17901_v2  ;;  %v17869_v1 = vor.u32 %v19316_v47, %v17868_v35  ;;  %11718 = vmatpush.bf16.msrb.mxu2 %v17581_v8  ;;  %v16206_v2 = vld [vmem:[%s20235_s15 + $0x2b8] sm:$0xf0]  ;;  %v15921_v47 = vor.u32 %v18824_v53, %v15918_v5 }
 0x8e8   : > { %v19236_v14 = vld [vmem:[%s20235_s15 + $0xd34] sm:$0xf0]  ;;  %11745 = vmatpush.bf16.msra.mxu0 %v16017_v12  ;;  %v19112_v5 = vld [vmem:[%s20235_s15 + $0x95c] sm:$0xf] }
 0x8e9   : > { %v17549_v24 = vor.u32 %v19236_v14, %v17548_v48  ;;  %v17836_v21 = vld [vmem:[%s20235_s15 + $0xf58] sm:$0xf]  ;;  %v18816_v48 = vld [vmem:[%s20235_s15 + $0x1c] sm:$0xf] }
 0x8ea   : > { %v19308_v61 = vld [vmem:[%s20235_s15 + $0xf74] sm:$0xf0]  ;;  %11756 = vmatpush.bf16.msra.mxu1 %v16337_v4  ;;  %v15886_v14 = vld [vmem:[%s20235_s15 + $0x38] sm:$0xf0]  ;;  %v16209_v4 = vor.u32 %v18896_v31, %v16206_v2 }
 0x8eb   : > { %v17516_v25 = vld [vmem:[%s20235_s15 + $0xcd8] sm:$0xf]  ;;  %11730 = vmatpush.bf16.msrb.mxu3 %v17869_v1  ;;  %v17837_v15 = vor.u32 %v19308_v61, %v17836_v21  ;;  %11719 = vmatpush.bf16.msrb.mxu2 %v17549_v24  ;;  %v19128_v1 = vld [vmem:[%s20235_s15 + $0x9dc] sm:$0xf]  ;;  %v11478_v61 = vpop.f32.mrf.mxu3  ;;  %v11467_v26 = vpop.f32.mrf.mxu2 }
 0x8ec   : > { %v19228_v23 = vld [vmem:[%s20235_s15 + $0xcf4] sm:$0xf0]  ;;  %11746 = vmatpush.bf16.msra.mxu0 %v15985_v7  ;;  %v18888_v24 = vld [vmem:[%s20235_s15 + $0x25c] sm:$0xf] }
 0x8ed   : > { %v17517_v32 = vor.u32 %v19228_v23, %v17516_v25  ;;  %v17804_v6 = vld [vmem:[%s20235_s15 + $0xf18] sm:$0xf]  ;;  %v16174_v21 = vld [vmem:[%s20235_s15 + $0x278] sm:$0xf0] }
 0x8ee   : > { %v19300_v38 = vld [vmem:[%s20235_s15 + $0xf34] sm:$0xf0]  ;;  %11757 = vmatpush.bf16.msra.mxu1 %v16305_v40  ;;  %v11479_v40 = vadd.f32 %v11478_v61, %v11466_v39  ;;  %v16558_v39 = vld [vmem:[%s20235_s15 + $0x578] sm:$0xf0] }
 0x8ef   : > { %v17484_v41 = vld [vmem:[%s20235_s15 + $0xc98] sm:$0xf]  ;;  %11731 = vmatpush.bf16.msrb.mxu3 %v17837_v15  ;;  %v17805_v42 = vor.u32 %v19300_v38, %v17804_v6  ;;  %11720 = vmatpush.bf16.msrb.mxu2 %v17517_v32  ;;  %v15889_v15 = vor.u32 %v18816_v48, %v15886_v14  ;;  %v17137_v32 = vor.u32 %v19128_v1, %v17134_v0  ;;  %v16590_v38 = vld [vmem:[%s20235_s15 + $0x5b8] sm:$0xf0] }
 0x8f0   : > { %v19220_v46 = vld [vmem:[%s20235_s15 + $0xcb4] sm:$0xf0]  ;;  %11747 = vmatpush.bf16.msra.mxu0 %v15953_v56  ;;  %v16177_v6 = vor.u32 %v18888_v24, %v16174_v21  ;;  %v19184_v2 = vld [vmem:[%s20235_s15 + $0xb9c] sm:$0xf] }
 0x8f1   : > { %v17485_v28 = vor.u32 %v19220_v46, %v17484_v41  ;;  %v17772_v43 = vld [vmem:[%s20235_s15 + $0xed8] sm:$0xf]  ;;  %v19120_v41 = vld [vmem:[%s20235_s15 + $0x99c] sm:$0xf]  ;;  %v11492_v46 = vadd.f32 %v23398_v52, %v11479_v40 }
 0x8f2   : > { %v19292_v44 = vld [vmem:[%s20235_s15 + $0xef4] sm:$0xf0]  ;;  %11758 = vmatpush.bf16.msra.mxu1 %v16273_v37  ;;  %v17105_v56 = vor.u32 %v19120_v41, %v17102_v29  ;;  %v17358_v13 = vld [vmem:[%s20235_s15 + $0xbb8] sm:$0xf0] }
 0x8f3   : > { %v17452_v59 = vld [vmem:[%s20235_s15 + $0xc58] sm:$0xf]  ;;  %11732 = vmatpush.bf16.msrb.mxu3 %v17805_v42  ;;  %v17773_v17 = vor.u32 %v19292_v44, %v17772_v43  ;;  %11721 = vmatpush.bf16.msrb.mxu2 %v17485_v28  ;;  %v16142_v42 = vld [vmem:[%s20235_s15 + $0x238] sm:$0xf0]  ;;  %v16593_v43 = vor.u32 %v18992_v22, %v16590_v38  ;;  %v23447_v52 = vadd.f32 %v23410_v57, %v11492_v46 }
 0x8f4   : > { %v19212_v60 = vld [vmem:[%s20235_s15 + $0xc74] sm:$0xf0]  ;;  %11748 = vmatpush.bf16.msra.mxu0 %v15921_v47  ;;  %v17390_v28 = vld [vmem:[%s20235_s15 + $0xbf8] sm:$0xf0] }
 0x8f5   : > { %v17453_v54 = vor.u32 %v19212_v60, %v17452_v59  ;;  %v17740_v8 = vld [vmem:[%s20235_s15 + $0xe98] sm:$0xf]  ;;  %v19064_v44 = vld [vmem:[%s20235_s15 + $0x7dc] sm:$0xf]  ;;  %v16145_v59 = vor.u32 %v18880_v30, %v16142_v42  ;;  %v17393_v53 = vor.u32 %v19192_v36, %v17390_v28 }
 0x8f6   : > { %v19284_v55 = vld [vmem:[%s20235_s15 + $0xeb4] sm:$0xf0]  ;;  %11759 = vmatpush.bf16.msra.mxu1 %v16241_v63  ;;  %v18984_v60 = vld [vmem:[%s20235_s15 + $0x55c] sm:$0xf]  ;;  %v16881_v31 = vor.u32 %v19064_v44, %v16878_v16  ;;  %v11556_v44 = vpop.f32.mrf.mxu1 }
 0x8f7   : > { %v17420_v35 = vld [vmem:[%s20235_s15 + $0xc18] sm:$0xf]  ;;  %11733 = vmatpush.bf16.msrb.mxu3 %v17773_v17  ;;  %v17741_v19 = vor.u32 %v19284_v55, %v17740_v8  ;;  %11722 = vmatpush.bf16.msrb.mxu2 %v17453_v54  ;;  %v17070_v57 = vld [vmem:[%s20235_s15 + $0x978] sm:$0xf0]  ;;  %v11480_v17 = vpop.f32.mrf.mxu3  ;;  %v16561_v54 = vor.u32 %v18984_v60, %v16558_v39 }
 0x8f8   : > { %v19204_v45 = vld [vmem:[%s20235_s15 + $0xc34] sm:$0xf0]  ;;  %11749 = vmatpush.bf16.msra.mxu0 %v15889_v15  ;;  %v19056_v8 = vld [vmem:[%s20235_s15 + $0x79c] sm:$0xf]  ;;  %v11543_v15 = vpop.f32.mrf.mxu0 }
 0x8f9   : > { %v17421_v12 = vor.u32 %v19204_v45, %v17420_v35  ;;  %v17708_v25 = vld [vmem:[%s20235_s15 + $0xe58] sm:$0xf]  ;;  %v16846_v55 = vld [vmem:[%s20235_s15 + $0x7b8] sm:$0xf0]  ;;  %v17073_v35 = vor.u32 %v19112_v5, %v17070_v57  ;;  %v11544_v42 = vadd.f32 %v11543_v15, %v8443_v33 }
 0x8fa   : > { %v19276_v23 = vld [vmem:[%s20235_s15 + $0xe74] sm:$0xf0]  ;;  %11760 = vmatpush.bf16.msra.mxu1 %v16209_v4  ;;  %v18976_v47 = vld [vmem:[%s20235_s15 + $0x51c] sm:$0xf]  ;;  %v16849_v4 = vor.u32 %v19056_v8, %v16846_v55 }
 0x8fb   : > { %v17676_v7 = vld [vmem:[%s20235_s15 + $0xe18] sm:$0xf]  ;;  %11734 = vmatpush.bf16.msrb.mxu3 %v17741_v19  ;;  %v17709_v37 = vor.u32 %v19276_v23, %v17708_v25  ;;  %11723 = vmatpush.bf16.msrb.mxu2 %v17421_v12  ;;  %v16526_v45 = vld [vmem:[%s20235_s15 + $0x538] sm:$0xf0]  ;;  %v23489_v39 = vadd.f32 %v11556_v44, %v11544_v42 }
 0x8fc   : > { %v19268_v58 = vld [vmem:[%s20235_s15 + $0xe34] sm:$0xf0]  ;;  %11794 = vmatpush.bf16.msrb.mxu0 %v17137_v32  ;;  %v19104_v48 = vld [vmem:[%s20235_s15 + $0x91c] sm:$0xf]  ;;  %v16529_v1 = vor.u32 %v18976_v47, %v16526_v45 }
 0x8fd   : > { %v17677_v63 = vor.u32 %v19268_v58, %v17676_v7  ;;  %11750 = vmatmul.bf16.vlgmr.msra.gmra.mxu0 %v22461_v11  ;;  %v17361_v11 = vor.u32 %v19184_v2, %v17358_v13  ;;  %v17038_v14 = vld [vmem:[%s20235_s15 + $0x938] sm:$0xf0] }
 0x8fe   : > { %11761 = vmatpush.bf16.msra.mxu1 %v16177_v6  ;;  %11724 = vmatmul.bf16.vlgmr.msrb.gmra.mxu2 %v22597_v34  ;;  %v17326_v9 = vld [vmem:[%s20235_s15 + $0xb78] sm:$0xf0]  ;;  %v17041_v24 = vor.u32 %v19104_v48, %v17038_v14 }
 0x8ff   : > { %11768 = vmatpush.bf16.msra.mxu2 %v16625_v20  ;;  %11735 = vmatpush.bf16.msrb.mxu3 %v17709_v37  ;;  %v19048_v19 = vld [vmem:[%s20235_s15 + $0x75c] sm:$0xf]  ;;  %v17329_v12 = vor.u32 %v19176_v10, %v17326_v9 }
 0x900   : > { %11795 = vmatpush.bf16.msrb.mxu0 %v17105_v56  ;;  %v16814_v0 = vld [vmem:[%s20235_s15 + $0x778] sm:$0xf0]  ;;  %v11545_v2 = vpop.f32.mrf.mxu0 }
 0x901   : > { %v18968_v21 = vld [vmem:[%s20235_s15 + $0x4dc] sm:$0xf] }
 0x902   : > { %11762 = vmatpush.bf16.msra.mxu1 %v16145_v59  ;;  %v16494_v61 = vld [vmem:[%s20235_s15 + $0x4f8] sm:$0xf0] }
 0x903   : > { %11769 = vmatpush.bf16.msra.mxu2 %v16593_v43  ;;  %11736 = vmatpush.bf16.msrb.mxu3 %v17677_v63  ;;  %v19096_v25 = vld [vmem:[%s20235_s15 + $0x8dc] sm:$0xf]  ;;  %v16497_v20 = vor.u32 %v18968_v21, %v16494_v61  ;;  %v11517_v43 = vpop.f32.mrf.mxu2 }
 0x904   : > { %11796 = vmatpush.bf16.msrb.mxu0 %v17073_v35  ;;  %v17006_v23 = vld [vmem:[%s20235_s15 + $0x8f8] sm:$0xf0]  ;;  %v11518_v60 = vadd.f32 %v11517_v43, %v23447_v52 }
 0x905   : > { %11763 = vmatmul.bf16.vlgmr.msra.gmra.mxu1 %v22474_v27  ;;  %v16817_v27 = vor.u32 %v19048_v19, %v16814_v0  ;;  %v19168_v40 = vld [vmem:[%s20235_s15 + $0xb1c] sm:$0xf]  ;;  %v17009_v6 = vor.u32 %v19096_v25, %v17006_v23 }
 0x906   : > { %11807 = vmatpush.bf16.msrb.mxu1 %v17393_v53  ;;  %11737 = vmatmul.bf16.vlgmr.msrb.gmra.mxu3 %v22616_v18  ;;  %v17294_v26 = vld [vmem:[%s20235_s15 + $0xb38] sm:$0xf0] }
 0x907   : > { %11781 = vmatpush.bf16.msra.mxu3 %v16881_v31  ;;  %11770 = vmatpush.bf16.msra.mxu2 %v16561_v54  ;;  %v19040_v22 = vld [vmem:[%s20235_s15 + $0x71c] sm:$0xf]  ;;  %v17297_v41 = vor.u32 %v19168_v40, %v17294_v26 }
 0x908   : > { %v16782_v32 = vld [vmem:[%s20235_s15 + $0x738] sm:$0xf0]  ;;  %11797 = vmatpush.bf16.msrb.mxu0 %v17041_v24 }
 0x909   : > { %v18960_v38 = vld [vmem:[%s20235_s15 + $0x49c] sm:$0xf]  ;;  %v16785_v51 = vor.u32 %v19040_v22, %v16782_v32 }
 0x90a   : > { %11808 = vmatpush.bf16.msrb.mxu1 %v17361_v11  ;;  %v16462_v7 = vld [vmem:[%s20235_s15 + $0x4b8] sm:$0xf0] }
 0x90b   : > { %11782 = vmatpush.bf16.msra.mxu3 %v16849_v4  ;;  %11771 = vmatpush.bf16.msra.mxu2 %v16529_v1  ;;  %v19088_v46 = vld [vmem:[%s20235_s15 + $0x89c] sm:$0xf]  ;;  %v16465_v58 = vor.u32 %v18960_v38, %v16462_v7  ;;  %v11530_v1 = vpop.f32.mrf.mxu3  ;;  %v11519_v61 = vpop.f32.mrf.mxu2 }
 0x90c   : > { %v16974_v37 = vld [vmem:[%s20235_s15 + $0x8b8] sm:$0xf0]  ;;  %11798 = vmatpush.bf16.msrb.mxu0 %v17009_v6  ;;  %v23507_v21 = vadd.f32 %v11530_v1, %v11518_v60 }
 0x90d   : > { %v19160_v29 = vld [vmem:[%s20235_s15 + $0xadc] sm:$0xf]  ;;  %v16977_v16 = vor.u32 %v19088_v46, %v16974_v37 }
 0x90e   : > { %11809 = vmatpush.bf16.msrb.mxu1 %v17329_v12  ;;  %v17262_v30 = vld [vmem:[%s20235_s15 + $0xaf8] sm:$0xf0]  ;;  %v11558_v12 = vpop.f32.mrf.mxu1 }
 0x90f   : > { %11783 = vmatpush.bf16.msra.mxu3 %v16817_v27  ;;  %11772 = vmatpush.bf16.msra.mxu2 %v16497_v20  ;;  %v19032_v36 = vld [vmem:[%s20235_s15 + $0x6dc] sm:$0xf]  ;;  %v17265_v63 = vor.u32 %v19160_v29, %v17262_v30 }
 0x910   : > { %v16750_v28 = vld [vmem:[%s20235_s15 + $0x6f8] sm:$0xf0]  ;;  %11799 = vmatpush.bf16.msrb.mxu0 %v16977_v16 }
 0x911   : > { %v18952_v56 = vld [vmem:[%s20235_s15 + $0x45c] sm:$0xf]  ;;  %v16753_v57 = vor.u32 %v19032_v36, %v16750_v28 }
 0x912   : > { %v16430_v59 = vld [vmem:[%s20235_s15 + $0x478] sm:$0xf0]  ;;  %11810 = vmatpush.bf16.msrb.mxu1 %v17297_v41 }
 0x913   : > { %v19080_v53 = vld [vmem:[%s20235_s15 + $0x85c] sm:$0xf]  ;;  %11784 = vmatpush.bf16.msra.mxu3 %v16785_v51  ;;  %11773 = vmatpush.bf16.msra.mxu2 %v16465_v58  ;;  %v16433_v52 = vor.u32 %v18952_v56, %v16430_v59  ;;  %v11532_v29 = vpop.f32.mrf.mxu3 }
 0x914   : > { %v16942_v5 = vld [vmem:[%s20235_s15 + $0x878] sm:$0xf0] }
 0x915   : > { %v19152_v17 = vld [vmem:[%s20235_s15 + $0xa9c] sm:$0xf]  ;;  %v16945_v8 = vor.u32 %v19080_v53, %v16942_v5 }
 0x916   : > { %v17230_v31 = vld [vmem:[%s20235_s15 + $0xab8] sm:$0xf0]  ;;  %11811 = vmatpush.bf16.msrb.mxu1 %v17265_v63  ;;  %v11595_v63 = vpop.f32.mrf.mxu0 }
 0x917   : > { %v19024_v13 = vld [vmem:[%s20235_s15 + $0x69c] sm:$0xf]  ;;  %v17233_v45 = vor.u32 %v19152_v17, %v17230_v31  ;;  %11785 = vmatpush.bf16.msra.mxu3 %v16753_v57  ;;  %11774 = vmatpush.bf16.msra.mxu2 %v16433_v52 }
 0x918   : > { %v16718_v54 = vld [vmem:[%s20235_s15 + $0x6b8] sm:$0xf0]  ;;  %11800 = vmatpush.bf16.msrb.mxu0 %v16945_v8 }
 0x919   : > { %v18944_v55 = vld [vmem:[%s20235_s15 + $0x41c] sm:$0xf]  ;;  %v16721_v4 = vor.u32 %v19024_v13, %v16718_v54  ;;  %v11569_v13 = vpop.f32.mrf.mxu2  ;;  %v11608_v54 = vpop.f32.mrf.mxu1 }
 0x91a   : > { %v16398_v35 = vld [vmem:[%s20235_s15 + $0x438] sm:$0xf0]  ;;  %11812 = vmatpush.bf16.msrb.mxu1 %v17233_v45 }
 0x91b   : > { %v19072_v47 = vld [vmem:[%s20235_s15 + $0x81c] sm:$0xf]  ;;  %v16401_v19 = vor.u32 %v18944_v55, %v16398_v35  ;;  %11786 = vmatpush.bf16.msra.mxu3 %v16721_v4  ;;  %v11570_v35 = vadd.f32 %v11569_v13, %v23489_v39 }
 0x91c   : > { %v16910_v11 = vld [vmem:[%s20235_s15 + $0x838] sm:$0xf0]  ;;  %v11582_v1 = vpop.f32.mrf.mxu3 }
 0x91d   : > { %v19256_v48 = vld [vmem:[%s20235_s15 + $0xddc] sm:$0xf]  ;;  %v16913_v25 = vor.u32 %v19072_v47, %v16910_v11  ;;  %11775 = vmatpush.bf16.msra.mxu2 %v16401_v19  ;;  %v11583_v39 = vadd.f32 %v11582_v1, %v11570_v35 }
 0x91e   : > { %v17646_v14 = vld [vmem:[%s20235_s15 + $0xdf8] sm:$0xf0]  ;;  %v11597_v45 = vpop.f32.mrf.mxu0 }
 0x91f   : > { %v19144_v10 = vld [vmem:[%s20235_s15 + $0xa5c] sm:$0xf]  ;;  %v17649_v23 = vor.u32 %v19256_v48, %v17646_v14  ;;  %11801 = vmatpush.bf16.msrb.mxu0 %v16913_v25  ;;  %v11596_v25 = vadd.f32 %v11595_v63, %v11583_v39 }
 0x920   : > { %v17198_v9 = vld [vmem:[%s20235_s15 + $0xa78] sm:$0xf0]  ;;  %11776 = vmatmul.bf16.vlgmr.msra.gmra.mxu2 %v22497_v50 }
 0x921   : > { %v19016_v0 = vld [vmem:[%s20235_s15 + $0x65c] sm:$0xf]  ;;  %v17201_v27 = vor.u32 %v19144_v10, %v17198_v9  ;;  %11820 = vmatpush.bf16.msrb.mxu2 %v17649_v23  ;;  %v11571_v61 = vpop.f32.mrf.mxu2  ;;  %v11610_v12 = vpop.f32.mrf.mxu1 }
 0x922   : > { %v16686_v24 = vld [vmem:[%s20235_s15 + $0x678] sm:$0xf0]  ;;  %11802 = vmatmul.bf16.vlgmr.msrb.gmra.mxu0 %v22539_v3 }
 0x923   : > { %v19248_v40 = vld [vmem:[%s20235_s15 + $0xd9c] sm:$0xf]  ;;  %v16689_v33 = vor.u32 %v19016_v0, %v16686_v24  ;;  %11813 = vmatpush.bf16.msrb.mxu1 %v17201_v27 }
 0x924   : > { %v17614_v26 = vld [vmem:[%s20235_s15 + $0xdb8] sm:$0xf0] }
 0x925   : > { %v19136_v15 = vld [vmem:[%s20235_s15 + $0xa1c] sm:$0xf]  ;;  %v17617_v6 = vor.u32 %v19248_v40, %v17614_v26  ;;  %11787 = vmatpush.bf16.msra.mxu3 %v16689_v33  ;;  %v11609_v26 = vadd.f32 %v11608_v54, %v11596_v25 }
 0x926   : > { %v17166_v20 = vld [vmem:[%s20235_s15 + $0xa38] sm:$0xf0] }
 0x927   : > { %v19008_v22 = vld [vmem:[%s20235_s15 + $0x61c] sm:$0xf]  ;;  %v17169_v41 = vor.u32 %v19136_v15, %v17166_v20  ;;  %11821 = vmatpush.bf16.msrb.mxu2 %v17617_v6  ;;  %v11584_v15 = vpop.f32.mrf.mxu3  ;;  %v19391_v20 = vld [vmem:[%s20239_s6] sm:$0xff] }
 0x928   : > { %v16654_v32 = vld [vmem:[%s20235_s15 + $0x638] sm:$0xf0]  ;;  %v8445_v45 = vperm.slane %v19391_v20, 7 }
 0x929   : > { %v19320_v38 = vld [vmem:[%s20235_s15 + $0xfdc] sm:$0xf]  ;;  %v16657_v51 = vor.u32 %v19008_v22, %v16654_v32  ;;  %11814 = vmatpush.bf16.msrb.mxu1 %v17169_v41  ;;  %v8444_v22 = vperm.slane %v19391_v20, 6 }
 0x92a   : > { %v17902_v7 = vld [vmem:[%s20235_s15 + $0xff8] sm:$0xf0] }
 0x92b   : > { %v19240_v46 = vld [vmem:[%s20235_s15 + $0xd5c] sm:$0xf]  ;;  %v17905_v30 = vor.u32 %v19320_v38, %v17902_v7  ;;  %11788 = vmatpush.bf16.msra.mxu3 %v16657_v51 }
 0x92c   : > { %v17582_v37 = vld [vmem:[%s20235_s15 + $0xd78] sm:$0xf0]  ;;  %11815 = vmatmul.bf16.vlgmr.msrb.gmra.mxu1 %v22556_v62 }
 0x92d   : > { %v17585_v42 = vor.u32 %v19240_v46, %v17582_v37  ;;  %v19312_v58 = vld [vmem:[%s20235_s15 + $0xf9c] sm:$0xf]  ;;  %v11647_v32 = vpop.f32.mrf.mxu0 }
 0x92e   : > { %v17870_v36 = vld [vmem:[%s20235_s15 + $0xfb8] sm:$0xf0]  ;;  %11789 = vmatmul.bf16.vlgmr.msra.gmra.mxu3 %v22515_v49  ;;  %v11648_v6 = vadd.f32 %v11647_v32, %v8444_v22 }
 0x92f   : > { %v19232_v28 = vld [vmem:[%s20235_s15 + $0xd1c] sm:$0xf]  ;;  %11833 = vmatpush.bf16.msrb.mxu3 %v17905_v30  ;;  %v17873_v50 = vor.u32 %v19312_v58, %v17870_v36  ;;  %11822 = vmatpush.bf16.msrb.mxu2 %v17585_v42 }
 0x930   : > { %v17550_v43 = vld [vmem:[%s20235_s15 + $0xd38] sm:$0xf0] }
 0x931   : > { %v17553_v3 = vor.u32 %v19232_v28, %v17550_v43  ;;  %v19304_v44 = vld [vmem:[%s20235_s15 + $0xf5c] sm:$0xf] }
 0x932   : > { %v17838_v16 = vld [vmem:[%s20235_s15 + $0xf78] sm:$0xf0] }
 0x933   : > { %v19224_v56 = vld [vmem:[%s20235_s15 + $0xcdc] sm:$0xf]  ;;  %11834 = vmatpush.bf16.msrb.mxu3 %v17873_v50  ;;  %v17841_v60 = vor.u32 %v19304_v44, %v17838_v16  ;;  %11823 = vmatpush.bf16.msrb.mxu2 %v17553_v3 }
 0x934   : > { %v17518_v59 = vld [vmem:[%s20235_s15 + $0xcf8] sm:$0xf0]  ;;  %v11621_v38 = vpop.f32.mrf.mxu2 }
 0x935   : > { %v17521_v53 = vor.u32 %v19224_v56, %v17518_v59  ;;  %v19296_v5 = vld [vmem:[%s20235_s15 + $0xf1c] sm:$0xf]  ;;  %v11660_v7 = vpop.f32.mrf.mxu1  ;;  %v11622_v41 = vadd.f32 %v11621_v38, %v11609_v26  ;;  %v11649_v37 = vpop.f32.mrf.mxu0 }
 0x936   : > { %v17806_v57 = vld [vmem:[%s20235_s15 + $0xf38] sm:$0xf0]  ;;  %v11661_v46 = vadd.f32 %v11660_v7, %v11648_v6 }
 0x937   : > { %v19216_v17 = vld [vmem:[%s20235_s15 + $0xc9c] sm:$0xf]  ;;  %11835 = vmatpush.bf16.msrb.mxu3 %v17841_v60  ;;  %v17809_v31 = vor.u32 %v19296_v5, %v17806_v57  ;;  %11824 = vmatpush.bf16.msrb.mxu2 %v17521_v53 }
 0x938   : > { %v17486_v62 = vld [vmem:[%s20235_s15 + $0xcb8] sm:$0xf0] }
 0x939   : > { %v17489_v49 = vor.u32 %v19216_v17, %v17486_v62  ;;  %v19288_v2 = vld [vmem:[%s20235_s15 + $0xedc] sm:$0xf] }
 0x93a   : > { %v17774_v52 = vld [vmem:[%s20235_s15 + $0xef8] sm:$0xf0] }
 0x93b   : > { %v19208_v8 = vld [vmem:[%s20235_s15 + $0xc5c] sm:$0xf]  ;;  %11836 = vmatpush.bf16.msrb.mxu3 %v17809_v31  ;;  %v17777_v47 = vor.u32 %v19288_v2, %v17774_v52  ;;  %11825 = vmatpush.bf16.msrb.mxu2 %v17489_v49 }
 0x93c   : > { %v17454_v55 = vld [vmem:[%s20235_s15 + $0xc78] sm:$0xf0]  ;;  %v11634_v51 = vpop.f32.mrf.mxu3  ;;  %v11623_v30 = vpop.f32.mrf.mxu2 }
 0x93d   : > { %v17457_v11 = vor.u32 %v19208_v8, %v17454_v55  ;;  %v19280_v48 = vld [vmem:[%s20235_s15 + $0xe9c] sm:$0xf]  ;;  %v11635_v29 = vadd.f32 %v11634_v51, %v11622_v41  ;;  %v11662_v42 = vpop.f32.mrf.mxu1 }
 0x93e   : > { %v17742_v14 = vld [vmem:[%s20235_s15 + $0xeb8] sm:$0xf0] }
 0x93f   : > { %v19200_v4 = vld [vmem:[%s20235_s15 + $0xc1c] sm:$0xf]  ;;  %11837 = vmatpush.bf16.msrb.mxu3 %v17777_v47  ;;  %v17745_v9 = vor.u32 %v19280_v48, %v17742_v14  ;;  %11826 = vmatpush.bf16.msrb.mxu2 %v17457_v11  ;;  %v11857_v58 = vrot.slane %v11635_v29, 6 }
 0x940   : > { %v17422_v10 = vld [vmem:[%s20235_s15 + $0xc38] sm:$0xf0] }
 0x941   : > { %v17425_v19 = vor.u32 %v19200_v4, %v17422_v10  ;;  %v19272_v0 = vld [vmem:[%s20235_s15 + $0xe5c] sm:$0xf] }
 0x942   : > { %v17710_v24 = vld [vmem:[%s20235_s15 + $0xe78] sm:$0xf0] }
 0x943   : > { %11838 = vmatpush.bf16.msrb.mxu3 %v17745_v9  ;;  %v17713_v23 = vor.u32 %v19272_v0, %v17710_v24  ;;  %11827 = vmatpush.bf16.msrb.mxu2 %v17425_v19  ;;  %v19264_v27 = vld [vmem:[%s20235_s15 + $0xe1c] sm:$0xf] }
 0x944   : > { %v17678_v40 = vld [vmem:[%s20235_s15 + $0xe38] sm:$0xf0]  ;;  %v11636_v36 = vpop.f32.mrf.mxu3 }
 0x945   : > { %v17681_v33 = vor.u32 %v19264_v27, %v17678_v40 }
 0x946   : > { %11828 = vmatmul.bf16.vlgmr.msrb.gmra.mxu2 %v22597_v34  ;;  %v11865_v34 = vsel %vm6908_vm0, %v23507_v21, %v11857_v58 }
 0x947   : > { %11839 = vmatpush.bf16.msrb.mxu3 %v17713_v23 }
 0x94b   : > { %11840 = vmatpush.bf16.msrb.mxu3 %v17681_v33 }
 0x94e   : > { %11841 = vmatmul.bf16.vlgmr.msrb.gmra.mxu3 %v22616_v18 }
 0x957   : > { %v11699_v28 = vpop.f32.mrf.mxu0 }
 0x95b   : > { %v11673_v18 = vpop.f32.mrf.mxu2 }
 0x95c   : > { %v11674_v50 = vadd.f32 %v11673_v18, %v11661_v46 }
 0x95f   : > { %v11701_v3 = vpop.f32.mrf.mxu0 }
 0x962   : > { %v11712_v43 = vpop.f32.mrf.mxu1 }
 0x963   : > { %v11675_v56 = vpop.f32.mrf.mxu2 }
 0x969   : > { %v11686_v44 = vpop.f32.mrf.mxu3 }
 0x96a   : > { %v11687_v16 = vadd.f32 %v11686_v44, %v11674_v50  ;;  %v11714_v59 = vpop.f32.mrf.mxu1 }
 0x96c   : > { %v11700_v60 = vadd.f32 %v11699_v28, %v11687_v16 }
 0x96e   : > { %v11713_v63 = vadd.f32 %v11712_v43, %v11700_v60 }
 0x971   : > { %v11688_v53 = vpop.f32.mrf.mxu3 }
 0x97a   : > { %v11751_v5 = vpop.f32.mrf.mxu0 }
 0x97b   : > { %v11752_v48 = vadd.f32 %v11751_v5, %v8445_v45 }
 0x981   : > { %v11725_v57 = vpop.f32.mrf.mxu2 }
 0x982   : > { %v11764_v17 = vpop.f32.mrf.mxu1  ;;  %v11753_v62 = vpop.f32.mrf.mxu0  ;;  %v11726_v19 = vadd.f32 %v11725_v57, %v11713_v63 }
 0x983   : > { %v11765_v14 = vadd.f32 %v11764_v17, %v11752_v48 }
 0x989   : > { %v11738_v31 = vpop.f32.mrf.mxu3  ;;  %v11727_v49 = vpop.f32.mrf.mxu2 }
 0x98a   : > { %v11766_v21 = vpop.f32.mrf.mxu1  ;;  %v11739_v24 = vadd.f32 %v11738_v31, %v11726_v19 }
 0x98c   : > { %v11858_v23 = vrot.slane %v11739_v24, 4 }
 0x991   : > { %v11740_v2 = vpop.f32.mrf.mxu3 }
 0x99f   : > { %v11803_v52 = vpop.f32.mrf.mxu0 }
 0x9a3   : > { %v11777_v13 = vpop.f32.mrf.mxu2 }
 0x9a4   : > { %v11778_v4 = vadd.f32 %v11777_v13, %v11765_v14 }
 0x9a7   : > { %v11805_v8 = vpop.f32.mrf.mxu0 }
 0x9a9   : > { %v11816_v54 = vpop.f32.mrf.mxu1 }
 0x9ab   : > { %v11779_v35 = vpop.f32.mrf.mxu2 }
 0x9b1   : > { %v11790_v55 = vpop.f32.mrf.mxu3  ;;  %v11818_v47 = vpop.f32.mrf.mxu1 }
 0x9b2   : > { %v11791_v10 = vadd.f32 %v11790_v55, %v11778_v4 }
 0x9b4   : > { %v11804_v9 = vadd.f32 %v11803_v52, %v11791_v10 }
 0x9b6   : > { %v11817_v0 = vadd.f32 %v11816_v54, %v11804_v9 }
 0x9b9   : > { %v11792_v11 = vpop.f32.mrf.mxu3 }
 0x9c9   : > { %v11829_v1 = vpop.f32.mrf.mxu2 }
 0x9ca   : > { %v11830_v39 = vadd.f32 %v11829_v1, %v11817_v0 }
 0x9d1   : > { %v11842_v61 = vpop.f32.mrf.mxu3  ;;  %v11831_v25 = vpop.f32.mrf.mxu2 }
 0x9d2   : > { %v11843_v12 = vadd.f32 %v11842_v61, %v11830_v39 }
 0x9d4   : > { %v11859_v27 = vrot.slane %v11843_v12, 2 }
 0x9d6   : > { %v11866_v40 = vsel %vm11861_vm1, %v11858_v23, %v11859_v27 }
 0x9d7   : > { %v11867_v26 = vsel %vm11863_vm2, %v11865_v34, %v11866_v40 }
 0x9d8   : > { %11871 = vst [vmem:[%s23361_s13 + $0x8] sm:$0xff] %v11867_v26 }
 0x9d9   : > { %v11844_v33 = vpop.f32.mrf.mxu3 }
 0x9da PF: > { %s23651_s16 = sld [smem:[#allocation31_spill]] }
 0x9db   : > { %s23652_s29 = sld [smem:[#allocation28_spill]] }
 0x9dc   : > { %s23653_s30 = sld [smem:[#allocation29_spill]] }
 0x9dd   : > { %s23654_s15 = sld [smem:[#allocation32_spill]] }
 0x9e0   : > { %p43_p6 = scmp.ge.s32.totalorder %s23651_s16, 4  }
 0x9e2   :  { %45 = sbr.rel (!%p43_p6) target bundleno = 25 (0x19), region = 261 }
 0x9e7   :  { %11909 = vsyncpa [#allocation3], 1 }
 0x9e8   :  { %11911 = vsyncpa [#allocation3 + $0x1], 1 }
 0x9e9   :  { %11912 = vsyncpa [#allocation5], 1 }
 0x9ea   :  { %11914 = vsyncpa [#allocation5 + $0x1], 1 }
 0x9eb   :  { %11915 = vsyncpa [#allocation8], 1 }
 0x9ec   :  { %11917 = vsyncpa [#allocation8 + $0x1], 1 }
 0x9ed   :  { %11918 = vsyncpa [#allocation11], 1 }
 0x9ee   :  { %11920 = vsyncpa [#allocation11 + $0x1], 1 }
 0x9ef   :  { %11921 = vsyncpa [#allocation14], 1 }
 0x9f0   :  { %11923 = vsyncpa [#allocation14 + $0x1], 1 }
 0x9f1   :  { %11924 = vsyncpa [#allocation17], 1 }
 0x9f2   :  { %11926 = vsyncpa [#allocation17 + $0x1], 1 }
 0x9f3   :  { %11927 = vsyncpa [#allocation20], 1 }
 0x9f4   :  { %11929 = vsyncpa [#allocation20 + $0x1], 1 }

</bundles_post_ra>
